<compile_context>
chip_gen: v5e
topology: v5e:2x2
jax: 0.10.0
libtpu: 0.0.40
codegen_flags: <defaults>
</compile_context>

<pallas_src>
import jax
import jax.numpy as jnp
import numpy as np
from jax.experimental import pallas as pl
from jax.experimental.pallas import tpu as pltpu

# bf16 MXU operands (f32 accumulation).  Flip to jnp.float32 for bit-accurate
# checks; the reference tolerance in __main__ adapts automatically.
MXU_DTYPE = jnp.bfloat16


def _round_up(x, m):
    return ((x + m - 1) // m) * m


def _detect_num_tensorcores():
    """Conservative TensorCore count (defaults to 1 on v5e/v6e or if unknown)."""
    try:
        info = pltpu.get_tpu_info()
    except Exception:
        return 1
    for attr in ("num_tensorcores", "tensorcores_per_chip", "num_tensor_cores"):
        v = getattr(info, attr, None)
        if isinstance(v, int) and v > 0:
            return v
    return 1


def _detect_vmem_limit_bytes():
    """3/4 of physical VMEM, capped at 96 MiB (leaves headroom on v7x's 64 MiB)."""
    try:
        cap = int(pltpu.get_tpu_info().vmem_capacity_bytes)
    except Exception:
        cap = 128 * 1024 * 1024
    return int(min((cap * 3) // 4, 96 * 1024 * 1024))


_NUM_TC = _detect_num_tensorcores()
_VMEM_LIMIT = _detect_vmem_limit_bytes()


def _tap_shifts(Wp, KH, KW):
    """Flat-lane shift per conv tap (dy, dx) in the row-padded layout."""
    ph, pw = KH // 2, KW // 2
    return tuple((dy - ph) * Wp + (dx - pw) for dy in range(KH) for dx in range(KW))


def _interior_mask(BS, H, W, ph, pw, NPS):
    """(1, NPS) f32 mask: 1 at real-image lanes, 0 at border-pad / tail lanes."""
    Hp, Wp = H + 2 * ph, W + 2 * pw
    m = np.zeros((BS, Hp, Wp), np.float32)
    m[:, ph:ph + H, pw:pw + W] = 1.0
    m = m.reshape(-1)
    m = np.pad(m, (0, NPS - m.size))
    return jnp.asarray(m.reshape(1, NPS))


def make_xconv_kernel(NTOT, LPAD, shifts):
    """Per-timestep input conv: xc[t] = W_x * x[t] + bias (lane-dense, bf16 out)."""
    def kernel(xpad_ref, wx_ref, b_ref, xc_ref):
        xp = xpad_ref[0]                                       # (Cin, NPADTOT) bf16
        # Zero-border layout -> shifted slices ARE the im2col columns (no masks).
        col = jnp.concatenate(
            [xp[:, LPAD + s:LPAD + s + NTOT] for s in shifts], axis=0)
        acc = jnp.dot(wx_ref[...], col, preferred_element_type=jnp.float32)
        xc_ref[0] = (acc + b_ref[...]).astype(xc_ref.dtype)    # bias folded, bf16 out
    return kernel


def make_recurrence_kernel(NPS, LPAD, shifts, CH):
    """Sequential ConvLSTM step: conv(h, W_h) + xc[t] + gates, per batch shard."""
    def kernel(imask_ref, xc_ref, wh_ref, h_out_ref, c_out_ref,
               hpad_sc, c_sc, acc_sc):
        t = pl.program_id(1)

        @pl.when(t == 0)
        def _init():
            # Halo + interior must be zero before the first h-conv; the halo is
            # never written afterwards (zero-border invariant for all t).
            hpad_sc[...] = jnp.zeros_like(hpad_sc)
            c_sc[...] = jnp.zeros_like(c_sc)
            # h == 0 at t == 0 -> skip the whole h-conv (pure waste otherwise).
            acc_sc[...] = xc_ref[0].astype(jnp.float32)

        @pl.when(t > 0)
        def _hconv():
            # Fused im2col over the KH*KW taps: static lane-shifted bf16 slices
            # of the zero-border flat h buffer -> single MXU matmul (K=KT*CH).
            # TODO(synk): for production W, pad the row stride to a multiple of
            # 128 and hoist the KW-1 lane rotations once per step (XLU relief).
            col = jnp.concatenate(
                [hpad_sc[:, LPAD + s:LPAD + s + NPS] for s in shifts], axis=0)
            acc_sc[...] = (jnp.dot(wh_ref[...], col,
                                   preferred_element_type=jnp.float32)
                           + xc_ref[0].astype(jnp.float32))

        acc = acc_sc[...]                                      # (4*CH, NPS) f32
        # Gate slices along the sublane axis (CH % 8 == 0 keeps them aligned).
        i = jax.nn.sigmoid(acc[0 * CH:1 * CH])
        f = jax.nn.sigmoid(acc[1 * CH:2 * CH])
        o = jax.nn.sigmoid(acc[2 * CH:3 * CH])
        g = jnp.tanh(acc[3 * CH:4 * CH])

        c_next = f * c_sc[...] + i * g
        h_next = o * jnp.tanh(c_next)
        c_sc[...] = c_next

        # Aligned full-width store of the interior window; the interior mask
        # re-zeroes the border-pad lanes so the next step's shifted slices pick
        # up zeros at image edges (single vmul replaces KT per-tap mask muls).
        hpad_sc[:, LPAD:LPAD + NPS] = (h_next * imask_ref[...]).astype(hpad_sc.dtype)

        # NOTE: outputs use a t-invariant index_map and are written ONLY at the
        # final timestep (resident-output contract).  Do not make the output
        # index_map depend on t or enable output revisiting.
        @pl.when(t == pl.num_programs(1) - 1)
        def _write_out():
            h_out_ref[...] = h_next
            c_out_ref[...] = c_next
    return kernel


@jax.jit
def conv_lstm2d_forward(x_btchw, weight, bias):
    """Matches ConvLSTM2DLayer.forward with hidden_state=None,
    return_all_layers=False (layer-norm branch is not taken on that path)."""
    B, T, Cin, H, W = x_btchw.shape
    Cout, Ctot, KH, KW = weight.shape
    CH = Cout // 4
    assert Cout == 4 * CH, "conv out_channels must be exactly 4*hidden_dim"
    assert Ctot == Cin + CH
    assert KH % 2 == 1 and KW % 2 == 1, "odd 'same' kernels only"
    assert CH % 8 == 0, "hidden_dim must be a multiple of 8 (sublane alignment)"

    f32 = jnp.float32
    ph, pw = KH // 2, KW // 2
    Hp, Wp = H + 2 * ph, W + 2 * pw
    KT = KH * KW

    # Megacore: shard the recurrence over batch only if the chip really has
    # >1 TensorCore (v7x); on single-TC v5e/v6e the extra axis is pure overhead.
    G = 2 if (_NUM_TC >= 2 and B % 2 == 0) else 1
    BS = B // G
    NPS0 = BS * Hp * Wp                      # valid padded lanes per shard
    NPS = _round_up(NPS0, 128)               # lane-aligned per-shard width
    NTOT = G * NPS
    LPAD = _round_up(ph * Wp + pw, 128)      # lane-aligned halo >= max |tap shift|
    NPADTOT = NTOT + 2 * LPAD
    shifts = _tap_shifts(Wp, KH, KW)
    imask = _interior_mask(BS, H, W, ph, pw, NPS)      # (1, NPS) f32

    # Row/edge-padded flat layout (zeros at image borders + per-shard tail),
    # plus a 128-aligned zero halo for the shifted slices; pre-cast to bf16.
    xp5 = jnp.pad(x_btchw.astype(f32), ((0, 0), (0, 0), (0, 0), (ph, ph), (pw, pw)))
    x_flat = jnp.transpose(xp5, (1, 2, 0, 3, 4)).reshape(T, Cin, G, NPS0)
    x_flat = jnp.pad(x_flat, ((0, 0), (0, 0), (0, 0), (0, NPS - NPS0)))
    x_flat = x_flat.reshape(T, Cin, NTOT)
    x_pad = jnp.pad(x_flat, ((0, 0), (0, 0), (LPAD, LPAD))).astype(MXU_DTYPE)

    # Split conv weight (input vs recurrent part), flattened so that the column
    # index = tap*(C) + c_in (matches in-kernel im2col order); pre-cast to bf16.
    w = weight.astype(f32)
    wx = jnp.transpose(w[:, :Cin], (0, 2, 3, 1)).reshape(Cout, KT * Cin).astype(MXU_DTYPE)
    wh = jnp.transpose(w[:, Cin:], (0, 2, 3, 1)).reshape(Cout, KT * CH).astype(MXU_DTYPE)
    b2 = bias.astype(f32).reshape(Cout, 1)

    # ---- stage 1: input conv for all timesteps (parallel over T) -----------
    # TODO(synk): lane-tile this stage (second grid axis over 128-multiple lane
    # blocks) before targeting production img_size=(500,500) so per-step
    # working sets fit v7x's 64 MiB VMEM.
    xc = pl.pallas_call(
        make_xconv_kernel(NTOT, LPAD, shifts),
        out_shape=jax.ShapeDtypeStruct((T, Cout, NTOT), MXU_DTYPE),
        grid_spec=pltpu.PrefetchScalarGridSpec(
            num_scalar_prefetch=0,
            grid=(T,),
            in_specs=[
                pl.BlockSpec((1, Cin, NPADTOT), lambda t: (t, 0, 0)),   # padded x_t
                pl.BlockSpec((Cout, KT * Cin), lambda t: (0, 0)),       # W_x (bf16)
                pl.BlockSpec((Cout, 1), lambda t: (0, 0)),              # bias (f32)
            ],
            out_specs=pl.BlockSpec((1, Cout, NTOT), lambda t: (t, 0, 0)),
        ),
        compiler_params=pltpu.CompilerParams(
            dimension_semantics=(pltpu.PARALLEL,),
            vmem_limit_bytes=_VMEM_LIMIT),
    )(x_pad, wx, b2)

    # ---- stage 2: sequential LSTM recurrence (h-conv + gates only) ---------
    # TODO(synk): add spatial (H-halo) tiling of the recurrence for production
    # img_size; if xprof shows the xc DMA exposed, bump its BlockSpec to
    # pipeline_mode=pl.Buffered(3).
    core_sem = pltpu.CORE_PARALLEL if G > 1 else pltpu.ARBITRARY
    h_last, c_last = pl.pallas_call(
        make_recurrence_kernel(NPS, LPAD, shifts, CH),
        out_shape=(jax.ShapeDtypeStruct((CH, NTOT), f32),
                   jax.ShapeDtypeStruct((CH, NTOT), f32)),
        grid_spec=pltpu.PrefetchScalarGridSpec(
            num_scalar_prefetch=0,
            grid=(G, T),
            in_specs=[
                pl.BlockSpec((1, NPS), lambda g, t: (0, 0)),            # interior mask
                pl.BlockSpec((1, Cout, NPS), lambda g, t: (t, 0, g)),   # xc[t] (bf16)
                pl.BlockSpec((Cout, KT * CH), lambda g, t: (0, 0)),     # W_h (bf16)
            ],
            out_specs=[
                pl.BlockSpec((CH, NPS), lambda g, t: (0, g)),
                pl.BlockSpec((CH, NPS), lambda g, t: (0, g)),
            ],
            scratch_shapes=[
                pltpu.VMEM((CH, NPS + 2 * LPAD), MXU_DTYPE),   # zero-halo flat h (bf16)
                pltpu.VMEM((CH, NPS), f32),                    # c state (f32)
                pltpu.VMEM((Cout, NPS), f32),                  # pre-gate accumulator
            ],
        ),
        compiler_params=pltpu.CompilerParams(
            dimension_semantics=(core_sem, pltpu.ARBITRARY),
            vmem_limit_bytes=_VMEM_LIMIT),
    )(imask, xc, wh)

    # back to PyTorch NCHW conventions (drop border-pad and tail lanes)
    def unflat(z):
        z = z.reshape(CH, G, NPS)[:, :, :NPS0].reshape(CH, B, Hp, Wp)
        return jnp.transpose(z[:, :, ph:ph + H, pw:pw + W], (1, 0, 2, 3))

    h_nchw = unflat(h_last)
    c_nchw = unflat(c_last)
    layer_output = h_nchw[:, None]                      # (B, 1, CH, H, W)
    return layer_output, (h_nchw, c_nchw)


def reference_forward(x_btchw, weight, bias):
    """Pure-JAX reference (lax conv) replicating the PyTorch semantics."""
    B, T, Cin, H, W = x_btchw.shape
    Cout = weight.shape[0]
    CH = Cout // 4
    w_hwio = jnp.transpose(weight, (2, 3, 1, 0))
    h = jnp.zeros((B, H, W, CH), jnp.float32)
    c = jnp.zeros((B, H, W, CH), jnp.float32)
    for t in range(T):
        xt = jnp.transpose(x_btchw[:, t], (0, 2, 3, 1)).astype(jnp.float32)
        comb = jnp.concatenate([xt, h], axis=-1)
        cc = jax.lax.conv_general_dilated(
            comb, w_hwio, window_strides=(1, 1), padding="SAME",
            dimension_numbers=("NHWC", "HWIO", "NHWC")) + bias
        i = jax.nn.sigmoid(cc[..., 0 * CH:1 * CH])
        f = jax.nn.sigmoid(cc[..., 1 * CH:2 * CH])
        o = jax.nn.sigmoid(cc[..., 2 * CH:3 * CH])
        g = jnp.tanh(cc[..., 3 * CH:4 * CH])
        c = f * c + i * g
        h = o * jnp.tanh(c)
    return jnp.transpose(h, (0, 3, 1, 2)), jnp.transpose(c, (0, 3, 1, 2))


if __name__ == "__main__":
    # input_tensor: (B, T, input_dim, H, W)
    B, T, Cin, H, W = 2, 8, 4, 16, 16
    CH = 32                    # hidden_dim
    KH = KW = 3                # kernel_size
    Ctot, Cout = Cin + CH, 4 * CH

    key = jax.random.PRNGKey(0)
    kx, kw = jax.random.split(key)

    x = jax.random.normal(kx, (B, T, Cin, H, W), dtype=jnp.float32)

    # deterministic xavier_uniform_ for conv.weight, zeros for conv.bias
    fan_in = Ctot * KH * KW
    fan_out = Cout * KH * KW
    bound = float(np.sqrt(6.0 / (fan_in + fan_out)))
    weight = jax.random.uniform(kw, (Cout, Ctot, KH, KW),
                                minval=-bound, maxval=bound, dtype=jnp.float32)
    bias = jnp.zeros((Cout,), dtype=jnp.float32)

    layer_output, (h_last, c_last) = conv_lstm2d_forward(x, weight, bias)
    jax.block_until_ready((layer_output, h_last, c_last))

    # sanity check against pure-JAX f32 reference; the bf16 MXU path compounds
    # rounding through the recurrence, so the tolerance is relaxed accordingly
    # (the f32 path passes at 1e-4).
    h_ref, c_ref = reference_forward(x, weight, bias)
    tol = 4e-2 if MXU_DTYPE == jnp.bfloat16 else 1e-4
    np.testing.assert_allclose(np.asarray(h_last), np.asarray(h_ref), rtol=tol, atol=tol)
    np.testing.assert_allclose(np.asarray(c_last), np.asarray(c_ref), rtol=tol, atol=tol)
    assert layer_output.shape == (B, 1, CH, H, W)

    print("KERNEL_OK")
</pallas_src>

<mosaic_0001>
module attributes {stable_mosaic.version = 11 : i64} {
  func.func @kernel(%arg0: i32, %arg1: memref<1x4x1024xbf16, #tpu.memory_space<vmem>>, %arg2: memref<128x36xbf16, #tpu.memory_space<vmem>>, %arg3: memref<128x1xf32, #tpu.memory_space<vmem>>, %arg4: memref<1x128x768xbf16, #tpu.memory_space<vmem>>) attributes {dimension_semantics = [#tpu.dimension_semantics<parallel>], iteration_bounds = array<i64: 8>, scalar_prefetch = 0 : i64, scratch_operands = 0 : i64, tpu.core_type = #tpu.core_type<tc>, window_params = [{transform_indices = @transform_0, window_bounds = array<i64: 1, 4, 1024>}, {pipeline_mode = #tpu.pipeline_mode<synchronous>, transform_indices = @transform_1, window_bounds = array<i64: 128, 36>}, {pipeline_mode = #tpu.pipeline_mode<synchronous>, transform_indices = @transform_2, window_bounds = array<i64: 128, 1>}, {transform_indices = @transform_3, window_bounds = array<i64: 1, 128, 768>}]} {
    %c0 = arith.constant 0 : index
    %c0_0 = arith.constant 0 : index
    %c0_1 = arith.constant 0 : index
    %0 = vector.load %arg1[%c0, %c0_0, %c0_1] : memref<1x4x1024xbf16, #tpu.memory_space<vmem>>, vector<1x4x1024xbf16>
    %1 = vector.shape_cast %0 : vector<1x4x1024xbf16> to vector<4x1024xbf16>
    %2 = vector.extract_strided_slice %1 {offsets = [0, 109], sizes = [4, 768], strides = [1, 1]} : vector<4x1024xbf16> to vector<4x768xbf16>
    %3 = vector.extract_strided_slice %1 {offsets = [0, 110], sizes = [4, 768], strides = [1, 1]} : vector<4x1024xbf16> to vector<4x768xbf16>
    %4 = vector.extract_strided_slice %1 {offsets = [0, 111], sizes = [4, 768], strides = [1, 1]} : vector<4x1024xbf16> to vector<4x768xbf16>
    %5 = vector.extract_strided_slice %1 {offsets = [0, 127], sizes = [4, 768], strides = [1, 1]} : vector<4x1024xbf16> to vector<4x768xbf16>
    %6 = vector.extract_strided_slice %1 {offsets = [0, 128], sizes = [4, 768], strides = [1, 1]} : vector<4x1024xbf16> to vector<4x768xbf16>
    %7 = vector.extract_strided_slice %1 {offsets = [0, 129], sizes = [4, 768], strides = [1, 1]} : vector<4x1024xbf16> to vector<4x768xbf16>
    %8 = vector.extract_strided_slice %1 {offsets = [0, 145], sizes = [4, 768], strides = [1, 1]} : vector<4x1024xbf16> to vector<4x768xbf16>
    %9 = vector.extract_strided_slice %1 {offsets = [0, 146], sizes = [4, 768], strides = [1, 1]} : vector<4x1024xbf16> to vector<4x768xbf16>
    %10 = vector.extract_strided_slice %1 {offsets = [0, 147], sizes = [4, 768], strides = [1, 1]} : vector<4x1024xbf16> to vector<4x768xbf16>
    %11 = tpu.concatenate %2, %3, %4, %5, %6, %7, %8, %9, %10 in 0 : vector<4x768xbf16>, vector<4x768xbf16>, vector<4x768xbf16>, vector<4x768xbf16>, vector<4x768xbf16>, vector<4x768xbf16>, vector<4x768xbf16>, vector<4x768xbf16>, vector<4x768xbf16> -> vector<36x768xbf16>
    %c0_2 = arith.constant 0 : index
    %c0_3 = arith.constant 0 : index
    %12 = vector.load %arg2[%c0_2, %c0_3] : memref<128x36xbf16, #tpu.memory_space<vmem>>, vector<128x36xbf16>
    %cst = arith.constant dense<0.000000e+00> : vector<128x768xf32>
    %13 = tpu.matmul %12, %11, %cst {dimension_numbers = #tpu.dot_dimension_numbers<[1], [0], [0], [1], [0, 0, 1, 1], [], []>} : vector<128x36xbf16>, vector<36x768xbf16>, vector<128x768xf32> -> vector<128x768xf32>
    %c0_4 = arith.constant 0 : index
    %c0_5 = arith.constant 0 : index
    %14 = vector.load %arg3[%c0_4, %c0_5] : memref<128x1xf32, #tpu.memory_space<vmem>>, vector<128x1xf32>
    %15 = vector.broadcast %14 : vector<128x1xf32> to vector<128x768xf32>
    %16 = arith.addf %13, %15 : vector<128x768xf32>
    %17 = arith.truncf %16 : vector<128x768xf32> to vector<128x768xbf16>
    %c0_6 = arith.constant 0 : index
    %c0_7 = arith.constant 0 : index
    %c0_8 = arith.constant 0 : index
    %18 = vector.load %arg4[%c0_6, %c0_7, %c0_8] : memref<1x128x768xbf16, #tpu.memory_space<vmem>>, vector<1x128x768xbf16>
    %19 = vector.shape_cast %18 : vector<1x128x768xbf16> to vector<128x768xbf16>
    %20 = vector.shape_cast %17 : vector<128x768xbf16> to vector<1x128x768xbf16>
    tpu.vector_store %arg4[%c0_6, %c0_7, %c0_8], %20 {strides = array<i32>} : memref<1x128x768xbf16, #tpu.memory_space<vmem>>, vector<1x128x768xbf16>,
    return
  }
  func.func @transform_0(%arg0: i32) -> (i32, i32, i32) {
    %c0_i32 = arith.constant 0 : i32
    %c0_i32_0 = arith.constant 0 : i32
    %c0_i32_1 = arith.constant 0 : i32
    return %arg0, %c0_i32, %c0_i32_0 : i32, i32, i32
  }
  func.func @transform_1(%arg0: i32) -> (i32, i32) {
    %c0_i32 = arith.constant 0 : i32
    %c0_i32_0 = arith.constant 0 : i32
    %c0_i32_1 = arith.constant 0 : i32
    return %c0_i32, %c0_i32_0 : i32, i32
  }
  func.func @transform_2(%arg0: i32) -> (i32, i32) {
    %c0_i32 = arith.constant 0 : i32
    %c0_i32_0 = arith.constant 0 : i32
    %c0_i32_1 = arith.constant 0 : i32
    return %c0_i32, %c0_i32_0 : i32, i32
  }
  func.func @transform_3(%arg0: i32) -> (i32, i32, i32) {
    %c0_i32 = arith.constant 0 : i32
    %c0_i32_0 = arith.constant 0 : i32
    %c0_i32_1 = arith.constant 0 : i32
    return %arg0, %c0_i32, %c0_i32_0 : i32, i32, i32
  }
}

module attributes {stable_mosaic.version = 11 : i64} {
  func.func @kernel(%arg0: i32, %arg1: i32, %arg2: memref<1x768xf32, #tpu.memory_space<vmem>>, %arg3: memref<1x128x768xbf16, #tpu.memory_space<vmem>>, %arg4: memref<128x288xbf16, #tpu.memory_space<vmem>>, %arg5: memref<32x768xf32, #tpu.memory_space<vmem>>, %arg6: memref<32x768xf32, #tpu.memory_space<vmem>>, %arg7: memref<32x1024xbf16, #tpu.memory_space<vmem>>, %arg8: memref<32x768xf32, #tpu.memory_space<vmem>>, %arg9: memref<128x768xf32, #tpu.memory_space<vmem>>) attributes {dimension_semantics = [#tpu.dimension_semantics<arbitrary>, #tpu.dimension_semantics<arbitrary>], iteration_bounds = array<i64: 1, 8>, scalar_prefetch = 0 : i64, scratch_operands = 3 : i64, tpu.core_type = #tpu.core_type<tc>, window_params = [{pipeline_mode = #tpu.pipeline_mode<synchronous>, transform_indices = @transform_0, window_bounds = array<i64: 1, 768>}, {transform_indices = @transform_1, window_bounds = array<i64: 1, 128, 768>}, {pipeline_mode = #tpu.pipeline_mode<synchronous>, transform_indices = @transform_2, window_bounds = array<i64: 128, 288>}, {transform_indices = @transform_3, window_bounds = array<i64: 32, 768>}, {transform_indices = @transform_4, window_bounds = array<i64: 32, 768>}]} {
    %c0_i32 = arith.constant 0 : i32
    %0 = arith.cmpi eq, %arg1, %c0_i32 : i32
    %1 = arith.extui %0 : i1 to i32
    %c0_i32_0 = arith.constant 0 : i32
    %2 = arith.cmpi ne, %1, %c0_i32_0 : i32
    scf.if %2 {
      %cst_14 = arith.constant 0.000000e+00 : bf16
      %42 = vector.broadcast %cst_14 : bf16 to vector<32x1024xbf16>
      %c0_15 = arith.constant 0 : index
      %c0_16 = arith.constant 0 : index
      %43 = vector.load %arg7[%c0_15, %c0_16] : memref<32x1024xbf16, #tpu.memory_space<vmem>>, vector<32x1024xbf16>
      tpu.vector_store %arg7[%c0_15, %c0_16], %42 {strides = array<i32>} : memref<32x1024xbf16, #tpu.memory_space<vmem>>, vector<32x1024xbf16>,
      %cst_17 = arith.constant 0.000000e+00 : f32
      %44 = vector.broadcast %cst_17 : f32 to vector<32x768xf32>
      %c0_18 = arith.constant 0 : index
      %c0_19 = arith.constant 0 : index
      %45 = vector.load %arg8[%c0_18, %c0_19] : memref<32x768xf32, #tpu.memory_space<vmem>>, vector<32x768xf32>
      tpu.vector_store %arg8[%c0_18, %c0_19], %44 {strides = array<i32>} : memref<32x768xf32, #tpu.memory_space<vmem>>, vector<32x768xf32>,
      %c0_20 = arith.constant 0 : index
      %c0_21 = arith.constant 0 : index
      %c0_22 = arith.constant 0 : index
      %46 = vector.load %arg3[%c0_20, %c0_21, %c0_22] : memref<1x128x768xbf16, #tpu.memory_space<vmem>>, vector<1x128x768xbf16>
      %47 = vector.shape_cast %46 : vector<1x128x768xbf16> to vector<128x768xbf16>
      %48 = arith.extf %47 : vector<128x768xbf16> to vector<128x768xf32>
      %c0_23 = arith.constant 0 : index
      %c0_24 = arith.constant 0 : index
      %49 = vector.load %arg9[%c0_23, %c0_24] : memref<128x768xf32, #tpu.memory_space<vmem>>, vector<128x768xf32>
      tpu.vector_store %arg9[%c0_23, %c0_24], %48 {strides = array<i32>} : memref<128x768xf32, #tpu.memory_space<vmem>>, vector<128x768xf32>,
    } else {
    }
    %c0_i32_1 = arith.constant 0 : i32
    %3 = arith.cmpi sgt, %arg1, %c0_i32_1 : i32
    %4 = arith.extui %3 : i1 to i32
    %c0_i32_2 = arith.constant 0 : i32
    %5 = arith.cmpi ne, %4, %c0_i32_2 : i32
    scf.if %5 {
      %c0_14 = arith.constant 0 : index
      %c109 = arith.constant 109 : index
      %42 = vector.load %arg7[%c0_14, %c109] : memref<32x1024xbf16, #tpu.memory_space<vmem>>, vector<32x768xbf16>
      %c0_15 = arith.constant 0 : index
      %c110 = arith.constant 110 : index
      %43 = vector.load %arg7[%c0_15, %c110] : memref<32x1024xbf16, #tpu.memory_space<vmem>>, vector<32x768xbf16>
      %c0_16 = arith.constant 0 : index
      %c111 = arith.constant 111 : index
      %44 = vector.load %arg7[%c0_16, %c111] : memref<32x1024xbf16, #tpu.memory_space<vmem>>, vector<32x768xbf16>
      %c0_17 = arith.constant 0 : index
      %c127 = arith.constant 127 : index
      %45 = vector.load %arg7[%c0_17, %c127] : memref<32x1024xbf16, #tpu.memory_space<vmem>>, vector<32x768xbf16>
      %c0_18 = arith.constant 0 : index
      %c128_19 = arith.constant 128 : index
      %46 = vector.load %arg7[%c0_18, %c128_19] : memref<32x1024xbf16, #tpu.memory_space<vmem>>, vector<32x768xbf16>
      %c0_20 = arith.constant 0 : index
      %c129 = arith.constant 129 : index
      %47 = vector.load %arg7[%c0_20, %c129] : memref<32x1024xbf16, #tpu.memory_space<vmem>>, vector<32x768xbf16>
      %c0_21 = arith.constant 0 : index
      %c145 = arith.constant 145 : index
      %48 = vector.load %arg7[%c0_21, %c145] : memref<32x1024xbf16, #tpu.memory_space<vmem>>, vector<32x768xbf16>
      %c0_22 = arith.constant 0 : index
      %c146 = arith.constant 146 : index
      %49 = vector.load %arg7[%c0_22, %c146] : memref<32x1024xbf16, #tpu.memory_space<vmem>>, vector<32x768xbf16>
      %c0_23 = arith.constant 0 : index
      %c147 = arith.constant 147 : index
      %50 = vector.load %arg7[%c0_23, %c147] : memref<32x1024xbf16, #tpu.memory_space<vmem>>, vector<32x768xbf16>
      %51 = tpu.concatenate %42, %43, %44, %45, %46, %47, %48, %49, %50 in 0 : vector<32x768xbf16>, vector<32x768xbf16>, vector<32x768xbf16>, vector<32x768xbf16>, vector<32x768xbf16>, vector<32x768xbf16>, vector<32x768xbf16>, vector<32x768xbf16>, vector<32x768xbf16> -> vector<288x768xbf16>
      %c0_24 = arith.constant 0 : index
      %c0_25 = arith.constant 0 : index
      %52 = vector.load %arg4[%c0_24, %c0_25] : memref<128x288xbf16, #tpu.memory_space<vmem>>, vector<128x288xbf16>
      %cst_26 = arith.constant dense<0.000000e+00> : vector<128x768xf32>
      %53 = tpu.matmul %52, %51, %cst_26 {dimension_numbers = #tpu.dot_dimension_numbers<[1], [0], [0], [1], [0, 0, 1, 1], [], []>} : vector<128x288xbf16>, vector<288x768xbf16>, vector<128x768xf32> -> vector<128x768xf32>
      %c0_27 = arith.constant 0 : index
      %c0_28 = arith.constant 0 : index
      %c0_29 = arith.constant 0 : index
      %54 = vector.load %arg3[%c0_27, %c0_28, %c0_29] : memref<1x128x768xbf16, #tpu.memory_space<vmem>>, vector<1x128x768xbf16>
      %55 = vector.shape_cast %54 : vector<1x128x768xbf16> to vector<128x768xbf16>
      %56 = arith.extf %55 : vector<128x768xbf16> to vector<128x768xf32>
      %57 = arith.addf %53, %56 : vector<128x768xf32>
      %c0_30 = arith.constant 0 : index
      %c0_31 = arith.constant 0 : index
      %58 = vector.load %arg9[%c0_30, %c0_31] : memref<128x768xf32, #tpu.memory_space<vmem>>, vector<128x768xf32>
      tpu.vector_store %arg9[%c0_30, %c0_31], %57 {strides = array<i32>} : memref<128x768xf32, #tpu.memory_space<vmem>>, vector<128x768xf32>,
    } else {
    }
    %c0 = arith.constant 0 : index
    %c0_3 = arith.constant 0 : index
    %6 = vector.load %arg9[%c0, %c0_3] : memref<128x768xf32, #tpu.memory_space<vmem>>, vector<128x768xf32>
    %7 = vector.extract_strided_slice %6 {offsets = [0, 0], sizes = [32, 768], strides = [1, 1]} : vector<128x768xf32> to vector<32x768xf32>
    %8 = arith.negf %7 : vector<32x768xf32>
    %9 = math.exp %8 : vector<32x768xf32>
    %cst = arith.constant 1.000000e+00 : f32
    %10 = vector.broadcast %cst : f32 to vector<32x768xf32>
    %11 = arith.addf %10, %9 : vector<32x768xf32>
    %12 = arith.divf %10, %11 : vector<32x768xf32>
    %13 = vector.extract_strided_slice %6 {offsets = [32, 0], sizes = [32, 768], strides = [1, 1]} : vector<128x768xf32> to vector<32x768xf32>
    %14 = arith.negf %13 : vector<32x768xf32>
    %15 = math.exp %14 : vector<32x768xf32>
    %cst_4 = arith.constant 1.000000e+00 : f32
    %16 = vector.broadcast %cst_4 : f32 to vector<32x768xf32>
    %17 = arith.addf %16, %15 : vector<32x768xf32>
    %18 = arith.divf %16, %17 : vector<32x768xf32>
    %19 = vector.extract_strided_slice %6 {offsets = [64, 0], sizes = [32, 768], strides = [1, 1]} : vector<128x768xf32> to vector<32x768xf32>
    %20 = arith.negf %19 : vector<32x768xf32>
    %21 = math.exp %20 : vector<32x768xf32>
    %cst_5 = arith.constant 1.000000e+00 : f32
    %22 = vector.broadcast %cst_5 : f32 to vector<32x768xf32>
    %23 = arith.addf %22, %21 : vector<32x768xf32>
    %24 = arith.divf %22, %23 : vector<32x768xf32>
    %25 = vector.extract_strided_slice %6 {offsets = [96, 0], sizes = [32, 768], strides = [1, 1]} : vector<128x768xf32> to vector<32x768xf32>
    %26 = math.tanh %25 : vector<32x768xf32>
    %c0_6 = arith.constant 0 : index
    %c0_7 = arith.constant 0 : index
    %27 = vector.load %arg8[%c0_6, %c0_7] : memref<32x768xf32, #tpu.memory_space<vmem>>, vector<32x768xf32>
    %28 = arith.mulf %18, %27 : vector<32x768xf32>
    %29 = arith.mulf %12, %26 : vector<32x768xf32>
    %30 = arith.addf %28, %29 : vector<32x768xf32>
    %31 = math.tanh %30 : vector<32x768xf32>
    %32 = arith.mulf %24, %31 : vector<32x768xf32>
    %c0_8 = arith.constant 0 : index
    %c0_9 = arith.constant 0 : index
    %33 = vector.load %arg8[%c0_8, %c0_9] : memref<32x768xf32, #tpu.memory_space<vmem>>, vector<32x768xf32>
    tpu.vector_store %arg8[%c0_8, %c0_9], %30 {strides = array<i32>} : memref<32x768xf32, #tpu.memory_space<vmem>>, vector<32x768xf32>,
    %c0_10 = arith.constant 0 : index
    %c0_11 = arith.constant 0 : index
    %34 = vector.load %arg2[%c0_10, %c0_11] : memref<1x768xf32, #tpu.memory_space<vmem>>, vector<1x768xf32>
    %35 = vector.broadcast %34 : vector<1x768xf32> to vector<32x768xf32>
    %36 = arith.mulf %32, %35 : vector<32x768xf32>
    %37 = arith.truncf %36 : vector<32x768xf32> to vector<32x768xbf16>
    %c0_12 = arith.constant 0 : index
    %c128 = arith.constant 128 : index
    %38 = vector.load %arg7[%c0_12, %c128] : memref<32x1024xbf16, #tpu.memory_space<vmem>>, vector<32x768xbf16>
    tpu.vector_store %arg7[%c0_12, %c128], %37 {strides = array<i32>} : memref<32x1024xbf16, #tpu.memory_space<vmem>>, vector<32x768xbf16>,
    %c7_i32 = arith.constant 7 : i32
    %39 = arith.cmpi eq, %arg1, %c7_i32 : i32
    %40 = arith.extui %39 : i1 to i32
    %c0_i32_13 = arith.constant 0 : i32
    %41 = arith.cmpi ne, %40, %c0_i32_13 : i32
    scf.if %41 {
      %c0_14 = arith.constant 0 : index
      %c0_15 = arith.constant 0 : index
      %42 = vector.load %arg5[%c0_14, %c0_15] : memref<32x768xf32, #tpu.memory_space<vmem>>, vector<32x768xf32>
      tpu.vector_store %arg5[%c0_14, %c0_15], %32 {strides = array<i32>} : memref<32x768xf32, #tpu.memory_space<vmem>>, vector<32x768xf32>,
      %c0_16 = arith.constant 0 : index
      %c0_17 = arith.constant 0 : index
      %43 = vector.load %arg6[%c0_16, %c0_17] : memref<32x768xf32, #tpu.memory_space<vmem>>, vector<32x768xf32>
      tpu.vector_store %arg6[%c0_16, %c0_17], %30 {strides = array<i32>} : memref<32x768xf32, #tpu.memory_space<vmem>>, vector<32x768xf32>,
    } else {
    }
    return
  }
  func.func @transform_0(%arg0: i32, %arg1: i32) -> (i32, i32) {
    %c0_i32 = arith.constant 0 : i32
    %c0_i32_0 = arith.constant 0 : i32
    %c0_i32_1 = arith.constant 0 : i32
    return %c0_i32, %c0_i32_0 : i32, i32
  }
  func.func @transform_1(%arg0: i32, %arg1: i32) -> (i32, i32, i32) {
    %c0_i32 = arith.constant 0 : i32
    %c0_i32_0 = arith.constant 0 : i32
    return %arg1, %c0_i32, %arg0 : i32, i32, i32
  }
  func.func @transform_2(%arg0: i32, %arg1: i32) -> (i32, i32) {
    %c0_i32 = arith.constant 0 : i32
    %c0_i32_0 = arith.constant 0 : i32
    %c0_i32_1 = arith.constant 0 : i32
    return %c0_i32, %c0_i32_0 : i32, i32
  }
  func.func @transform_3(%arg0: i32, %arg1: i32) -> (i32, i32) {
    %c0_i32 = arith.constant 0 : i32
    %c0_i32_0 = arith.constant 0 : i32
    return %c0_i32, %arg0 : i32, i32
  }
  func.func @transform_4(%arg0: i32, %arg1: i32) -> (i32, i32) {
    %c0_i32 = arith.constant 0 : i32
    %c0_i32_0 = arith.constant 0 : i32
    return %c0_i32, %arg0 : i32, i32
  }
}

</mosaic_0001>

<bundles_post_ra>
// kernel: conv_lstm2d_forward.2
= control target key start
LH: loop header
LB: loop body
LE: loop exit
PB: predicated region body
PF: predicated region fallthrough
CT: control target
= control target key end

     0   :  { %s1477_s12 = smov 0   ;;  %s2200_s0 = inlined_call_operand.vmem [shape: bf16[8,4,1024], index: 0, kind: input, shape index: {}]   ;;  %s2201_s1 = inlined_call_operand.vmem [shape: bf16[128,36], index: 1, kind: input, shape index: {}]   ;;  %s2202_s2 = inlined_call_operand.vmem [shape: f32[128,1], index: 2, kind: input, shape index: {}]   ;;  %s2203_s3 = inlined_call_operand.vmem [shape: bf16[8,128,768], index: 3, kind: output, shape index: {}]  }
   0x1 LB: > { %s1312_s13 = sadd.s32 4294967295, %s1445_s12   ;;  %p1316_p0 = scmp.ge.s32.totalorder %s1445_s12, 1  ;;  %s1445_s12 = sphi %s1477_s12, %s13_s12  }
   0x2   : > { %p137_p1 = scmp.lt.s32.totalorder %s1445_s12, 9 }
   0x4   : > { %p138_p2 = pnand %p1316_p0, %p137_p1 }
   0x5   : > { %p161_p3 = scmp.lt.s32.totalorder (!%p138_p2), %s1312_s13, 7  ;;  %s1447_s18 = smov (!%p138_p2), 127  }
   0x6   : > { %141 = sbr.rel (%p138_p2) target bundleno = 751 (0x2ef), region = 32  ;;  %s1448_s19 = smov (!%p138_p2), 126  }
   0x7   : > { %s1449_s20 = smov (!%p138_p2), 110   ;;  %s1450_s21 = smov (!%p138_p2), 109  }
   0x8   : > { %s1451_s22 = smov (!%p138_p2), 108   ;;  %s1452_s23 = smov (!%p138_p2), 92  }
   0x9   : > { %s1453_s24 = smov (!%p138_p2), 91   ;;  %s1454_s25 = smov (!%p138_p2), 90  }
   0xa   : > { %s1455_s26 = smov (!%p138_p2), 19  }
   0xb   : > { %s2205_s13 = smov (!%p161_p3, %s1312_s13), 7  ;;  %vm218_vm0 = vcmask 1039360   ;;  %vm257_vm1 = vcmask 1031168   ;;  %vm491_vm2 = vcmask 1041408   ;;  %vm296_vm3 = vcmask 900096  }
   0xc   : > { %s1402_s14 = sshll.u32 %s2205_s13, 4  ;;  %vm506_vm4 = vcmask 1043456   ;;  %vm521_vm5 = vcmask 1045504   ;;  %vm368_vm6 = vcmask 883712   ;;  %vm407_vm7 = vcmask 752640  }
   0xd   : > { %s165_s17 = scalar_lea.vmem %s2200_s0, %s1402_s14  ;;  %vm330_vm8 = vcmask 891904   ;;  %vm446_vm9 = vcmask 744448   ;;  %vm484_vm10 = vcmask 736256   ;;  %vm793_vm11 = vcmask 154624  }
   0xe   : > { %v1491_v0 = vld [vmem:[%s165_s17] sm:$0xff]  ;;  %v1493_v1 = vld [vmem:[%s165_s17 + $0x8] sm:$0xff]  ;;  %vm824_vm12 = vcmask 293888  }
   0xf   : > { %175 = vst [vmem:[#allocation1] ss:$4 sm:$0xff] %v1491_v0 }
  0x10   : > { %178 = vst [vmem:[#allocation1 + $0x20] ss:$4 sm:$0xff] %v1493_v1 }
  0x16   : > { %v1497_v2 = vld.sshfl [vmem:[#allocation1] sm:$0xff pattern:$0x73625140]  ;;  %v1499_v3 = vld.sshfl [vmem:[#allocation1 + $0x8] sm:$0xff pattern:$0x73625140] }
  0x17   : > { %v1501_v4 = vld.sshfl [vmem:[#allocation1 + $0x10] sm:$0xff pattern:$0x73625140]  ;;  %v1503_v5 = vld.sshfl [vmem:[#allocation1 + $0x18] sm:$0xff pattern:$0x73625140] }
  0x18   : > { %v1505_v6 = vld.sshfl [vmem:[#allocation1 + $0x20] sm:$0xff pattern:$0x73625140]  ;;  %v1507_v7 = vld.sshfl [vmem:[#allocation1 + $0x28] sm:$0xff pattern:$0x73625140] }
  0x19   : > { %v1509_v8 = vld.sshfl [vmem:[#allocation1 + $0x30] sm:$0xff pattern:$0x73625140]  ;;  %187 = vst [vmem:[#allocation1 + $0x1] ss:$4 sm:$0xff] %v1491_v0 }
  0x1a   : > { %189 = vst [vmem:[#allocation1 + $0x21] ss:$4 sm:$0xff] %v1493_v1 }
  0x20   : > { %v192_v9 = vld.sshfl [vmem:[#allocation1 + $0x8] sm:$0xff pattern:$0x73625140]  ;;  %v190_v10 = vld.sshfl [vmem:[#allocation1] sm:$0xff pattern:$0x73625140] }
  0x21   : > { %v1513_v11 = vld.sshfl [vmem:[#allocation1 + $0x20] sm:$0xff pattern:$0x73625140]  ;;  %v1515_v12 = vld.sshfl [vmem:[#allocation1 + $0x28] sm:$0xff pattern:$0x73625140]  ;;  %206 = vrot.lane.b32.xlu1 %v192_v9, %s1447_s18  ;;  %204 = vrot.lane.b32.xlu0 %v190_v10, %s1447_s18 }
  0x22   : > { %v1519_v13 = vld.sshfl [vmem:[#allocation1 + $0x30] sm:$0xff pattern:$0x73625140]  ;;  %v196_v15 = vld.sshfl [vmem:[#allocation1 + $0x18] sm:$0xff pattern:$0x73625140] }
  0x23   : > { %v194_v14 = vld.sshfl [vmem:[#allocation1 + $0x10] sm:$0xff pattern:$0x73625140]  ;;  %228 = vst [vmem:[#allocation1 + $0x22] ss:$4 sm:$0xff] %v1493_v1 }
  0x24   : > { %208 = vrot.lane.b32.xlu2 %v194_v14, %s1447_s18  ;;  %226 = vst [vmem:[#allocation1 + $0x2] ss:$4 sm:$0xff] %v1491_v0 }
  0x29   : > { %210 = vrot.lane.b32.xlu0 %v196_v15, %s1447_s18 }
  0x2a   : > { %v1525_v16 = vld.sshfl [vmem:[#allocation1 + $0x20] sm:$0xff pattern:$0x73625140]  ;;  %v1527_v17 = vld.sshfl [vmem:[#allocation1 + $0x28] sm:$0xff pattern:$0x73625140] }
  0x2b   : > { %v1529_v18 = vld.sshfl [vmem:[#allocation1 + $0x30] sm:$0xff pattern:$0x73625140]  ;;  %v229_v19 = vld.sshfl [vmem:[#allocation1] sm:$0xff pattern:$0x73625140] }
  0x2c   : > { %267 = vst [vmem:[#allocation1 + $0x23] ss:$4 sm:$0xff] %v1493_v1  ;;  %243 = vrot.lane.b32.xlu1 %v229_v19, %s1448_s19  ;;  %v233_v20 = vld.sshfl [vmem:[#allocation1 + $0x10] sm:$0xff pattern:$0x73625140] }
  0x2d   : > { %v235_v21 = vld.sshfl [vmem:[#allocation1 + $0x18] sm:$0xff pattern:$0x73625140]  ;;  %v231_v22 = vld.sshfl [vmem:[#allocation1 + $0x8] sm:$0xff pattern:$0x73625140] }
  0x2e   : > { %245 = vrot.lane.b32.xlu2 %v231_v22, %s1448_s19  ;;  %265 = vst [vmem:[#allocation1 + $0x3] ss:$4 sm:$0xff] %v1491_v0 }
  0x31   : > { %247 = vrot.lane.b32.xlu0 %v233_v20, %s1448_s19 }
  0x33   : > { %v1536_v23 = vld.sshfl [vmem:[#allocation1 + $0x20] sm:$0xff pattern:$0x73625140]  ;;  %v1539_v24 = vld.sshfl [vmem:[#allocation1 + $0x28] sm:$0xff pattern:$0x73625140] }
  0x34   : > { %249 = vrot.lane.b32.xlu1 %v235_v21, %s1448_s19  ;;  %v1541_v25 = vld.sshfl [vmem:[#allocation1 + $0x30] sm:$0xff pattern:$0x73625140] }
  0x35   : > { %v272_v26 = vld.sshfl [vmem:[#allocation1 + $0x10] sm:$0xff pattern:$0x73625140]  ;;  %v274_v27 = vld.sshfl [vmem:[#allocation1 + $0x18] sm:$0xff pattern:$0x73625140] }
  0x36   : > { %v270_v28 = vld.sshfl [vmem:[#allocation1 + $0x8] sm:$0xff pattern:$0x73625140]  ;;  %v268_v29 = vld.sshfl [vmem:[#allocation1] sm:$0xff pattern:$0x73625140] }
  0x37   : > { %282 = vrot.lane.b32.xlu2 %v268_v29, %s1449_s20  ;;  %303 = vst [vmem:[#allocation1] ss:$4 sm:$0xff] %v1491_v0 }
  0x38   : > { %305 = vst [vmem:[#allocation1 + $0x20] ss:$4 sm:$0xff] %v1493_v1 }
  0x39   : > { %284 = vrot.lane.b32.xlu0 %v270_v28, %s1449_s20 }
  0x3c   : > { %286 = vrot.lane.b32.xlu1 %v272_v26, %s1449_s20 }
  0x3e   : > { %v306_v30 = vld.sshfl [vmem:[#allocation1 + $0x8] sm:$0xff pattern:$0x73625140]  ;;  %v308_v31 = vld.sshfl [vmem:[#allocation1 + $0x10] sm:$0xff pattern:$0x73625140] }
  0x3f   : > { %v310_v32 = vld.sshfl [vmem:[#allocation1 + $0x18] sm:$0xff pattern:$0x73625140]  ;;  %288 = vrot.lane.b32.xlu2 %v274_v27, %s1449_s20  ;;  %v312_v33 = vld.sshfl [vmem:[#allocation1 + $0x20] sm:$0xff pattern:$0x73625140] }
  0x40   : > { %337 = vst [vmem:[#allocation1 + $0x1] ss:$4 sm:$0xff] %v1491_v0  ;;  %v314_v34 = vld.sshfl [vmem:[#allocation1 + $0x28] sm:$0xff pattern:$0x73625140] }
  0x41   : > { %v1550_v35 = vld.sshfl [vmem:[#allocation1 + $0x30] sm:$0xff pattern:$0x73625140] }
  0x42   : > { %339 = vst [vmem:[#allocation1 + $0x21] ss:$4 sm:$0xff] %v1493_v1 }
  0x44   : > { %318 = vrot.lane.b32.xlu1 %v306_v30, %s1450_s21 }
  0x47   : > { %v344_v36 = vld.sshfl [vmem:[#allocation1 + $0x18] sm:$0xff pattern:$0x73625140]  ;;  %v340_v37 = vld.sshfl [vmem:[#allocation1 + $0x8] sm:$0xff pattern:$0x73625140]  ;;  %320 = vrot.lane.b32.xlu2 %v308_v31, %s1450_s21 }
  0x48   : > { %354 = vrot.lane.b32.xlu0 %v340_v37, %s1451_s22  ;;  %v342_v38 = vld.sshfl [vmem:[#allocation1 + $0x10] sm:$0xff pattern:$0x73625140] }
  0x49   : > { %376 = vst [vmem:[#allocation1 + $0x2] ss:$4 sm:$0xff] %v1491_v0  ;;  %v346_v39 = vld.sshfl [vmem:[#allocation1 + $0x20] sm:$0xff pattern:$0x73625140] }
  0x4a   : > { %v348_v40 = vld.sshfl [vmem:[#allocation1 + $0x28] sm:$0xff pattern:$0x73625140]  ;;  %v1557_v41 = vld.sshfl [vmem:[#allocation1 + $0x30] sm:$0xff pattern:$0x73625140] }
  0x4b   : > { %v1559_v42 = vld.sshfl [vmem:[#allocation1 + $0x38] sm:$0xff pattern:$0x73625140] }
  0x4c   : > { %356 = vrot.lane.b32.xlu1 %v342_v38, %s1451_s22  ;;  %378 = vst [vmem:[#allocation1 + $0x22] ss:$4 sm:$0xff] %v1493_v1 }
  0x4f   : > { %322 = vrot.lane.b32.xlu2 %v310_v32, %s1450_s21 }
  0x50   : > { %v383_v43 = vld.sshfl [vmem:[#allocation1 + $0x18] sm:$0xff pattern:$0x73625140]  ;;  %v379_v44 = vld.sshfl [vmem:[#allocation1 + $0x8] sm:$0xff pattern:$0x73625140] }
  0x51   : > { %393 = vrot.lane.b32.xlu0 %v379_v44, %s1452_s23  ;;  %v381_v45 = vld.sshfl [vmem:[#allocation1 + $0x10] sm:$0xff pattern:$0x73625140] }
  0x52   : > { %415 = vst [vmem:[#allocation1 + $0x3] ss:$4 sm:$0xff] %v1491_v0 }
  0x53   : > { %v385_v46 = vld.sshfl [vmem:[#allocation1 + $0x20] sm:$0xff pattern:$0x73625140]  ;;  %v387_v47 = vld.sshfl [vmem:[#allocation1 + $0x28] sm:$0xff pattern:$0x73625140] }
  0x54   : > { %395 = vrot.lane.b32.xlu1 %v381_v45, %s1452_s23  ;;  %v1567_v48 = vld.sshfl [vmem:[#allocation1 + $0x30] sm:$0xff pattern:$0x73625140]  ;;  %v1569_v49 = vld.sshfl [vmem:[#allocation1 + $0x38] sm:$0xff pattern:$0x73625140] }
  0x55   : > { %417 = vst [vmem:[#allocation1 + $0x23] ss:$4 sm:$0xff] %v1493_v1 }
  0x57   : > { %358 = vrot.lane.b32.xlu2 %v344_v36, %s1451_s22 }
  0x59   : > { %v422_v50 = vld.sshfl [vmem:[#allocation1 + $0x18] sm:$0xff pattern:$0x73625140]  ;;  %v418_v51 = vld.sshfl [vmem:[#allocation1 + $0x8] sm:$0xff pattern:$0x73625140] }
  0x5a   : > { %432 = vrot.lane.b32.xlu0 %v418_v51, %s1453_s24  ;;  %v420_v52 = vld.sshfl [vmem:[#allocation1 + $0x10] sm:$0xff pattern:$0x73625140] }
  0x5b   : > { %453 = vst [vmem:[#allocation1] ss:$4 sm:$0xff] %v1491_v0 }
  0x5c   : > { %434 = vrot.lane.b32.xlu1 %v420_v52, %s1453_s24  ;;  %v424_v53 = vld.sshfl [vmem:[#allocation1 + $0x20] sm:$0xff pattern:$0x73625140]  ;;  %v426_v54 = vld.sshfl [vmem:[#allocation1 + $0x28] sm:$0xff pattern:$0x73625140] }
  0x5d   : > { %v1576_v55 = vld.sshfl [vmem:[#allocation1 + $0x30] sm:$0xff pattern:$0x73625140]  ;;  %v1578_v56 = vld.sshfl [vmem:[#allocation1 + $0x38] sm:$0xff pattern:$0x73625140] }
  0x5e   : > { %455 = vst [vmem:[#allocation1 + $0x20] ss:$4 sm:$0xff] %v1493_v1 }
  0x5f   : > { %397 = vrot.lane.b32.xlu2 %v383_v43, %s1452_s23 }
  0x62   : > { %v456_v57 = vld.sshfl [vmem:[#allocation1 + $0x8] sm:$0xff pattern:$0x73625140]  ;;  %v460_v58 = vld.sshfl [vmem:[#allocation1 + $0x18] sm:$0xff pattern:$0x73625140] }
  0x63   : > { %470 = vrot.lane.b32.xlu0 %v456_v57, %s1454_s25  ;;  %v458_v59 = vld.sshfl [vmem:[#allocation1 + $0x10] sm:$0xff pattern:$0x73625140] }
  0x64   : > { %474 = vrot.lane.b32.xlu1 %v460_v58, %s1454_s25 }
  0x65   : > { %v464_v60 = vld.sshfl [vmem:[#allocation1 + $0x28] sm:$0xff pattern:$0x73625140]  ;;  %v462_v61 = vld.sshfl [vmem:[#allocation1 + $0x20] sm:$0xff pattern:$0x73625140] }
  0x66   : > { %v466_v0 = vld.sshfl [vmem:[#allocation1 + $0x30] sm:$0xff pattern:$0x73625140] }
  0x67   : > { %436 = vrot.lane.b32.xlu2 %v422_v50, %s1453_s24 }
  0x6b   : > { %472 = vrot.lane.b32.xlu0 %v458_v59, %s1454_s25 }
  0x6c   : > { %478 = vrot.lane.b32.xlu1 %v464_v60, %s1454_s25 }
  0x6f   : > { %324 = vrot.lane.b32.xlu2 %v312_v33, %s1450_s21 }
  0x73   : > { %476 = vrot.lane.b32.xlu0 %v462_v61, %s1454_s25 }
  0x74   : > { %360 = vrot.lane.b32.xlu1 %v346_v39, %s1451_s22 }
  0x77   : > { %362 = vrot.lane.b32.xlu2 %v348_v40, %s1451_s22 }
  0x7b   : > { %326 = vrot.lane.b32.xlu0 %v314_v34, %s1450_s21 }
  0x7c   : > { %401 = vrot.lane.b32.xlu1 %v387_v47, %s1452_s23 }
  0x7e   : > { %v209_v62 = vpop.permute.xlu2 %208 }
  0x7f   : > { %438 = vrot.lane.b32.xlu2 %v424_v53, %s1453_s24 }
  0x83   : > { %399 = vrot.lane.b32.xlu0 %v385_v46, %s1452_s23 }
  0x84   : > { %212 = vrot.lane.b32.xlu1 %v1513_v11, %s1447_s18 }
  0x87   : > { %214 = vrot.lane.b32.xlu2 %v1515_v12, %s1447_s18 }
  0x88   : > { %v246_v63 = vpop.permute.xlu2 %245 }
  0x8b   : > { %440 = vrot.lane.b32.xlu0 %v426_v54, %s1453_s24 }
  0x91   : > { %v283_v1 = vpop.permute.xlu2 %282 }
  0x93   : > { %v205_v9 = vpop.permute.xlu0 %204  ;;  %480 = vrot.lane.b32.xlu0 %v466_v0, %s1454_s25  ;;  %v207_v10 = vpop.permute.xlu1 %206 }
  0x94   : > { %v219_v21 = vsel %vm218_vm0, %v205_v9, %v207_v10  ;;  %v220_v26 = vsel %vm218_vm0, %v207_v10, %v209_v62 }
  0x95   : > { %v493_v27 = vsel %vm491_vm2, %v1497_v2, %v219_v21  ;;  %v495_v36 = vsel %vm491_vm2, %v1499_v3, %v220_v26 }
  0x99   : > { %v1603_v15 = vpop.permute.xlu2 %288 }
  0x9b   : > { %v1601_v14 = vpop.permute.xlu0 %210 }
  0x9c   : > { %v221_v28 = vsel %vm218_vm0, %v209_v62, %v1601_v14 }
  0x9d   : > { %v497_v2 = vsel %vm491_vm2, %v1501_v4, %v221_v28 }
  0x9e   : > { %v244_v19 = vpop.permute.xlu1 %243 }
  0x9f   : > { %v258_v22 = vsel %vm257_vm1, %v244_v19, %v246_v63 }
  0xa0   : > { %v508_v33 = vsel %vm506_vm4, %v493_v27, %v258_v22 }
  0xa1   : > { %v321_v12 = vpop.permute.xlu2 %320 }
  0xa3   : > { %v248_v20 = vpop.permute.xlu0 %247 }
  0xa4   : > { %v259_v30 = vsel %vm257_vm1, %v246_v63, %v248_v20 }
  0xa5   : > { %v510_v43 = vsel %vm506_vm4, %v495_v36, %v259_v30 }
  0xa6   : > { %v1605_v11 = vpop.permute.xlu1 %249 }
  0xa7   : > { %v260_v31 = vsel %vm257_vm1, %v248_v20, %v1605_v11 }
  0xa8   : > { %v512_v40 = vsel %vm506_vm4, %v497_v2, %v260_v31  ;;  %v468_v2 = vld.sshfl [vmem:[#allocation1 + $0x38] sm:$0xff pattern:$0x73625140] }
  0xa9   : > { %v323_v44 = vpop.permute.xlu2 %322 }
  0xaa   : > { %v332_v54 = vsel %vm330_vm8, %v321_v12, %v323_v44 }
  0xab   : > { %v285_v29 = vpop.permute.xlu0 %284 }
  0xac   : > { %v297_v32 = vsel %vm296_vm3, %v283_v1, %v285_v29 }
  0xad   : > { %v523_v34 = vsel %vm521_vm5, %v508_v33, %v297_v32 }
  0xae   : > { %v287_v37 = vpop.permute.xlu1 %286  ;;  %751 = vrot.lane.b32.xlu0 %v523_v34, %s1455_s26 }
  0xaf   : > { %v299_v38 = vsel %vm296_vm3, %v287_v37, %v1603_v15  ;;  %v298_v39 = vsel %vm296_vm3, %v285_v29, %v287_v37 }
  0xb0   : > { %v527_v45 = vsel %vm521_vm5, %v512_v40, %v299_v38  ;;  %v525_v3 = vsel %vm521_vm5, %v510_v43, %v298_v39 }
  0xb1   : > { %755 = vrot.lane.b32.xlu2 %v527_v45, %s1455_s26  ;;  %753 = vrot.lane.b32.xlu1 %v525_v3, %s1455_s26  ;;  %v359_v47 = vpop.permute.xlu2 %358 }
  0xb6   : > { %v319_v4 = vpop.permute.xlu1 %318 }
  0xb7   : > { %v331_v0 = vsel %vm330_vm8, %v319_v4, %v321_v12 }
  0xb9   : > { %v398_v52 = vpop.permute.xlu2 %397 }
  0xba   : > { %v355_v46 = vpop.permute.xlu0 %354 }
  0xbb   : > { %v538_v57 = vsel %vm491_vm2, %v319_v4, %v355_v46 }
  0xbe   : > { %v357_v50 = vpop.permute.xlu1 %356 }
  0xbf   : > { %v369_v58 = vsel %vm368_vm6, %v355_v46, %v357_v50  ;;  %v370_v59 = vsel %vm368_vm6, %v357_v50, %v359_v47 }
  0xc0   : > { %v541_v9 = vsel %vm491_vm2, %v331_v0, %v369_v58  ;;  %v544_v10 = vsel %vm491_vm2, %v332_v54, %v370_v59 }
  0xc1   : > { %v437_v19 = vpop.permute.xlu2 %436 }
  0xc3   : > { %v394_v51 = vpop.permute.xlu0 %393 }
  0xc4   : > { %v558_v60 = vsel %vm506_vm4, %v538_v57, %v394_v51 }
  0xc6   : > { %v396_v53 = vpop.permute.xlu1 %395 }
  0xc7   : > { %v408_v61 = vsel %vm407_vm7, %v394_v51, %v396_v53  ;;  %v409_v62 = vsel %vm407_vm7, %v396_v53, %v398_v52 }
  0xc8   : > { %v562_v26 = vsel %vm506_vm4, %v544_v10, %v409_v62  ;;  %v560_v27 = vsel %vm506_vm4, %v541_v9, %v408_v61 }
  0xc9   : > { %v325_v36 = vpop.permute.xlu2 %324 }
  0xca   : > { %v333_v38 = vsel %vm330_vm8, %v323_v44, %v325_v36 }
  0xcc   : > { %v433_v63 = vpop.permute.xlu0 %432 }
  0xcd   : > { %v572_v1 = vsel %vm521_vm5, %v558_v60, %v433_v63 }
  0xce   : > { %765 = vrot.lane.b32.xlu0 %v572_v1, %s1455_s26  ;;  %v435_v20 = vpop.permute.xlu1 %434 }
  0xcf   : > { %v447_v21 = vsel %vm446_vm9, %v433_v63, %v435_v20  ;;  %v448_v22 = vsel %vm446_vm9, %v435_v20, %v437_v19 }
  0xd0   : > { %v576_v12 = vsel %vm521_vm5, %v562_v26, %v448_v22  ;;  %v574_v28 = vsel %vm521_vm5, %v560_v27, %v447_v21 }
  0xd1   : > { %769 = vrot.lane.b32.xlu2 %v576_v12, %s1455_s26  ;;  %767 = vrot.lane.b32.xlu1 %v574_v28, %s1455_s26 }
  0xd5   : > { %v471_v29 = vpop.permute.xlu0 %470 }
  0xd6   : > { %779 = vrot.lane.b32.xlu0 %v471_v29, %s1455_s26  ;;  %v475_v30 = vpop.permute.xlu1 %474 }
  0xdd   : > { %v473_v31 = vpop.permute.xlu0 %472 }
  0xde   : > { %253 = vrot.lane.b32.xlu0 %v1527_v17, %s1448_s19  ;;  %v486_v32 = vsel %vm484_vm10, %v473_v31, %v475_v30  ;;  %v485_v33 = vsel %vm484_vm10, %v471_v29, %v473_v31  ;;  %v479_v34 = vpop.permute.xlu1 %478 }
  0xdf   : > { %783 = vrot.lane.b32.xlu2 %v486_v32, %s1455_s26  ;;  %781 = vrot.lane.b32.xlu1 %v485_v33, %s1455_s26 }
  0xe5   : > { %v477_v39 = vpop.permute.xlu0 %476 }
  0xe6   : > { %328 = vrot.lane.b32.xlu0 %v1550_v35, %s1450_s21  ;;  %v361_v37 = vpop.permute.xlu1 %360 }
  0xe7   : > { %251 = vrot.lane.b32.xlu2 %v1525_v16, %s1448_s19  ;;  %482 = vrot.lane.b32.xlu1 %v468_v2, %s1454_s25  ;;  %v371_v17 = vsel %vm368_vm6, %v359_v47, %v361_v37  ;;  %v1679_v16 = vpop.permute.xlu2 %362  ;;  %v488_v47 = vsel %vm484_vm10, %v477_v39, %v479_v34  ;;  %s1417_s25 = smul.u32 384, %s2205_s13 }
  0xe8   : > { %v547_v40 = vsel %vm491_vm2, %v333_v38, %v371_v17 }
  0xe9   : > { %s2001_s28 = scalar_lea.vmem %s2203_s3, %s1417_s25 }
  0xed   : > { %v1675_v35 = vpop.permute.xlu0 %326 }
  0xee   : > { %403 = vrot.lane.b32.xlu0 %v1567_v48, %s1452_s23 }
  0xef   : > { %292 = vrot.lane.b32.xlu2 %v1539_v24, %s1449_s20  ;;  %290 = vrot.lane.b32.xlu1 %v1536_v23, %s1449_s20  ;;  %v439_v23 = vpop.permute.xlu2 %438 }
  0xf0   : > { %v449_v43 = vsel %vm446_vm9, %v437_v19, %v439_v23 }
  0xf5   : > { %v400_v48 = vpop.permute.xlu0 %399 }
  0xf6   : > { %444 = vrot.lane.b32.xlu0 %v1578_v56, %s1453_s24  ;;  %v410_v24 = vsel %vm407_vm7, %v398_v52, %v400_v48 }
  0xf7   : > { %366 = vrot.lane.b32.xlu2 %v1559_v42, %s1451_s22  ;;  %364 = vrot.lane.b32.xlu1 %v1557_v41, %s1451_s22  ;;  %v564_v56 = vsel %vm506_vm4, %v547_v40, %v410_v24  ;;  %v372_v42 = vsel %vm368_vm6, %v361_v37, %v1679_v16  ;;  %v334_v41 = vsel %vm330_vm8, %v325_v36, %v1675_v35 }
  0xf8   : > { %v578_v44 = vsel %vm521_vm5, %v564_v56, %v449_v43 }
  0xfd   : > { %v1705_v45 = vpop.permute.xlu0 %440 }
  0xfe   : > { %294 = vrot.lane.b32.xlu0 %v1541_v25, %s1449_s20  ;;  %v1698_v25 = vpop.permute.xlu1 %401  ;;  %v450_v3 = vsel %vm446_vm9, %v439_v23, %v1705_v45 }
  0xff   : > { %442 = vrot.lane.b32.xlu2 %v1576_v55, %s1453_s24  ;;  %405 = vrot.lane.b32.xlu1 %v1569_v49, %s1452_s23  ;;  %v550_v55 = vsel %vm491_vm2, %v334_v41, %v372_v42  ;;  %v411_v49 = vsel %vm407_vm7, %v400_v48, %v1698_v25 }
 0x100   : > { %v566_v4 = vsel %vm506_vm4, %v550_v55, %v411_v49 }
 0x101   : > { %v580_v46 = vsel %vm521_vm5, %v566_v4, %v450_v3 }
 0x105   : > { %v481_v50 = vpop.permute.xlu0 %480 }
 0x106   : > { %771 = vrot.lane.b32.xlu0 %v578_v44, %s1455_s26  ;;  %v489_v51 = vsel %vm484_vm10, %v479_v34, %v481_v50  ;;  %v213_v54 = vpop.permute.xlu1 %212 }
 0x107   : > { %255 = vrot.lane.b32.xlu2 %v1529_v18, %s1448_s19  ;;  %216 = vrot.lane.b32.xlu1 %v1519_v13, %s1447_s18  ;;  %v487_v18 = vsel %vm484_vm10, %v475_v30, %v477_v39  ;;  %v1722_v13 = vpop.permute.xlu2 %214  ;;  %v222_v33 = vsel %vm218_vm0, %v1601_v14, %v213_v54 }
 0x108   : > { %v223_v34 = vsel %vm218_vm0, %v213_v54, %v1722_v13  ;;  %v499_v37 = vsel %vm491_vm2, %v1503_v5, %v222_v33  ;;  %v604_v33 = vld [vmem:[%s2202_s2 + $0x18] sm:$0xff] }
 0x109   : > { %v501_v38 = vsel %vm491_vm2, %v1505_v6, %v223_v34  ;;  %v1868_v34 = vld [vmem:[%s2201_s1 + $0x30] sm:$0xff] }
 0x10f   : > { %773 = vrot.lane.b32.xlu1 %v580_v46, %s1455_s26  ;;  %787 = vrot.lane.b32.xlu2 %v488_v47, %s1455_s26  ;;  %v1724_v52 = vpop.permute.xlu2 %755 }
 0x117   : > { %785 = vrot.lane.b32.xlu1 %v487_v18, %s1455_s26  ;;  %789 = vrot.lane.b32.xlu2 %v489_v51, %s1455_s26 }
 0x120   : > { %v752_v57 = vpop.permute.xlu0 %751 }
 0x123   : > { %v754_v59 = vpop.permute.xlu1 %753 }
 0x124   : > { %v794_v31 = vsel %vm793_vm11, %v752_v57, %v754_v59  ;;  %v795_v32 = vsel %vm793_vm11, %v754_v59, %v1724_v52 }
 0x12b   : > { %v1726_v53 = vpop.permute.xlu2 %769 }
 0x139   : > { %v1728_v58 = vpop.permute.xlu2 %783 }
 0x140   : > { %v766_v60 = vpop.permute.xlu0 %765 }
 0x141   : > { %v252_v61 = vpop.permute.xlu2 %251 }
 0x142   : > { %v261_v36 = vsel %vm257_vm1, %v1605_v11, %v252_v61 }
 0x143   : > { %v768_v62 = vpop.permute.xlu1 %767  ;;  %v514_v48 = vsel %vm506_vm4, %v499_v37, %v261_v36  ;;  %v609_v36 = vld [vmem:[%s2202_s2 + $0x40] sm:$0xff]  ;;  %v602_v37 = vld [vmem:[%s2202_s2 + $0x8] sm:$0xff] }
 0x144   : > { %v800_v26 = vsel %vm793_vm11, %v766_v60, %v768_v62  ;;  %v801_v27 = vsel %vm793_vm11, %v768_v62, %v1726_v53 }
 0x148   : > { %v780_v63 = vpop.permute.xlu0 %779 }
 0x149   : > { %v1730_v0 = vpop.permute.xlu2 %292 }
 0x150   : > { %v1732_v1 = vpop.permute.xlu0 %253 }
 0x151   : > { %v367_v9 = vpop.permute.xlu2 %366  ;;  %v782_v10 = vpop.permute.xlu1 %781  ;;  %v262_v2 = vsel %vm257_vm1, %v252_v61, %v1732_v1 }
 0x152   : > { %v806_v19 = vsel %vm793_vm11, %v780_v63, %v782_v10  ;;  %v807_v20 = vsel %vm793_vm11, %v782_v10, %v1728_v58  ;;  %v516_v11 = vsel %vm506_vm4, %v501_v38, %v262_v2  ;;  %v603_v2 = vld [vmem:[%s2202_s2 + $0x10] sm:$0xff]  ;;  %v608_v38 = vld [vmem:[%s2202_s2 + $0x38] sm:$0xff] }
 0x153   : > { %v850_v21 = vsel %vm491_vm2, %v806_v19, 0  ;;  %v853_v22 = vsel %vm491_vm2, %v807_v20, 0 }
 0x154   : > { %872 = vmatpush.bf16.msra.mxu0 %v850_v21  ;;  %1411 = vmatpush.bf16.msra.mxu2 %v850_v21 }
 0x155   : > { %921 = vmatpush.bf16.msra.mxu1 %v853_v22  ;;  %1414 = vmatpush.bf16.msra.mxu3 %v853_v22  ;;  %v601_v22 = vld [vmem:[%s2202_s2] sm:$0xff] }
 0x158   : > { %873 = vmatpush.bf16.msra.mxu0 %v800_v26  ;;  %1412 = vmatpush.bf16.msra.mxu2 %v800_v26  ;;  %v329_v30 = vpop.permute.xlu0 %328 }
 0x159   : > { %922 = vmatpush.bf16.msra.mxu1 %v801_v27  ;;  %1415 = vmatpush.bf16.msra.mxu3 %v801_v27  ;;  %v443_v12 = vpop.permute.xlu2 %442  ;;  %v483_v28 = vpop.permute.xlu1 %482 }
 0x15a   : > { %v490_v29 = vsel %vm484_vm10, %v481_v50, %v483_v28  ;;  %v451_v44 = vsel %vm446_vm9, %v1705_v45, %v443_v12 }
 0x15b   : > { %791 = vrot.lane.b32.xlu0 %v490_v29, %s1455_s26 }
 0x15c   : > { %874 = vmatpush.bf16.msra.mxu0 %v794_v31  ;;  %1413 = vmatpush.bf16.msra.mxu2 %v794_v31 }
 0x15d   : > { %923 = vmatpush.bf16.msra.mxu1 %v795_v32  ;;  %1416 = vmatpush.bf16.msra.mxu3 %v795_v32 }
 0x160   : > { %v404_v5 = vpop.permute.xlu0 %403 }
 0x161   : > { %v256_v17 = vpop.permute.xlu2 %255  ;;  %v291_v39 = vpop.permute.xlu1 %290  ;;  %v412_v41 = vsel %vm407_vm7, %v1698_v25, %v404_v5  ;;  %v1790_v25 = vld [vmem:[%s2201_s1] sm:$0xff] }
 0x162   : > { %v300_v14 = vsel %vm296_vm3, %v1603_v15, %v291_v39  ;;  %v301_v40 = vsel %vm296_vm3, %v291_v39, %v1730_v0  ;;  %v335_v15 = vsel %vm330_vm8, %v1675_v35, %v329_v30  ;;  %1352 = vmatmul.msk.bf16.vlgmr.msra.gmra.mxu0 %vm824_vm12, %v1790_v25  ;;  %1360 = vmatmul.msk.bf16.vlgmr.msra.gmra.mxu1 %vm824_vm12, %v1790_v25  ;;  %v1901_v39 = vld [vmem:[%s2201_s1 + $0x38] sm:$0xff] }
 0x163   : > { %v529_v24 = vsel %vm521_vm5, %v514_v48, %v300_v14  ;;  %v531_v23 = vsel %vm521_vm5, %v516_v11, %v301_v40  ;;  %v263_v63 = vsel %vm257_vm1, %v1732_v1, %v256_v17  ;;  %v1456_v1 = vmov 0   ;;  %v612_v14 = vld [vmem:[%s2202_s2 + $0x58] sm:$0xff]  ;;  %v611_v40 = vld [vmem:[%s2202_s2 + $0x50] sm:$0xff] }
 0x164   : > { %757 = vrot.lane.b32.xlu1 %v529_v24, %s1455_s26  ;;  %759 = vrot.lane.b32.xlu2 %v531_v23, %s1455_s26  ;;  %v607_v48 = vld [vmem:[%s2202_s2 + $0x30] sm:$0xff]  ;;  %v1919_v11 = vld [vmem:[%s2201_s1 + $0x18] sm:$0xff] }
 0x165   : > { %1436 = vset.pattern.permute.xlu1 %v1456_v1  ;;  %1438 = vset.pattern.permute.xlu0 %v1456_v1  ;;  %v610_v24 = vld [vmem:[%s2202_s2 + $0x48] sm:$0xff] }
 0x166   : > { %1437 = vset.pattern.permute.xlu2 %v1456_v1  ;;  %v614_v23 = vld [vmem:[%s2202_s2 + $0x68] sm:$0xff] }
 0x168   : > { %v445_v3 = vpop.permute.xlu0 %444 }
 0x169   : > { %v365_v6 = vpop.permute.xlu1 %364  ;;  %v788_v56 = vpop.permute.xlu2 %787  ;;  %v452_v45 = vsel %vm446_vm9, %v443_v12, %v445_v3 }
 0x16a   : > { %v373_v42 = vsel %vm368_vm6, %v1679_v16, %v365_v6  ;;  %v374_v35 = vsel %vm368_vm6, %v365_v6, %v367_v9  ;;  %v1785_v16 = vld [vmem:[%s2201_s1 + $0x20] sm:$0xff] }
 0x16b   : > { %v553_v43 = vsel %vm491_vm2, %v335_v15, %v373_v42  ;;  %v556_v47 = vsel %vm491_vm2, %v329_v30, %v374_v35  ;;  %1356 = vmatmul.msk.bf16.vlgmr.msra.gmra.mxu2 %vm824_vm12, %v1785_v16  ;;  %1364 = vmatmul.msk.bf16.vlgmr.msra.gmra.mxu3 %vm824_vm12, %v1785_v16  ;;  %v615_v15 = vld [vmem:[%s2202_s2 + $0x70] sm:$0xff] }
 0x16c   : > { %v568_v55 = vsel %vm506_vm4, %v553_v43, %v412_v41 }
 0x16d   : > { %v582_v49 = vsel %vm521_vm5, %v568_v55, %v451_v44  ;;  %v613_v55 = vld [vmem:[%s2202_s2 + $0x60] sm:$0xff] }
 0x16e   : > { %775 = vrot.lane.b32.xlu0 %v582_v49, %s1455_s26 }
 0x170   : > { %v295_v59 = vpop.permute.xlu0 %294 }
 0x171   : > { %v406_v4 = vpop.permute.xlu1 %405  ;;  %v1793_v46 = vpop.permute.xlu2 %789  ;;  %v302_v19 = vsel %vm296_vm3, %v1730_v0, %v295_v59 }
 0x172   : > { %v413_v50 = vsel %vm407_vm7, %v404_v5, %v406_v4  ;;  %v810_v51 = vsel %vm793_vm11, %v788_v56, %v1793_v46  ;;  %v616_v4 = vld [vmem:[%s2202_s2 + $0x78] sm:$0xff] }
 0x173   : > { %v570_v18 = vsel %vm506_vm4, %v556_v47, %v413_v50  ;;  %v862_v54 = vsel %vm491_vm2, %v810_v51, 0 }
 0x174   : > { %v584_v57 = vsel %vm521_vm5, %v570_v18, %v452_v45  ;;  %1068 = vmatpush.bf16.msrb.mxu0 %v862_v54 }
 0x175   : > { %777 = vrot.lane.b32.xlu1 %v584_v57, %s1455_s26 }
 0x178   : > { %v772_v30 = vpop.permute.xlu0 %771 }
 0x179   : > { %v217_v60 = vpop.permute.xlu1 %216  ;;  %v802_v31 = vsel %vm793_vm11, %v1726_v53, %v772_v30  ;;  %v1877_v53 = vld [vmem:[%s2201_s1 + $0x10] sm:$0xff] }
 0x17a   : > { %v224_v61 = vsel %vm218_vm0, %v1722_v13, %v217_v60  ;;  %v505_v62 = vsel %vm491_vm2, %v1509_v8, %v217_v60  ;;  %v1830_v8 = vld [vmem:[%s2201_s1 + $0x28] sm:$0xff] }
 0x17b   : > { %v503_v9 = vsel %vm491_vm2, %v1507_v7, %v224_v61  ;;  %v520_v10 = vsel %vm506_vm4, %v505_v62, %v256_v17  ;;  %v1835_v7 = vld [vmem:[%s2201_s1 + $0x8] sm:$0xff]  ;;  %1357 = vmatmul.msk.bf16.gmra.mxu2 %vm824_vm12, %v1830_v8  ;;  %1365 = vmatmul.msk.bf16.gmra.mxu3 %vm824_vm12, %v1830_v8  ;;  %v605_v17 = vld [vmem:[%s2202_s2 + $0x20] sm:$0xff] }
 0x17c   : > { %v535_v20 = vsel %vm521_vm5, %v520_v10, %v295_v59  ;;  %v518_v21 = vsel %vm506_vm4, %v503_v9, %v263_v63  ;;  %1353 = vmatmul.msk.bf16.gmra.mxu0 %vm824_vm12, %v1835_v7  ;;  %1361 = vmatmul.msk.bf16.gmra.mxu1 %vm824_vm12, %v1835_v7 }
 0x17d   : > { %763 = vrot.lane.b32.xlu0 %v535_v20, %s1455_s26  ;;  %v533_v13 = vsel %vm521_vm5, %v518_v21, %v302_v19  ;;  %619 = vperm.xlu1 %1436, %v601_v22  }
 0x17e   : > { %761 = vrot.lane.b32.xlu2 %v533_v13, %s1455_s26 }
 0x181   : > { %v1837_v0 = vpop.permute.xlu1 %773 }
 0x182   : > { %v803_v32 = vsel %vm793_vm11, %v772_v30, %v1837_v0 }
 0x185   : > { %634 = vperm.xlu1 %1436, %v604_v33   ;;  %629 = vperm.xlu0 %1438, %v603_v2  }
 0x186   : > { %624 = vperm.xlu2 %1437, %v602_v37  }
 0x189   : > { %v786_v26 = vpop.permute.xlu1 %785 }
 0x18a   : > { %v808_v27 = vsel %vm793_vm11, %v1728_v58, %v786_v26  ;;  %v809_v12 = vsel %vm793_vm11, %v786_v26, %v788_v56  ;;  %v606_v58 = vld [vmem:[%s2202_s2 + $0x28] sm:$0xff] }
 0x18b   : > { %v856_v28 = vsel %vm491_vm2, %v808_v27, 0  ;;  %v859_v29 = vsel %vm491_vm2, %v809_v12, 0  ;;  %1358 = vmatmul.msk.bf16.gmra.mxu2 %vm824_vm12, %v1868_v34  ;;  %1366 = vmatmul.msk.bf16.gmra.mxu3 %vm824_vm12, %v1868_v34 }
 0x18c   : > { %970 = vmatpush.bf16.msrb.mxu2 %v856_v28  ;;  %1019 = vmatpush.bf16.msrb.mxu3 %v859_v29 }
 0x18d   : > { %644 = vperm.xlu1 %1436, %v606_v58   ;;  %1354 = vmatmul.msk.bf16.gmra.mxu0 %vm824_vm12, %v1877_v53 }
 0x18e   : > { %1362 = vmatmul.msk.bf16.gmra.mxu1 %vm824_vm12, %v1877_v53  ;;  %654 = vperm.xlu0 %1438, %v608_v38  }
 0x18f   : > { %639 = vperm.xlu2 %1437, %v605_v17  }
 0x190   : > { %971 = vmatpush.bf16.msrb.mxu2 %v802_v31  ;;  %1020 = vmatpush.bf16.msrb.mxu3 %v803_v32 }
 0x195   : > { %659 = vperm.xlu1 %1436, %v609_v36  }
 0x196   : > { %669 = vperm.xlu0 %1438, %v611_v40  }
 0x197   : > { %649 = vperm.xlu2 %1437, %v607_v48  }
 0x19b   : > { %1359 = vmatmul.msk.bf16.gmra.mxu2 %vm824_vm12, %v1901_v39  ;;  %1367 = vmatmul.msk.bf16.gmra.mxu3 %vm824_vm12, %v1901_v39 }
 0x19d   : > { %674 = vperm.xlu1 %1436, %v612_v14   ;;  %1355 = vmatmul.msk.bf16.gmra.mxu0 %vm824_vm12, %v1919_v11 }
 0x19e   : > { %1363 = vmatmul.msk.bf16.gmra.mxu1 %vm824_vm12, %v1919_v11  ;;  %684 = vperm.xlu0 %1438, %v614_v23  }
 0x19f   : > { %664 = vperm.xlu2 %1437, %v610_v24  }
 0x1a5   : > { %689 = vperm.xlu1 %1436, %v615_v15  }
 0x1a7   : > { %679 = vperm.xlu2 %1437, %v613_v55  }
 0x1af   : > { %694 = vperm.xlu2 %1437, %v616_v4  }
 0x1be   : > { %v760_v42 = vpop.permute.xlu2 %759 }
 0x1cd   : > { %v792_v5 = vpop.permute.xlu0 %791 }
 0x1ce   : > { %v811_v6 = vsel %vm793_vm11, %v1793_v46, %v792_v5 }
 0x1cf   : > { %v865_v56 = vsel %vm491_vm2, %v811_v6, 0 }
 0x1d0   : > { %1117 = vmatpush.bf16.msrb.mxu1 %v865_v56 }
 0x1d6   : > { %v758_v41 = vpop.permute.xlu1 %757 }
 0x1d7   : > { %v796_v43 = vsel %vm793_vm11, %v1724_v52, %v758_v41  ;;  %v797_v44 = vsel %vm793_vm11, %v758_v41, %v760_v42 }
 0x1d8   : > { %972 = vmatpush.bf16.msrb.mxu2 %v796_v43  ;;  %1021 = vmatpush.bf16.msrb.mxu3 %v797_v44  ;;  %v762_v52 = vpop.permute.xlu2 %761 }
 0x1d9   : > { %v798_v35 = vsel %vm793_vm11, %v760_v42, %v762_v52 }
 0x1db   : > { %1368 = vmatmul.msk.bf16.vlgmr.msrb.gmra.mxu2 %vm824_vm12, %v1790_v25  ;;  %1376 = vmatmul.msk.bf16.vlgmr.msrb.gmra.mxu3 %vm824_vm12, %v1790_v25 }
 0x1df   : > { %v925_v63 = vpop.f32.mrf.mxu1 }
 0x1e0   : > { %v776_v49 = vpop.permute.xlu0 %775  ;;  %v1971_v18 = vpop.permute.xlu2 %624 }
 0x1e1   : > { %v804_v3 = vsel %vm793_vm11, %v1837_v0, %v776_v49 }
 0x1e2   : > { %1069 = vmatpush.bf16.msrb.mxu0 %v804_v3 }
 0x1e6   : > { %1070 = vmatpush.bf16.msrb.mxu0 %v798_v35 }
 0x1e7   : > { %v778_v45 = vpop.permute.xlu1 %777  ;;  %v927_v13 = vpop.f32.mrf.mxu1 }
 0x1e8   : > { %v805_v46 = vsel %vm793_vm11, %v776_v49, %v778_v45  ;;  %v928_v22 = vadd.f32 %v927_v13, %v1971_v18 }
 0x1e9   : > { %1118 = vmatpush.bf16.msrb.mxu1 %v805_v46  ;;  %1384 = vmatmul.msk.bf16.vlgmr.msrb.gmra.mxu0 %vm824_vm12, %v1790_v25  ;;  %v1977_v60 = vpop.permute.xlu2 %639 }
 0x1eb   : > { %1369 = vmatmul.msk.bf16.gmra.mxu2 %vm824_vm12, %v1835_v7  ;;  %1377 = vmatmul.msk.bf16.gmra.mxu3 %vm824_vm12, %v1835_v7 }
 0x1ee   : > { %v896_v54 = vpop.f32.mrf.mxu2  ;;  %v945_v57 = vpop.f32.mrf.mxu3 }
 0x1ef   : > { %v764_v47 = vpop.permute.xlu0 %763  ;;  %v1965_v51 = vpop.permute.xlu1 %619 }
 0x1f0   : > { %v799_v50 = vsel %vm793_vm11, %v762_v52, %v764_v47  ;;  %v926_v0 = vadd.f32 %v925_v63, %v1965_v51 }
 0x1f1   : > { %1119 = vmatpush.bf16.msrb.mxu1 %v799_v50  ;;  %v1987_v19 = vpop.permute.xlu2 %649 }
 0x1f4   : > { %1392 = vmatmul.msk.bf16.vlgmr.msrb.gmra.mxu1 %vm824_vm12, %v1790_v25  ;;  %v876_v25 = vpop.f32.mrf.mxu0 }
 0x1f6   : > { %v898_v61 = vpop.f32.mrf.mxu2  ;;  %v947_v62 = vpop.f32.mrf.mxu3 }
 0x1f7   : > { %v1973_v59 = vpop.permute.xlu1 %634  ;;  %v1996_v27 = vpop.permute.xlu0 %629 }
 0x1f9   : > { %1385 = vmatmul.msk.bf16.gmra.mxu0 %vm824_vm12, %v1835_v7  ;;  %v2007_v32 = vpop.permute.xlu2 %664  ;;  %v930_v37 = vpop.f32.mrf.mxu1 }
 0x1fa   : > { %v899_v58 = vadd.f32 %v898_v61, %v2007_v32  ;;  %v948_v36 = vadd.f32 %v947_v62, %v2007_v32  ;;  %v931_v56 = vadd.f32 %v930_v37, %v1996_v27 }
 0x1fb   : > { %1370 = vmatmul.msk.bf16.gmra.mxu2 %vm824_vm12, %v1877_v53  ;;  %1378 = vmatmul.msk.bf16.gmra.mxu3 %vm824_vm12, %v1877_v53 }
 0x1fc   : > { %v878_v10 = vpop.f32.mrf.mxu0  ;;  %v1188_v2 = vpack.c.bf16 %v948_v36, %v899_v58 }
 0x1fd   : > { %v879_v1 = vadd.f32 %v878_v10, %v1971_v18 }
 0x1fe   : > { %v901_v20 = vpop.f32.mrf.mxu2  ;;  %v950_v21 = vpop.f32.mrf.mxu3  ;;  %1236 = vst [vmem:[%s2001_s28 + $0xd8] sm:$0xff] %v1188_v2 }
 0x1ff   : > { %v1985_v9 = vpop.permute.xlu1 %644  ;;  %v1164_v31 = vpack.c.bf16 %v928_v22, %v879_v1 }
 0x200   : > { %v2021_v17 = vpop.permute.xlu0 %654 }
 0x201   : > { %1212 = vst [vmem:[%s2001_s28 + $0x18] sm:$0xff] %v1164_v31  ;;  %v932_v40 = vpop.f32.mrf.mxu1  ;;  %v2054_v10 = vpop.permute.xlu2 %679 }
 0x202   : > { %v933_v5 = vadd.f32 %v932_v40, %v1973_v59 }
 0x204   : > { %1393 = vmatmul.msk.bf16.gmra.mxu1 %vm824_vm12, %v1835_v7  ;;  %v877_v7 = vadd.f32 %v876_v25, %v1965_v51  ;;  %v881_v12 = vpop.f32.mrf.mxu0 }
 0x205   : > { %v882_v6 = vadd.f32 %v881_v12, %v1996_v27 }
 0x206   : > { %v1161_v30 = vpack.c.bf16 %v926_v0, %v877_v7  ;;  %v952_v38 = vpop.f32.mrf.mxu3 }
 0x207   : > { %v1994_v26 = vpop.permute.xlu1 %659  ;;  %v1167_v52 = vpack.c.bf16 %v931_v56, %v882_v6 }
 0x208   : > { %v897_v28 = vadd.f32 %v896_v54, %v1994_v26  ;;  %v946_v29 = vadd.f32 %v945_v57, %v1994_v26  ;;  %1209 = vst [vmem:[%s2001_s28] sm:$0xff] %v1161_v30  ;;  %v2029_v15 = vpop.permute.xlu0 %669 }
 0x209   : > { %1386 = vmatmul.msk.bf16.gmra.mxu0 %vm824_vm12, %v1877_v53  ;;  %v902_v44 = vadd.f32 %v901_v20, %v2029_v15  ;;  %v951_v55 = vadd.f32 %v950_v21, %v2029_v15  ;;  %1215 = vst [vmem:[%s2001_s28 + $0x30] sm:$0xff] %v1167_v52 }
 0x20a   : > { %v1185_v33 = vpack.c.bf16 %v946_v29, %v897_v28 }
 0x20b   : > { %1371 = vmatmul.msk.bf16.gmra.mxu2 %vm824_vm12, %v1919_v11  ;;  %1379 = vmatmul.msk.bf16.gmra.mxu3 %vm824_vm12, %v1919_v11  ;;  %v1191_v45 = vpack.c.bf16 %v951_v55, %v902_v44  ;;  %v935_v4 = vpop.f32.mrf.mxu1 }
 0x20c   : > { %1233 = vst [vmem:[%s2001_s28 + $0xc0] sm:$0xff] %v1185_v33  ;;  %v883_v14 = vpop.f32.mrf.mxu0  ;;  %v936_v46 = vadd.f32 %v935_v4, %v1977_v60 }
 0x20d   : > { %v884_v23 = vadd.f32 %v883_v14, %v1973_v59  ;;  %1239 = vst [vmem:[%s2001_s28 + $0xf0] sm:$0xff] %v1191_v45 }
 0x20e   : > { %v955_v49 = vpop.f32.mrf.mxu3 }
 0x20f   : > { %v2023_v48 = vpop.permute.xlu1 %674  ;;  %v1170_v3 = vpack.c.bf16 %v933_v5, %v884_v23  ;;  %v956_v7 = vadd.f32 %v955_v49, %v2054_v10  ;;  %v2080_v23 = vpop.permute.xlu2 %694 }
 0x210   : > { %v953_v43 = vadd.f32 %v952_v38, %v2023_v48  ;;  %v2051_v62 = vpop.permute.xlu0 %684 }
 0x211   : > { %1218 = vst [vmem:[%s2001_s28 + $0x48] sm:$0xff] %v1170_v3 }
 0x213   : > { %v937_v61 = vpop.f32.mrf.mxu1 }
 0x214   : > { %1394 = vmatmul.msk.bf16.gmra.mxu1 %vm824_vm12, %v1877_v53  ;;  %v903_v53 = vpop.f32.mrf.mxu2  ;;  %v886_v42 = vpop.f32.mrf.mxu0  ;;  %v938_v63 = vadd.f32 %v937_v61, %v1985_v9 }
 0x215   : > { %v904_v41 = vadd.f32 %v903_v53, %v2023_v48 }
 0x216   : > { %v957_v57 = vpop.f32.mrf.mxu3 }
 0x217   : > { %v1194_v35 = vpack.c.bf16 %v953_v43, %v904_v41  ;;  %v958_v21 = vadd.f32 %v957_v57, %v2051_v62  ;;  %v2075_v37 = vpop.permute.xlu1 %689 }
 0x219   : > { %1387 = vmatmul.msk.bf16.gmra.mxu0 %vm824_vm12, %v1919_v11  ;;  %1242 = vst [vmem:[%s2001_s28 + $0x108] sm:$0xff] %v1194_v35 }
 0x21b   : > { %1372 = vmatmul.msk.bf16.gmra.mxu2 %vm824_vm12, %v1785_v16  ;;  %1380 = vmatmul.msk.bf16.gmra.mxu3 %vm824_vm12, %v1785_v16 }
 0x21c   : > { %v906_v24 = vpop.f32.mrf.mxu2  ;;  %v888_v47 = vpop.f32.mrf.mxu0 }
 0x21d   : > { %v889_v25 = vadd.f32 %v888_v47, %v1985_v9  ;;  %v907_v13 = vadd.f32 %v906_v24, %v2054_v10 }
 0x21e   : > { %v960_v30 = vpop.f32.mrf.mxu3 }
 0x21f   : > { %v1176_v0 = vpack.c.bf16 %v938_v63, %v889_v25  ;;  %v1197_v22 = vpack.c.bf16 %v956_v7, %v907_v13  ;;  %v961_v24 = vadd.f32 %v960_v30, %v2075_v37 }
 0x221   : > { %1224 = vst [vmem:[%s2001_s28 + $0x78] sm:$0xff] %v1176_v0 }
 0x222   : > { %1245 = vst [vmem:[%s2001_s28 + $0x120] sm:$0xff] %v1197_v22 }
 0x224   : > { %1395 = vmatmul.msk.bf16.gmra.mxu1 %vm824_vm12, %v1919_v11  ;;  %v887_v11 = vadd.f32 %v886_v42, %v1977_v60  ;;  %v908_v50 = vpop.f32.mrf.mxu2  ;;  %v891_v12 = vpop.f32.mrf.mxu0 }
 0x225   : > { %v909_v20 = vadd.f32 %v908_v50, %v2051_v62  ;;  %v892_v29 = vadd.f32 %v891_v12, %v1987_v19 }
 0x226   : > { %v1173_v54 = vpack.c.bf16 %v936_v46, %v887_v11  ;;  %v962_v38 = vpop.f32.mrf.mxu3 }
 0x227   : > { %v1200_v1 = vpack.c.bf16 %v958_v21, %v909_v20  ;;  %v963_v6 = vadd.f32 %v962_v38, %v2080_v23 }
 0x228   : > { %1221 = vst [vmem:[%s2001_s28 + $0x60] sm:$0xff] %v1173_v54 }
 0x229   : > { %1388 = vmatmul.msk.bf16.gmra.mxu0 %vm824_vm12, %v1785_v16  ;;  %1248 = vst [vmem:[%s2001_s28 + $0x138] sm:$0xff] %v1200_v1 }
 0x22b   : > { %1373 = vmatmul.msk.bf16.gmra.mxu2 %vm824_vm12, %v1830_v8  ;;  %1381 = vmatmul.msk.bf16.gmra.mxu3 %vm824_vm12, %v1830_v8 }
 0x22c   : > { %v911_v28 = vpop.f32.mrf.mxu2  ;;  %v893_v58 = vpop.f32.mrf.mxu0 }
 0x22d   : > { %v894_v36 = vadd.f32 %v893_v58, %v2021_v17  ;;  %v912_v40 = vadd.f32 %v911_v28, %v2075_v37 }
 0x22f   : > { %v1203_v42 = vpack.c.bf16 %v961_v24, %v912_v40 }
 0x231   : > { %1251 = vst [vmem:[%s2001_s28 + $0x150] sm:$0xff] %v1203_v42 }
 0x234   : > { %1396 = vmatmul.msk.bf16.gmra.mxu1 %vm824_vm12, %v1785_v16  ;;  %v940_v16 = vpop.f32.mrf.mxu1  ;;  %v913_v2 = vpop.f32.mrf.mxu2 }
 0x235   : > { %v941_v31 = vadd.f32 %v940_v16, %v1987_v19  ;;  %v914_v5 = vadd.f32 %v913_v2, %v2080_v23 }
 0x237   : > { %v1179_v33 = vpack.c.bf16 %v941_v31, %v892_v29  ;;  %v1206_v41 = vpack.c.bf16 %v963_v6, %v914_v5 }
 0x239   : > { %1389 = vmatmul.msk.bf16.gmra.mxu0 %vm824_vm12, %v1830_v8  ;;  %1227 = vst [vmem:[%s2001_s28 + $0x90] sm:$0xff] %v1179_v33 }
 0x23a   : > { %1254 = vst [vmem:[%s2001_s28 + $0x168] sm:$0xff] %v1206_v41 }
 0x23b   : > { %1374 = vmatmul.msk.bf16.gmra.mxu2 %vm824_vm12, %v1868_v34  ;;  %1382 = vmatmul.msk.bf16.gmra.mxu3 %vm824_vm12, %v1868_v34 }
 0x23c   : > { %v942_v53 = vpop.f32.mrf.mxu1 }
 0x23d   : > { %v943_v14 = vadd.f32 %v942_v53, %v2021_v17 }
 0x23f   : > { %v1182_v56 = vpack.c.bf16 %v943_v14, %v894_v36 }
 0x241   : > { %1230 = vst [vmem:[%s2001_s28 + $0xa8] sm:$0xff] %v1182_v56 }
 0x244   : > { %1397 = vmatmul.msk.bf16.gmra.mxu1 %vm824_vm12, %v1830_v8 }
 0x249   : > { %1390 = vmatmul.msk.bf16.gmra.mxu0 %vm824_vm12, %v1868_v34 }
 0x24b   : > { %1375 = vmatmul.msk.bf16.gmra.mxu2 %vm824_vm12, %v1901_v39  ;;  %1383 = vmatmul.msk.bf16.gmra.mxu3 %vm824_vm12, %v1901_v39 }
 0x254   : > { %1398 = vmatmul.msk.bf16.gmra.mxu1 %vm824_vm12, %v1868_v34 }
 0x259   : > { %1391 = vmatmul.msk.bf16.gmra.mxu0 %vm824_vm12, %v1901_v39 }
 0x25e   : > { %v974_v8 = vpop.f32.mrf.mxu2  ;;  %v1023_v43 = vpop.f32.mrf.mxu3 }
 0x25f   : > { %v975_v44 = vadd.f32 %v974_v8, %v1965_v51  ;;  %v1024_v55 = vadd.f32 %v1023_v43, %v1965_v51 }
 0x261   : > { %v1162_v49 = vpack.c.bf16 %v1024_v55, %v975_v44 }
 0x263   : > { %1210 = vst [vmem:[%s2001_s28 + $0x8] sm:$0xff] %v1162_v49 }
 0x264   : > { %1399 = vmatmul.msk.bf16.gmra.mxu1 %vm824_vm12, %v1901_v39 }
 0x266   : > { %v1072_v3 = vpop.f32.mrf.mxu0  ;;  %v976_v52 = vpop.f32.mrf.mxu2 }
 0x267   : > { %v977_v35 = vadd.f32 %v976_v52, %v1971_v18  ;;  %v1025_v34 = vpop.f32.mrf.mxu3  ;;  %v1073_v54 = vadd.f32 %v1072_v3, %v1965_v51 }
 0x268   : > { %v1026_v45 = vadd.f32 %v1025_v34, %v1971_v18 }
 0x26a   : > { %v1165_v11 = vpack.c.bf16 %v1026_v45, %v977_v35 }
 0x26c   : > { %1213 = vst [vmem:[%s2001_s28 + $0x20] sm:$0xff] %v1165_v11 }
 0x26e   : > { %v1074_v4 = vpop.f32.mrf.mxu0  ;;  %v979_v46 = vpop.f32.mrf.mxu2 }
 0x26f   : > { %v980_v47 = vadd.f32 %v979_v46, %v1996_v27  ;;  %v1028_v50 = vpop.f32.mrf.mxu3  ;;  %v1075_v22 = vadd.f32 %v1074_v4, %v1971_v18 }
 0x270   : > { %v1029_v39 = vadd.f32 %v1028_v50, %v1996_v27 }
 0x271   : > { %v1121_v57 = vpop.f32.mrf.mxu1 }
 0x272   : > { %v1122_v25 = vadd.f32 %v1121_v57, %v1965_v51  ;;  %v1168_v61 = vpack.c.bf16 %v1029_v39, %v980_v47 }
 0x274   : > { %v1163_v63 = vpack.c.bf16 %v1122_v25, %v1073_v54  ;;  %1216 = vst [vmem:[%s2001_s28 + $0x38] sm:$0xff] %v1168_v61 }
 0x276   : > { %1211 = vst [vmem:[%s2001_s28 + $0x10] sm:$0xff] %v1163_v63  ;;  %v1077_v20 = vpop.f32.mrf.mxu0  ;;  %v981_v21 = vpop.f32.mrf.mxu2 }
 0x277   : > { %v982_v13 = vadd.f32 %v981_v21, %v1973_v59  ;;  %v1030_v7 = vpop.f32.mrf.mxu3  ;;  %v1078_v33 = vadd.f32 %v1077_v20, %v1996_v27 }
 0x278   : > { %v1031_v0 = vadd.f32 %v1030_v7, %v1973_v59 }
 0x279   : > { %v1123_v1 = vpop.f32.mrf.mxu1 }
 0x27a   : > { %v1124_v12 = vadd.f32 %v1123_v1, %v1971_v18  ;;  %v1171_v51 = vpack.c.bf16 %v1031_v0, %v982_v13 }
 0x27c   : > { %v1166_v28 = vpack.c.bf16 %v1124_v12, %v1075_v22  ;;  %1219 = vst [vmem:[%s2001_s28 + $0x50] sm:$0xff] %v1171_v51 }
 0x27e   : > { %1214 = vst [vmem:[%s2001_s28 + $0x28] sm:$0xff] %v1166_v28  ;;  %v1079_v29 = vpop.f32.mrf.mxu0  ;;  %v984_v30 = vpop.f32.mrf.mxu2 }
 0x27f   : > { %v985_v16 = vadd.f32 %v984_v30, %v1977_v60  ;;  %v1033_v31 = vpop.f32.mrf.mxu3  ;;  %v1080_v56 = vadd.f32 %v1079_v29, %v1973_v59 }
 0x280   : > { %v1034_v58 = vadd.f32 %v1033_v31, %v1977_v60 }
 0x281   : > { %v1126_v36 = vpop.f32.mrf.mxu1 }
 0x282   : > { %v1127_v2 = vadd.f32 %v1126_v36, %v1996_v27  ;;  %v1174_v18 = vpack.c.bf16 %v1034_v58, %v985_v16 }
 0x284   : > { %v1169_v53 = vpack.c.bf16 %v1127_v2, %v1078_v33  ;;  %1222 = vst [vmem:[%s2001_s28 + $0x68] sm:$0xff] %v1174_v18 }
 0x286   : > { %1217 = vst [vmem:[%s2001_s28 + $0x40] sm:$0xff] %v1169_v53  ;;  %v1082_v38 = vpop.f32.mrf.mxu0  ;;  %v986_v14 = vpop.f32.mrf.mxu2 }
 0x287   : > { %v987_v40 = vadd.f32 %v986_v14, %v1985_v9  ;;  %v1035_v24 = vpop.f32.mrf.mxu3  ;;  %v1083_v49 = vadd.f32 %v1082_v38, %v1977_v60 }
 0x288   : > { %v1036_v5 = vadd.f32 %v1035_v24, %v1985_v9 }
 0x289   : > { %v1128_v6 = vpop.f32.mrf.mxu1 }
 0x28a   : > { %v1129_v42 = vadd.f32 %v1128_v6, %v1973_v59  ;;  %v1177_v27 = vpack.c.bf16 %v1036_v5, %v987_v40 }
 0x28c   : > { %v1172_v41 = vpack.c.bf16 %v1129_v42, %v1080_v56  ;;  %1225 = vst [vmem:[%s2001_s28 + $0x80] sm:$0xff] %v1177_v27 }
 0x28e   : > { %1220 = vst [vmem:[%s2001_s28 + $0x58] sm:$0xff] %v1172_v41  ;;  %v1084_v8 = vpop.f32.mrf.mxu0  ;;  %v989_v43 = vpop.f32.mrf.mxu2 }
 0x28f   : > { %v990_v44 = vadd.f32 %v989_v43, %v1987_v19  ;;  %v1038_v55 = vpop.f32.mrf.mxu3  ;;  %v1085_v54 = vadd.f32 %v1084_v8, %v1985_v9 }
 0x290   : > { %v1039_v3 = vadd.f32 %v1038_v55, %v1987_v19 }
 0x291   : > { %v1131_v52 = vpop.f32.mrf.mxu1 }
 0x292   : > { %v1132_v35 = vadd.f32 %v1131_v52, %v1977_v60  ;;  %v1180_v59 = vpack.c.bf16 %v1039_v3, %v990_v44 }
 0x294   : > { %v1175_v34 = vpack.c.bf16 %v1132_v35, %v1083_v49  ;;  %1228 = vst [vmem:[%s2001_s28 + $0x98] sm:$0xff] %v1180_v59 }
 0x296   : > { %1223 = vst [vmem:[%s2001_s28 + $0x70] sm:$0xff] %v1175_v34  ;;  %v1087_v45 = vpop.f32.mrf.mxu0  ;;  %v991_v11 = vpop.f32.mrf.mxu2 }
 0x297   : > { %v992_v4 = vadd.f32 %v991_v11, %v2021_v17  ;;  %v1040_v46 = vpop.f32.mrf.mxu3  ;;  %v1088_v21 = vadd.f32 %v1087_v45, %v1987_v19 }
 0x298   : > { %v1041_v47 = vadd.f32 %v1040_v46, %v2021_v17 }
 0x299   : > { %v1133_v50 = vpop.f32.mrf.mxu1 }
 0x29a   : > { %v1134_v39 = vadd.f32 %v1133_v50, %v1985_v9  ;;  %v1183_v60 = vpack.c.bf16 %v1041_v47, %v992_v4 }
 0x29c   : > { %v1178_v57 = vpack.c.bf16 %v1134_v39, %v1085_v54  ;;  %1231 = vst [vmem:[%s2001_s28 + $0xb0] sm:$0xff] %v1183_v60 }
 0x29e   : > { %1226 = vst [vmem:[%s2001_s28 + $0x88] sm:$0xff] %v1178_v57  ;;  %v1089_v25 = vpop.f32.mrf.mxu0  ;;  %v994_v61 = vpop.f32.mrf.mxu2 }
 0x29f   : > { %v995_v63 = vadd.f32 %v994_v61, %v1994_v26  ;;  %v1043_v20 = vpop.f32.mrf.mxu3  ;;  %v1090_v16 = vadd.f32 %v1089_v25, %v2021_v17 }
 0x2a0   : > { %v1044_v13 = vadd.f32 %v1043_v20, %v1994_v26 }
 0x2a1   : > { %v1136_v7 = vpop.f32.mrf.mxu1 }
 0x2a2   : > { %v1137_v0 = vadd.f32 %v1136_v7, %v1987_v19  ;;  %v1186_v9 = vpack.c.bf16 %v1044_v13, %v995_v63 }
 0x2a4   : > { %v1181_v1 = vpack.c.bf16 %v1137_v0, %v1088_v21  ;;  %1234 = vst [vmem:[%s2001_s28 + $0xc8] sm:$0xff] %v1186_v9 }
 0x2a6   : > { %1229 = vst [vmem:[%s2001_s28 + $0xa0] sm:$0xff] %v1181_v1  ;;  %v1092_v22 = vpop.f32.mrf.mxu0  ;;  %v996_v12 = vpop.f32.mrf.mxu2 }
 0x2a7   : > { %v997_v51 = vadd.f32 %v996_v12, %v2007_v32  ;;  %v1045_v28 = vpop.f32.mrf.mxu3  ;;  %v1093_v53 = vadd.f32 %v1092_v22, %v1994_v26 }
 0x2a8   : > { %v1046_v29 = vadd.f32 %v1045_v28, %v2007_v32 }
 0x2a9   : > { %v1138_v30 = vpop.f32.mrf.mxu1 }
 0x2aa   : > { %v1139_v31 = vadd.f32 %v1138_v30, %v2021_v17  ;;  %v1189_v19 = vpack.c.bf16 %v1046_v29, %v997_v51 }
 0x2ac   : > { %v1184_v33 = vpack.c.bf16 %v1139_v31, %v1090_v16  ;;  %1237 = vst [vmem:[%s2001_s28 + $0xe0] sm:$0xff] %v1189_v19 }
 0x2ae   : > { %1232 = vst [vmem:[%s2001_s28 + $0xb8] sm:$0xff] %v1184_v33  ;;  %v1094_v58 = vpop.f32.mrf.mxu0  ;;  %v999_v36 = vpop.f32.mrf.mxu2 }
 0x2af   : > { %v1000_v2 = vadd.f32 %v999_v36, %v2029_v15  ;;  %v1048_v18 = vpop.f32.mrf.mxu3  ;;  %v1095_v8 = vadd.f32 %v1094_v58, %v2007_v32 }
 0x2b0   : > { %v1049_v38 = vadd.f32 %v1048_v18, %v2029_v15 }
 0x2b1   : > { %v1141_v14 = vpop.f32.mrf.mxu1 }
 0x2b2   : > { %v1142_v40 = vadd.f32 %v1141_v14, %v1994_v26  ;;  %v1192_v17 = vpack.c.bf16 %v1049_v38, %v1000_v2 }
 0x2b4   : > { %v1187_v24 = vpack.c.bf16 %v1142_v40, %v1093_v53  ;;  %1240 = vst [vmem:[%s2001_s28 + $0xf8] sm:$0xff] %v1192_v17 }
 0x2b6   : > { %1235 = vst [vmem:[%s2001_s28 + $0xd0] sm:$0xff] %v1187_v24  ;;  %v1097_v5 = vpop.f32.mrf.mxu0  ;;  %v1001_v6 = vpop.f32.mrf.mxu2 }
 0x2b7   : > { %v1002_v56 = vadd.f32 %v1001_v6, %v2023_v48  ;;  %v1050_v42 = vpop.f32.mrf.mxu3  ;;  %v1098_v35 = vadd.f32 %v1097_v5, %v2029_v15 }
 0x2b8   : > { %v1051_v27 = vadd.f32 %v1050_v42, %v2023_v48 }
 0x2b9   : > { %v1143_v41 = vpop.f32.mrf.mxu1 }
 0x2ba   : > { %v1144_v43 = vadd.f32 %v1143_v41, %v2007_v32  ;;  %v1195_v26 = vpack.c.bf16 %v1051_v27, %v1002_v56 }
 0x2bc   : > { %v1190_v44 = vpack.c.bf16 %v1144_v43, %v1095_v8  ;;  %1243 = vst [vmem:[%s2001_s28 + $0x110] sm:$0xff] %v1195_v26 }
 0x2be   : > { %1238 = vst [vmem:[%s2001_s28 + $0xe8] sm:$0xff] %v1190_v44  ;;  %v1004_v55 = vpop.f32.mrf.mxu2  ;;  %v1099_v49 = vpop.f32.mrf.mxu0 }
 0x2bf   : > { %v1005_v3 = vadd.f32 %v1004_v55, %v2054_v10  ;;  %v1053_v52 = vpop.f32.mrf.mxu3  ;;  %v1100_v60 = vadd.f32 %v1099_v49, %v2023_v48 }
 0x2c0   : > { %v1054_v59 = vadd.f32 %v1053_v52, %v2054_v10 }
 0x2c1   : > { %v1146_v34 = vpop.f32.mrf.mxu1 }
 0x2c2   : > { %v1147_v45 = vadd.f32 %v1146_v34, %v2029_v15  ;;  %v1198_v32 = vpack.c.bf16 %v1054_v59, %v1005_v3 }
 0x2c4   : > { %v1193_v11 = vpack.c.bf16 %v1147_v45, %v1098_v35  ;;  %1246 = vst [vmem:[%s2001_s28 + $0x128] sm:$0xff] %v1198_v32 }
 0x2c6   : > { %1241 = vst [vmem:[%s2001_s28 + $0x100] sm:$0xff] %v1193_v11  ;;  %v1006_v4 = vpop.f32.mrf.mxu2  ;;  %v1102_v54 = vpop.f32.mrf.mxu0 }
 0x2c7   : > { %v1007_v46 = vadd.f32 %v1006_v4, %v2051_v62  ;;  %v1055_v47 = vpop.f32.mrf.mxu3  ;;  %v1103_v7 = vadd.f32 %v1102_v54, %v2054_v10 }
 0x2c8   : > { %v1056_v50 = vadd.f32 %v1055_v47, %v2051_v62 }
 0x2c9   : > { %v1148_v39 = vpop.f32.mrf.mxu1 }
 0x2ca   : > { %v1149_v57 = vadd.f32 %v1148_v39, %v2023_v48  ;;  %v1201_v15 = vpack.c.bf16 %v1056_v50, %v1007_v46 }
 0x2cc   : > { %v1196_v25 = vpack.c.bf16 %v1149_v57, %v1100_v60  ;;  %1249 = vst [vmem:[%s2001_s28 + $0x140] sm:$0xff] %v1201_v15 }
 0x2ce   : > { %1244 = vst [vmem:[%s2001_s28 + $0x118] sm:$0xff] %v1196_v25  ;;  %v1009_v61 = vpop.f32.mrf.mxu2  ;;  %v1104_v48 = vpop.f32.mrf.mxu0 }
 0x2cf   : > { %v1010_v63 = vadd.f32 %v1009_v61, %v2075_v37  ;;  %v1058_v20 = vpop.f32.mrf.mxu3  ;;  %v1105_v30 = vadd.f32 %v1104_v48, %v2051_v62 }
 0x2d0   : > { %v1059_v21 = vadd.f32 %v1058_v20, %v2075_v37 }
 0x2d1   : > { %v1151_v13 = vpop.f32.mrf.mxu1 }
 0x2d2   : > { %v1152_v0 = vadd.f32 %v1151_v13, %v2054_v10  ;;  %v1204_v9 = vpack.c.bf16 %v1059_v21, %v1010_v63 }
 0x2d4   : > { %v1199_v1 = vpack.c.bf16 %v1152_v0, %v1103_v7  ;;  %1252 = vst [vmem:[%s2001_s28 + $0x158] sm:$0xff] %v1204_v9 }
 0x2d6   : > { %1247 = vst [vmem:[%s2001_s28 + $0x130] sm:$0xff] %v1199_v1  ;;  %v1011_v22 = vpop.f32.mrf.mxu2  ;;  %v1107_v19 = vpop.f32.mrf.mxu0 }
 0x2d7   : > { %v1012_v12 = vadd.f32 %v1011_v22, %v2080_v23  ;;  %v1060_v51 = vpop.f32.mrf.mxu3  ;;  %v1108_v58 = vadd.f32 %v1107_v19, %v2075_v37 }
 0x2d8   : > { %v1061_v28 = vadd.f32 %v1060_v51, %v2080_v23 }
 0x2d9   : > { %v1153_v29 = vpop.f32.mrf.mxu1 }
 0x2da   : > { %v1154_v16 = vadd.f32 %v1153_v29, %v2051_v62  ;;  %v1207_v10 = vpack.c.bf16 %v1061_v28, %v1012_v12 }
 0x2dc   : > { %v1202_v31 = vpack.c.bf16 %v1154_v16, %v1105_v30  ;;  %1255 = vst [vmem:[%s2001_s28 + $0x170] sm:$0xff] %v1207_v10 }
 0x2de   : > { %1250 = vst [vmem:[%s2001_s28 + $0x148] sm:$0xff] %v1202_v31  ;;  %v1109_v18 = vpop.f32.mrf.mxu0 }
 0x2df   : > { %v1110_v38 = vadd.f32 %v1109_v18, %v2080_v23 }
 0x2e1   : > { %v1156_v33 = vpop.f32.mrf.mxu1 }
 0x2e2   : > { %v1157_v36 = vadd.f32 %v1156_v33, %v2075_v37 }
 0x2e4   : > { %v1205_v2 = vpack.c.bf16 %v1157_v36, %v1108_v58 }
 0x2e6   : > { %1253 = vst [vmem:[%s2001_s28 + $0x160] sm:$0xff] %v1205_v2 }
 0x2e9   : > { %v1158_v53 = vpop.f32.mrf.mxu1 }
 0x2ea   : > { %v1159_v14 = vadd.f32 %v1158_v53, %v2080_v23 }
 0x2ec   : > { %v1208_v62 = vpack.c.bf16 %v1159_v14, %v1110_v38 }
 0x2ee   : > { %1256 = vst [vmem:[%s2001_s28 + $0x178] sm:$0xff] %v1208_v62 }
 0x2ef PF: > { %s13_s12 = sadd.s32 1, %s1445_s12  }
 0x2f0   : > { %p10_p4 = scmp.ge.s32.totalorder %s13_s12, 10  }
 0x2f2   :  { %12 = sbr.rel (!%p10_p4) target bundleno = 1 (0x1), region = 77 }

// kernel: conv_lstm2d_forward.3
= control target key start
LH: loop header
LB: loop body
LE: loop exit
PB: predicated region body
PF: predicated region fallthrough
CT: control target
= control target key end

     0   :  { %s5645_s15 = smov 0   ;;  %s5647_s16 = smov 0   ;;  %s9654_s0 = inlined_call_operand.vmem [shape: f32[1,768], index: 0, kind: input, shape index: {}]   ;;  %s9655_s1 = inlined_call_operand.vmem [shape: bf16[8,128,768], index: 1, kind: input, shape index: {}]   ;;  %s9656_s2 = inlined_call_operand.vmem [shape: bf16[128,288], index: 2, kind: input, shape index: {}]   ;;  %s9657_s3 = inlined_call_operand.vmem [shape: f32[32,768], index: 3, kind: output, shape index: {0}]   ;;  %s9658_s4 = inlined_call_operand.vmem [shape: f32[32,768], index: 4, kind: output, shape index: {1}]  }
   0x1   :  { %s5649_s17 = smov 0  }
   0x2 LB: > { %s24_s18 = sadd.s32 1, %s5603_s16  ;;  %p4700_p0 = scmp.ge.s32.totalorder %s5607_s17, 1  ;;  %s5607_s17 = sphi %s5649_s17, %s15_s17   ;;  %s5603_s16 = sphi %s5647_s16, %s10199_s16   ;;  %s5599_s15 = sphi %s5645_s15, %s10198_s15  }
   0x3   : > { %p25_p1 = scmp.ge.s32.totalorder %s24_s18, 8  ;;  %p184_p2 = scmp.lt.s32.totalorder %s5607_s17, 9 }
   0x5   : > { %s10201_s18 = smov (%p25_p1, %s24_s18), 0  ;;  %p185_p3 = pnand %p4700_p0, %p184_p2 }
   0x7   : > { %188 = sbr.rel (%p185_p3) target bundleno = 1838 (0x72e), region = 32 }
   0xc   : > { %p220_p4 = scmp.lt.s32.totalorder %s5599_s15, 7  ;;  %p4702_p5 = scmp.ne.s32.totalorder %s5599_s15, 0 }
   0xe   : > { %s221_s19 = scalar_select %p220_p4, %s5599_s15, 7 }
   0xf   : > { %245 = sbr.rel (%p4702_p5) target bundleno = 157 (0x9d), region = 36 }
  0x10   : > { %s5161_s20 = smul.u32 384, %s221_s19 }
  0x12   : > { %s5670_s23 = scalar_lea.vmem %s9655_s1, %s5161_s20 }
  0x14   : > { %v5609_v0 = vmov 0   ;;  %v5610_v1 = vmov 0.0   ;;  %v286_v2 = vld [vmem:[%s5670_s23] sm:$0xff]  ;;  %v287_v3 = vld [vmem:[%s5670_s23 + $0x8] sm:$0xff]  ;;  %v288_v6 = vld [vmem:[%s5670_s23 + $0x10] sm:$0xff] }
  0x15   : > { %246 = vst [vmem:[#allocation2] sm:$0xff] %v5609_v0  ;;  %v334_v4 = vunpack.c.l.bf16 %v286_v2  ;;  %v335_v5 = vunpack.c.h.bf16 %v286_v2  ;;  %v336_v7 = vunpack.c.l.bf16 %v287_v3  ;;  %v337_v8 = vunpack.c.h.bf16 %v287_v3  ;;  %v289_v9 = vld [vmem:[%s5670_s23 + $0x18] sm:$0xff]  ;;  %v290_v12 = vld [vmem:[%s5670_s23 + $0x20] sm:$0xff]  ;;  %v291_v15 = vld [vmem:[%s5670_s23 + $0x28] sm:$0xff] }
  0x16   : > { %247 = vst [vmem:[#allocation2 + $0x8] sm:$0xff] %v5609_v0  ;;  %v338_v10 = vunpack.c.l.bf16 %v288_v6  ;;  %v339_v11 = vunpack.c.h.bf16 %v288_v6  ;;  %v340_v13 = vunpack.c.l.bf16 %v289_v9  ;;  %v341_v14 = vunpack.c.h.bf16 %v289_v9  ;;  %v292_v18 = vld [vmem:[%s5670_s23 + $0x30] sm:$0xff]  ;;  %v293_v21 = vld [vmem:[%s5670_s23 + $0x38] sm:$0xff]  ;;  %v294_v24 = vld [vmem:[%s5670_s23 + $0x40] sm:$0xff] }
  0x17   : > { %248 = vst [vmem:[#allocation2 + $0x10] sm:$0xff] %v5609_v0  ;;  %v342_v16 = vunpack.c.l.bf16 %v290_v12  ;;  %v343_v17 = vunpack.c.h.bf16 %v290_v12  ;;  %v344_v19 = vunpack.c.l.bf16 %v291_v15  ;;  %v345_v20 = vunpack.c.h.bf16 %v291_v15  ;;  %v295_v27 = vld [vmem:[%s5670_s23 + $0x48] sm:$0xff]  ;;  %v296_v30 = vld [vmem:[%s5670_s23 + $0x50] sm:$0xff]  ;;  %v297_v33 = vld [vmem:[%s5670_s23 + $0x58] sm:$0xff] }
  0x18   : > { %249 = vst [vmem:[#allocation2 + $0x18] sm:$0xff] %v5609_v0  ;;  %v346_v22 = vunpack.c.l.bf16 %v292_v18  ;;  %v347_v23 = vunpack.c.h.bf16 %v292_v18  ;;  %v348_v25 = vunpack.c.l.bf16 %v293_v21  ;;  %v349_v26 = vunpack.c.h.bf16 %v293_v21  ;;  %v298_v36 = vld [vmem:[%s5670_s23 + $0x60] sm:$0xff]  ;;  %v299_v39 = vld [vmem:[%s5670_s23 + $0x68] sm:$0xff]  ;;  %v300_v42 = vld [vmem:[%s5670_s23 + $0x70] sm:$0xff] }
  0x19   : > { %250 = vst [vmem:[#allocation2 + $0x20] sm:$0xff] %v5609_v0  ;;  %v350_v28 = vunpack.c.l.bf16 %v294_v24  ;;  %v351_v29 = vunpack.c.h.bf16 %v294_v24  ;;  %v352_v31 = vunpack.c.l.bf16 %v295_v27  ;;  %v353_v32 = vunpack.c.h.bf16 %v295_v27  ;;  %v301_v45 = vld [vmem:[%s5670_s23 + $0x78] sm:$0xff]  ;;  %v302_v48 = vld [vmem:[%s5670_s23 + $0x80] sm:$0xff]  ;;  %v303_v51 = vld [vmem:[%s5670_s23 + $0x88] sm:$0xff] }
  0x1a   : > { %251 = vst [vmem:[#allocation2 + $0x28] sm:$0xff] %v5609_v0  ;;  %v354_v34 = vunpack.c.l.bf16 %v296_v30  ;;  %v355_v35 = vunpack.c.h.bf16 %v296_v30  ;;  %v356_v37 = vunpack.c.l.bf16 %v297_v33  ;;  %v357_v38 = vunpack.c.h.bf16 %v297_v33  ;;  %v304_v54 = vld [vmem:[%s5670_s23 + $0x90] sm:$0xff]  ;;  %v305_v57 = vld [vmem:[%s5670_s23 + $0x98] sm:$0xff]  ;;  %v306_v60 = vld [vmem:[%s5670_s23 + $0xa0] sm:$0xff] }
  0x1b   : > { %252 = vst [vmem:[#allocation2 + $0x30] sm:$0xff] %v5609_v0  ;;  %v358_v40 = vunpack.c.l.bf16 %v298_v36  ;;  %v359_v41 = vunpack.c.h.bf16 %v298_v36  ;;  %v360_v43 = vunpack.c.l.bf16 %v299_v39  ;;  %v361_v44 = vunpack.c.h.bf16 %v299_v39  ;;  %v307_v63 = vld [vmem:[%s5670_s23 + $0xa8] sm:$0xff]  ;;  %v308_v2 = vld [vmem:[%s5670_s23 + $0xb0] sm:$0xff] }
  0x1c   : > { %253 = vst [vmem:[#allocation2 + $0x38] sm:$0xff] %v5609_v0  ;;  %v362_v46 = vunpack.c.l.bf16 %v300_v42  ;;  %v363_v47 = vunpack.c.h.bf16 %v300_v42  ;;  %v364_v49 = vunpack.c.l.bf16 %v301_v45  ;;  %v365_v50 = vunpack.c.h.bf16 %v301_v45 }
  0x1d   : > { %254 = vst [vmem:[#allocation2 + $0x40] sm:$0xff] %v5609_v0  ;;  %v366_v52 = vunpack.c.l.bf16 %v302_v48  ;;  %v367_v53 = vunpack.c.h.bf16 %v302_v48  ;;  %v368_v55 = vunpack.c.l.bf16 %v303_v51  ;;  %v369_v56 = vunpack.c.h.bf16 %v303_v51 }
  0x1e   : > { %255 = vst [vmem:[#allocation2 + $0x48] sm:$0xff] %v5609_v0  ;;  %v370_v58 = vunpack.c.l.bf16 %v304_v54  ;;  %v371_v59 = vunpack.c.h.bf16 %v304_v54  ;;  %v372_v61 = vunpack.c.l.bf16 %v305_v57  ;;  %v373_v62 = vunpack.c.h.bf16 %v305_v57 }
  0x1f   : > { %256 = vst [vmem:[#allocation2 + $0x50] sm:$0xff] %v5609_v0  ;;  %v376_v3 = vunpack.c.l.bf16 %v307_v63  ;;  %v378_v6 = vunpack.c.l.bf16 %v308_v2 }
  0x20   : > { %257 = vst [vmem:[#allocation2 + $0x58] sm:$0xff] %v5609_v0 }
  0x21   : > { %258 = vst [vmem:[#allocation2 + $0x60] sm:$0xff] %v5609_v0 }
  0x22   : > { %259 = vst [vmem:[#allocation2 + $0x68] sm:$0xff] %v5609_v0 }
  0x23   : > { %260 = vst [vmem:[#allocation2 + $0x70] sm:$0xff] %v5609_v0 }
  0x24   : > { %261 = vst [vmem:[#allocation2 + $0x78] sm:$0xff] %v5609_v0  ;;  %v374_v0 = vunpack.c.l.bf16 %v306_v60 }
  0x25   : > { %262 = vst [vmem:[#allocation3 + $0xb0] sm:$0xff] %v5610_v1 }
  0x26   : > { %263 = vst [vmem:[#allocation3] sm:$0xff] %v5610_v1 }
  0x27   : > { %264 = vst [vmem:[#allocation3 + $0x10] sm:$0xff] %v5610_v1 }
  0x28   : > { %265 = vst [vmem:[#allocation3 + $0x48] sm:$0xff] %v5610_v1 }
  0x29   : > { %266 = vst [vmem:[#allocation3 + $0x60] sm:$0xff] %v5610_v1 }
  0x2a   : > { %267 = vst [vmem:[#allocation3 + $0x28] sm:$0xff] %v5610_v1 }
  0x2b   : > { %268 = vst [vmem:[#allocation3 + $0x40] sm:$0xff] %v5610_v1 }
  0x2c   : > { %269 = vst [vmem:[#allocation3 + $0x78] sm:$0xff] %v5610_v1 }
  0x2d   : > { %270 = vst [vmem:[#allocation3 + $0x88] sm:$0xff] %v5610_v1 }
  0x2e   : > { %271 = vst [vmem:[#allocation3 + $0x90] sm:$0xff] %v5610_v1 }
  0x2f   : > { %272 = vst [vmem:[#allocation3 + $0x18] sm:$0xff] %v5610_v1 }
  0x30   : > { %273 = vst [vmem:[#allocation3 + $0x98] sm:$0xff] %v5610_v1 }
  0x31   : > { %274 = vst [vmem:[#allocation3 + $0x38] sm:$0xff] %v5610_v1 }
  0x32   : > { %275 = vst [vmem:[#allocation3 + $0x50] sm:$0xff] %v5610_v1 }
  0x33   : > { %276 = vst [vmem:[#allocation3 + $0x70] sm:$0xff] %v5610_v1 }
  0x34   : > { %277 = vst [vmem:[#allocation3 + $0xa0] sm:$0xff] %v5610_v1 }
  0x35   : > { %278 = vst [vmem:[#allocation3 + $0xa8] sm:$0xff] %v5610_v1 }
  0x36   : > { %279 = vst [vmem:[#allocation3 + $0x68] sm:$0xff] %v5610_v1 }
  0x37   : > { %280 = vst [vmem:[#allocation3 + $0x30] sm:$0xff] %v5610_v1 }
  0x38   : > { %281 = vst [vmem:[#allocation3 + $0x58] sm:$0xff] %v5610_v1 }
  0x39   : > { %282 = vst [vmem:[#allocation3 + $0x80] sm:$0xff] %v5610_v1 }
  0x3a   : > { %283 = vst [vmem:[#allocation3 + $0xb8] sm:$0xff] %v5610_v1 }
  0x3b   : > { %284 = vst [vmem:[#allocation3 + $0x20] sm:$0xff] %v5610_v1 }
  0x3c   : > { %285 = vst [vmem:[#allocation3 + $0x8] sm:$0xff] %v5610_v1  ;;  %v375_v1 = vunpack.c.h.bf16 %v306_v60 }
  0x3d   : > { %430 = vst [vmem:[#allocation4 + $0x230] sm:$0xff] %v334_v4  ;;  %v377_v4 = vunpack.c.h.bf16 %v307_v63 }
  0x3e   : > { %431 = vst [vmem:[#allocation4 + $0x1c8] sm:$0xff] %v335_v5  ;;  %v309_v5 = vld [vmem:[%s5670_s23 + $0xb8] sm:$0xff] }
  0x3f   : > { %432 = vst [vmem:[#allocation4 + $0x2a0] sm:$0xff] %v336_v7  ;;  %v379_v7 = vunpack.c.h.bf16 %v308_v2  ;;  %v380_v9 = vunpack.c.l.bf16 %v309_v5 }
  0x40   : > { %433 = vst [vmem:[#allocation4 + $0x70] sm:$0xff] %v337_v8  ;;  %v310_v8 = vld [vmem:[%s5670_s23 + $0xc0] sm:$0xff] }
  0x41   : > { %434 = vst [vmem:[#allocation4 + $0xf0] sm:$0xff] %v338_v10  ;;  %v381_v10 = vunpack.c.h.bf16 %v309_v5  ;;  %v382_v12 = vunpack.c.l.bf16 %v310_v8 }
  0x42   : > { %435 = vst [vmem:[#allocation4 + $0x1b0] sm:$0xff] %v339_v11  ;;  %v311_v11 = vld [vmem:[%s5670_s23 + $0xc8] sm:$0xff] }
  0x43   : > { %436 = vst [vmem:[#allocation4 + $0x30] sm:$0xff] %v340_v13  ;;  %v383_v13 = vunpack.c.h.bf16 %v310_v8  ;;  %v384_v15 = vunpack.c.l.bf16 %v311_v11 }
  0x44   : > { %437 = vst [vmem:[#allocation4 + $0x2f0] sm:$0xff] %v341_v14  ;;  %v312_v14 = vld [vmem:[%s5670_s23 + $0xd0] sm:$0xff] }
  0x45   : > { %438 = vst [vmem:[#allocation4 + $0x88] sm:$0xff] %v342_v16  ;;  %v385_v16 = vunpack.c.h.bf16 %v311_v11  ;;  %v386_v18 = vunpack.c.l.bf16 %v312_v14 }
  0x46   : > { %439 = vst [vmem:[#allocation4 + $0x140] sm:$0xff] %v343_v17  ;;  %v313_v17 = vld [vmem:[%s5670_s23 + $0xd8] sm:$0xff] }
  0x47   : > { %440 = vst [vmem:[#allocation4 + $0x2d0] sm:$0xff] %v344_v19  ;;  %v387_v19 = vunpack.c.h.bf16 %v312_v14  ;;  %v388_v21 = vunpack.c.l.bf16 %v313_v17 }
  0x48   : > { %441 = vst [vmem:[#allocation4 + $0x1b8] sm:$0xff] %v345_v20  ;;  %v314_v20 = vld [vmem:[%s5670_s23 + $0xe0] sm:$0xff] }
  0x49   : > { %442 = vst [vmem:[#allocation4 + $0x1f0] sm:$0xff] %v346_v22  ;;  %v389_v22 = vunpack.c.h.bf16 %v313_v17  ;;  %v390_v24 = vunpack.c.l.bf16 %v314_v20 }
  0x4a   : > { %443 = vst [vmem:[#allocation4 + $0x1d0] sm:$0xff] %v347_v23  ;;  %v315_v23 = vld [vmem:[%s5670_s23 + $0xe8] sm:$0xff] }
  0x4b   : > { %444 = vst [vmem:[#allocation4 + $0xc8] sm:$0xff] %v348_v25  ;;  %v391_v25 = vunpack.c.h.bf16 %v314_v20  ;;  %v392_v27 = vunpack.c.l.bf16 %v315_v23 }
  0x4c   : > { %445 = vst [vmem:[#allocation4 + $0x20] sm:$0xff] %v349_v26  ;;  %v316_v26 = vld [vmem:[%s5670_s23 + $0xf0] sm:$0xff] }
  0x4d   : > { %446 = vst [vmem:[#allocation4 + $0x100] sm:$0xff] %v350_v28  ;;  %v393_v28 = vunpack.c.h.bf16 %v315_v23  ;;  %v394_v30 = vunpack.c.l.bf16 %v316_v26 }
  0x4e   : > { %447 = vst [vmem:[#allocation4 + $0x278] sm:$0xff] %v351_v29  ;;  %v317_v29 = vld [vmem:[%s5670_s23 + $0xf8] sm:$0xff] }
  0x4f   : > { %448 = vst [vmem:[#allocation4 + $0x48] sm:$0xff] %v352_v31  ;;  %v395_v31 = vunpack.c.h.bf16 %v316_v26  ;;  %v396_v33 = vunpack.c.l.bf16 %v317_v29 }
  0x50   : > { %449 = vst [vmem:[#allocation4 + $0x150] sm:$0xff] %v353_v32  ;;  %v318_v32 = vld [vmem:[%s5670_s23 + $0x100] sm:$0xff] }
  0x51   : > { %450 = vst [vmem:[#allocation4 + $0x248] sm:$0xff] %v354_v34  ;;  %v397_v34 = vunpack.c.h.bf16 %v317_v29  ;;  %v398_v36 = vunpack.c.l.bf16 %v318_v32 }
  0x52   : > { %451 = vst [vmem:[#allocation4 + $0x2b0] sm:$0xff] %v355_v35  ;;  %v319_v35 = vld [vmem:[%s5670_s23 + $0x108] sm:$0xff] }
  0x53   : > { %452 = vst [vmem:[#allocation4 + $0x118] sm:$0xff] %v356_v37  ;;  %v399_v37 = vunpack.c.h.bf16 %v318_v32  ;;  %v400_v39 = vunpack.c.l.bf16 %v319_v35 }
  0x54   : > { %453 = vst [vmem:[#allocation4 + $0x1a0] sm:$0xff] %v357_v38  ;;  %v320_v38 = vld [vmem:[%s5670_s23 + $0x110] sm:$0xff] }
  0x55   : > { %454 = vst [vmem:[#allocation4 + $0x298] sm:$0xff] %v358_v40  ;;  %v401_v40 = vunpack.c.h.bf16 %v319_v35  ;;  %v402_v42 = vunpack.c.l.bf16 %v320_v38 }
  0x56   : > { %455 = vst [vmem:[#allocation4 + $0x200] sm:$0xff] %v359_v41  ;;  %v321_v41 = vld [vmem:[%s5670_s23 + $0x118] sm:$0xff] }
  0x57   : > { %456 = vst [vmem:[#allocation4 + $0x268] sm:$0xff] %v360_v43  ;;  %v403_v43 = vunpack.c.h.bf16 %v320_v38  ;;  %v404_v45 = vunpack.c.l.bf16 %v321_v41 }
  0x58   : > { %457 = vst [vmem:[#allocation4 + $0x178] sm:$0xff] %v361_v44  ;;  %v322_v44 = vld [vmem:[%s5670_s23 + $0x120] sm:$0xff] }
  0x59   : > { %458 = vst [vmem:[#allocation4 + $0x260] sm:$0xff] %v362_v46  ;;  %v405_v46 = vunpack.c.h.bf16 %v321_v41  ;;  %v406_v48 = vunpack.c.l.bf16 %v322_v44 }
  0x5a   : > { %459 = vst [vmem:[#allocation4 + $0x98] sm:$0xff] %v363_v47  ;;  %v323_v47 = vld [vmem:[%s5670_s23 + $0x128] sm:$0xff] }
  0x5b   : > { %460 = vst [vmem:[#allocation4 + $0xe8] sm:$0xff] %v364_v49  ;;  %v407_v49 = vunpack.c.h.bf16 %v322_v44  ;;  %v408_v51 = vunpack.c.l.bf16 %v323_v47 }
  0x5c   : > { %461 = vst [vmem:[#allocation4 + $0x240] sm:$0xff] %v365_v50  ;;  %v324_v50 = vld [vmem:[%s5670_s23 + $0x130] sm:$0xff] }
  0x5d   : > { %462 = vst [vmem:[#allocation4 + $0x28] sm:$0xff] %v366_v52  ;;  %v409_v52 = vunpack.c.h.bf16 %v323_v47  ;;  %v410_v54 = vunpack.c.l.bf16 %v324_v50 }
  0x5e   : > { %463 = vst [vmem:[#allocation4 + $0x58] sm:$0xff] %v367_v53  ;;  %v325_v53 = vld [vmem:[%s5670_s23 + $0x138] sm:$0xff] }
  0x5f   : > { %464 = vst [vmem:[#allocation4 + $0x2c0] sm:$0xff] %v368_v55  ;;  %v411_v55 = vunpack.c.h.bf16 %v324_v50  ;;  %v412_v57 = vunpack.c.l.bf16 %v325_v53 }
  0x60   : > { %465 = vst [vmem:[#allocation4 + $0x110] sm:$0xff] %v369_v56  ;;  %v326_v56 = vld [vmem:[%s5670_s23 + $0x140] sm:$0xff] }
  0x61   : > { %466 = vst [vmem:[#allocation4 + $0x228] sm:$0xff] %v370_v58  ;;  %v413_v58 = vunpack.c.h.bf16 %v325_v53  ;;  %v414_v60 = vunpack.c.l.bf16 %v326_v56 }
  0x62   : > { %467 = vst [vmem:[#allocation4 + $0x130] sm:$0xff] %v371_v59  ;;  %v327_v59 = vld [vmem:[%s5670_s23 + $0x148] sm:$0xff] }
  0x63   : > { %468 = vst [vmem:[#allocation4 + $0x50] sm:$0xff] %v372_v61  ;;  %v415_v61 = vunpack.c.h.bf16 %v326_v56  ;;  %v416_v63 = vunpack.c.l.bf16 %v327_v59 }
  0x64   : > { %469 = vst [vmem:[#allocation4 + $0x210] sm:$0xff] %v373_v62  ;;  %v328_v62 = vld [vmem:[%s5670_s23 + $0x150] sm:$0xff] }
  0x65   : > { %470 = vst [vmem:[#allocation4 + $0x270] sm:$0xff] %v374_v0  ;;  %v417_v0 = vunpack.c.h.bf16 %v327_v59  ;;  %v418_v2 = vunpack.c.l.bf16 %v328_v62 }
  0x66   : > { %471 = vst [vmem:[#allocation4] sm:$0xff] %v375_v1  ;;  %v329_v1 = vld [vmem:[%s5670_s23 + $0x158] sm:$0xff] }
  0x67   : > { %472 = vst [vmem:[#allocation4 + $0x168] sm:$0xff] %v376_v3  ;;  %v419_v3 = vunpack.c.h.bf16 %v328_v62  ;;  %v420_v5 = vunpack.c.l.bf16 %v329_v1 }
  0x68   : > { %473 = vst [vmem:[#allocation4 + $0xb0] sm:$0xff] %v377_v4  ;;  %v330_v4 = vld [vmem:[%s5670_s23 + $0x160] sm:$0xff] }
  0x69   : > { %474 = vst [vmem:[#allocation4 + $0x1c0] sm:$0xff] %v378_v6  ;;  %v421_v6 = vunpack.c.h.bf16 %v329_v1  ;;  %v422_v8 = vunpack.c.l.bf16 %v330_v4 }
  0x6a   : > { %475 = vst [vmem:[#allocation4 + $0x78] sm:$0xff] %v379_v7  ;;  %v331_v7 = vld [vmem:[%s5670_s23 + $0x168] sm:$0xff] }
  0x6b   : > { %476 = vst [vmem:[#allocation4 + $0x288] sm:$0xff] %v380_v9  ;;  %v423_v9 = vunpack.c.h.bf16 %v330_v4  ;;  %v424_v11 = vunpack.c.l.bf16 %v331_v7 }
  0x6c   : > { %477 = vst [vmem:[#allocation4 + $0x2e8] sm:$0xff] %v381_v10  ;;  %v332_v10 = vld [vmem:[%s5670_s23 + $0x170] sm:$0xff] }
  0x6d   : > { %478 = vst [vmem:[#allocation4 + $0x38] sm:$0xff] %v382_v12  ;;  %v425_v12 = vunpack.c.h.bf16 %v331_v7  ;;  %v426_v14 = vunpack.c.l.bf16 %v332_v10 }
  0x6e   : > { %479 = vst [vmem:[#allocation4 + $0x190] sm:$0xff] %v383_v13  ;;  %v333_v13 = vld [vmem:[%s5670_s23 + $0x178] sm:$0xff] }
  0x6f   : > { %480 = vst [vmem:[#allocation4 + $0xa8] sm:$0xff] %v384_v15  ;;  %v427_v15 = vunpack.c.h.bf16 %v332_v10  ;;  %v429_v17 = vunpack.c.h.bf16 %v333_v13 }
  0x70   : > { %481 = vst [vmem:[#allocation4 + $0x128] sm:$0xff] %v385_v16  ;;  %v428_v16 = vunpack.c.l.bf16 %v333_v13 }
  0x71   : > { %482 = vst [vmem:[#allocation4 + $0x1f8] sm:$0xff] %v386_v18 }
  0x72   : > { %483 = vst [vmem:[#allocation4 + $0x68] sm:$0xff] %v387_v19 }
  0x73   : > { %484 = vst [vmem:[#allocation4 + $0x220] sm:$0xff] %v388_v21 }
  0x74   : > { %485 = vst [vmem:[#allocation4 + $0x2e0] sm:$0xff] %v389_v22 }
  0x75   : > { %486 = vst [vmem:[#allocation4 + $0x238] sm:$0xff] %v390_v24 }
  0x76   : > { %487 = vst [vmem:[#allocation4 + $0x290] sm:$0xff] %v391_v25 }
  0x77   : > { %488 = vst [vmem:[#allocation4 + $0x170] sm:$0xff] %v392_v27 }
  0x78   : > { %489 = vst [vmem:[#allocation4 + $0x1d8] sm:$0xff] %v393_v28 }
  0x79   : > { %490 = vst [vmem:[#allocation4 + $0x258] sm:$0xff] %v394_v30 }
  0x7a   : > { %491 = vst [vmem:[#allocation4 + $0xa0] sm:$0xff] %v395_v31 }
  0x7b   : > { %492 = vst [vmem:[#allocation4 + $0x2c8] sm:$0xff] %v396_v33 }
  0x7c   : > { %493 = vst [vmem:[#allocation4 + $0x2a8] sm:$0xff] %v397_v34 }
  0x7d   : > { %494 = vst [vmem:[#allocation4 + $0x60] sm:$0xff] %v398_v36 }
  0x7e   : > { %495 = vst [vmem:[#allocation4 + $0x80] sm:$0xff] %v399_v37 }
  0x7f   : > { %496 = vst [vmem:[#allocation4 + $0x90] sm:$0xff] %v400_v39 }
  0x80   : > { %497 = vst [vmem:[#allocation4 + $0x10] sm:$0xff] %v401_v40 }
  0x81   : > { %498 = vst [vmem:[#allocation4 + $0xc0] sm:$0xff] %v402_v42 }
  0x82   : > { %499 = vst [vmem:[#allocation4 + $0x2b8] sm:$0xff] %v403_v43 }
  0x83   : > { %500 = vst [vmem:[#allocation4 + $0x198] sm:$0xff] %v404_v45 }
  0x84   : > { %501 = vst [vmem:[#allocation4 + $0x160] sm:$0xff] %v405_v46 }
  0x85   : > { %502 = vst [vmem:[#allocation4 + $0x1e0] sm:$0xff] %v406_v48 }
  0x86   : > { %503 = vst [vmem:[#allocation4 + $0xe0] sm:$0xff] %v407_v49 }
  0x87   : > { %504 = vst [vmem:[#allocation4 + $0x280] sm:$0xff] %v408_v51 }
  0x88   : > { %505 = vst [vmem:[#allocation4 + $0x148] sm:$0xff] %v409_v52 }
  0x89   : > { %506 = vst [vmem:[#allocation4 + $0x120] sm:$0xff] %v410_v54 }
  0x8a   : > { %507 = vst [vmem:[#allocation4 + $0x40] sm:$0xff] %v411_v55 }
  0x8b   : > { %508 = vst [vmem:[#allocation4 + $0x18] sm:$0xff] %v412_v57 }
  0x8c   : > { %509 = vst [vmem:[#allocation4 + $0x1a8] sm:$0xff] %v413_v58 }
  0x8d   : > { %510 = vst [vmem:[#allocation4 + $0x188] sm:$0xff] %v414_v60 }
  0x8e   : > { %511 = vst [vmem:[#allocation4 + $0xd0] sm:$0xff] %v415_v61 }
  0x8f   : > { %512 = vst [vmem:[#allocation4 + $0x138] sm:$0xff] %v416_v63 }
  0x90   : > { %513 = vst [vmem:[#allocation4 + $0x158] sm:$0xff] %v417_v0 }
  0x91   : > { %514 = vst [vmem:[#allocation4 + $0xd8] sm:$0xff] %v418_v2 }
  0x92   : > { %515 = vst [vmem:[#allocation4 + $0x1e8] sm:$0xff] %v419_v3 }
  0x93   : > { %516 = vst [vmem:[#allocation4 + $0x8] sm:$0xff] %v420_v5 }
  0x94   : > { %517 = vst [vmem:[#allocation4 + $0x2f8] sm:$0xff] %v421_v6 }
  0x95   : > { %518 = vst [vmem:[#allocation4 + $0x180] sm:$0xff] %v422_v8 }
  0x96   : > { %519 = vst [vmem:[#allocation4 + $0xb8] sm:$0xff] %v423_v9 }
  0x97   : > { %520 = vst [vmem:[#allocation4 + $0xf8] sm:$0xff] %v424_v11 }
  0x98   : > { %521 = vst [vmem:[#allocation4 + $0x2d8] sm:$0xff] %v425_v12 }
  0x99   : > { %522 = vst [vmem:[#allocation4 + $0x218] sm:$0xff] %v426_v14 }
  0x9a   : > { %523 = vst [vmem:[#allocation4 + $0x108] sm:$0xff] %v427_v15 }
  0x9b   : > { %524 = vst [vmem:[#allocation4 + $0x208] sm:$0xff] %v428_v16 }
  0x9c   : > { %525 = vst [vmem:[#allocation4 + $0x250] sm:$0xff] %v429_v17 }
  0x9d PF: > { %p4703_p6 = scmp.le.s32.totalorder %s5599_s15, 0 }
  0x9f   : > { %529 = sbr.rel (%p4703_p6) target bundleno = 1438 (0x59e), region = 40 }
  0xa4   : > { %v4742_v18 = vld [vmem:[#allocation2 + $0x48] sm:$0xf]  ;;  %v4734_v21 = vld [vmem:[#allocation2 + $0x40] sm:$0xf]  ;;  %s5611_s24 = smov 110   ;;  %s5612_s25 = smov 90  }
  0xa5   : > { %v5098_v19 = vld [vmem:[#allocation2 + $0x64] sm:$0xf0]  ;;  %v5097_v22 = vld [vmem:[#allocation2 + $0x5c] sm:$0xf0]  ;;  %v4838_v26 = vld [vmem:[#allocation2 + $0x44] sm:$0xf] }
  0xa6   : > { %v5722_v20 = vor.u32 %v5098_v19, %v4742_v18  ;;  %v5724_v23 = vor.u32 %v5097_v22, %v4734_v21  ;;  %v5120_v24 = vld [vmem:[#allocation2 + $0x48] sm:$0xf]  ;;  %v5123_v27 = vld [vmem:[#allocation2 + $0x60] sm:$0xf0]  ;;  %v4706_v32 = vld [vmem:[#allocation2] sm:$0xf] }
  0xa7   : > { %v4840_v25 = vld [vmem:[#allocation2 + $0x64] sm:$0xf0]  ;;  %v5094_v29 = vld [vmem:[#allocation2 + $0x44] sm:$0xf]  ;;  %v5734_v31 = vor.u32 %v5123_v27, %v4838_v26  ;;  %v5090_v33 = vld [vmem:[#allocation2 + $0x1c] sm:$0xf0] }
  0xa8   : > { %732 = vrot.lane.b32.xlu1 %v5722_v20, %s5611_s24  ;;  %728 = vrot.lane.b32.xlu0 %v5724_v23, %s5611_s24  ;;  %v5730_v28 = vor.u32 %v5120_v24, %v4840_v25  ;;  %v4736_v30 = vld [vmem:[#allocation2 + $0x60] sm:$0xf0]  ;;  %v5738_v35 = vor.u32 %v5090_v33, %v4706_v32  ;;  %v4714_v36 = vld [vmem:[#allocation2 + $0x8] sm:$0xf]  ;;  %s5613_s26 = smov 126   ;;  %s5614_s27 = smov 127  }
  0xa9   : > { %v5736_v34 = vor.u32 %v5094_v29, %v4736_v30  ;;  %v5091_v37 = vld [vmem:[#allocation2 + $0x24] sm:$0xf0]  ;;  %v5087_v38 = vld [vmem:[#allocation2 + $0x4] sm:$0xf]  ;;  %v5095_v48 = vld [vmem:[#allocation2 + $0x4c] sm:$0xf] }
  0xaa   : > { %1035 = vrot.lane.b32.xlu2 %v5730_v28, %s5612_s25  ;;  %v4708_v39 = vld [vmem:[#allocation2 + $0x20] sm:$0xf0]  ;;  %v5746_v40 = vor.u32 %v5091_v37, %v4714_v36  ;;  %v5113_v45 = vld [vmem:[#allocation2 + $0x8] sm:$0xf]  ;;  %v4744_v49 = vld [vmem:[#allocation2 + $0x68] sm:$0xf0] }
  0xab   : > { %v4810_v41 = vld [vmem:[#allocation2 + $0x4] sm:$0xf]  ;;  %v5748_v43 = vor.u32 %v5087_v38, %v4708_v39  ;;  %v4812_v46 = vld [vmem:[#allocation2 + $0x24] sm:$0xf0]  ;;  %v5784_v50 = vor.u32 %v5095_v48, %v4744_v49  ;;  %v4846_v51 = vld [vmem:[#allocation2 + $0x4c] sm:$0xf] }
  0xac   : > { %v5116_v42 = vld [vmem:[#allocation2 + $0x20] sm:$0xf0]  ;;  %v5758_v47 = vor.u32 %v5113_v45, %v4812_v46  ;;  %v5124_v52 = vld [vmem:[#allocation2 + $0x68] sm:$0xf0]  ;;  %s5615_s28 = smov 91   ;;  %s5616_s29 = smov 19  }
  0xad   : > { %v5750_v44 = vor.u32 %v5116_v42, %v4810_v41  ;;  %v5792_v53 = vor.u32 %v5124_v52, %v4846_v51  ;;  %v5088_v54 = vld [vmem:[#allocation2 + $0xc] sm:$0xf]  ;;  %vm742_vm0 = vcmask 900096   ;;  %vm1047_vm1 = vcmask 736256   ;;  %s5617_s30 = smov 92   ;;  %s5618_s5 = smov 108  }
  0xae   : > { %v4716_v55 = vld [vmem:[#allocation2 + $0x28] sm:$0xf0]  ;;  %vm701_vm2 = vcmask 1031168   ;;  %vm660_vm3 = vcmask 1039360   ;;  %v5107_v41 = vld [vmem:[#allocation2 + $0x48] sm:$0xf] }
  0xaf   : > { %v5800_v56 = vor.u32 %v5088_v54, %v4716_v55  ;;  %v4818_v57 = vld [vmem:[#allocation2 + $0xc] sm:$0xf]  ;;  %v4788_v42 = vld [vmem:[#allocation2 + $0x64] sm:$0xf0]  ;;  %s5619_s6 = smov 109   ;;  %vm1006_vm4 = vcmask 744448  }
  0xb0   : > { %1033 = vrot.lane.b32.xlu1 %v5734_v31, %s5612_s25  ;;  %730 = vrot.lane.b32.xlu0 %v5736_v34, %s5611_s24  ;;  %v5117_v58 = vld [vmem:[#allocation2 + $0x28] sm:$0xf0]  ;;  %v4791_v45 = vor.u32 %v5107_v41, %v4788_v42  ;;  %v5110_v51 = vld [vmem:[#allocation2 + $0x60] sm:$0xf0]  ;;  %vm1608_vm5 = vcmask 154624   ;;  %vm965_vm6 = vcmask 752640  }
  0xb1   : > { %v5806_v59 = vor.u32 %v5117_v58, %v4818_v57  ;;  %v4794_v52 = vld [vmem:[#allocation2 + $0x4c] sm:$0xf]  ;;  %vm924_vm7 = vcmask 883712   ;;  %vm827_vm8 = vcmask 891904   ;;  %vm1825_vm9 = vcmask 261120  }
  0xb2   : > { %714 = vrot.lane.b32.xlu2 %v5738_v35, %s5611_s24  ;;  %v5111_v54 = vld [vmem:[#allocation2 + $0x68] sm:$0xf0] }
  0xb3   : > { %v4795_v58 = vor.u32 %v5111_v54, %v4794_v52 }
  0xb8   : > { %718 = vrot.lane.b32.xlu1 %v5746_v40, %s5611_s24  ;;  %716 = vrot.lane.b32.xlu0 %v5748_v43, %s5611_s24 }
  0xba   : > { %1019 = vrot.lane.b32.xlu2 %v5750_v44, %s5612_s25 }
  0xc0   : > { %687 = vrot.lane.b32.xlu1 %v5724_v23, %s5613_s26  ;;  %1021 = vrot.lane.b32.xlu0 %v5758_v47, %s5612_s25 }
  0xc2   : > { %689 = vrot.lane.b32.xlu2 %v5736_v34, %s5613_s26 }
  0xc8   : > { %673 = vrot.lane.b32.xlu1 %v5738_v35, %s5613_s26  ;;  %691 = vrot.lane.b32.xlu0 %v5722_v20, %s5613_s26 }
  0xca   : > { %675 = vrot.lane.b32.xlu2 %v5748_v43, %s5613_s26 }
  0xd0   : > { %646 = vrot.lane.b32.xlu1 %v5724_v23, %s5614_s27  ;;  %677 = vrot.lane.b32.xlu0 %v5746_v40, %s5613_s26 }
  0xd2   : > { %648 = vrot.lane.b32.xlu2 %v5736_v34, %s5614_s27 }
  0xd8   : > { %632 = vrot.lane.b32.xlu1 %v5738_v35, %s5614_s27  ;;  %650 = vrot.lane.b32.xlu0 %v5722_v20, %s5614_s27 }
  0xda   : > { %634 = vrot.lane.b32.xlu2 %v5748_v43, %s5614_s27 }
  0xe0   : > { %734 = vrot.lane.b32.xlu1 %v5784_v50, %s5611_s24  ;;  %636 = vrot.lane.b32.xlu0 %v5746_v40, %s5614_s27 }
  0xe2   : > { %992 = vrot.lane.b32.xlu2 %v5734_v31, %s5615_s28 }
  0xe8   : > { %996 = vrot.lane.b32.xlu1 %v5792_v53, %s5615_s28  ;;  %994 = vrot.lane.b32.xlu0 %v5730_v28, %s5615_s28 }
  0xea   : > { %978 = vrot.lane.b32.xlu2 %v5750_v44, %s5615_s28 }
  0xf0   : > { %720 = vrot.lane.b32.xlu1 %v5800_v56, %s5611_s24  ;;  %980 = vrot.lane.b32.xlu0 %v5758_v47, %s5615_s28 }
  0xf8   : > { %982 = vrot.lane.b32.xlu1 %v5806_v59, %s5615_s28 }
 0x104   : > { %v5810_v60 = vpop.permute.xlu2 %1035 }
 0x10c   : > { %v715_v61 = vpop.permute.xlu2 %714 }
 0x114   : > { %v1020_v62 = vpop.permute.xlu2 %1019 }
 0x115   : > { %1580 = vrot.lane.b32.xlu1 %v1020_v62, %s5616_s29 }
 0x11a   : > { %v5813_v63 = vpop.permute.xlu1 %732  ;;  %v729_v0 = vpop.permute.xlu0 %728 }
 0x11c   : > { %v690_v6 = vpop.permute.xlu2 %689 }
 0x122   : > { %v1034_v1 = vpop.permute.xlu1 %1033  ;;  %v731_v2 = vpop.permute.xlu0 %730 }
 0x123   : > { %1594 = vrot.lane.b32.xlu0 %v1034_v1, %s5616_s29  ;;  %v749_v3 = vsel %vm742_vm0, %v729_v0, %v731_v2  ;;  %v750_v4 = vsel %vm742_vm0, %v731_v2, %v5813_v63  ;;  %v1054_v8 = vsel %vm1047_vm1, %v1034_v1, %v5810_v60  ;;  %v5104_v0 = vld [vmem:[#allocation2 + $0x20] sm:$0xf0]  ;;  %v4770_v1 = vld [vmem:[#allocation2 + $0xc] sm:$0xf] }
 0x124   : > { %1454 = vrot.lane.b32.xlu1 %v749_v3, %s5616_s29  ;;  %1456 = vrot.lane.b32.xlu2 %v750_v4, %s5616_s29  ;;  %v676_v15 = vpop.permute.xlu2 %675  ;;  %v5105_v2 = vld [vmem:[#allocation2 + $0x28] sm:$0xf0] }
 0x12a   : > { %v5821_v5 = vpop.permute.xlu1 %718  ;;  %v717_v7 = vpop.permute.xlu0 %716 }
 0x12b   : > { %v744_v9 = vsel %vm742_vm0, %v717_v7, %v5821_v5  ;;  %v743_v10 = vsel %vm742_vm0, %v715_v61, %v717_v7 }
 0x12c   : > { %1596 = vrot.lane.b32.xlu1 %v1054_v8, %s5616_s29  ;;  %1442 = vrot.lane.b32.xlu0 %v744_v9, %s5616_s29  ;;  %v649_v21 = vpop.permute.xlu2 %648 }
 0x12d   : > { %1440 = vrot.lane.b32.xlu2 %v743_v10, %s5616_s29 }
 0x132   : > { %v688_v11 = vpop.permute.xlu1 %687  ;;  %v5831_v12 = vpop.permute.xlu0 %1021 }
 0x133   : > { %v708_v13 = vsel %vm701_vm2, %v688_v11, %v690_v6  ;;  %v1048_v14 = vsel %vm1047_vm1, %v1020_v62, %v5831_v12 }
 0x134   : > { %1426 = vrot.lane.b32.xlu0 %v708_v13, %s5616_s29  ;;  %v635_v27 = vpop.permute.xlu2 %634 }
 0x135   : > { %1582 = vrot.lane.b32.xlu2 %v1048_v14, %s5616_s29 }
 0x13a   : > { %v674_v16 = vpop.permute.xlu1 %673  ;;  %v5838_v17 = vpop.permute.xlu0 %691 }
 0x13b   : > { %v702_v18 = vsel %vm701_vm2, %v674_v16, %v676_v15  ;;  %v709_v19 = vsel %vm701_vm2, %v690_v6, %v5838_v17  ;;  %v4771_v6 = vor.u32 %v5105_v2, %v4770_v1 }
 0x13c   : > { %1428 = vrot.lane.b32.xlu1 %v709_v19, %s5616_s29  ;;  %v5886_v39 = vpop.permute.xlu2 %992 }
 0x13d   : > { %1412 = vrot.lane.b32.xlu2 %v702_v18, %s5616_s29 }
 0x142   : > { %v647_v22 = vpop.permute.xlu1 %646  ;;  %v5845_v24 = vpop.permute.xlu0 %677 }
 0x143   : > { %v667_v25 = vsel %vm660_vm3, %v647_v22, %v649_v21  ;;  %v703_v26 = vsel %vm701_vm2, %v676_v15, %v5845_v24 }
 0x144   : > { %693 = vrot.lane.b32.xlu1 %v5784_v50, %s5613_s26  ;;  %1414 = vrot.lane.b32.xlu0 %v703_v26, %s5616_s29 }
 0x145   : > { %1398 = vrot.lane.b32.xlu2 %v667_v25, %s5616_s29 }
 0x14a   : > { %v633_v29 = vpop.permute.xlu1 %632  ;;  %v5854_v30 = vpop.permute.xlu0 %650 }
 0x14b   : > { %v661_v32 = vsel %vm660_vm3, %v633_v29, %v635_v27  ;;  %v668_v33 = vsel %vm660_vm3, %v649_v21, %v5854_v30 }
 0x14c   : > { %955 = vrot.lane.b32.xlu1 %v5792_v53, %s5617_s30  ;;  %1400 = vrot.lane.b32.xlu0 %v668_v33, %s5616_s29 }
 0x14d   : > { %1384 = vrot.lane.b32.xlu2 %v661_v32, %s5616_s29 }
 0x152   : > { %v5863_v36 = vpop.permute.xlu0 %636  ;;  %v5884_v38 = vpop.permute.xlu1 %734 }
 0x153   : > { %v662_v37 = vsel %vm660_vm3, %v635_v27, %v5863_v36  ;;  %v751_v13 = vsel %vm742_vm0, %v5813_v63, %v5884_v38 }
 0x154   : > { %679 = vrot.lane.b32.xlu1 %v5800_v56, %s5613_s26  ;;  %1386 = vrot.lane.b32.xlu0 %v662_v37, %s5616_s29 }
 0x155   : > { %951 = vrot.lane.b32.xlu2 %v5734_v31, %s5617_s30 }
 0x15c   : > { %941 = vrot.lane.b32.xlu1 %v5806_v59, %s5617_s30  ;;  %953 = vrot.lane.b32.xlu0 %v5730_v28, %s5617_s30 }
 0x15d   : > { %1370 = vrot.lane.b32.xlu2 %v5724_v23, %s5616_s29  ;;  %v5894_v23 = vpop.permute.xlu1 %996 }
 0x164   : > { %652 = vrot.lane.b32.xlu1 %v5784_v50, %s5614_s27  ;;  %1372 = vrot.lane.b32.xlu0 %v5736_v34, %s5616_s29  ;;  %v5900_v34 = vpop.permute.xlu2 %978 }
 0x165   : > { %937 = vrot.lane.b32.xlu2 %v5750_v44, %s5617_s30  ;;  %v5904_v46 = vpop.permute.xlu1 %720 }
 0x166   : > { %v745_v63 = vsel %vm742_vm0, %v5821_v5, %v5904_v46 }
 0x16c   : > { %914 = vrot.lane.b32.xlu1 %v5792_v53, %s5618_s5  ;;  %939 = vrot.lane.b32.xlu0 %v5758_v47, %s5617_s30 }
 0x16d   : > { %1356 = vrot.lane.b32.xlu2 %v5738_v35, %s5616_s29  ;;  %v5101_v35 = vld [vmem:[#allocation2 + $0x8] sm:$0xf]  ;;  %v5913_v49 = vpop.permute.xlu1 %982 }
 0x174   : > { %898 = vrot.lane.b32.xlu1 %v5758_v47, %s5618_s5  ;;  %1358 = vrot.lane.b32.xlu0 %v5748_v43, %s5616_s29  ;;  %v4764_v43 = vld [vmem:[#allocation2 + $0x24] sm:$0xf0] }
 0x175   : > { %910 = vrot.lane.b32.xlu2 %v5734_v31, %s5618_s5  ;;  %v4767_v48 = vor.u32 %v5101_v35, %v4764_v43  ;;  %v995_v31 = vpop.permute.xlu0 %994 }
 0x176   : > { %v1014_v7 = vsel %vm1006_vm4, %v995_v31, %v5894_v23 }
 0x17c   : > { %817 = vrot.lane.b32.xlu1 %v4791_v45, %s5619_s6  ;;  %912 = vrot.lane.b32.xlu0 %v5730_v28, %s5618_s5  ;;  %v4786_v28 = vld [vmem:[#allocation2 + $0x44] sm:$0xf] }
 0x17d   : > { %638 = vrot.lane.b32.xlu2 %v5800_v56, %s5614_s27  ;;  %v4787_v57 = vor.u32 %v5110_v51, %v4786_v28  ;;  %v981_v61 = vpop.permute.xlu0 %980 }
 0x17e   : > { %v5911_v47 = vpop.permute.xlu2 %1456  ;;  %v1008_v11 = vsel %vm1006_vm4, %v981_v61, %v5913_v49  ;;  %v1007_v25 = vsel %vm1006_vm4, %v5900_v34, %v981_v61 }
 0x184   : > { %805 = vrot.lane.b32.xlu1 %v4767_v48, %s5619_s6  ;;  %896 = vrot.lane.b32.xlu0 %v5750_v44, %s5618_s5  ;;  %v4762_v44 = vld [vmem:[#allocation2 + $0x4] sm:$0xf] }
 0x185   : > { %900 = vrot.lane.b32.xlu2 %v5806_v59, %s5618_s5  ;;  %v4763_v4 = vor.u32 %v5104_v0, %v4762_v44 }
 0x187   : > { %v1441_v55 = vpop.permute.xlu2 %1440  ;;  %v1581_v62 = vpop.permute.xlu1 %1580 }
 0x18c   : > { %1023 = vrot.lane.b32.xlu1 %v5806_v59, %s5612_s25  ;;  %815 = vrot.lane.b32.xlu0 %v4787_v57, %s5619_s6 }
 0x18d   : > { %819 = vrot.lane.b32.xlu2 %v4795_v58, %s5619_s6 }
 0x18f   : > { %v5924_v3 = vpop.permute.xlu2 %1582 }
 0x190   : > { %v1705_v21 = vsel %vm1608_vm5, %v1581_v62, %v5924_v3 }
 0x194   : > { %803 = vrot.lane.b32.xlu0 %v4763_v4, %s5619_s6  ;;  %1570 = vrot.lane.b32.xlu1 %v1014_v7, %s5616_s29 }
 0x195   : > { %v1595_v59 = vpop.permute.xlu0 %1594  ;;  %807 = vrot.lane.b32.xlu2 %v4771_v6, %s5619_s6 }
 0x196   : > { %v1455_v8 = vpop.permute.xlu1 %1454 }
 0x197   : > { %v1413_v9 = vpop.permute.xlu2 %1412  ;;  %v1651_v10 = vsel %vm1608_vm5, %v1455_v8, %v5911_v47 }
 0x198   : > { %1850 = vmatpush.bf16.msra.mxu0 %v1651_v10  ;;  %5151 = vmatpush.bf16.msra.mxu1 %v1651_v10 }
 0x19c   : > { %1037 = vrot.lane.b32.xlu0 %v5792_v53, %s5612_s25  ;;  %1556 = vrot.lane.b32.xlu1 %v1008_v11, %s5616_s29  ;;  %v1013_v53 = vsel %vm1006_vm4, %v5886_v39, %v995_v31 }
 0x19d   : > { %1458 = vrot.lane.b32.xlu2 %v751_v13, %s5616_s29 }
 0x19e   : > { %v5942_v14 = vpop.permute.xlu1 %1596  ;;  %v5944_v15 = vpop.permute.xlu0 %1442 }
 0x19f   : > { %v1399_v16 = vpop.permute.xlu2 %1398  ;;  %v1645_v18 = vsel %vm1608_vm5, %v1441_v55, %v5944_v15  ;;  %v1711_v19 = vsel %vm1608_vm5, %v1595_v59, %v5942_v14 }
 0x1a0   : > { %1851 = vmatpush.bf16.msra.mxu0 %v1645_v18  ;;  %5152 = vmatpush.bf16.msra.mxu1 %v1645_v18 }
 0x1a1   : > { %1954 = vmatpush.bf16.msra.mxu2 %v1711_v19  ;;  %5159 = vmatpush.bf16.msra.mxu3 %v1711_v19 }
 0x1a4   : > { %1568 = vrot.lane.b32.xlu0 %v1013_v53, %s5616_s29 }
 0x1a5   : > { %1444 = vrot.lane.b32.xlu2 %v745_v63, %s5616_s29  ;;  %1955 = vmatpush.bf16.msra.mxu2 %v1705_v21 }
 0x1a6   : > { %5160 = vmatpush.bf16.msra.mxu3 %v1705_v21  ;;  %v1427_v26 = vpop.permute.xlu0 %1426 }
 0x1a7   : > { %v1385_v22 = vpop.permute.xlu2 %1384 }
 0x1ac   : > { %1554 = vrot.lane.b32.xlu0 %v1007_v25, %s5616_s29 }
 0x1ae   : > { %v5962_v27 = vpop.permute.xlu1 %1428 }
 0x1af   : > { %v5964_v29 = vpop.permute.xlu2 %951  ;;  %v1639_v5 = vsel %vm1608_vm5, %v1427_v26, %v5962_v27 }
 0x1b0   : > { %1852 = vmatpush.bf16.msra.mxu0 %v1639_v5  ;;  %5153 = vmatpush.bf16.msra.mxu1 %v1639_v5 }
 0x1b6   : > { %v5968_v32 = vpop.permute.xlu1 %693  ;;  %v5970_v33 = vpop.permute.xlu0 %1414 }
 0x1b7   : > { %v1371_v37 = vpop.permute.xlu2 %1370  ;;  %v710_v41 = vsel %vm701_vm2, %v5838_v17, %v5968_v32  ;;  %v1633_v42 = vsel %vm1608_vm5, %v1413_v9, %v5970_v33 }
 0x1b8   : > { %1430 = vrot.lane.b32.xlu2 %v710_v41, %s5616_s29  ;;  %1853 = vmatpush.bf16.msra.mxu0 %v1633_v42 }
 0x1b9   : > { %5154 = vmatpush.bf16.msra.mxu1 %v1633_v42 }
 0x1be   : > { %v5978_v45 = vpop.permute.xlu1 %955  ;;  %v5980_v35 = vpop.permute.xlu0 %1400 }
 0x1bf   : > { %v5982_v43 = vpop.permute.xlu2 %937  ;;  %v1627_v48 = vsel %vm1608_vm5, %v1399_v16, %v5980_v35 }
 0x1c0   : > { %1566 = vrot.lane.b32.xlu2 %v5886_v39, %s5616_s29  ;;  %1854 = vmatpush.bf16.msra.mxu0 %v1627_v48 }
 0x1c1   : > { %5155 = vmatpush.bf16.msra.mxu1 %v1627_v48 }
 0x1c6   : > { %v5988_v17 = vpop.permute.xlu1 %679  ;;  %v5990_v31 = vpop.permute.xlu0 %1386 }
 0x1c7   : > { %v1357_v28 = vpop.permute.xlu2 %1356  ;;  %v1621_v51 = vsel %vm1608_vm5, %v1385_v22, %v5990_v31  ;;  %v704_v62 = vsel %vm701_vm2, %v5845_v24, %v5988_v17 }
 0x1c8   : > { %1855 = vmatpush.bf16.msra.mxu0 %v1621_v51  ;;  %5156 = vmatpush.bf16.msra.mxu1 %v1621_v51 }
 0x1ce   : > { %v5994_v52 = vpop.permute.xlu1 %941  ;;  %v954_v54 = vpop.permute.xlu0 %953 }
 0x1cf   : > { %v911_v55 = vpop.permute.xlu2 %910  ;;  %v973_v39 = vsel %vm965_vm6, %v954_v54, %v5978_v45  ;;  %v972_v57 = vsel %vm965_vm6, %v5964_v29, %v954_v54 }
 0x1d0   : > { %1542 = vrot.lane.b32.xlu1 %v973_v39, %s5616_s29  ;;  %1540 = vrot.lane.b32.xlu0 %v972_v57, %s5616_s29  ;;  %v5114_v57 = vld [vmem:[#allocation2 + $0x10] sm:$0xf] }
 0x1d6   : > { %v6002_v58 = vpop.permute.xlu0 %1372  ;;  %v6011_v0 = vpop.permute.xlu1 %652 }
 0x1d7   : > { %v6004_v61 = vpop.permute.xlu2 %638  ;;  %v1615_v44 = vsel %vm1608_vm5, %v1371_v37, %v6002_v58  ;;  %v669_v9 = vsel %vm660_vm3, %v5854_v30, %v6011_v0 }
 0x1d8   : > { %1416 = vrot.lane.b32.xlu0 %v704_v62, %s5616_s29  ;;  %1856 = vmatpush.bf16.msra.mxu0 %v1615_v44  ;;  %v663_v63 = vsel %vm660_vm3, %v5863_v36, %v6004_v61  ;;  %v4820_v62 = vld [vmem:[#allocation2 + $0x2c] sm:$0xf0] }
 0x1d9   : > { %5157 = vmatpush.bf16.msra.mxu1 %v1615_v44 }
 0x1de   : > { %v940_v1 = vpop.permute.xlu0 %939  ;;  %v6024_v24 = vpop.permute.xlu1 %914 }
 0x1df   : > { %v6014_v2 = vpop.permute.xlu2 %900  ;;  %v967_v4 = vsel %vm965_vm6, %v940_v1, %v5994_v52  ;;  %v966_v6 = vsel %vm965_vm6, %v5982_v43, %v940_v1 }
 0x1e0   : > { %1552 = vrot.lane.b32.xlu0 %v5900_v34, %s5616_s29  ;;  %1528 = vrot.lane.b32.xlu2 %v967_v4, %s5616_s29 }
 0x1e1   : > { %1526 = vrot.lane.b32.xlu1 %v966_v6, %s5616_s29 }
 0x1e6   : > { %v6026_v7 = vpop.permute.xlu0 %1358  ;;  %v899_v34 = vpop.permute.xlu1 %898 }
 0x1e7   : > { %v6028_v59 = vpop.permute.xlu2 %819  ;;  %v1609_v8 = vsel %vm1608_vm5, %v1357_v28, %v6026_v7  ;;  %v926_v19 = vsel %vm924_vm7, %v899_v34, %v6014_v2 }
 0x1e8   : > { %1857 = vmatpush.bf16.msra.mxu0 %v1609_v8  ;;  %5158 = vmatpush.bf16.msra.mxu1 %v1609_v8 }
 0x1e9   : > { %1402 = vrot.lane.b32.xlu1 %v669_v9, %s5616_s29 }
 0x1ee   : > { %v913_v10 = vpop.permute.xlu0 %912  ;;  %v818_v30 = vpop.permute.xlu1 %817 }
 0x1ef   : > { %v6036_v11 = vpop.permute.xlu2 %807  ;;  %v932_v13 = vsel %vm924_vm7, %v913_v10, %v6024_v24  ;;  %v931_v16 = vsel %vm924_vm7, %v911_v55, %v913_v10  ;;  %v834_v37 = vsel %vm827_vm8, %v818_v30, %v6028_v59  ;;  %v5099_v10 = vld [vmem:[#allocation2 + $0x6c] sm:$0xf0] }
 0x1f0   : > { %1514 = vrot.lane.b32.xlu0 %v932_v13, %s5616_s29  ;;  %1512 = vrot.lane.b32.xlu2 %v931_v16, %s5616_s29  ;;  %v5096_v13 = vld [vmem:[#allocation2 + $0x54] sm:$0xf] }
 0x1f1   : > { %1538 = vrot.lane.b32.xlu1 %v5964_v29, %s5616_s29  ;;  %v4752_v16 = vld [vmem:[#allocation2 + $0x70] sm:$0xf0] }
 0x1f6   : > { %v897_v18 = vpop.permute.xlu0 %896  ;;  %v806_v36 = vpop.permute.xlu1 %805 }
 0x1f7   : > { %v6047_v53 = vpop.permute.xlu2 %1458  ;;  %v925_v21 = vsel %vm924_vm7, %v897_v18, %v899_v34  ;;  %v829_v41 = vsel %vm827_vm8, %v806_v36, %v6036_v11  ;;  %v4750_v34 = vld [vmem:[#allocation2 + $0x50] sm:$0xf] }
 0x1f8   : > { %v1652_v22 = vsel %vm1608_vm5, %v5911_v47, %v6047_v53  ;;  %1388 = vrot.lane.b32.xlu2 %v663_v63, %s5616_s29  ;;  %1498 = vrot.lane.b32.xlu0 %v925_v21, %s5616_s29  ;;  %v5089_v63 = vld [vmem:[#allocation2 + $0x14] sm:$0xf] }
 0x1f9   : > { %1997 = vmatpush.bf16.msrb.mxu3 %v1652_v22  ;;  %1500 = vrot.lane.b32.xlu1 %v926_v19, %s5616_s29  ;;  %v5092_v19 = vld [vmem:[#allocation2 + $0x2c] sm:$0xf0]  ;;  %v4724_v21 = vld [vmem:[#allocation2 + $0x30] sm:$0xf0] }
 0x1fe   : > { %v816_v25 = vpop.permute.xlu0 %815 }
 0x1ff   : > { %v6059_v26 = vpop.permute.xlu2 %1444  ;;  %v833_v29 = vsel %vm827_vm8, %v816_v25, %v818_v30  ;;  %v6118_v30 = vor.u32 %v5099_v10, %v4750_v34 }
 0x200   : > { %v1646_v5 = vsel %vm1608_vm5, %v5944_v15, %v6059_v26  ;;  %1524 = vrot.lane.b32.xlu2 %v5982_v43, %s5616_s29  ;;  %1374 = vrot.lane.b32.xlu0 %v5722_v20, %s5616_s29  ;;  %v6076_v15 = vpop.permute.xlu1 %1023 }
 0x201   : > { %1998 = vmatpush.bf16.msrb.mxu3 %v1646_v5  ;;  %1484 = vrot.lane.b32.xlu1 %v833_v29, %s5616_s29  ;;  %v1049_v8 = vsel %vm1047_vm1, %v5831_v12, %v6076_v15  ;;  %v4722_v12 = vld [vmem:[#allocation2 + $0x10] sm:$0xf]  ;;  %v4914_v29 = vld [vmem:[%s9656_s2 + $0x60] sm:$0xf] }
 0x202   : > { %v6127_v22 = vor.u32 %v5092_v19, %v4722_v12  ;;  %v5146_v12 = vld [vmem:[%s9656_s2 + $0x98] sm:$0xf0] }
 0x206   : > { %v804_v47 = vpop.permute.xlu0 %803 }
 0x207   : > { %v828_v20 = vsel %vm827_vm8, %v804_v47, %v806_v36  ;;  %v5140_v36 = vld [vmem:[%s9656_s2 + $0x68] sm:$0xf0] }
 0x208   : > { %1486 = vrot.lane.b32.xlu2 %v834_v37, %s5616_s29  ;;  %1510 = vrot.lane.b32.xlu0 %v911_v55, %s5616_s29  ;;  %v6091_v48 = vpop.permute.xlu1 %1570  ;;  %v5121_v55 = vld [vmem:[#allocation2 + $0x50] sm:$0xf]  ;;  %v6143_v5 = vor.u32 %v5140_v36, %v4914_v29 }
 0x209   : > { %1360 = vrot.lane.b32.xlu1 %v5746_v40, %s5616_s29  ;;  %v5108_v37 = vld [vmem:[#allocation2 + $0x50] sm:$0xf] }
 0x20a   : > { %1878 = vmatmul.bf16.vlgmr.msra.gmra.mxu1 %v6143_v5 }
 0x20e   : > { %v6081_v42 = vpop.permute.xlu0 %1037 }
 0x20f   : > { %v1055_v51 = vsel %vm1047_vm1, %v5810_v60, %v6081_v42  ;;  %v6102_v60 = vor.u32 %v5114_v57, %v4820_v62  ;;  %v4772_v57 = vld [vmem:[#allocation2 + $0x2c] sm:$0xf0] }
 0x210   : > { %1472 = vrot.lane.b32.xlu0 %v829_v41, %s5616_s29  ;;  %1470 = vrot.lane.b32.xlu2 %v828_v20, %s5616_s29  ;;  %v6104_v4 = vpop.permute.xlu1 %1556  ;;  %v4796_v41 = vld [vmem:[#allocation2 + $0x6c] sm:$0xf0] }
 0x211   : > { %1496 = vrot.lane.b32.xlu1 %v897_v18, %s5616_s29  ;;  %v6120_v18 = vor.u32 %v5096_v13, %v4752_v16 }
 0x212   : > { %v6086_v43 = vpop.permute.xlu2 %1430 }
 0x213   : > { %v1640_v40 = vsel %vm1608_vm5, %v5962_v27, %v6086_v43  ;;  %v4848_v27 = vld [vmem:[#allocation2 + $0x6c] sm:$0xf0]  ;;  %9753 = vst [vmem:[#allocation5_spill] sm:$0xff] %v6120_v18 }
 0x214   : > { %1999 = vmatpush.bf16.msrb.mxu3 %v1640_v40  ;;  %v4851_v1 = vor.u32 %v5121_v55, %v4848_v27  ;;  %v5143_v55 = vld [vmem:[%s9656_s2 + $0x80] sm:$0xf0] }
 0x216   : > { %v1569_v28 = vpop.permute.xlu0 %1568 }
 0x217   : > { %v1700_v54 = vsel %vm1608_vm5, %v1569_v28, %v6091_v48 }
 0x218   : > { %1482 = vrot.lane.b32.xlu2 %v816_v25, %s5616_s29  ;;  %1598 = vrot.lane.b32.xlu0 %v1055_v51, %s5616_s29  ;;  %v6129_v25 = vor.u32 %v5089_v63, %v4724_v21  ;;  %v4799_v51 = vor.u32 %v5108_v37, %v4796_v41 }
 0x219   : > { %1468 = vrot.lane.b32.xlu1 %v804_v47, %s5616_s29  ;;  %2046 = vmatpush.bf16.msrb.mxu2 %v1700_v54  ;;  %v4926_v54 = vld [vmem:[%s9656_s2 + $0x78] sm:$0xf] }
 0x21a   : > { %v1567_v39 = vpop.permute.xlu2 %1566  ;;  %9754 = vst [vmem:[#allocation6_spill] sm:$0xff] %v6129_v25  ;;  %v6169_v27 = vor.u32 %v5143_v55, %v4926_v54 }
 0x21b   : > { %v1699_v44 = vsel %vm1608_vm5, %v1567_v39, %v1569_v28  ;;  %v5102_v39 = vld [vmem:[#allocation2 + $0x10] sm:$0xf] }
 0x21c   : > { %1899 = vmatpush.bf16.msrb.mxu1 %v1699_v44  ;;  %9755 = vst [vmem:[#allocation7_spill] sm:$0xff] %v6169_v27 }
 0x21d   : > { %1883 = vmatmul.bf16.gmra.mxu1 %v6169_v27 }
 0x21e   : > { %v6106_v6 = vpop.permute.xlu0 %1554 }
 0x21f   : > { %v1694_v9 = vsel %vm1608_vm5, %v6106_v6, %v6104_v4 }
 0x220   : > { %1584 = vrot.lane.b32.xlu2 %v1049_v8, %s5616_s29  ;;  %998 = vrot.lane.b32.xlu0 %v4851_v1, %s5615_s28 }
 0x221   : > { %984 = vrot.lane.b32.xlu1 %v6102_v60, %s5615_s28  ;;  %2047 = vmatpush.bf16.msrb.mxu2 %v1694_v9  ;;  %v4775_v9 = vor.u32 %v5102_v39, %v4772_v57 }
 0x228   : > { %957 = vrot.lane.b32.xlu2 %v4851_v1, %s5617_s30  ;;  %736 = vrot.lane.b32.xlu0 %v6118_v30, %s5611_s24 }
 0x229   : > { %738 = vrot.lane.b32.xlu1 %v6120_v18, %s5611_s24 }
 0x230   : > { %943 = vrot.lane.b32.xlu2 %v6102_v60, %s5617_s30  ;;  %722 = vrot.lane.b32.xlu0 %v6127_v22, %s5611_s24 }
 0x231   : > { %724 = vrot.lane.b32.xlu1 %v6129_v25, %s5611_s24 }
 0x238   : > { %916 = vrot.lane.b32.xlu2 %v4851_v1, %s5618_s5  ;;  %695 = vrot.lane.b32.xlu0 %v6118_v30, %s5613_s26 }
 0x239   : > { %697 = vrot.lane.b32.xlu1 %v6120_v18, %s5613_s26 }
 0x23a   : > { %v6155_v47 = vpop.permute.xlu2 %1528 }
 0x240   : > { %902 = vrot.lane.b32.xlu2 %v6102_v60, %s5618_s5  ;;  %681 = vrot.lane.b32.xlu0 %v6127_v22, %s5613_s26 }
 0x241   : > { %683 = vrot.lane.b32.xlu1 %v6129_v25, %s5613_s26 }
 0x242   : > { %v6159_v20 = vpop.permute.xlu1 %1542  ;;  %v1541_v40 = vpop.permute.xlu0 %1540 }
 0x243   : > { %v1688_v28 = vsel %vm1608_vm5, %v1541_v40, %v6159_v20 }
 0x244   : > { %2048 = vmatpush.bf16.msrb.mxu2 %v1688_v28 }
 0x248   : > { %821 = vrot.lane.b32.xlu2 %v4799_v51, %s5619_s6  ;;  %654 = vrot.lane.b32.xlu0 %v6118_v30, %s5614_s27 }
 0x249   : > { %656 = vrot.lane.b32.xlu1 %v6120_v18, %s5614_s27  ;;  %v5142_v18 = vld [vmem:[%s9656_s2 + $0x7c] sm:$0xf] }
 0x24a   : > { %v1513_v62 = vpop.permute.xlu2 %1512  ;;  %v6177_v44 = vpop.permute.xlu0 %1416 }
 0x24b   : > { %v1634_v8 = vsel %vm1608_vm5, %v5970_v33, %v6177_v44 }
 0x24c   : > { %2000 = vmatpush.bf16.msrb.mxu3 %v1634_v8 }
 0x250   : > { %1039 = vrot.lane.b32.xlu2 %v4851_v1, %s5612_s25  ;;  %809 = vrot.lane.b32.xlu0 %v4775_v9, %s5619_s6  ;;  %v4938_v1 = vld [vmem:[%s9656_s2 + $0x90] sm:$0xf] }
 0x251   : > { %640 = vrot.lane.b32.xlu1 %v6127_v22, %s5614_s27  ;;  %v6198_v19 = vor.u32 %v5146_v12, %v4938_v1  ;;  %v5129_v1 = vld [vmem:[%s9656_s2 + $0x10] sm:$0xf0] }
 0x252   : > { %v6186_v34 = vpop.permute.xlu2 %1388  ;;  %v1553_v10 = vpop.permute.xlu0 %1552 }
 0x253   : > { %v1527_v13 = vpop.permute.xlu1 %1526  ;;  %v1693_v16 = vsel %vm1608_vm5, %v1553_v10, %v6106_v6  ;;  %9756 = vst [vmem:[#allocation8_spill] sm:$0xff] %v6198_v19  ;;  %1888 = vmatmul.bf16.gmra.mxu1 %v6198_v19  ;;  %v1622_v29 = vsel %vm1608_vm5, %v5990_v31, %v6186_v34  ;;  %v5149_v31 = vld [vmem:[%s9656_s2 + $0xb0] sm:$0xf0] }
 0x254   : > { %1900 = vmatpush.bf16.msrb.mxu1 %v1693_v16  ;;  %v1682_v33 = vsel %vm1608_vm5, %v1527_v13, %v6155_v47 }
 0x255   : > { %2049 = vmatpush.bf16.msrb.mxu2 %v1682_v33  ;;  %v4874_v33 = vld [vmem:[%s9656_s2 + $0x8] sm:$0xf] }
 0x256   : > { %v6247_v12 = vor.u32 %v5129_v1, %v4874_v33 }
 0x258   : > { %1025 = vrot.lane.b32.xlu0 %v6102_v60, %s5612_s25  ;;  %642 = vrot.lane.b32.xlu2 %v6129_v25, %s5614_s27  ;;  %9757 = vst [vmem:[#allocation9_spill] sm:$0xff] %v6247_v12  ;;  %v5134_v25 = vld [vmem:[%s9656_s2 + $0x38] sm:$0xf0] }
 0x259   : > { %4960 = vmatmul.msk.bf16.vlgmr.msra.gmra.mxu2 %vm1825_vm9, %v6247_v12 }
 0x25a   : > { %v1525_v6 = vpop.permute.xlu2 %1524 }
 0x25b   : > { %v6205_v63 = vpop.permute.xlu1 %1402  ;;  %v1681_v54 = vsel %vm1608_vm5, %v1525_v6, %v1527_v13 }
 0x25c   : > { %v1628_v21 = vsel %vm1608_vm5, %v5980_v35, %v6205_v63  ;;  %v4950_v35 = vld [vmem:[%s9656_s2 + $0xa8] sm:$0xf] }
 0x25d   : > { %2001 = vmatpush.bf16.msrb.mxu3 %v1628_v21  ;;  %v6226_v51 = vor.u32 %v5149_v31, %v4950_v35 }
 0x261   : > { %2002 = vmatpush.bf16.msrb.mxu3 %v1622_v29 }
 0x262   : > { %v6213_v36 = vpop.permute.xlu2 %1486  ;;  %v6215_v37 = vpop.permute.xlu0 %1514 }
 0x263   : > { %v1539_v60 = vpop.permute.xlu1 %1538  ;;  %v1676_v41 = vsel %vm1608_vm5, %v1513_v62, %v6215_v37  ;;  %1893 = vmatmul.bf16.gmra.mxu1 %v6226_v51 }
 0x264   : > { %v1687_v28 = vsel %vm1608_vm5, %v1539_v60, %v1541_v40  ;;  %2050 = vmatpush.bf16.msrb.mxu2 %v1676_v41 }
 0x265   : > { %1901 = vmatpush.bf16.msrb.mxu1 %v1687_v28 }
 0x269   : > { %1902 = vmatpush.bf16.msrb.mxu1 %v1681_v54 }
 0x26a   : > { %v1471_v55 = vpop.permute.xlu2 %1470  ;;  %v1499_v39 = vpop.permute.xlu0 %1498 }
 0x26b   : > { %v6230_v40 = vpop.permute.xlu1 %1500 }
 0x26c   : > { %v1670_v57 = vsel %vm1608_vm5, %v1499_v39, %v6230_v40 }
 0x26d   : > { %2051 = vmatpush.bf16.msrb.mxu2 %v1670_v57  ;;  %v4886_v57 = vld [vmem:[%s9656_s2 + $0x20] sm:$0xf] }
 0x272   : > { %v1483_v8 = vpop.permute.xlu2 %1482  ;;  %v6234_v9 = vpop.permute.xlu0 %1374 }
 0x273   : > { %v1485_v10 = vpop.permute.xlu1 %1484  ;;  %v1616_v16 = vsel %vm1608_vm5, %v6002_v58, %v6234_v9 }
 0x274   : > { %2003 = vmatpush.bf16.msrb.mxu3 %v1616_v16  ;;  %v1664_v13 = vsel %vm1608_vm5, %v1485_v10, %v6213_v36  ;;  %v5132_v16 = vld [vmem:[%s9656_s2 + $0x28] sm:$0xf0] }
 0x275   : > { %2052 = vmatpush.bf16.msrb.mxu2 %v1664_v13  ;;  %v6283_v13 = vor.u32 %v5132_v16, %v4886_v57 }
 0x277   : > { %9759 = vst [vmem:[#allocation11_spill] sm:$0xff] %v6283_v13  ;;  %4961 = vmatmul.msk.bf16.gmra.mxu2 %vm1825_vm9, %v6283_v13 }
 0x27a   : > { %v6249_v6 = vpop.permute.xlu2 %1584  ;;  %v1511_v21 = vpop.permute.xlu0 %1510 }
 0x27b   : > { %v6251_v58 = vpop.permute.xlu1 %1360  ;;  %v1675_v29 = vsel %vm1608_vm5, %v1511_v21, %v1513_v62 }
 0x27c   : > { %1903 = vmatpush.bf16.msrb.mxu1 %v1675_v29  ;;  %v1610_v60 = vsel %vm1608_vm5, %v6026_v7, %v6251_v58  ;;  %v1663_v7 = vsel %vm1608_vm5, %v1483_v8, %v1485_v10 }
 0x27d   : > { %2004 = vmatpush.bf16.msrb.mxu3 %v1610_v60 }
 0x282   : > { %v6259_v41 = vpop.permute.xlu2 %957  ;;  %v6261_v28 = vpop.permute.xlu0 %1472 }
 0x283   : > { %9758 = vst [vmem:[#allocation10_spill] sm:$0xff] %v6259_v41  ;;  %v1497_v35 = vpop.permute.xlu1 %1496  ;;  %v974_v31 = vsel %vm965_vm6, %v5978_v45, %v6259_v41  ;;  %v1658_v62 = vsel %vm1608_vm5, %v1471_v55, %v6261_v28  ;;  %v5127_v45 = vld [vmem:[%s9656_s2 + $0x4] sm:$0xf]  ;;  %v5112_v41 = vld [vmem:[#allocation2 + $0x70] sm:$0xf0] }
 0x284   : > { %1544 = vrot.lane.b32.xlu0 %v974_v31, %s5616_s29  ;;  %v1669_v54 = vsel %vm1608_vm5, %v1497_v35, %v1499_v39  ;;  %2053 = vmatpush.bf16.msrb.mxu2 %v1658_v62  ;;  %v4868_v39 = vld [vmem:[%s9656_s2 + $0xc] sm:$0xf0]  ;;  %v1706_v35 = vsel %vm1608_vm5, %v5924_v3, %v6249_v6 }
 0x285   : > { %1904 = vmatpush.bf16.msrb.mxu1 %v1669_v54  ;;  %v6299_v60 = vor.u32 %v5127_v45, %v4868_v39  ;;  %v4898_v54 = vld [vmem:[%s9656_s2 + $0x38] sm:$0xf] }
 0x287   : > { %9761 = vst [vmem:[#allocation13_spill] sm:$0xff] %v6299_v60 }
 0x289   : > { %1905 = vmatpush.bf16.msrb.mxu1 %v1663_v7 }
 0x28a   : > { %v6285_v8 = vpop.permute.xlu2 %943  ;;  %v6287_v10 = vpop.permute.xlu0 %1598 }
 0x28b   : > { %9760 = vst [vmem:[#allocation12_spill] sm:$0xff] %v6285_v8  ;;  %v1469_v33 = vpop.permute.xlu1 %1468  ;;  %v968_v1 = vsel %vm965_vm6, %v5994_v52, %v6285_v8  ;;  %v1712_v21 = vsel %vm1608_vm5, %v5942_v14, %v6287_v10  ;;  %v4928_v8 = vld [vmem:[%s9656_s2 + $0x84] sm:$0xf0] }
 0x28c   : > { %1530 = vrot.lane.b32.xlu0 %v968_v1, %s5616_s29  ;;  %v1657_v29 = vsel %vm1608_vm5, %v1469_v33, %v1471_v55  ;;  %2101 = vmatpush.bf16.msrb.mxu0 %v1712_v21 }
 0x28d   : > { %1906 = vmatpush.bf16.msrb.mxu1 %v1657_v29 }
 0x290   : > { %2102 = vmatpush.bf16.msrb.mxu0 %v1706_v35  ;;  %1907 = vmatmul.bf16.vlgmr.msrb.gmra.mxu1 %v6299_v60 }
 0x292   : > { %v6305_v52 = vpop.permute.xlu2 %916  ;;  %v6307_v14 = vpop.permute.xlu0 %998 }
 0x293   : > { %9762 = vst [vmem:[#allocation14_spill] sm:$0xff] %v6305_v52  ;;  %v6309_v31 = vpop.permute.xlu1 %984  ;;  %v933_v55 = vsel %vm924_vm7, %v6024_v24, %v6305_v52  ;;  %v1015_v62 = vsel %vm1006_vm4, %v5894_v23, %v6307_v14  ;;  %v5135_v24 = vld [vmem:[%s9656_s2 + $0x40] sm:$0xf0]  ;;  %v5130_v23 = vld [vmem:[%s9656_s2 + $0x1c] sm:$0xf] }
 0x294   : > { %9763 = vst [vmem:[#allocation15_spill] sm:$0xff] %v6309_v31  ;;  %v1009_v3 = vsel %vm1006_vm4, %v5913_v49, %v6309_v31  ;;  %1516 = vrot.lane.b32.xlu0 %v933_v55, %s5616_s29  ;;  %1572 = vrot.lane.b32.xlu1 %v1015_v62, %s5616_s29  ;;  %v4880_v49 = vld [vmem:[%s9656_s2 + $0x24] sm:$0xf0]  ;;  %v6335_v7 = vor.u32 %v5135_v24, %v4898_v54  ;;  %v5128_v54 = vld [vmem:[%s9656_s2 + $0x8] sm:$0xf0] }
 0x295   : > { %1558 = vrot.lane.b32.xlu2 %v1009_v3, %s5616_s29  ;;  %v6352_v21 = vor.u32 %v5130_v23, %v4880_v49  ;;  %v4866_v3 = vld [vmem:[%s9656_s2] sm:$0xf]  ;;  %v5138_v24 = vld [vmem:[%s9656_s2 + $0x58] sm:$0xf0]  ;;  %v5133_v23 = vld [vmem:[%s9656_s2 + $0x34] sm:$0xf] }
 0x296   : > { %9764 = vst [vmem:[#allocation16_spill] sm:$0xff] %v6335_v7  ;;  %4962 = vmatmul.msk.bf16.gmra.mxu2 %vm1825_vm9, %v6335_v7  ;;  %v4892_v49 = vld [vmem:[%s9656_s2 + $0x3c] sm:$0xf0] }
 0x297   : > { %9766 = vst [vmem:[#allocation18_spill] sm:$0xff] %v6352_v21 }
 0x29a   : > { %v6337_v57 = vpop.permute.xlu2 %902  ;;  %v737_v16 = vpop.permute.xlu0 %736 }
 0x29b   : > { %9765 = vst [vmem:[#allocation17_spill] sm:$0xff] %v6337_v57  ;;  %v6339_v45 = vpop.permute.xlu1 %738  ;;  %v927_v39 = vsel %vm924_vm7, %v6014_v2, %v6337_v57  ;;  %v752_v33 = vsel %vm742_vm0, %v5884_v38, %v737_v16  ;;  %v4958_v57 = vld [vmem:[%s9656_s2 + $0xb0] sm:$0xf] }
 0x29c   : > { %1502 = vrot.lane.b32.xlu0 %v927_v39, %s5616_s29  ;;  %v753_v1 = vsel %vm742_vm0, %v737_v16, %v6339_v45  ;;  %1460 = vrot.lane.b32.xlu1 %v752_v33, %s5616_s29 }
 0x29d   : > { %1462 = vrot.lane.b32.xlu2 %v753_v1, %s5616_s29 }
 0x2a0   : > { %1912 = vmatmul.bf16.gmra.mxu1 %v6352_v21 }
 0x2a2   : > { %v6356_v2 = vpop.permute.xlu2 %821  ;;  %v723_v29 = vpop.permute.xlu0 %722 }
 0x2a3   : > { %9767 = vst [vmem:[#allocation19_spill] sm:$0xff] %v6356_v2  ;;  %v6358_v38 = vpop.permute.xlu1 %724  ;;  %v835_v35 = vsel %vm827_vm8, %v6028_v59, %v6356_v2  ;;  %v746_v55 = vsel %vm742_vm0, %v5904_v46, %v723_v29  ;;  %v6376_v59 = vor.u32 %v5128_v54, %v4866_v3  ;;  %v4910_v46 = vld [vmem:[%s9656_s2 + $0x50] sm:$0xf] }
 0x2a4   : > { %1488 = vrot.lane.b32.xlu0 %v835_v35, %s5616_s29  ;;  %v747_v62 = vsel %vm742_vm0, %v723_v29, %v6358_v38  ;;  %1446 = vrot.lane.b32.xlu1 %v746_v55, %s5616_s29  ;;  %v6391_v16 = vor.u32 %v5138_v24, %v4910_v46 }
 0x2a5   : > { %1448 = vrot.lane.b32.xlu2 %v747_v62, %s5616_s29  ;;  %9768 = vst [vmem:[#allocation20_spill] sm:$0xff] %v6376_v59  ;;  %1858 = vmatmul.bf16.vlgmr.msra.gmra.mxu0 %v6376_v59  ;;  %v6408_v62 = vor.u32 %v5133_v23, %v4892_v49  ;;  %v4878_v49 = vld [vmem:[%s9656_s2 + $0x18] sm:$0xf] }
 0x2a6   : > { %9769 = vst [vmem:[#allocation21_spill] sm:$0xff] %v6391_v16  ;;  %4963 = vmatmul.msk.bf16.gmra.mxu2 %vm1825_vm9, %v6391_v16 }
 0x2a7   : > { %9770 = vst [vmem:[#allocation22_spill] sm:$0xff] %v6408_v62 }
 0x2aa   : > { %v6393_v39 = vpop.permute.xlu2 %1039  ;;  %v696_v33 = vpop.permute.xlu0 %695 }
 0x2ab   : > { %v1056_v1 = vsel %vm1047_vm1, %v6081_v42, %v6393_v39  ;;  %v6398_v29 = vpop.permute.xlu1 %697  ;;  %v711_v35 = vsel %vm701_vm2, %v5968_v32, %v696_v33  ;;  %v4934_v42 = vld [vmem:[%s9656_s2 + $0x80] sm:$0xf]  ;;  %v5144_v32 = vld [vmem:[%s9656_s2 + $0x88] sm:$0xf0] }
 0x2ac   : > { %1600 = vrot.lane.b32.xlu0 %v1056_v1, %s5616_s29  ;;  %v712_v55 = vsel %vm701_vm2, %v696_v33, %v6398_v29  ;;  %1432 = vrot.lane.b32.xlu1 %v711_v35, %s5616_s29  ;;  %v6417_v3 = vor.u32 %v5144_v32, %v4934_v42  ;;  %v5131_v33 = vld [vmem:[%s9656_s2 + $0x20] sm:$0xf0]  ;;  %v5141_v35 = vld [vmem:[%s9656_s2 + $0x70] sm:$0xf0] }
 0x2ad   : > { %1434 = vrot.lane.b32.xlu2 %v712_v55, %s5616_s29  ;;  %v6436_v1 = vor.u32 %v5131_v33, %v4878_v49  ;;  %v5136_v55 = vld [vmem:[%s9656_s2 + $0x4c] sm:$0xf]  ;;  %v4904_v42 = vld [vmem:[%s9656_s2 + $0x54] sm:$0xf0] }
 0x2ae   : > { %9771 = vst [vmem:[#allocation23_spill] sm:$0xff] %v6417_v3  ;;  %4965 = vmatmul.msk.bf16.vlgmr.msra.gmra.mxu3 %vm1825_vm9, %v6417_v3  ;;  %v6462_v33 = vor.u32 %v5136_v55, %v4904_v42 }
 0x2af   : > { %9772 = vst [vmem:[#allocation24_spill] sm:$0xff] %v6436_v1 }
 0x2b0   : > { %1917 = vmatmul.bf16.gmra.mxu1 %v6408_v62  ;;  %9773 = vst [vmem:[#allocation25_spill] sm:$0xff] %v6462_v33 }
 0x2b2   : > { %v682_v54 = vpop.permute.xlu0 %681  ;;  %v6478_v55 = vpop.permute.xlu2 %642 }
 0x2b3   : > { %v6422_v46 = vpop.permute.xlu1 %683  ;;  %v705_v24 = vsel %vm701_vm2, %v5988_v17, %v682_v54  ;;  %v4922_v17 = vld [vmem:[%s9656_s2 + $0x68] sm:$0xf] }
 0x2b4   : > { %v706_v23 = vsel %vm701_vm2, %v682_v54, %v6422_v46  ;;  %1418 = vrot.lane.b32.xlu1 %v705_v24, %s5616_s29  ;;  %v6451_v32 = vor.u32 %v5141_v35, %v4922_v17  ;;  %v4946_v17 = vld [vmem:[%s9656_s2 + $0x98] sm:$0xf]  ;;  %v6471_v35 = vpop.f32.mrf.mxu1 }
 0x2b5   : > { %1420 = vrot.lane.b32.xlu2 %v706_v23, %s5616_s29  ;;  %1863 = vmatmul.bf16.gmra.mxu0 %v6436_v1 }
 0x2b6   : > { %4964 = vmatmul.msk.bf16.gmra.mxu2 %vm1825_vm9, %v6451_v32 }
 0x2ba   : > { %v655_v54 = vpop.permute.xlu0 %654 }
 0x2bb   : > { %v6453_v24 = vpop.permute.xlu1 %656  ;;  %v670_v23 = vsel %vm660_vm3, %v6011_v0, %v655_v54  ;;  %v5147_v0 = vld [vmem:[%s9656_s2 + $0xa0] sm:$0xf0] }
 0x2bc   : > { %v671_v49 = vsel %vm660_vm3, %v655_v54, %v6453_v24  ;;  %1404 = vrot.lane.b32.xlu1 %v670_v23, %s5616_s29  ;;  %v6473_v2 = vor.u32 %v5147_v0, %v4946_v17  ;;  %v4890_v0 = vld [vmem:[%s9656_s2 + $0x30] sm:$0xf] }
 0x2bd   : > { %1406 = vrot.lane.b32.xlu2 %v671_v49, %s5616_s29 }
 0x2be   : > { %9774 = vst [vmem:[#allocation26_spill] sm:$0xff] %v6473_v2  ;;  %4966 = vmatmul.msk.bf16.gmra.mxu3 %vm1825_vm9, %v6473_v2 }
 0x2c0   : > { %1922 = vmatmul.bf16.gmra.mxu1 %v6462_v33 }
 0x2c2   : > { %v6480_v42 = vpop.permute.xlu0 %809 }
 0x2c3   : > { %9775 = vst [vmem:[#allocation27_spill] sm:$0xff] %v6480_v42  ;;  %v641_v54 = vpop.permute.xlu1 %640  ;;  %v830_v23 = vsel %vm827_vm8, %v6036_v11, %v6480_v42  ;;  %v6498_v11 = vor.u32 %v5134_v25, %v4890_v0  ;;  %v5100_v0 = vld [vmem:[#allocation2 + $0x74] sm:$0xf0] }
 0x2c4   : > { %v664_v49 = vsel %vm660_vm3, %v6004_v61, %v641_v54  ;;  %v665_v17 = vsel %vm660_vm3, %v641_v54, %v6478_v55  ;;  %1474 = vrot.lane.b32.xlu1 %v830_v23, %s5616_s29  ;;  %v6500_v61 = vpop.f32.mrf.mxu1  ;;  %v5139_v54 = vld [vmem:[%s9656_s2 + $0x64] sm:$0xf]  ;;  %v4916_v23 = vld [vmem:[%s9656_s2 + $0x6c] sm:$0xf0] }
 0x2c5   : > { %1392 = vrot.lane.b32.xlu0 %v665_v17, %s5616_s29  ;;  %1390 = vrot.lane.b32.xlu2 %v664_v49, %s5616_s29  ;;  %9776 = vst [vmem:[#allocation28_spill] sm:$0xff] %v6498_v11  ;;  %v6516_v25 = vor.u32 %v5139_v54, %v4916_v23  ;;  %v4758_v17 = vld [vmem:[#allocation2 + $0x58] sm:$0xf] }
 0x2c6   : > { %1868 = vmatmul.bf16.gmra.mxu0 %v6498_v11  ;;  %2054 = vmatmul.bf16.vlgmr.msrb.gmra.mxu2 %v6299_v60  ;;  %v6531_v54 = vor.u32 %v5100_v0, %v4758_v17  ;;  %v4730_v23 = vld [vmem:[#allocation2 + $0x18] sm:$0xf]  ;;  %v4854_v0 = vld [vmem:[#allocation2 + $0x54] sm:$0xf] }
 0x2c8   : > { %9779 = vst [vmem:[#allocation31_spill] sm:$0xff] %v6531_v54 }
 0x2ca   : > { %v6509_v42 = vpop.permute.xlu0 %1025 }
 0x2cb   : > { %9777 = vst [vmem:[#allocation29_spill] sm:$0xff] %v6509_v42  ;;  %v1050_v49 = vsel %vm1047_vm1, %v6076_v15, %v6509_v42  ;;  %v5150_v15 = vld [vmem:[%s9656_s2 + $0xb8] sm:$0xf0] }
 0x2cc   : > { %1586 = vrot.lane.b32.xlu1 %v1050_v49, %s5616_s29  ;;  %v6528_v42 = vor.u32 %v5150_v15, %v4958_v57  ;;  %v5137_v57 = vld [vmem:[%s9656_s2 + $0x50] sm:$0xf0]  ;;  %v5093_v49 = vld [vmem:[#allocation2 + $0x34] sm:$0xf0] }
 0x2cd   : > { %1378 = vrot.lane.b32.xlu0 %v6118_v30, %s5616_s29  ;;  %1376 = vrot.lane.b32.xlu2 %v5784_v50, %s5616_s29  ;;  %v6535_v50 = vpop.f32.mrf.mxu1  ;;  %v4902_v30 = vld [vmem:[%s9656_s2 + $0x48] sm:$0xf]  ;;  %v6552_v15 = vor.u32 %v5093_v49, %v4730_v23  ;;  %v4856_v23 = vld [vmem:[#allocation2 + $0x74] sm:$0xf0]  ;;  %v4826_v49 = vld [vmem:[#allocation2 + $0x14] sm:$0xf] }
 0x2ce   : > { %9778 = vst [vmem:[#allocation30_spill] sm:$0xff] %v6528_v42  ;;  %4967 = vmatmul.msk.bf16.gmra.mxu3 %vm1825_vm9, %v6528_v42  ;;  %v6549_v17 = vor.u32 %v5137_v57, %v4902_v30  ;;  %v6565_v30 = vor.u32 %v5142_v18, %v4928_v8  ;;  %v5122_v57 = vld [vmem:[#allocation2 + $0x58] sm:$0xf] }
 0x2cf   : > { %9780 = vst [vmem:[#allocation32_spill] sm:$0xff] %v6535_v50  ;;  %v5115_v18 = vld [vmem:[#allocation2 + $0x18] sm:$0xf] }
 0x2d0   : > { %1927 = vmatmul.bf16.gmra.mxu1 %v6516_v25  ;;  %9781 = vst [vmem:[#allocation33_spill] sm:$0xff] %v6552_v15  ;;  %v4828_v8 = vld [vmem:[#allocation2 + $0x34] sm:$0xf0] }
 0x2d1   : > { %9783 = vst [vmem:[#allocation35_spill] sm:$0xff] %v6565_v30 }
 0x2d4   : > { %1362 = vrot.lane.b32.xlu1 %v5800_v56, %s5616_s29  ;;  %v5125_v56 = vld [vmem:[#allocation2 + $0x70] sm:$0xf0] }
 0x2d5   : > { %740 = vrot.lane.b32.xlu0 %v6531_v54, %s5611_s24  ;;  %1364 = vrot.lane.b32.xlu2 %v6127_v22, %s5616_s29  ;;  %v4855_v52 = vor.u32 %v5125_v56, %v4854_v0  ;;  %v6560_v22 = vpop.f32.mrf.mxu1  ;;  %v5118_v0 = vld [vmem:[#allocation2 + $0x30] sm:$0xf0]  ;;  %v6570_v56 = vor.u32 %v5122_v57, %v4856_v23  ;;  %v6583_v57 = vor.u32 %v5115_v18, %v4828_v8 }
 0x2d6   : > { %1873 = vmatmul.bf16.gmra.mxu0 %v6549_v17  ;;  %9782 = vst [vmem:[#allocation34_spill] sm:$0xff] %v6560_v22  ;;  %2059 = vmatmul.bf16.gmra.mxu2 %v6352_v21  ;;  %v4827_v60 = vor.u32 %v5118_v0, %v4826_v49  ;;  %v5145_v23 = vld [vmem:[%s9656_s2 + $0x94] sm:$0xf]  ;;  %v4940_v49 = vld [vmem:[%s9656_s2 + $0x9c] sm:$0xf0] }
 0x2d7   : > { %9784 = vst [vmem:[#allocation36_spill] sm:$0xff] %v6570_v56  ;;  %v6594_v0 = vor.u32 %v5145_v23, %v4940_v49 }
 0x2d8   : > { %9786 = vst [vmem:[#allocation38_spill] sm:$0xff] %v6583_v57 }
 0x2dc   : > { %726 = vrot.lane.b32.xlu1 %v6552_v15, %s5611_s24 }
 0x2dd   : > { %1000 = vrot.lane.b32.xlu0 %v4855_v52, %s5615_s28  ;;  %699 = vrot.lane.b32.xlu2 %v6531_v54, %s5613_s26  ;;  %v6579_v21 = vpop.f32.mrf.mxu1 }
 0x2de   : > { %2005 = vmatmul.bf16.vlgmr.msrb.gmra.mxu3 %v6376_v59  ;;  %9785 = vst [vmem:[#allocation37_spill] sm:$0xff] %v6579_v21  ;;  %v6633_v21 = vpop.f32.mrf.mxu2 }
 0x2e0   : > { %1932 = vmatmul.bf16.gmra.mxu1 %v6565_v30 }
 0x2e4   : > { %1002 = vrot.lane.b32.xlu1 %v6570_v56, %s5615_s28 }
 0x2e5   : > { %986 = vrot.lane.b32.xlu0 %v4827_v60, %s5615_s28  ;;  %685 = vrot.lane.b32.xlu2 %v6552_v15, %s5613_s26  ;;  %v6601_v8 = vpop.f32.mrf.mxu1 }
 0x2e6   : > { %4968 = vmatmul.msk.bf16.vlgmr.msrb.gmra.mxu0 %vm1825_vm9, %v6247_v12  ;;  %2064 = vmatmul.bf16.gmra.mxu2 %v6408_v62  ;;  %9788 = vst [vmem:[#allocation40_spill] sm:$0xff] %v6601_v8  ;;  %v5148_v62 = vld [vmem:[%s9656_s2 + $0xac] sm:$0xf]  ;;  %v4952_v8 = vld [vmem:[%s9656_s2 + $0xb4] sm:$0xf0]  ;;  %v6654_v50 = vpop.f32.mrf.mxu2 }
 0x2ec   : > { %988 = vrot.lane.b32.xlu1 %v6583_v57, %s5615_s28 }
 0x2ed   : > { %959 = vrot.lane.b32.xlu0 %v4855_v52, %s5617_s30  ;;  %658 = vrot.lane.b32.xlu2 %v6531_v54, %s5614_s27  ;;  %v6616_v54 = vpop.f32.mrf.mxu1 }
 0x2ee   : > { %2010 = vmatmul.bf16.gmra.mxu3 %v6436_v1  ;;  %9790 = vst [vmem:[#allocation42_spill] sm:$0xff] %v6616_v54  ;;  %v4804_v1 = vld [vmem:[#allocation2 + $0x74] sm:$0xf0] }
 0x2ef   : > { %v6599_v18 = vpop.permute.xlu2 %1558 }
 0x2f0   : > { %9787 = vst [vmem:[#allocation39_spill] sm:$0xff] %v6599_v18  ;;  %1937 = vmatmul.bf16.gmra.mxu1 %v6594_v0  ;;  %v1695_v31 = vsel %vm1608_vm5, %v6104_v4, %v6599_v18 }
 0x2f4   : > { %961 = vrot.lane.b32.xlu1 %v6570_v56, %s5617_s30 }
 0x2f5   : > { %945 = vrot.lane.b32.xlu0 %v4827_v60, %s5617_s30  ;;  %644 = vrot.lane.b32.xlu2 %v6552_v15, %s5614_s27  ;;  %v6627_v15 = vor.u32 %v5148_v62, %v4952_v8 }
 0x2f6   : > { %v6610_v23 = vpop.permute.xlu0 %1544  ;;  %4969 = vmatmul.msk.bf16.gmra.mxu0 %vm1825_vm9, %v6283_v13  ;;  %2069 = vmatmul.bf16.gmra.mxu2 %v6462_v33  ;;  %v6639_v33 = vpop.f32.mrf.mxu1  ;;  %v5109_v13 = vld [vmem:[#allocation2 + $0x58] sm:$0xf] }
 0x2f7   : > { %9789 = vst [vmem:[#allocation41_spill] sm:$0xff] %v6610_v23  ;;  %v6612_v49 = vpop.permute.xlu2 %1462 }
 0x2f8   : > { %9793 = vst [vmem:[#allocation45_spill] sm:$0xff] %v6639_v33 }
 0x2fc   : > { %947 = vrot.lane.b32.xlu1 %v6583_v57, %s5617_s30 }
 0x2fd   : > { %918 = vrot.lane.b32.xlu0 %v4855_v52, %s5618_s5  ;;  %1041 = vrot.lane.b32.xlu2 %v4855_v52, %s5612_s25  ;;  %v4802_v52 = vld [vmem:[#allocation2 + $0x54] sm:$0xf] }
 0x2fe   : > { %v6631_v54 = vpop.permute.xlu0 %1530  ;;  %2015 = vmatmul.bf16.gmra.mxu3 %v6498_v11 }
 0x2ff   : > { %9791 = vst [vmem:[#allocation43_spill] sm:$0xff] %v6631_v54  ;;  %v6635_v22 = vpop.permute.xlu2 %1448 }
 0x300   : > { %9792 = vst [vmem:[#allocation44_spill] sm:$0xff] %v6635_v22  ;;  %1942 = vmatmul.bf16.gmra.mxu1 %v6627_v15 }
 0x304   : > { %920 = vrot.lane.b32.xlu1 %v6570_v56, %s5618_s5  ;;  %v4807_v56 = vor.u32 %v5109_v13, %v4804_v1  ;;  %v5103_v1 = vld [vmem:[#allocation2 + $0x18] sm:$0xf] }
 0x305   : > { %904 = vrot.lane.b32.xlu0 %v4827_v60, %s5618_s5  ;;  %1027 = vrot.lane.b32.xlu2 %v4827_v60, %s5612_s25  ;;  %v4803_v60 = vor.u32 %v5112_v41, %v4802_v52 }
 0x306   : > { %v6645_v62 = vpop.permute.xlu1 %1572  ;;  %v6647_v8 = vpop.permute.xlu0 %1516  ;;  %4970 = vmatmul.msk.bf16.gmra.mxu0 %vm1825_vm9, %v6335_v7  ;;  %2074 = vmatmul.bf16.gmra.mxu2 %v6516_v25 }
 0x307   : > { %9794 = vst [vmem:[#allocation46_spill] sm:$0xff] %v6645_v62  ;;  %v1701_v11 = vsel %vm1608_vm5, %v6091_v48, %v6645_v62  ;;  %v6652_v33 = vpop.permute.xlu2 %1434  ;;  %v4778_v48 = vld [vmem:[#allocation2 + $0x14] sm:$0xf] }
 0x308   : > { %9795 = vst [vmem:[#allocation47_spill] sm:$0xff] %v6647_v8  ;;  %2193 = vmatpush.bf16.msra.mxu3 %v1701_v11  ;;  %v5106_v62 = vld [vmem:[#allocation2 + $0x30] sm:$0xf0]  ;;  %v4780_v11 = vld [vmem:[#allocation2 + $0x34] sm:$0xf0] }
 0x309   : > { %9796 = vst [vmem:[#allocation48_spill] sm:$0xff] %v6652_v33  ;;  %v4779_v18 = vor.u32 %v5106_v62, %v4778_v48  ;;  %v1677_v48 = vsel %vm1608_vm5, %v6215_v37, %v6647_v8 }
 0x30c   : > { %2194 = vmatpush.bf16.msra.mxu3 %v1695_v31  ;;  %906 = vrot.lane.b32.xlu1 %v6583_v57, %s5618_s5  ;;  %v4783_v57 = vor.u32 %v5103_v1, %v4780_v11 }
 0x30d   : > { %823 = vrot.lane.b32.xlu2 %v4803_v60, %s5619_s6  ;;  %825 = vrot.lane.b32.xlu0 %v4807_v56, %s5619_s6  ;;  %v6666_v7 = vpop.f32.mrf.mxu1  ;;  %v1689_v56 = vsel %vm1608_vm5, %v6159_v20, %v6610_v23  ;;  %v6679_v60 = vpop.f32.mrf.mxu2 }
 0x30e   : > { %v1461_v41 = vpop.permute.xlu1 %1460  ;;  %v6668_v13 = vpop.permute.xlu0 %1502  ;;  %2020 = vmatmul.bf16.gmra.mxu3 %v6549_v17 }
 0x30f   : > { %9797 = vst [vmem:[#allocation49_spill] sm:$0xff] %v6668_v13  ;;  %v1653_v4 = vsel %vm1608_vm5, %v6047_v53, %v1461_v41  ;;  %v1654_v31 = vsel %vm1608_vm5, %v1461_v41, %v6612_v49  ;;  %v6674_v52 = vpop.permute.xlu2 %1420  ;;  %v1683_v53 = vsel %vm1608_vm5, %v6155_v47, %v6631_v54 }
 0x310   : > { %9798 = vst [vmem:[#allocation50_spill] sm:$0xff] %v6674_v52  ;;  %2144 = vmatpush.bf16.msra.mxu1 %v1653_v4  ;;  %2195 = vmatpush.bf16.msra.mxu3 %v1689_v56 }
 0x311   : > { %2291 = vmatpush.bf16.msra.mxu0 %v1654_v31 }
 0x314   : > { %811 = vrot.lane.b32.xlu1 %v4779_v18, %s5619_s6  ;;  %2196 = vmatpush.bf16.msra.mxu3 %v1683_v53  ;;  %v1671_v18 = vsel %vm1608_vm5, %v6230_v40, %v6668_v13 }
 0x315   : > { %813 = vrot.lane.b32.xlu2 %v4783_v57, %s5619_s6  ;;  %v1910_v41 = vpop.f32.mrf.mxu1  ;;  %v6700_v57 = vpop.f32.mrf.mxu2 }
 0x316   : > { %v1447_v20 = vpop.permute.xlu1 %1446  ;;  %v6687_v23 = vpop.permute.xlu0 %1488  ;;  %4971 = vmatmul.msk.bf16.gmra.mxu0 %vm1825_vm9, %v6391_v16  ;;  %2079 = vmatmul.bf16.gmra.mxu2 %v6565_v30 }
 0x317   : > { %9799 = vst [vmem:[#allocation51_spill] sm:$0xff] %v6687_v23  ;;  %v6689_v4 = vpop.permute.xlu2 %1406  ;;  %v1647_v62 = vsel %vm1608_vm5, %v6059_v26, %v1447_v20  ;;  %v1648_v47 = vsel %vm1608_vm5, %v1447_v20, %v6635_v22  ;;  %v1665_v40 = vsel %vm1608_vm5, %v6213_v36, %v6687_v23 }
 0x318   : > { %2145 = vmatpush.bf16.msra.mxu1 %v1647_v62  ;;  %2197 = vmatpush.bf16.msra.mxu3 %v1677_v48 }
 0x319   : > { %2292 = vmatpush.bf16.msra.mxu0 %v1648_v47 }
 0x31c   : > { %2198 = vmatpush.bf16.msra.mxu3 %v1671_v18  ;;  %v6734_v18 = vld [vmem:[%s5670_s23] sm:$0xff] }
 0x31d   : > { %v6706_v26 = vpop.f32.mrf.mxu1  ;;  %v6721_v20 = vpop.f32.mrf.mxu2 }
 0x31e   : > { %v1433_v37 = vpop.permute.xlu1 %1432  ;;  %v6708_v1 = vpop.permute.xlu0 %1600  ;;  %2025 = vmatmul.bf16.gmra.mxu3 %v6143_v5 }
 0x31f   : > { %v1391_v11 = vpop.permute.xlu2 %1390  ;;  %v1713_v31 = vsel %vm1608_vm5, %v6287_v10, %v6708_v1  ;;  %v1641_v56 = vsel %vm1608_vm5, %v6086_v43, %v1433_v37  ;;  %v1642_v53 = vsel %vm1608_vm5, %v1433_v37, %v6652_v33  ;;  %v6737_v37 = vld [vmem:[%s5670_s23 + $0x18] sm:$0xff] }
 0x320   : > { %2146 = vmatpush.bf16.msra.mxu1 %v1641_v56  ;;  %2199 = vmatpush.bf16.msra.mxu3 %v1665_v40  ;;  %v1146_v56 = vunpack.c.l.bf16 %v6737_v37 }
 0x321   : > { %2248 = vmatpush.bf16.msra.mxu2 %v1713_v31  ;;  %2293 = vmatpush.bf16.msra.mxu0 %v1642_v53  ;;  %v1140_v31 = vunpack.c.l.bf16 %v6734_v18 }
 0x322   : > { %v1859_v10 = vpop.f32.mrf.mxu0 }
 0x325   : > { %v6723_v62 = vpop.f32.mrf.mxu1  ;;  %v6742_v40 = vpop.f32.mrf.mxu2 }
 0x326   : > { %v1419_v43 = vpop.permute.xlu1 %1418  ;;  %4972 = vmatmul.msk.bf16.gmra.mxu0 %vm1825_vm9, %v6451_v32  ;;  %2084 = vmatmul.bf16.gmra.mxu2 %v6594_v0 }
 0x327   : > { %v6725_v48 = vpop.permute.xlu2 %1376  ;;  %v1635_v36 = vsel %vm1608_vm5, %v6177_v44, %v1419_v43  ;;  %v1636_v47 = vsel %vm1608_vm5, %v1419_v43, %v6674_v52  ;;  %v1860_v43 = vadd.f32 %v1859_v10, %v1140_v31  ;;  %v1623_v10 = vsel %vm1608_vm5, %v6186_v34, %v1391_v11 }
 0x328   : > { %2147 = vmatpush.bf16.msra.mxu1 %v1635_v36  ;;  %2294 = vmatpush.bf16.msra.mxu0 %v1636_v47  ;;  %v1617_v34 = vsel %vm1608_vm5, %v6234_v9, %v6725_v48  ;;  %v6785_v9 = vld [vmem:[%s5670_s23 + $0x30] sm:$0xff] }
 0x329   : > { %v1909_v54 = vadd.f32 %v6666_v7, %v1860_v43 }
 0x32a   : > { %v1861_v44 = vpop.f32.mrf.mxu0 }
 0x32b   : > { %v1862_v23 = vadd.f32 %v1861_v44, %v1146_v56  ;;  %v1958_v33 = vadd.f32 %v6633_v21, %v1909_v54 }
 0x32d   : > { %v6744_v53 = vpop.f32.mrf.mxu1  ;;  %v1911_v52 = vadd.f32 %v1910_v41, %v1862_v23  ;;  %2732 = vst [vmem:[#allocation4 + $0x230] sm:$0xff] %v1958_v33  ;;  %v6764_v21 = vpop.f32.mrf.mxu2 }
 0x32e   : > { %v1405_v13 = vpop.permute.xlu1 %1404  ;;  %2030 = vmatmul.bf16.gmra.mxu3 %v6169_v27 }
 0x32f   : > { %v6746_v36 = vpop.permute.xlu2 %1364  ;;  %v1629_v47 = vsel %vm1608_vm5, %v6205_v63, %v1405_v13  ;;  %v1630_v8 = vsel %vm1608_vm5, %v1405_v13, %v6689_v4  ;;  %v1960_v22 = vadd.f32 %v6654_v50, %v1911_v52  ;;  %v6788_v13 = vld [vmem:[%s5670_s23 + $0x48] sm:$0xff]  ;;  %v1152_v52 = vunpack.c.l.bf16 %v6785_v9 }
 0x330   : > { %9800 = vst [vmem:[#allocation52_spill] sm:$0xff] %v6746_v36  ;;  %2148 = vmatpush.bf16.msra.mxu1 %v1629_v47  ;;  %2295 = vmatpush.bf16.msra.mxu0 %v1630_v8  ;;  %v1158_v41 = vunpack.c.l.bf16 %v6788_v13 }
 0x331   : > { %v6758_v31 = vpop.f32.mrf.mxu3  ;;  %2738 = vst [vmem:[#allocation4 + $0x30] sm:$0xff] %v1960_v22 }
 0x332   : > { %v1864_v63 = vpop.f32.mrf.mxu0 }
 0x333   : > { %v1865_v44 = vadd.f32 %v1864_v63, %v1152_v52 }
 0x334   : > { %2149 = vmatpush.bf16.msra.mxu1 %v1623_v10 }
 0x335   : > { %v6760_v7 = vpop.f32.mrf.mxu1 }
 0x336   : > { %v6762_v23 = vpop.permute.xlu1 %1474  ;;  %4973 = vmatmul.msk.bf16.gmra.mxu0 %vm1825_vm9, %v6417_v3  ;;  %2089 = vmatmul.bf16.gmra.mxu2 %v6627_v15 }
 0x337   : > { %9801 = vst [vmem:[#allocation53_spill] sm:$0xff] %v6762_v23  ;;  %v6766_v54 = vpop.permute.xlu2 %699  ;;  %v6768_v50 = vpop.permute.xlu0 %1392  ;;  %v1659_v33 = vsel %vm1608_vm5, %v6261_v28, %v6762_v23 }
 0x338   : > { %9802 = vst [vmem:[#allocation54_spill] sm:$0xff] %v6766_v54  ;;  %v713_v22 = vsel %vm701_vm2, %v6398_v29, %v6766_v54  ;;  %2150 = vmatpush.bf16.msra.mxu1 %v1617_v34  ;;  %2200 = vmatpush.bf16.msra.mxu3 %v1659_v33  ;;  %v1624_v8 = vsel %vm1608_vm5, %v1391_v11, %v6768_v50 }
 0x339   : > { %1436 = vrot.lane.b32.xlu2 %v713_v22, %s5616_s29  ;;  %2296 = vmatpush.bf16.msra.mxu0 %v1624_v8  ;;  %v6790_v28 = vpop.f32.mrf.mxu3  ;;  %v1914_v33 = vadd.f32 %v6706_v26, %v1865_v44  ;;  %v6821_v26 = vld [vmem:[%s5670_s23 + $0xc0] sm:$0xff] }
 0x33a   : > { %v1866_v29 = vpop.f32.mrf.mxu0 }
 0x33b   : > { %v1867_v11 = vadd.f32 %v1866_v29, %v1158_v41  ;;  %v1963_v52 = vadd.f32 %v6679_v60, %v1914_v33  ;;  %v6816_v41 = vpop.f32.mrf.mxu2  ;;  %v1188_v29 = vunpack.c.l.bf16 %v6821_v26 }
 0x33d   : > { %v6795_v56 = vpop.f32.mrf.mxu1  ;;  %v1916_v22 = vadd.f32 %v6723_v62, %v1867_v11  ;;  %2744 = vst [vmem:[#allocation4 + $0x1f0] sm:$0xff] %v1963_v52  ;;  %v6854_v52 = vld [vmem:[%s5670_s23 + $0xd8] sm:$0xff] }
 0x33e   : > { %v6797_v43 = vpop.permute.xlu1 %1586  ;;  %2035 = vmatmul.bf16.gmra.mxu3 %v6198_v19 }
 0x33f   : > { %9803 = vst [vmem:[#allocation55_spill] sm:$0xff] %v6797_v43  ;;  %v6799_v47 = vpop.permute.xlu2 %685  ;;  %v6801_v10 = vpop.permute.xlu0 %1378  ;;  %v1707_v34 = vsel %vm1608_vm5, %v6249_v6, %v6797_v43  ;;  %v1965_v6 = vadd.f32 %v6700_v57, %v1916_v22 }
 0x340   : > { %9804 = vst [vmem:[#allocation56_spill] sm:$0xff] %v6799_v47  ;;  %v707_v63 = vsel %vm701_vm2, %v6422_v46, %v6799_v47  ;;  %2249 = vmatpush.bf16.msra.mxu2 %v1707_v34  ;;  %v1618_v8 = vsel %vm1608_vm5, %v6725_v48, %v6801_v10 }
 0x341   : > { %1422 = vrot.lane.b32.xlu2 %v707_v63, %s5616_s29  ;;  %2297 = vmatpush.bf16.msra.mxu0 %v1618_v8  ;;  %v6823_v62 = vpop.f32.mrf.mxu3  ;;  %2750 = vst [vmem:[#allocation4 + $0x48] sm:$0xff] %v1965_v6  ;;  %v6848_v63 = vld [vmem:[%s5670_s23 + $0x60] sm:$0xff]  ;;  %v6851_v8 = vld [vmem:[%s5670_s23 + $0x78] sm:$0xff] }
 0x343   : > { %v1869_v46 = vpop.f32.mrf.mxu0 }
 0x345   : > { %v6825_v48 = vpop.f32.mrf.mxu1 }
 0x346   : > { %v1363_v60 = vpop.permute.xlu1 %1362  ;;  %4974 = vmatmul.msk.bf16.gmra.mxu0 %vm1825_vm9, %v6473_v2  ;;  %4976 = vmatmul.msk.bf16.vlgmr.msra.gmra.mxu2 %vm1825_vm9, %v6247_v12 }
 0x347   : > { %v6828_v44 = vpop.permute.xlu2 %658  ;;  %v6830_v57 = vpop.permute.xlu0 %740  ;;  %v1611_v11 = vsel %vm1608_vm5, %v6251_v58, %v1363_v60  ;;  %v1612_v34 = vsel %vm1608_vm5, %v1363_v60, %v6746_v36  ;;  %v1880_v58 = vadd.f32 %v6471_v35, %v1188_v29  ;;  %v1170_v60 = vunpack.c.l.bf16 %v6851_v8 }
 0x348   : > { %9805 = vst [vmem:[#allocation57_spill] sm:$0xff] %v6828_v44  ;;  %v672_v33 = vsel %vm660_vm3, %v6453_v24, %v6828_v44  ;;  %v754_v22 = vsel %vm742_vm0, %v6339_v45, %v6830_v57  ;;  %2151 = vmatpush.bf16.msra.mxu1 %v1611_v11  ;;  %2298 = vmatpush.bf16.msra.mxu0 %v1612_v34  ;;  %v1977_v24 = vpop.f32.mrf.mxu2  ;;  %v1164_v45 = vunpack.c.l.bf16 %v6848_v63 }
 0x349   : > { %1408 = vrot.lane.b32.xlu2 %v672_v33, %s5616_s29  ;;  %1464 = vrot.lane.b32.xlu0 %v754_v22, %s5616_s29  ;;  %v6856_v6 = vpop.f32.mrf.mxu3  ;;  %v1194_v33 = vunpack.c.l.bf16 %v6854_v52 }
 0x34a   : > { %v1870_v29 = vadd.f32 %v1869_v46, %v1164_v45 }
 0x34b   : > { %2152 = vmatmul.bf16.vlgmr.msra.gmra.mxu1 %v6376_v59  ;;  %v1871_v11 = vpop.f32.mrf.mxu0 }
 0x34c   : > { %v1872_v34 = vadd.f32 %v1871_v11, %v1170_v60  ;;  %v1919_v36 = vadd.f32 %v6744_v53, %v1870_v29 }
 0x34d   : > { %v1928_v35 = vpop.f32.mrf.mxu1 }
 0x34e   : > { %v6864_v22 = vpop.permute.xlu1 %726  ;;  %v1929_v44 = vadd.f32 %v1928_v35, %v1880_v58  ;;  %v1921_v12 = vadd.f32 %v6760_v7, %v1872_v34  ;;  %v1882_v7 = vadd.f32 %v6500_v61, %v1194_v33  ;;  %2040 = vmatmul.bf16.gmra.mxu3 %v6226_v51  ;;  %v9808_v35 = vld [vmem:[#allocation15_spill] sm:$0xff]  ;;  %v9809_v33 = vld [vmem:[#allocation32_spill] sm:$0xff] }
 0x34f   : > { %v6866_v47 = vpop.permute.xlu2 %644  ;;  %v748_v23 = vsel %vm742_vm0, %v6358_v38, %v6864_v22  ;;  %v1001_v54 = vpop.permute.xlu0 %1000  ;;  %v1968_v38 = vadd.f32 %v6721_v20, %v1919_v36 }
 0x350   : > { %9806 = vst [vmem:[#allocation58_spill] sm:$0xff] %v6866_v47  ;;  %v666_v46 = vsel %vm660_vm3, %v6478_v55, %v6866_v47  ;;  %v1016_v45 = vsel %vm1006_vm4, %v6307_v14, %v1001_v54  ;;  %1450 = vrot.lane.b32.xlu1 %v748_v23, %s5616_s29  ;;  %v1978_v58 = vadd.f32 %v1977_v24, %v1929_v44  ;;  %v6886_v55 = vld [vmem:[%s5670_s23 + $0xf0] sm:$0xff]  ;;  %v1979_v24 = vpop.f32.mrf.mxu2 }
 0x351   : > { %1394 = vrot.lane.b32.xlu2 %v666_v46, %s5616_s29  ;;  %1574 = vrot.lane.b32.xlu0 %v1016_v45, %s5616_s29  ;;  %v1970_v53 = vadd.f32 %v6742_v40, %v1921_v12  ;;  %2756 = vst [vmem:[#allocation4 + $0x298] sm:$0xff] %v1968_v38  ;;  %v6888_v14 = vpop.f32.mrf.mxu3  ;;  %v1200_v20 = vunpack.c.l.bf16 %v6886_v55  ;;  %v6909_v46 = vld [vmem:[%s5670_s23 + $0x90] sm:$0xff]  ;;  %v6912_v45 = vld [vmem:[%s5670_s23 + $0xa8] sm:$0xff] }
 0x352   : > { %2780 = vst [vmem:[#allocation4 + $0x38] sm:$0xff] %v1978_v58  ;;  %v6915_v58 = vld [vmem:[%s5670_s23 + $0x108] sm:$0xff]  ;;  %v1176_v38 = vunpack.c.l.bf16 %v6909_v46 }
 0x353   : > { %2762 = vst [vmem:[#allocation4 + $0xe8] sm:$0xff] %v1970_v53  ;;  %v1874_v23 = vpop.f32.mrf.mxu0  ;;  %v1182_v53 = vunpack.c.l.bf16 %v6912_v45 }
 0x355   : > { %v1930_v44 = vpop.f32.mrf.mxu1 }
 0x356   : > { %v6891_v36 = vpop.permute.xlu1 %1002  ;;  %v1931_v12 = vadd.f32 %v1930_v44, %v1882_v7  ;;  %4975 = vmatmul.msk.bf16.gmra.mxu0 %vm1825_vm9, %v6528_v42  ;;  %v9811_v7 = vld [vmem:[#allocation11_spill] sm:$0xff] }
 0x357   : > { %v6893_v61 = vpop.permute.xlu2 %1041  ;;  %v1017_v40 = vsel %vm1006_vm4, %v1001_v54, %v6891_v36  ;;  %v987_v60 = vpop.permute.xlu0 %986  ;;  %v1885_v54 = vadd.f32 %v9809_v33, %v1200_v20  ;;  %4977 = vmatmul.msk.bf16.gmra.mxu2 %vm1825_vm9, %v9811_v7  ;;  %v9813_v7 = vld [vmem:[#allocation10_spill] sm:$0xff] }
 0x358   : > { %9807 = vst [vmem:[#allocation59_spill] sm:$0xff] %v6893_v61  ;;  %v1057_v11 = vsel %vm1047_vm1, %v6393_v39, %v6893_v61  ;;  %v1010_v29 = vsel %vm1006_vm4, %v9808_v35, %v987_v60  ;;  %1576 = vrot.lane.b32.xlu1 %v1017_v40, %s5616_s29  ;;  %v1980_v34 = vadd.f32 %v1979_v24, %v1931_v12  ;;  %v9810_v39 = vld [vmem:[#allocation24_spill] sm:$0xff] }
 0x359   : > { %1602 = vrot.lane.b32.xlu2 %v1057_v11, %s5616_s29  ;;  %1560 = vrot.lane.b32.xlu0 %v1010_v29, %s5616_s29  ;;  %v6922_v44 = vpop.f32.mrf.mxu3  ;;  %v1875_v12 = vadd.f32 %v1874_v23, %v1176_v38  ;;  %v1206_v11 = vunpack.c.l.bf16 %v6915_v58 }
 0x35a   : > { %2786 = vst [vmem:[#allocation4 + $0x220] sm:$0xff] %v1980_v34 }
 0x35b   : > { %2157 = vmatmul.bf16.gmra.mxu1 %v9810_v39  ;;  %v1876_v24 = vpop.f32.mrf.mxu0  ;;  %v1924_v61 = vadd.f32 %v6795_v56, %v1875_v12  ;;  %v6941_v56 = vld [vmem:[%s5670_s23 + $0x120] sm:$0xff] }
 0x35c   : > { %v1877_v40 = vadd.f32 %v1876_v24, %v1182_v53  ;;  %v9814_v53 = vld [vmem:[#allocation34_spill] sm:$0xff]  ;;  %v9815_v24 = vld [vmem:[#allocation13_spill] sm:$0xff] }
 0x35d   : > { %v1933_v20 = vpop.f32.mrf.mxu1  ;;  %v1973_v38 = vadd.f32 %v6764_v21, %v1924_v61 }
 0x35e   : > { %v6925_v35 = vpop.permute.xlu1 %988  ;;  %v1934_v29 = vadd.f32 %v1933_v20, %v1885_v54  ;;  %v1926_v47 = vadd.f32 %v6825_v48, %v1877_v40  ;;  %2201 = vmatmul.bf16.vlgmr.msra.gmra.mxu3 %v9815_v24  ;;  %v9818_v40 = vld [vmem:[#allocation37_spill] sm:$0xff] }
 0x35f   : > { %9812 = vst [vmem:[#allocation15_spill] sm:$0xff] %v6925_v35  ;;  %v1011_v34 = vsel %vm1006_vm4, %v987_v60, %v6925_v35  ;;  %v960_v33 = vpop.permute.xlu0 %959  ;;  %v1887_v60 = vadd.f32 %v9814_v53, %v1206_v11 }
 0x360   : > { %v975_v43 = vsel %vm965_vm6, %v9813_v7, %v960_v33  ;;  %1562 = vrot.lane.b32.xlu1 %v1011_v34, %s5616_s29  ;;  %v1983_v23 = vadd.f32 %v6758_v31, %v1934_v29  ;;  %v1975_v54 = vadd.f32 %v6816_v41, %v1926_v47  ;;  %2768 = vst [vmem:[#allocation4 + $0x228] sm:$0xff] %v1973_v38  ;;  %v1212_v31 = vunpack.c.l.bf16 %v6941_v56  ;;  %v9817_v41 = vld [vmem:[#allocation12_spill] sm:$0xff]  ;;  %v6956_v29 = vld [vmem:[%s5670_s23 + $0x138] sm:$0xff] }
 0x361   : > { %1546 = vrot.lane.b32.xlu0 %v975_v43, %s5616_s29  ;;  %v2006_v48 = vpop.f32.mrf.mxu3  ;;  %v9819_v34 = vld [vmem:[#allocation28_spill] sm:$0xff] }
 0x362   : > { %2792 = vst [vmem:[#allocation4 + $0x258] sm:$0xff] %v1983_v23  ;;  %v1890_v11 = vadd.f32 %v9818_v40, %v1212_v31 }
 0x363   : > { %2774 = vst [vmem:[#allocation4 + $0x168] sm:$0xff] %v1975_v54  ;;  %v1218_v54 = vunpack.c.l.bf16 %v6956_v29 }
 0x365   : > { %v1935_v7 = vpop.f32.mrf.mxu1 }
 0x366   : > { %v6944_v20 = vpop.permute.xlu1 %961  ;;  %v1936_v43 = vadd.f32 %v1935_v7, %v1887_v60  ;;  %2299 = vmatmul.bf16.vlgmr.msra.gmra.mxu0 %v6376_v59 }
 0x367   : > { %9816 = vst [vmem:[#allocation32_spill] sm:$0xff] %v6944_v20  ;;  %v976_v21 = vsel %vm965_vm6, %v960_v33, %v6944_v20  ;;  %v946_v47 = vpop.permute.xlu0 %945  ;;  %v9820_v33 = vld [vmem:[#allocation16_spill] sm:$0xff]  ;;  %v2104_v20 = vpop.f32.mrf.mxu0 }
 0x368   : > { %v969_v61 = vsel %vm965_vm6, %v9817_v41, %v946_v47  ;;  %1548 = vrot.lane.b32.xlu1 %v976_v21, %s5616_s29  ;;  %v1985_v12 = vadd.f32 %v6790_v28, %v1936_v43  ;;  %4978 = vmatmul.msk.bf16.gmra.mxu2 %vm1825_vm9, %v9820_v33  ;;  %v9821_v43 = vld [vmem:[#allocation5_spill] sm:$0xff]  ;;  %v9822_v21 = vld [vmem:[#allocation40_spill] sm:$0xff] }
 0x369   : > { %1532 = vrot.lane.b32.xlu0 %v969_v61, %s5616_s29  ;;  %v2008_v23 = vpop.f32.mrf.mxu3  ;;  %v1892_v41 = vadd.f32 %v9822_v21, %v1218_v54  ;;  %v9823_v61 = vld [vmem:[#allocation18_spill] sm:$0xff] }
 0x36a   : > { %2798 = vst [vmem:[#allocation4 + $0x90] sm:$0xff] %v1985_v12  ;;  %v6973_v12 = vld [vmem:[%s5670_s23 + $0x150] sm:$0xff] }
 0x36b   : > { %2162 = vmatmul.bf16.gmra.mxu1 %v9819_v34 }
 0x36d   : > { %v1938_v38 = vpop.f32.mrf.mxu1 }
 0x36e   : > { %v6962_v53 = vpop.permute.xlu1 %947  ;;  %v1939_v28 = vadd.f32 %v1938_v38, %v1890_v11  ;;  %2206 = vmatmul.bf16.gmra.mxu3 %v9823_v61  ;;  %v6977_v11 = vpop.permute.xlu2 %1027  ;;  %v1224_v38 = vunpack.c.l.bf16 %v6973_v12 }
 0x36f   : > { %v970_v60 = vsel %vm965_vm6, %v946_v47, %v6962_v53  ;;  %v919_v7 = vpop.permute.xlu0 %918  ;;  %9824 = vst [vmem:[#allocation10_spill] sm:$0xff] %v6977_v11 }
 0x370   : > { %1534 = vrot.lane.b32.xlu1 %v970_v60, %s5616_s29  ;;  %v1988_v31 = vadd.f32 %v6823_v62, %v1939_v28  ;;  %v9826_v28 = vld [vmem:[#allocation14_spill] sm:$0xff] }
 0x371   : > { %1380 = vrot.lane.b32.xlu0 %v9821_v43, %s5616_s29  ;;  %v6975_v40 = vpop.f32.mrf.mxu3  ;;  %v934_v43 = vsel %vm924_vm7, %v9826_v28, %v919_v7  ;;  %v1147_v28 = vunpack.c.h.bf16 %v6737_v37 }
 0x372   : > { %2804 = vst [vmem:[#allocation4 + $0x1e0] sm:$0xff] %v1988_v31  ;;  %v9827_v31 = vld [vmem:[#allocation29_spill] sm:$0xff] }
 0x373   : > { %v1051_v21 = vsel %vm1047_vm1, %v9827_v31, %v6977_v11  ;;  %v9832_v11 = vld [vmem:[#allocation45_spill] sm:$0xff] }
 0x375   : > { %v1940_v47 = vpop.f32.mrf.mxu1 }
 0x376   : > { %v6980_v60 = vpop.permute.xlu1 %920  ;;  %v1941_v62 = vadd.f32 %v1940_v47, %v1892_v41  ;;  %2304 = vmatmul.bf16.gmra.mxu0 %v9810_v39  ;;  %v2055_v41 = vpop.f32.mrf.mxu2  ;;  %v1141_v47 = vunpack.c.h.bf16 %v6734_v18  ;;  %v6998_v39 = vld [vmem:[%s5670_s23 + $0x168] sm:$0xff] }
 0x377   : > { %9825 = vst [vmem:[#allocation34_spill] sm:$0xff] %v6980_v60  ;;  %v935_v54 = vsel %vm924_vm7, %v919_v7, %v6980_v60  ;;  %v9828_v7 = vld [vmem:[#allocation42_spill] sm:$0xff]  ;;  %v905_v33 = vpop.permute.xlu0 %904  ;;  %v1230_v18 = vunpack.c.l.bf16 %v6998_v39 }
 0x378   : > { %1520 = vrot.lane.b32.xlu2 %v935_v54, %s5616_s29  ;;  %1518 = vrot.lane.b32.xlu1 %v934_v43, %s5616_s29  ;;  %v1990_v61 = vadd.f32 %v6856_v6, %v1941_v62  ;;  %v1895_v60 = vadd.f32 %v9828_v7, %v1224_v38  ;;  %v2007_v62 = vadd.f32 %v2006_v48, %v1141_v47  ;;  %v9830_v38 = vld [vmem:[#allocation17_spill] sm:$0xff]  ;;  %v9831_v7 = vld [vmem:[#allocation6_spill] sm:$0xff] }
 0x379   : > { %1588 = vrot.lane.b32.xlu0 %v1051_v21, %s5616_s29  ;;  %4979 = vmatmul.msk.bf16.gmra.mxu2 %vm1825_vm9, %v6391_v16  ;;  %v2013_v6 = vpop.f32.mrf.mxu3  ;;  %v2009_v43 = vadd.f32 %v2008_v23, %v1147_v28  ;;  %v824_v16 = vpop.permute.xlu2 %823 }
 0x37a   : > { %2810 = vst [vmem:[#allocation4 + $0x18] sm:$0xff] %v1990_v61  ;;  %v928_v61 = vsel %vm924_vm7, %v9830_v38, %v905_v33  ;;  %v2056_v47 = vadd.f32 %v2055_v41, %v2007_v62  ;;  %v9833_v38 = vld [vmem:[#allocation22_spill] sm:$0xff]  ;;  %v9834_v62 = vld [vmem:[#allocation19_spill] sm:$0xff] }
 0x37b   : > { %2167 = vmatmul.bf16.gmra.mxu1 %v6549_v17 }
 0x37d   : > { %v1943_v54 = vpop.f32.mrf.mxu1 }
 0x37e   : > { %v7004_v31 = vpop.permute.xlu1 %906  ;;  %v1944_v37 = vadd.f32 %v1943_v54, %v1895_v60  ;;  %v2057_v23 = vpop.f32.mrf.mxu2  ;;  %v1897_v60 = vadd.f32 %v9832_v11, %v1230_v18  ;;  %2211 = vmatmul.bf16.gmra.mxu3 %v9833_v38  ;;  %v836_v11 = vsel %vm827_vm8, %v9834_v62, %v824_v16 }
 0x37f   : > { %9829 = vst [vmem:[#allocation12_spill] sm:$0xff] %v7004_v31  ;;  %v929_v21 = vsel %vm924_vm7, %v905_v33, %v7004_v31  ;;  %v2058_v28 = vadd.f32 %v2057_v23, %v2009_v43  ;;  %v7016_v54 = vpop.permute.xlu0 %825  ;;  %v2106_v33 = vpop.f32.mrf.mxu0  ;;  %v2105_v31 = vadd.f32 %v2104_v20, %v2056_v47  ;;  %v9835_v43 = vld [vmem:[#allocation27_spill] sm:$0xff]  ;;  %v1153_v23 = vunpack.c.h.bf16 %v6785_v9  ;;  %v4834_v47 = vld [vmem:[#allocation2 + $0x1c] sm:$0xf] }
 0x380   : > { %1366 = vrot.lane.b32.xlu1 %v9831_v7, %s5616_s29  ;;  %1504 = vrot.lane.b32.xlu2 %v928_v61, %s5616_s29  ;;  %v1993_v48 = vadd.f32 %v6888_v14, %v1944_v37  ;;  %v837_v14 = vsel %vm827_vm8, %v824_v16, %v7016_v54  ;;  %v1159_v16 = vunpack.c.h.bf16 %v6788_v13 }
 0x381   : > { %1506 = vrot.lane.b32.xlu0 %v929_v21, %s5616_s29  ;;  %v2107_v7 = vadd.f32 %v2106_v33, %v2058_v28  ;;  %v2016_v35 = vpop.f32.mrf.mxu3  ;;  %2733 = vst [vmem:[#allocation4 + $0x1c8] sm:$0xff] %v2105_v31  ;;  %v4862_v31 = vld [vmem:[#allocation2 + $0x5c] sm:$0xf]  ;;  %v7032_v33 = vpop.permute.xlu2 %813 }
 0x382   : > { %2816 = vst [vmem:[#allocation4 + $0xd8] sm:$0xff] %v1993_v48  ;;  %v5126_v48 = vld [vmem:[#allocation2 + $0x78] sm:$0xf0] }
 0x383   : > { %2739 = vst [vmem:[#allocation4 + $0x2f0] sm:$0xff] %v2107_v7  ;;  %v5119_v28 = vld [vmem:[#allocation2 + $0x38] sm:$0xf0] }
 0x385   : > { %v1945_v37 = vpop.f32.mrf.mxu1 }
 0x386   : > { %v812_v61 = vpop.permute.xlu1 %811  ;;  %v1946_v41 = vadd.f32 %v1945_v37, %v1897_v60  ;;  %2309 = vmatmul.bf16.gmra.mxu0 %v9819_v34  ;;  %v2060_v21 = vpop.f32.mrf.mxu2  ;;  %v2012_v37 = vadd.f32 %v6975_v40, %v1153_v23 }
 0x387   : > { %v831_v18 = vsel %vm827_vm8, %v9835_v43, %v812_v61  ;;  %v2109_v60 = vpop.f32.mrf.mxu0  ;;  %v832_v9 = vsel %vm827_vm8, %v812_v61, %v7032_v33  ;;  %v9836_v43 = vld [vmem:[#allocation25_spill] sm:$0xff] }
 0x388   : > { %1490 = vrot.lane.b32.xlu1 %v836_v11, %s5616_s29  ;;  %1492 = vrot.lane.b32.xlu2 %v837_v14, %s5616_s29  ;;  %v1995_v20 = vadd.f32 %v6922_v44, %v1946_v41  ;;  %v4863_v44 = vor.u32 %v5126_v48, %v4862_v31  ;;  %v4835_v14 = vor.u32 %v5119_v28, %v4834_v47  ;;  %v1171_v48 = vunpack.c.h.bf16 %v6851_v8 }
 0x389   : > { %1476 = vrot.lane.b32.xlu0 %v831_v18, %s5616_s29  ;;  %4980 = vmatmul.msk.bf16.gmra.mxu2 %vm1825_vm9, %v6451_v32  ;;  %v2018_v7 = vpop.f32.mrf.mxu3  ;;  %v2014_v41 = vadd.f32 %v2013_v6, %v1159_v16  ;;  %v2061_v62 = vadd.f32 %v2060_v21, %v2012_v37  ;;  %v1165_v21 = vunpack.c.h.bf16 %v6848_v63  ;;  %v9837_v37 = vld [vmem:[#allocation36_spill] sm:$0xff] }
 0x38a   : > { %2822 = vst [vmem:[#allocation4 + $0xf8] sm:$0xff] %v1995_v20 }
 0x38b   : > { %2172 = vmatmul.bf16.gmra.mxu1 %v6143_v5  ;;  %v2110_v31 = vadd.f32 %v2109_v60, %v2061_v62  ;;  %v2017_v28 = vadd.f32 %v2016_v35, %v1165_v21  ;;  %v2019_v60 = vadd.f32 %v2018_v7, %v1171_v48  ;;  %v9838_v35 = vld [vmem:[#allocation38_spill] sm:$0xff]  ;;  %v1177_v7 = vunpack.c.h.bf16 %v6909_v46 }
 0x38d   : > { %2745 = vst [vmem:[#allocation4 + $0x1d0] sm:$0xff] %v2110_v31  ;;  %v1183_v31 = vunpack.c.h.bf16 %v6912_v45 }
 0x38e   : > { %v2062_v13 = vpop.f32.mrf.mxu2  ;;  %2216 = vmatmul.bf16.gmra.mxu3 %v9836_v43 }
 0x38f   : > { %v2063_v11 = vadd.f32 %v2062_v13, %v2014_v41  ;;  %v2111_v18 = vpop.f32.mrf.mxu0 }
 0x390   : > { %1478 = vrot.lane.b32.xlu1 %v832_v9, %s5616_s29  ;;  %1004 = vrot.lane.b32.xlu2 %v4863_v44, %s5615_s28 }
 0x391   : > { %990 = vrot.lane.b32.xlu0 %v4835_v14, %s5615_s28  ;;  %v2112_v40 = vadd.f32 %v2111_v18, %v2063_v11  ;;  %v2021_v6 = vpop.f32.mrf.mxu3 }
 0x392   : > { %v2022_v21 = vadd.f32 %v2021_v6, %v1177_v7 }
 0x393   : > { %v7044_v20 = vpop.permute.xlu2 %1436  ;;  %2751 = vst [vmem:[#allocation4 + $0x150] sm:$0xff] %v2112_v40 }
 0x396   : > { %2314 = vmatmul.bf16.gmra.mxu0 %v6549_v17  ;;  %v2065_v61 = vpop.f32.mrf.mxu2 }
 0x397   : > { %v2114_v23 = vpop.f32.mrf.mxu0  ;;  %v2066_v63 = vadd.f32 %v2065_v61, %v2017_v28 }
 0x398   : > { %963 = vrot.lane.b32.xlu1 %v4863_v44, %s5617_s30  ;;  %949 = vrot.lane.b32.xlu2 %v4835_v14, %s5617_s30 }
 0x399   : > { %922 = vrot.lane.b32.xlu0 %v4863_v44, %s5618_s5  ;;  %4981 = vmatmul.msk.bf16.gmra.mxu2 %vm1825_vm9, %v6417_v3  ;;  %v2023_v47 = vpop.f32.mrf.mxu3  ;;  %v2115_v62 = vadd.f32 %v2114_v23, %v2066_v63  ;;  %v1195_v63 = vunpack.c.h.bf16 %v6854_v52 }
 0x39a   : > { %v2024_v48 = vadd.f32 %v2023_v47, %v1183_v31  ;;  %v1189_v47 = vunpack.c.h.bf16 %v6821_v26 }
 0x39b   : > { %v7052_v16 = vpop.permute.xlu2 %1422  ;;  %2177 = vmatmul.bf16.gmra.mxu1 %v6169_v27  ;;  %2757 = vst [vmem:[#allocation4 + $0x200] sm:$0xff] %v2115_v62 }
 0x39e   : > { %v2067_v41 = vpop.f32.mrf.mxu2  ;;  %2221 = vmatmul.bf16.gmra.mxu3 %v6516_v25 }
 0x39f   : > { %v2068_v8 = vadd.f32 %v2067_v41, %v2019_v60  ;;  %v2116_v9 = vpop.f32.mrf.mxu0 }
 0x3a0   : > { %908 = vrot.lane.b32.xlu1 %v4835_v14, %s5618_s5  ;;  %1043 = vrot.lane.b32.xlu2 %v9837_v37, %s5612_s25 }
 0x3a1   : > { %1045 = vrot.lane.b32.xlu0 %v4863_v44, %s5612_s25  ;;  %v2117_v11 = vadd.f32 %v2116_v9, %v2068_v8  ;;  %v2026_v18 = vpop.f32.mrf.mxu3 }
 0x3a2   : > { %v2027_v62 = vadd.f32 %v2026_v18, %v1189_v47 }
 0x3a3   : > { %v7062_v13 = vpop.permute.xlu2 %1408  ;;  %2763 = vst [vmem:[#allocation4 + $0x240] sm:$0xff] %v2117_v11 }
 0x3a6   : > { %2319 = vmatmul.bf16.gmra.mxu0 %v6143_v5  ;;  %v2070_v44 = vpop.f32.mrf.mxu2 }
 0x3a7   : > { %v2119_v40 = vpop.f32.mrf.mxu0 }
 0x3a8   : > { %1029 = vrot.lane.b32.xlu1 %v9838_v35, %s5612_s25  ;;  %1031 = vrot.lane.b32.xlu2 %v4835_v14, %s5612_s25 }
 0x3a9   : > { %1466 = vrot.lane.b32.xlu0 %v6830_v57, %s5616_s29  ;;  %4982 = vmatmul.msk.bf16.gmra.mxu2 %vm1825_vm9, %v6473_v2  ;;  %v2028_v23 = vpop.f32.mrf.mxu3  ;;  %v2071_v57 = vadd.f32 %v2070_v44, %v2022_v21  ;;  %v9839_v21 = vld [vmem:[#allocation44_spill] sm:$0xff] }
 0x3aa   : > { %v2029_v11 = vadd.f32 %v2028_v23, %v1195_v63 }
 0x3ab   : > { %v7072_v61 = vpop.permute.xlu2 %1394  ;;  %2182 = vmatmul.bf16.gmra.mxu1 %v6198_v19  ;;  %v2120_v60 = vadd.f32 %v2119_v40, %v2071_v57 }
 0x3ad   : > { %2769 = vst [vmem:[#allocation4 + $0x130] sm:$0xff] %v2120_v60 }
 0x3ae   : > { %v2072_v14 = vpop.f32.mrf.mxu2  ;;  %2226 = vmatmul.bf16.gmra.mxu3 %v6565_v30 }
 0x3af   : > { %v2073_v28 = vadd.f32 %v2072_v14, %v2024_v48  ;;  %v2121_v46 = vpop.f32.mrf.mxu0 }
 0x3b0   : > { %1452 = vrot.lane.b32.xlu2 %v6864_v22, %s5616_s29 }
 0x3b1   : > { %v2122_v37 = vadd.f32 %v2121_v46, %v2073_v28  ;;  %v2031_v6 = vpop.f32.mrf.mxu3  ;;  %v9841_v28 = vld [vmem:[#allocation48_spill] sm:$0xff] }
 0x3b2   : > { %v1643_v46 = vsel %vm1608_vm5, %v9841_v28, %v7044_v20 }
 0x3b3   : > { %v7080_v45 = vpop.permute.xlu2 %1602  ;;  %2775 = vst [vmem:[#allocation4 + $0xb0] sm:$0xff] %v2122_v37  ;;  %v1201_v37 = vunpack.c.h.bf16 %v6886_v55 }
 0x3b4   : > { %v1714_v41 = vsel %vm1608_vm5, %v6708_v1, %v7080_v45 }
 0x3b5   : > { %2395 = vmatpush.bf16.msrb.mxu3 %v1714_v41  ;;  %v1207_v41 = vunpack.c.h.bf16 %v6915_v58  ;;  %v2032_v55 = vadd.f32 %v2031_v6, %v1201_v37  ;;  %v1625_v6 = vsel %vm1608_vm5, %v6768_v50, %v7072_v61  ;;  %v1213_v50 = vunpack.c.h.bf16 %v6941_v56 }
 0x3b6   : > { %2324 = vmatmul.bf16.gmra.mxu0 %v6169_v27  ;;  %v2075_v22 = vpop.f32.mrf.mxu2 }
 0x3b7   : > { %v2124_v8 = vpop.f32.mrf.mxu0  ;;  %v2076_v26 = vadd.f32 %v2075_v22, %v2027_v62 }
 0x3b9   : > { %4983 = vmatmul.msk.bf16.gmra.mxu2 %vm1825_vm9, %v6528_v42  ;;  %v2033_v35 = vpop.f32.mrf.mxu3  ;;  %v2125_v14 = vadd.f32 %v2124_v8, %v2076_v26 }
 0x3ba   : > { %v2034_v26 = vadd.f32 %v2033_v35, %v1207_v41  ;;  %v1219_v41 = vunpack.c.h.bf16 %v6956_v29 }
 0x3bb   : > { %v7088_v9 = vpop.permute.xlu0 %1464  ;;  %2187 = vmatmul.bf16.gmra.mxu1 %v6226_v51  ;;  %2781 = vst [vmem:[#allocation4 + $0x190] sm:$0xff] %v2125_v14 }
 0x3bc   : > { %v1655_v1 = vsel %vm1608_vm5, %v6612_v49, %v7088_v9  ;;  %v9840_v49 = vld [vmem:[#allocation46_spill] sm:$0xff] }
 0x3bd   : > { %2438 = vmatpush.bf16.msrb.mxu2 %v1655_v1  ;;  %v9842_v1 = vld [vmem:[#allocation50_spill] sm:$0xff] }
 0x3be   : > { %v2077_v44 = vpop.f32.mrf.mxu2  ;;  %2231 = vmatmul.bf16.gmra.mxu3 %v6594_v0  ;;  %v1637_v62 = vsel %vm1608_vm5, %v9842_v1, %v7052_v16 }
 0x3bf   : > { %v2078_v7 = vadd.f32 %v2077_v44, %v2029_v11  ;;  %v2126_v31 = vpop.f32.mrf.mxu0  ;;  %v9843_v11 = vld [vmem:[#allocation39_spill] sm:$0xff] }
 0x3c1   : > { %v2127_v57 = vadd.f32 %v2126_v31, %v2078_v7  ;;  %v2036_v23 = vpop.f32.mrf.mxu3  ;;  %v1631_v7 = vsel %vm1608_vm5, %v6689_v4, %v7062_v13 }
 0x3c2   : > { %v7096_v52 = vpop.permute.xlu1 %1450 }
 0x3c3   : > { %v1575_v40 = vpop.permute.xlu0 %1574  ;;  %v1649_v48 = vsel %vm1608_vm5, %v9839_v21, %v7096_v52  ;;  %2787 = vst [vmem:[#allocation4 + $0x2e0] sm:$0xff] %v2127_v57 }
 0x3c4   : > { %v1702_v18 = vsel %vm1608_vm5, %v9840_v49, %v1575_v40  ;;  %2439 = vmatpush.bf16.msrb.mxu2 %v1649_v48 }
 0x3c5   : > { %2340 = vmatpush.bf16.msrb.mxu1 %v1702_v18  ;;  %v9844_v18 = vld [vmem:[#allocation41_spill] sm:$0xff] }
 0x3c6   : > { %2329 = vmatmul.bf16.gmra.mxu0 %v6198_v19  ;;  %v2080_v60 = vpop.f32.mrf.mxu2 }
 0x3c7   : > { %v2129_v47 = vpop.f32.mrf.mxu0 }
 0x3c8   : > { %2440 = vmatpush.bf16.msrb.mxu2 %v1643_v46  ;;  %v7145_v56 = vpop.f32.mrf.mxu1 }
 0x3c9   : > { %v2038_v58 = vpop.f32.mrf.mxu3 }
 0x3ca   : > { %v7110_v22 = vpop.permute.xlu1 %1576 }
 0x3cb   : > { %v1703_v63 = vsel %vm1608_vm5, %v1575_v40, %v7110_v22  ;;  %v1561_v8 = vpop.permute.xlu0 %1560  ;;  %v2081_v40 = vadd.f32 %v2080_v60, %v2032_v55  ;;  %v2037_v55 = vadd.f32 %v2036_v23, %v1213_v50  ;;  %v1231_v50 = vunpack.c.h.bf16 %v6998_v39  ;;  %v9848_v39 = vld [vmem:[#allocation55_spill] sm:$0xff] }
 0x3cc   : > { %v1696_v44 = vsel %vm1608_vm5, %v9843_v11, %v1561_v8  ;;  %2441 = vmatpush.bf16.msrb.mxu2 %v1637_v62  ;;  %2487 = vmatpush.bf16.msrb.mxu0 %v1703_v63  ;;  %v9845_v11 = vld [vmem:[#allocation43_spill] sm:$0xff] }
 0x3cd   : > { %2341 = vmatpush.bf16.msrb.mxu1 %v1696_v44  ;;  %v2130_v49 = vadd.f32 %v2129_v47, %v2081_v40 }
 0x3ce   : > { %v2082_v31 = vpop.f32.mrf.mxu2  ;;  %2236 = vmatmul.bf16.gmra.mxu3 %v6627_v15 }
 0x3cf   : > { %v2083_v21 = vadd.f32 %v2082_v31, %v2034_v26  ;;  %v2131_v4 = vpop.f32.mrf.mxu0  ;;  %2793 = vst [vmem:[#allocation4 + $0xa0] sm:$0xff] %v2130_v49  ;;  %v2039_v26 = vadd.f32 %v2038_v58, %v1219_v41 }
 0x3d0   : > { %2442 = vmatpush.bf16.msrb.mxu2 %v1631_v7 }
 0x3d1   : > { %v2132_v46 = vadd.f32 %v2131_v4, %v2083_v21  ;;  %v2041_v60 = vpop.f32.mrf.mxu3 }
 0x3d2   : > { %v7122_v48 = vpop.permute.xlu1 %1562  ;;  %v7124_v14 = vpop.permute.xlu2 %1520 }
 0x3d3   : > { %v1547_v57 = vpop.permute.xlu0 %1546  ;;  %v1697_v35 = vsel %vm1608_vm5, %v1561_v8, %v7122_v48  ;;  %2799 = vst [vmem:[#allocation4 + $0x10] sm:$0xff] %v2132_v46 }
 0x3d4   : > { %v1690_v28 = vsel %vm1608_vm5, %v9844_v18, %v1547_v57  ;;  %2443 = vmatpush.bf16.msrb.mxu2 %v1625_v6  ;;  %2488 = vmatpush.bf16.msrb.mxu0 %v1697_v35 }
 0x3d5   : > { %2342 = vmatpush.bf16.msrb.mxu1 %v1690_v28  ;;  %v2155_v28 = vpop.f32.mrf.mxu1 }
 0x3d6   : > { %2334 = vmatmul.bf16.gmra.mxu0 %v6226_v51  ;;  %v2085_v37 = vpop.f32.mrf.mxu2 }
 0x3d7   : > { %v2134_v62 = vpop.f32.mrf.mxu0  ;;  %v2086_v31 = vadd.f32 %v2085_v37, %v2037_v55  ;;  %v1225_v37 = vunpack.c.h.bf16 %v6973_v12 }
 0x3d9   : > { %v2043_v7 = vpop.f32.mrf.mxu3  ;;  %v2135_v49 = vadd.f32 %v2134_v62, %v2086_v31 }
 0x3da   : > { %v7137_v63 = vpop.permute.xlu1 %1548  ;;  %v7139_v47 = vpop.permute.xlu2 %1504 }
 0x3db   : > { %v1533_v8 = vpop.permute.xlu0 %1532  ;;  %v1691_v1 = vsel %vm1608_vm5, %v1547_v57, %v7137_v63  ;;  %2805 = vst [vmem:[#allocation4 + $0xe0] sm:$0xff] %v2135_v49  ;;  %v9850_v49 = vld [vmem:[#allocation9_spill] sm:$0xff] }
 0x3dc   : > { %v1684_v44 = vsel %vm1608_vm5, %v9845_v11, %v1533_v8  ;;  %2489 = vmatpush.bf16.msrb.mxu0 %v1691_v1 }
 0x3dd   : > { %2343 = vmatpush.bf16.msrb.mxu1 %v1684_v44  ;;  %v7172_v31 = vpop.f32.mrf.mxu1 }
 0x3de   : > { %v2087_v29 = vpop.f32.mrf.mxu2 }
 0x3df   : > { %v2088_v40 = vadd.f32 %v2087_v29, %v2039_v26  ;;  %v2136_v4 = vpop.f32.mrf.mxu0  ;;  %v2044_v26 = vadd.f32 %v2043_v7, %v1231_v50  ;;  %v9851_v7 = vld [vmem:[#allocation52_spill] sm:$0xff] }
 0x3e1   : > { %v2137_v58 = vadd.f32 %v2136_v4, %v2088_v40  ;;  %v2202_v18 = vpop.f32.mrf.mxu3  ;;  %v9849_v40 = vld [vmem:[#allocation49_spill] sm:$0xff] }
 0x3e2   : > { %v7147_v21 = vpop.permute.xlu1 %1534  ;;  %v7149_v6 = vpop.permute.xlu2 %1492 }
 0x3e3   : > { %v7151_v35 = vpop.permute.xlu0 %1380  ;;  %v1685_v57 = vsel %vm1608_vm5, %v1533_v8, %v7147_v21  ;;  %2811 = vst [vmem:[#allocation4 + $0x1a8] sm:$0xff] %v2137_v58 }
 0x3e4   : > { %v1619_v23 = vsel %vm1608_vm5, %v6801_v10, %v7151_v35  ;;  %2490 = vmatpush.bf16.msrb.mxu0 %v1685_v57  ;;  %v9847_v10 = vld [vmem:[#allocation47_spill] sm:$0xff]  ;;  %v1672_v57 = vsel %vm1608_vm5, %v9849_v40, %v7139_v47 }
 0x3e5   : > { %2444 = vmatpush.bf16.msrb.mxu2 %v1619_v23 }
 0x3e6   : > { %v2090_v46 = vpop.f32.mrf.mxu2 }
 0x3e7   : > { %v2139_v55 = vpop.f32.mrf.mxu0 }
 0x3e9   : > { %v2204_v29 = vpop.f32.mrf.mxu3 }
 0x3ea   : > { %v1519_v41 = vpop.permute.xlu1 %1518  ;;  %v1005_v8 = vpop.permute.xlu2 %1004 }
 0x3eb   : > { %v1018_v1 = vsel %vm1006_vm4, %v6891_v36, %v1005_v8  ;;  %v7162_v62 = vpop.permute.xlu0 %1588  ;;  %v1678_v11 = vsel %vm1608_vm5, %v9847_v10, %v1519_v41  ;;  %v1679_v44 = vsel %vm1608_vm5, %v1519_v41, %v7124_v14  ;;  %v2042_v36 = vadd.f32 %v2041_v60, %v1225_v37  ;;  %v1093_v8 = vld [vmem:[%s5670_s23 + $0x8] sm:$0xff] }
 0x3ec   : > { %9846 = vst [vmem:[#allocation37_spill] sm:$0xff] %v7162_v62  ;;  %1578 = vrot.lane.b32.xlu1 %v1018_v1, %s5616_s29  ;;  %2344 = vmatpush.bf16.msrb.mxu1 %v1678_v11  ;;  %v1708_v12 = vsel %vm1608_vm5, %v9848_v39, %v7162_v62  ;;  %v7183_v1 = vld [vmem:[%s5670_s23 + $0x20] sm:$0xff]  ;;  %v1142_v39 = vunpack.c.l.bf16 %v1093_v8 }
 0x3ed   : > { %2396 = vmatpush.bf16.msrb.mxu3 %v1708_v12  ;;  %2491 = vmatpush.bf16.msrb.mxu0 %v1679_v44  ;;  %v2091_v23 = vadd.f32 %v2090_v46, %v2042_v36  ;;  %v9852_v11 = vld [vmem:[#allocation54_spill] sm:$0xff]  ;;  %v1148_v12 = vunpack.c.l.bf16 %v7183_v1 }
 0x3ee   : > { %v2092_v4 = vpop.f32.mrf.mxu2 }
 0x3ef   : > { %v2093_v58 = vadd.f32 %v2092_v4, %v2044_v26  ;;  %v2140_v50 = vadd.f32 %v2139_v55, %v2091_v23  ;;  %v2141_v10 = vpop.f32.mrf.mxu0  ;;  %v2160_v26 = vpop.f32.mrf.mxu1  ;;  %v2156_v4 = vadd.f32 %v2155_v28, %v1148_v12 }
 0x3f0   : > { %2345 = vmatpush.bf16.msrb.mxu1 %v1672_v57  ;;  %4984 = vmatmul.msk.bf16.vlgmr.msrb.gmra.mxu3 %vm1825_vm9, %v9850_v49  ;;  %v2154_v57 = vadd.f32 %v7145_v56, %v1142_v39  ;;  %v9855_v39 = vld [vmem:[#allocation11_spill] sm:$0xff] }
 0x3f1   : > { %v2142_v44 = vadd.f32 %v2141_v10, %v2093_v58  ;;  %v2207_v36 = vpop.f32.mrf.mxu3  ;;  %2817 = vst [vmem:[#allocation4 + $0x1e8] sm:$0xff] %v2140_v50  ;;  %v2205_v28 = vadd.f32 %v2204_v29, %v2156_v4 }
 0x3f2   : > { %v7179_v41 = vpop.permute.xlu1 %1366  ;;  %v950_v55 = vpop.permute.xlu2 %949  ;;  %v2203_v56 = vadd.f32 %v2202_v18, %v2154_v57 }
 0x3f3   : > { %v7185_v60 = vpop.permute.xlu0 %1506  ;;  %v1613_v37 = vsel %vm1608_vm5, %v9851_v7, %v7179_v41  ;;  %2823 = vst [vmem:[#allocation4 + $0x2d8] sm:$0xff] %v2142_v44  ;;  %v9853_v7 = vld [vmem:[#allocation51_spill] sm:$0xff] }
 0x3f4   : > { %1438 = vrot.lane.b32.xlu1 %v9852_v11, %s5616_s29  ;;  %2445 = vmatpush.bf16.msrb.mxu2 %v1613_v37  ;;  %v1673_v46 = vsel %vm1608_vm5, %v7139_v47, %v7185_v60  ;;  %v971_v47 = vsel %vm965_vm6, %v6962_v53, %v950_v55  ;;  %v9854_v53 = vld [vmem:[#allocation53_spill] sm:$0xff] }
 0x3f5   : > { %2492 = vmatpush.bf16.msrb.mxu0 %v1673_v46 }
 0x3f6   : > { %v2251_v40 = vpop.f32.mrf.mxu2 }
 0x3f7   : > { %2446 = vmatmul.bf16.vlgmr.msrb.gmra.mxu2 %v6376_v59  ;;  %v2300_v50 = vpop.f32.mrf.mxu0  ;;  %v7205_v46 = vpop.f32.mrf.mxu1  ;;  %v2252_v55 = vadd.f32 %v2251_v40, %v2203_v56  ;;  %v9858_v40 = vld [vmem:[#allocation58_spill] sm:$0xff]  ;;  %v1105_v59 = vld [vmem:[%s5670_s23 + $0x68] sm:$0xff] }
 0x3f9   : > { %v2209_v11 = vpop.f32.mrf.mxu3  ;;  %2734 = vst [vmem:[#allocation4 + $0x2a0] sm:$0xff] %v2252_v55 }
 0x3fa   : > { %v1491_v23 = vpop.permute.xlu1 %1490 }
 0x3fb   : > { %v1477_v58 = vpop.permute.xlu0 %1476  ;;  %v1666_v37 = vsel %vm1608_vm5, %v9853_v7, %v1491_v23  ;;  %v1667_v10 = vsel %vm1608_vm5, %v1491_v23, %v7149_v6  ;;  %v1143_v23 = vunpack.c.h.bf16 %v1093_v8 }
 0x3fc   : > { %1536 = vrot.lane.b32.xlu1 %v971_v47, %s5616_s29  ;;  %2346 = vmatpush.bf16.msrb.mxu1 %v1666_v37  ;;  %v1660_v44 = vsel %vm1608_vm5, %v9854_v53, %v1477_v58  ;;  %v1099_v37 = vld [vmem:[%s5670_s23 + $0x38] sm:$0xff]  ;;  %v9857_v53 = vld [vmem:[#allocation15_spill] sm:$0xff] }
 0x3fd   : > { %2493 = vmatpush.bf16.msrb.mxu0 %v1667_v10  ;;  %v7215_v10 = vld [vmem:[%s5670_s23 + $0x50] sm:$0xff]  ;;  %v7220_v57 = vadd.f32 %v2300_v50, %v1143_v23  ;;  %v1154_v56 = vunpack.c.l.bf16 %v1099_v37 }
 0x3fe   : > { %v2253_v12 = vpop.f32.mrf.mxu2  ;;  %v9859_v50 = vld [vmem:[#allocation24_spill] sm:$0xff] }
 0x3ff   : > { %v2254_v7 = vadd.f32 %v2253_v12, %v2205_v28  ;;  %v7222_v4 = vpop.f32.mrf.mxu0  ;;  %v1160_v28 = vunpack.c.l.bf16 %v7215_v10  ;;  %v7232_v12 = vpop.permute.xlu2 %1043  ;;  %v2159_v23 = vadd.f32 %v7172_v31, %v1154_v56  ;;  %v9862_v56 = vld [vmem:[#allocation16_spill] sm:$0xff] }
 0x400   : > { %2347 = vmatpush.bf16.msrb.mxu1 %v1660_v44  ;;  %4985 = vmatmul.msk.bf16.gmra.mxu3 %vm1825_vm9, %v9855_v39  ;;  %v9861_v39 = vld [vmem:[#allocation56_spill] sm:$0xff] }
 0x401   : > { %2740 = vst [vmem:[#allocation4 + $0x88] sm:$0xff] %v2254_v7  ;;  %v2212_v44 = vpop.f32.mrf.mxu3 }
 0x402   : > { %v7211_v47 = vpop.permute.xlu1 %1478 }
 0x403   : > { %9856 = vst [vmem:[#allocation5_spill] sm:$0xff] %v7211_v47  ;;  %v991_v18 = vpop.permute.xlu0 %990  ;;  %2348 = vmatmul.bf16.vlgmr.msrb.gmra.mxu1 %v9815_v24  ;;  %v1661_v29 = vsel %vm1608_vm5, %v1477_v58, %v7211_v47  ;;  %v2165_v58 = vpop.f32.mrf.mxu1  ;;  %v7248_v47 = vld [vmem:[%s5670_s23 + $0x80] sm:$0xff] }
 0x404   : > { %v1012_v8 = vsel %vm1006_vm4, %v9857_v53, %v991_v18  ;;  %1396 = vrot.lane.b32.xlu1 %v9858_v40, %s5616_s29  ;;  %2494 = vmatpush.bf16.msrb.mxu0 %v1661_v29  ;;  %v2161_v18 = vadd.f32 %v2160_v26, %v1160_v28  ;;  %v9860_v29 = vld [vmem:[#allocation32_spill] sm:$0xff]  ;;  %9863 = vst [vmem:[#allocation40_spill] sm:$0xff] %v7248_v47 }
 0x405   : > { %1564 = vrot.lane.b32.xlu0 %v1012_v8, %s5616_s29 }
 0x406   : > { %v2256_v55 = vpop.f32.mrf.mxu2  ;;  %v2210_v49 = vadd.f32 %v2209_v11, %v2161_v18 }
 0x407   : > { %2495 = vmatmul.bf16.vlgmr.msrb.gmra.mxu0 %v9815_v24  ;;  %2451 = vmatmul.bf16.gmra.mxu2 %v9859_v50  ;;  %v2305_v40 = vpop.f32.mrf.mxu0  ;;  %v2208_v50 = vadd.f32 %v2207_v36, %v2159_v23  ;;  %v1032_v24 = vpop.permute.xlu2 %1031 }
 0x409   : > { %v2214_v31 = vpop.f32.mrf.mxu3 }
 0x40a   : > { %v964_v53 = vpop.permute.xlu1 %963 }
 0x40b   : > { %v977_v7 = vsel %vm965_vm6, %v9860_v29, %v964_v53  ;;  %v923_v8 = vpop.permute.xlu0 %922  ;;  %v7242_v26 = vpop.f32.mrf.mxu1  ;;  %v2257_v53 = vadd.f32 %v2256_v55, %v2208_v50  ;;  %v1155_v29 = vunpack.c.h.bf16 %v1099_v37  ;;  %v9867_v50 = vld [vmem:[#allocation34_spill] sm:$0xff]  ;;  %v9868_v37 = vld [vmem:[#allocation57_spill] sm:$0xff]  ;;  %v1166_v55 = vunpack.c.l.bf16 %v1105_v59 }
 0x40c   : > { %1550 = vrot.lane.b32.xlu2 %v977_v7, %s5616_s29  ;;  %1494 = vrot.lane.b32.xlu1 %v7016_v54, %s5616_s29  ;;  %v9864_v54 = vld [vmem:[#allocation59_spill] sm:$0xff] }
 0x40d   : > { %1424 = vrot.lane.b32.xlu0 %v9861_v39, %s5616_s29  ;;  %v1058_v36 = vsel %vm1047_vm1, %v9864_v54, %v7232_v12  ;;  %v9865_v39 = vld [vmem:[#allocation18_spill] sm:$0xff]  ;;  %2746 = vst [vmem:[#allocation4 + $0xc8] sm:$0xff] %v2257_v53  ;;  %v7254_v23 = vadd.f32 %v2305_v40, %v1155_v29 }
 0x40e   : > { %v2258_v28 = vpop.f32.mrf.mxu2 }
 0x40f   : > { %v2259_v62 = vadd.f32 %v2258_v28, %v2210_v49  ;;  %v7256_v18 = vpop.f32.mrf.mxu0  ;;  %v936_v49 = vsel %vm924_vm7, %v9867_v50, %v923_v8  ;;  %v1172_v28 = vunpack.c.l.bf16 %v7248_v47  ;;  %v2164_v8 = vadd.f32 %v7205_v46, %v1166_v55  ;;  %v9870_v46 = vld [vmem:[#allocation31_spill] sm:$0xff] }
 0x410   : > { %4986 = vmatmul.msk.bf16.gmra.mxu3 %vm1825_vm9, %v9862_v56  ;;  %9866 = vst [vmem:[#allocation14_spill] sm:$0xff] %v7256_v18 }
 0x411   : > { %2752 = vst [vmem:[#allocation4 + $0x248] sm:$0xff] %v2259_v62  ;;  %v2217_v54 = vpop.f32.mrf.mxu3  ;;  %v2166_v29 = vadd.f32 %v2165_v58, %v1172_v28  ;;  %v2213_v58 = vadd.f32 %v2212_v44, %v2164_v8  ;;  %v9871_v28 = vld [vmem:[#allocation21_spill] sm:$0xff] }
 0x412   : > { %v909_v7 = vpop.permute.xlu1 %908 }
 0x413   : > { %v1046_v11 = vpop.permute.xlu0 %1045  ;;  %2353 = vmatmul.bf16.gmra.mxu1 %v9865_v39  ;;  %v2170_v40 = vpop.f32.mrf.mxu1 }
 0x414   : > { %1410 = vrot.lane.b32.xlu2 %v9868_v37, %s5616_s29  ;;  %1604 = vrot.lane.b32.xlu1 %v1058_v36, %s5616_s29  ;;  %v9869_v37 = vld [vmem:[#allocation12_spill] sm:$0xff] }
 0x415   : > { %1522 = vrot.lane.b32.xlu0 %v936_v49, %s5616_s29  ;;  %v930_v36 = vsel %vm924_vm7, %v9869_v37, %v909_v7  ;;  %v2215_v7 = vadd.f32 %v2214_v31, %v2166_v29  ;;  %v1059_v29 = vsel %vm1047_vm1, %v7232_v12, %v1046_v11  ;;  %v1117_v12 = vld [vmem:[%s5670_s23 + $0xc8] sm:$0xff]  ;;  %v7308_v11 = vld [vmem:[%s5670_s23 + $0xe0] sm:$0xff] }
 0x416   : > { %v2261_v53 = vpop.f32.mrf.mxu2 }
 0x417   : > { %2500 = vmatmul.bf16.gmra.mxu0 %v9865_v39  ;;  %2456 = vmatmul.bf16.gmra.mxu2 %v9819_v34  ;;  %v2310_v56 = vpop.f32.mrf.mxu0  ;;  %v1453_v34 = vpop.permute.xlu2 %1452  ;;  %v2262_v37 = vadd.f32 %v2261_v53, %v2213_v58  ;;  %v7283_v39 = vld [vmem:[%s5670_s23 + $0xb0] sm:$0xff]  ;;  %v9873_v58 = vld [vmem:[#allocation10_spill] sm:$0xff] }
 0x419   : > { %v2219_v55 = vpop.f32.mrf.mxu3  ;;  %2758 = vst [vmem:[#allocation4 + $0x268] sm:$0xff] %v2262_v37 }
 0x41a   : > { %v1030_v50 = vpop.permute.xlu1 %1029 }
 0x41b   : > { %v1053_v62 = vsel %vm1047_vm1, %v1030_v50, %v1032_v24  ;;  %v1467_v49 = vpop.permute.xlu0 %1466  ;;  %v1650_v24 = vsel %vm1608_vm5, %v7096_v52, %v1453_v34  ;;  %v2173_v18 = vpop.f32.mrf.mxu1  ;;  %v9872_v34 = vld [vmem:[#allocation33_spill] sm:$0xff]  ;;  %v1184_v52 = vunpack.c.l.bf16 %v7283_v39 }
 0x41c   : > { %v1656_v47 = vsel %vm1608_vm5, %v7088_v9, %v1467_v49  ;;  %1508 = vrot.lane.b32.xlu2 %v930_v36, %s5616_s29  ;;  %1592 = vrot.lane.b32.xlu1 %v1053_v62, %s5616_s29  ;;  %v1167_v36 = vunpack.c.h.bf16 %v1105_v59  ;;  %v1111_v62 = vld [vmem:[%s5670_s23 + $0x98] sm:$0xff] }
 0x41d   : > { %1382 = vrot.lane.b32.xlu0 %v9870_v46, %s5616_s29  ;;  %2585 = vmatpush.bf16.msra.mxu3 %v1656_v47  ;;  %v1178_v59 = vunpack.c.l.bf16 %v1111_v62  ;;  %v2171_v8 = vadd.f32 %v2170_v40, %v1184_v52 }
 0x41e   : > { %v2263_v9 = vpop.f32.mrf.mxu2  ;;  %v7286_v47 = vadd.f32 %v2310_v56, %v1167_v36  ;;  %v1179_v36 = vunpack.c.h.bf16 %v1111_v62 }
 0x41f   : > { %v2264_v49 = vadd.f32 %v2263_v9, %v2215_v7  ;;  %v7288_v44 = vpop.f32.mrf.mxu0  ;;  %v2169_v56 = vadd.f32 %v7242_v26, %v1178_v59  ;;  %v2220_v9 = vadd.f32 %v2219_v55, %v2171_v8  ;;  %v1196_v55 = vunpack.c.l.bf16 %v7308_v11 }
 0x420   : > { %4987 = vmatmul.msk.bf16.gmra.mxu3 %vm1825_vm9, %v9871_v28 }
 0x421   : > { %2586 = vmatpush.bf16.msra.mxu3 %v1650_v24  ;;  %2764 = vst [vmem:[#allocation4 + $0x28] sm:$0xff] %v2264_v49  ;;  %v2222_v31 = vpop.f32.mrf.mxu3  ;;  %v2218_v24 = vadd.f32 %v2217_v54, %v2169_v56  ;;  %v1190_v54 = vunpack.c.l.bf16 %v1117_v12 }
 0x423   : > { %2358 = vmatmul.bf16.gmra.mxu1 %v9833_v38  ;;  %v2175_v7 = vpop.f32.mrf.mxu1 }
 0x424   : > { %1368 = vrot.lane.b32.xlu2 %v9872_v34, %s5616_s29  ;;  %v2176_v56 = vadd.f32 %v2175_v7, %v1196_v55 }
 0x425   : > { %1480 = vrot.lane.b32.xlu0 %v7032_v33, %s5616_s29  ;;  %v1052_v33 = vsel %vm1047_vm1, %v9873_v58, %v1030_v50 }
 0x426   : > { %v2266_v53 = vpop.f32.mrf.mxu2 }
 0x427   : > { %2505 = vmatmul.bf16.gmra.mxu0 %v9833_v38  ;;  %2461 = vmatmul.bf16.gmra.mxu2 %v6549_v17  ;;  %v2315_v46 = vpop.f32.mrf.mxu0  ;;  %v2267_v40 = vadd.f32 %v2266_v53, %v2218_v24  ;;  %v2174_v53 = vadd.f32 %v2173_v18, %v1190_v54 }
 0x428   : > { %v7311_v50 = vadd.f32 %v2315_v46, %v1179_v36  ;;  %v1123_v36 = vld [vmem:[%s5670_s23 + $0xf8] sm:$0xff] }
 0x429   : > { %v2224_v37 = vpop.f32.mrf.mxu3  ;;  %2770 = vst [vmem:[#allocation4 + $0x50] sm:$0xff] %v2267_v40 }
 0x42a   : > { %v2225_v46 = vadd.f32 %v2224_v37, %v2176_v56 }
 0x42b   : > { %v2178_v59 = vpop.f32.mrf.mxu1 }
 0x42c   : > { %1606 = vrot.lane.b32.xlu2 %v1059_v29, %s5616_s29  ;;  %v2223_v29 = vadd.f32 %v2222_v31, %v2174_v53  ;;  %v1202_v31 = vunpack.c.l.bf16 %v1123_v36 }
 0x42d   : > { %1590 = vrot.lane.b32.xlu0 %v1052_v33, %s5616_s29 }
 0x42e   : > { %v2268_v26 = vpop.f32.mrf.mxu2  ;;  %v2179_v54 = vadd.f32 %v2178_v59, %v1202_v31 }
 0x42f   : > { %v2269_v49 = vadd.f32 %v2268_v26, %v2220_v9  ;;  %v7313_v34 = vpop.f32.mrf.mxu0  ;;  %v1191_v26 = vunpack.c.h.bf16 %v1117_v12 }
 0x430   : > { %4988 = vmatmul.msk.bf16.gmra.mxu3 %vm1825_vm9, %v6451_v32 }
 0x431   : > { %2776 = vst [vmem:[#allocation4 + $0x1c0] sm:$0xff] %v2269_v49  ;;  %v2227_v52 = vpop.f32.mrf.mxu3  ;;  %v7322_v49 = vld [vmem:[%s5670_s23 + $0x110] sm:$0xff] }
 0x432   : > { %v1208_v37 = vunpack.c.l.bf16 %v7322_v49 }
 0x433   : > { %2363 = vmatmul.bf16.gmra.mxu1 %v9836_v43  ;;  %v2180_v58 = vpop.f32.mrf.mxu1 }
 0x434   : > { %v2181_v55 = vadd.f32 %v2180_v58, %v1208_v37 }
 0x436   : > { %v2271_v62 = vpop.f32.mrf.mxu2 }
 0x437   : > { %2510 = vmatmul.bf16.gmra.mxu0 %v9836_v43  ;;  %2466 = vmatmul.bf16.gmra.mxu2 %v6143_v5  ;;  %v2320_v8 = vpop.f32.mrf.mxu0  ;;  %v2272_v9 = vadd.f32 %v2271_v62, %v2223_v29 }
 0x438   : > { %v7325_v18 = vadd.f32 %v2320_v8, %v1191_v26  ;;  %v2228_v8 = vadd.f32 %v2227_v52, %v2179_v54 }
 0x439   : > { %v2229_v24 = vpop.f32.mrf.mxu3  ;;  %2782 = vst [vmem:[#allocation4 + $0xa8] sm:$0xff] %v2272_v9  ;;  %v1203_v9 = vunpack.c.h.bf16 %v1123_v36 }
 0x43a   : > { %v2230_v29 = vadd.f32 %v2229_v24, %v2181_v55 }
 0x43b   : > { %v2183_v62 = vpop.f32.mrf.mxu1 }
 0x43e   : > { %v2273_v33 = vpop.f32.mrf.mxu2 }
 0x43f   : > { %v2274_v40 = vadd.f32 %v2273_v33, %v2225_v46  ;;  %v7327_v7 = vpop.f32.mrf.mxu0 }
 0x440   : > { %4989 = vmatmul.msk.bf16.gmra.mxu3 %vm1825_vm9, %v6417_v3  ;;  %v7336_v3 = vld [vmem:[%s5670_s23 + $0x140] sm:$0xff] }
 0x441   : > { %2788 = vst [vmem:[#allocation4 + $0x238] sm:$0xff] %v2274_v40  ;;  %v2232_v53 = vpop.f32.mrf.mxu3  ;;  %v1129_v40 = vld [vmem:[%s5670_s23 + $0x128] sm:$0xff]  ;;  %v1220_v24 = vunpack.c.l.bf16 %v7336_v3 }
 0x442   : > { %v1214_v52 = vunpack.c.l.bf16 %v1129_v40 }
 0x443   : > { %2368 = vmatmul.bf16.gmra.mxu1 %v6516_v25  ;;  %v2185_v31 = vpop.f32.mrf.mxu1 }
 0x444   : > { %v2186_v54 = vadd.f32 %v2185_v31, %v1220_v24 }
 0x446   : > { %v2276_v12 = vpop.f32.mrf.mxu2 }
 0x447   : > { %2515 = vmatmul.bf16.gmra.mxu0 %v6516_v25  ;;  %2471 = vmatmul.bf16.gmra.mxu2 %v6169_v27  ;;  %v2325_v56 = vpop.f32.mrf.mxu0  ;;  %v2277_v33 = vadd.f32 %v2276_v12, %v2228_v8  ;;  %v2184_v12 = vadd.f32 %v2183_v62, %v1214_v52  ;;  %v1135_v62 = vld [vmem:[%s5670_s23 + $0x158] sm:$0xff]  ;;  %v7352_v52 = vld [vmem:[%s5670_s23 + $0x170] sm:$0xff] }
 0x448   : > { %v7339_v59 = vadd.f32 %v2325_v56, %v1203_v9  ;;  %9874 = vst [vmem:[#allocation29_spill] sm:$0xff] %v7352_v52  ;;  %v1226_v31 = vunpack.c.l.bf16 %v1135_v62 }
 0x449   : > { %2794 = vst [vmem:[#allocation4 + $0x2c8] sm:$0xff] %v2277_v33  ;;  %v2234_v37 = vpop.f32.mrf.mxu3  ;;  %v2233_v56 = vadd.f32 %v2232_v53, %v2184_v12 }
 0x44a   : > { %v2235_v8 = vadd.f32 %v2234_v37, %v2186_v54 }
 0x44e   : > { %v2278_v46 = vpop.f32.mrf.mxu2 }
 0x44f   : > { %v2279_v26 = vadd.f32 %v2278_v46, %v2230_v29  ;;  %v7341_v58 = vpop.f32.mrf.mxu0  ;;  %v2188_v46 = vpop.f32.mrf.mxu1 }
 0x450   : > { %4990 = vmatmul.msk.bf16.gmra.mxu3 %vm1825_vm9, %v6473_v2 }
 0x451   : > { %2800 = vst [vmem:[#allocation4 + $0xc0] sm:$0xff] %v2279_v26  ;;  %v2237_v9 = vpop.f32.mrf.mxu3 }
 0x453   : > { %2373 = vmatmul.bf16.gmra.mxu1 %v6565_v30 }
 0x456   : > { %v2281_v36 = vpop.f32.mrf.mxu2 }
 0x457   : > { %2520 = vmatmul.bf16.gmra.mxu0 %v6565_v30  ;;  %2476 = vmatmul.bf16.gmra.mxu2 %v6198_v19  ;;  %v2330_v55 = vpop.f32.mrf.mxu0  ;;  %v2282_v2 = vadd.f32 %v2281_v36, %v2233_v56  ;;  %v1215_v19 = vunpack.c.h.bf16 %v1129_v40  ;;  %v2190_v36 = vpop.f32.mrf.mxu1 }
 0x459   : > { %2806 = vst [vmem:[#allocation4 + $0x280] sm:$0xff] %v2282_v2  ;;  %v7355_v53 = vadd.f32 %v2330_v55, %v1215_v19  ;;  %v2189_v19 = vadd.f32 %v2188_v46, %v1226_v31 }
 0x45b   : > { %v2238_v55 = vadd.f32 %v2237_v9, %v2189_v19 }
 0x45e   : > { %v1579_v29 = vpop.permute.xlu1 %1578  ;;  %v2283_v26 = vpop.f32.mrf.mxu2 }
 0x45f   : > { %v1704_v33 = vsel %vm1608_vm5, %v7110_v22, %v1579_v29  ;;  %v2284_v30 = vadd.f32 %v2283_v26, %v2235_v8  ;;  %v1232_v22 = vunpack.c.l.bf16 %v7352_v52  ;;  %v7358_v24 = vpop.f32.mrf.mxu0  ;;  %v1227_v52 = vunpack.c.h.bf16 %v1135_v62 }
 0x460   : > { %2634 = vmatpush.bf16.msra.mxu2 %v1704_v33  ;;  %4991 = vmatmul.msk.bf16.gmra.mxu3 %vm1825_vm9, %v6528_v42 }
 0x461   : > { %2812 = vst [vmem:[#allocation4 + $0x188] sm:$0xff] %v2284_v30  ;;  %v2191_v54 = vadd.f32 %v2190_v36, %v1232_v22  ;;  %v2239_v30 = vpop.f32.mrf.mxu3 }
 0x463   : > { %2378 = vmatmul.bf16.gmra.mxu1 %v6594_v0  ;;  %v2240_v56 = vadd.f32 %v2239_v30, %v2191_v54 }
 0x466   : > { %v1439_v37 = vpop.permute.xlu1 %1438  ;;  %v1551_v12 = vpop.permute.xlu2 %1550 }
 0x467   : > { %v1644_v40 = vsel %vm1608_vm5, %v7044_v20, %v1439_v37  ;;  %2525 = vmatmul.bf16.gmra.mxu0 %v6594_v0  ;;  %2481 = vmatmul.bf16.gmra.mxu2 %v6226_v51  ;;  %v2286_v2 = vpop.f32.mrf.mxu2  ;;  %v2335_v33 = vpop.f32.mrf.mxu0 }
 0x468   : > { %2587 = vmatpush.bf16.msra.mxu3 %v1644_v40  ;;  %v2287_v42 = vadd.f32 %v2286_v2, %v2238_v55  ;;  %v7365_v37 = vadd.f32 %v2335_v33, %v1227_v52 }
 0x46a   : > { %2818 = vst [vmem:[#allocation4 + $0x8] sm:$0xff] %v2287_v42  ;;  %v1692_v42 = vsel %vm1608_vm5, %v7137_v63, %v1551_v12 }
 0x46e   : > { %v1537_v8 = vpop.permute.xlu1 %1536  ;;  %v1411_v29 = vpop.permute.xlu2 %1410 }
 0x46f   : > { %v2288_v26 = vpop.f32.mrf.mxu2  ;;  %v7370_v40 = vpop.f32.mrf.mxu0  ;;  %v1686_v55 = vsel %vm1608_vm5, %v7147_v21, %v1537_v8 }
 0x470   : > { %v2289_v27 = vadd.f32 %v2288_v26, %v2240_v56  ;;  %v1149_v26 = vunpack.c.h.bf16 %v7183_v1 }
 0x472   : > { %2824 = vst [vmem:[#allocation4 + $0x218] sm:$0xff] %v2289_v27  ;;  %v7375_v27 = vld [vmem:[%s5670_s23 + $0x10] sm:$0xff] }
 0x473   : > { %2383 = vmatmul.bf16.gmra.mxu1 %v6627_v15  ;;  %v2398_v20 = vpop.f32.mrf.mxu3  ;;  %v1144_v54 = vunpack.c.l.bf16 %v7375_v27 }
 0x476   : > { %v1397_v46 = vpop.permute.xlu1 %1396  ;;  %v1509_v31 = vpop.permute.xlu2 %1508 }
 0x477   : > { %v1565_v22 = vpop.permute.xlu0 %1564  ;;  %2530 = vmatmul.bf16.gmra.mxu0 %v6627_v15 }
 0x478   : > { %v1698_v9 = vsel %vm1608_vm5, %v7122_v48, %v1565_v22 }
 0x479   : > { %2635 = vmatpush.bf16.msra.mxu2 %v1698_v9  ;;  %v1632_v9 = vsel %vm1608_vm5, %v7062_v13, %v1411_v29  ;;  %v1626_v13 = vsel %vm1608_vm5, %v7072_v61, %v1397_v46 }
 0x47a   : > { %v2447_v62 = vpop.f32.mrf.mxu2 }
 0x47b   : > { %v2400_v36 = vpop.f32.mrf.mxu3  ;;  %v2448_v63 = vadd.f32 %v2447_v62, %v1144_v54 }
 0x47d   : > { %2636 = vmatpush.bf16.msra.mxu2 %v1692_v42 }
 0x47e   : > { %v1495_v52 = vpop.permute.xlu1 %1494  ;;  %v1369_v2 = vpop.permute.xlu2 %1368 }
 0x47f   : > { %v1425_v19 = vpop.permute.xlu0 %1424 }
 0x480   : > { %v2349_v30 = vpop.f32.mrf.mxu1  ;;  %v1638_v48 = vsel %vm1608_vm5, %v7052_v16, %v1425_v19 }
 0x481   : > { %v2350_v56 = vadd.f32 %v2349_v30, %v7220_v57  ;;  %2588 = vmatpush.bf16.msra.mxu3 %v1638_v48  ;;  %2637 = vmatpush.bf16.msra.mxu2 %v1686_v55  ;;  %v2303_v57 = vadd.f32 %v7222_v4, %v1149_v26 }
 0x482   : > { %v7383_v12 = vpop.f32.mrf.mxu2 }
 0x483   : > { %v2399_v33 = vadd.f32 %v2398_v20, %v2350_v56  ;;  %v2403_v22 = vpop.f32.mrf.mxu3  ;;  %v7403_v56 = vld [vmem:[%s5670_s23 + $0x40] sm:$0xff] }
 0x484   : > { %v2496_v42 = vpop.f32.mrf.mxu0  ;;  %v1156_v46 = vunpack.c.l.bf16 %v7403_v56 }
 0x485   : > { %2735 = vst [vmem:[#allocation4 + $0x70] sm:$0xff] %v2399_v33  ;;  %2589 = vmatpush.bf16.msra.mxu3 %v1632_v9  ;;  %v7388_v16 = vadd.f32 %v2496_v42, %v2448_v63  ;;  %v1161_v9 = vunpack.c.h.bf16 %v7215_v10 }
 0x486   : > { %v1605_v21 = vpop.permute.xlu1 %1604  ;;  %v1607_v8 = vpop.permute.xlu2 %1606 }
 0x487   : > { %v1715_v62 = vsel %vm1608_vm5, %v7080_v45, %v1605_v21  ;;  %v1716_v20 = vsel %vm1608_vm5, %v1605_v21, %v1607_v8  ;;  %v1523_v19 = vpop.permute.xlu0 %1522  ;;  %v1674_v45 = vsel %vm1608_vm5, %v7185_v60, %v1509_v31  ;;  %v1614_v21 = vsel %vm1608_vm5, %v7179_v41, %v1369_v2  ;;  %v9878_v2 = vld [vmem:[#allocation13_spill] sm:$0xff] }
 0x488   : > { %v2351_v1 = vpop.f32.mrf.mxu1  ;;  %2542 = vmatpush.bf16.msra.mxu1 %v1715_v62  ;;  %v1680_v29 = vsel %vm1608_vm5, %v7124_v14, %v1523_v19  ;;  %2689 = vmatpush.bf16.msra.mxu0 %v1716_v20  ;;  %v9876_v62 = vld [vmem:[#allocation5_spill] sm:$0xff] }
 0x489   : > { %v2352_v54 = vadd.f32 %v2351_v1, %v2303_v57  ;;  %2590 = vmatpush.bf16.msra.mxu3 %v1626_v13  ;;  %2638 = vmatpush.bf16.msra.mxu2 %v1680_v29 }
 0x48a   : > { %v2452_v4 = vpop.f32.mrf.mxu2 }
 0x48b   : > { %v2401_v30 = vadd.f32 %v2400_v36, %v2352_v54  ;;  %v2405_v48 = vpop.f32.mrf.mxu3  ;;  %v1668_v36 = vsel %vm1608_vm5, %v7149_v6, %v1495_v52  ;;  %v2453_v60 = vadd.f32 %v2452_v4, %v1156_v46  ;;  %v9875_v6 = vld [vmem:[#allocation14_spill] sm:$0xff]  ;;  %v7426_v54 = vld [vmem:[%s5670_s23 + $0x70] sm:$0xff] }
 0x48c   : > { %v7400_v55 = vpop.f32.mrf.mxu0 }
 0x48d   : > { %2741 = vst [vmem:[#allocation4 + $0x140] sm:$0xff] %v2401_v30  ;;  %2639 = vmatpush.bf16.msra.mxu2 %v1674_v45  ;;  %v1168_v30 = vunpack.c.l.bf16 %v7426_v54 }
 0x48e   : > { %v1593_v29 = vpop.permute.xlu1 %1592 }
 0x48f   : > { %v1383_v61 = vpop.permute.xlu0 %1382 }
 0x490   : > { %v2354_v14 = vpop.f32.mrf.mxu1  ;;  %v1620_v63 = vsel %vm1608_vm5, %v7151_v35, %v1383_v61  ;;  %v9879_v61 = vld [vmem:[#allocation37_spill] sm:$0xff] }
 0x491   : > { %v2355_v33 = vadd.f32 %v2354_v14, %v7254_v23  ;;  %2591 = vmatpush.bf16.msra.mxu3 %v1620_v63  ;;  %2640 = vmatpush.bf16.msra.mxu2 %v1668_v36  ;;  %v2308_v23 = vadd.f32 %v9875_v6, %v1161_v9 }
 0x492   : > { %v7411_v31 = vpop.f32.mrf.mxu2 }
 0x493   : > { %v2404_v26 = vadd.f32 %v2403_v22, %v2355_v33  ;;  %v2408_v42 = vpop.f32.mrf.mxu3  ;;  %v9877_v22 = vld [vmem:[#allocation20_spill] sm:$0xff] }
 0x494   : > { %v2501_v8 = vpop.f32.mrf.mxu0 }
 0x495   : > { %2747 = vst [vmem:[#allocation4 + $0x20] sm:$0xff] %v2404_v26  ;;  %2592 = vmatpush.bf16.msra.mxu3 %v1614_v21  ;;  %v7416_v35 = vadd.f32 %v2501_v8, %v2453_v60  ;;  %v9880_v60 = vld [vmem:[#allocation40_spill] sm:$0xff]  ;;  %v9881_v21 = vld [vmem:[#allocation9_spill] sm:$0xff] }
 0x496   : > { %v1173_v26 = vunpack.c.h.bf16 %v9880_v60 }
 0x497   : > { %v1481_v52 = vpop.permute.xlu0 %1480 }
 0x498   : > { %v2356_v57 = vpop.f32.mrf.mxu1  ;;  %v1662_v20 = vsel %vm1608_vm5, %v9876_v62, %v1481_v52  ;;  %2593 = vmatmul.bf16.vlgmr.msra.gmra.mxu3 %v9877_v22  ;;  %v9882_v52 = vld [vmem:[#allocation24_spill] sm:$0xff]  ;;  %v9883_v22 = vld [vmem:[#allocation18_spill] sm:$0xff] }
 0x499   : > { %v2357_v10 = vadd.f32 %v2356_v57, %v2308_v23  ;;  %2641 = vmatpush.bf16.msra.mxu2 %v1662_v20 }
 0x49a   : > { %v2457_v19 = vpop.f32.mrf.mxu2 }
 0x49b   : > { %v2406_v1 = vadd.f32 %v2405_v48, %v2357_v10  ;;  %v2410_v41 = vpop.f32.mrf.mxu3  ;;  %v2458_v63 = vadd.f32 %v2457_v19, %v1168_v30  ;;  %v7448_v19 = vld [vmem:[%s5670_s23 + $0xa0] sm:$0xff] }
 0x49c   : > { %2642 = vmatmul.bf16.vlgmr.msra.gmra.mxu2 %v9878_v2  ;;  %v7423_v13 = vpop.f32.mrf.mxu0 }
 0x49d   : > { %2753 = vst [vmem:[#allocation4 + $0x2b0] sm:$0xff] %v2406_v1  ;;  %v1180_v1 = vunpack.c.l.bf16 %v7448_v19 }
 0x49f   : > { %v1591_v4 = vpop.permute.xlu0 %1590 }
 0x4a0   : > { %v2359_v45 = vpop.f32.mrf.mxu1  ;;  %v1709_v46 = vsel %vm1608_vm5, %v9879_v61, %v1591_v4  ;;  %v1710_v14 = vsel %vm1608_vm5, %v1591_v4, %v1593_v29  ;;  %v9884_v61 = vld [vmem:[#allocation11_spill] sm:$0xff] }
 0x4a1   : > { %v2360_v48 = vadd.f32 %v2359_v45, %v7286_v47  ;;  %2543 = vmatpush.bf16.msra.mxu1 %v1709_v46  ;;  %2690 = vmatpush.bf16.msra.mxu0 %v1710_v14  ;;  %v2313_v47 = vadd.f32 %v7288_v44, %v1173_v26  ;;  %v1185_v45 = vunpack.c.h.bf16 %v7283_v39 }
 0x4a2   : > { %v7433_v36 = vpop.f32.mrf.mxu2 }
 0x4a3   : > { %v2409_v33 = vadd.f32 %v2408_v42, %v2360_v48  ;;  %v2413_v9 = vpop.f32.mrf.mxu3 }
 0x4a4   : > { %4992 = vmatmul.msk.bf16.vlgmr.msra.gmra.mxu1 %vm1825_vm9, %v9881_v21  ;;  %5000 = vmatmul.msk.bf16.vlgmr.msra.gmra.mxu0 %vm1825_vm9, %v9881_v21  ;;  %v2506_v8 = vpop.f32.mrf.mxu0  ;;  %v7467_v21 = vld [vmem:[%s5670_s23 + $0xd0] sm:$0xff] }
 0x4a5   : > { %2759 = vst [vmem:[#allocation4 + $0x178] sm:$0xff] %v2409_v33  ;;  %v7440_v6 = vadd.f32 %v2506_v8, %v2458_v63  ;;  %v9885_v63 = vld [vmem:[#allocation28_spill] sm:$0xff]  ;;  %v1192_v8 = vunpack.c.l.bf16 %v7467_v21 }
 0x4a8   : > { %v2361_v23 = vpop.f32.mrf.mxu1  ;;  %2598 = vmatmul.bf16.gmra.mxu3 %v9882_v52  ;;  %v7472_v52 = vld [vmem:[%s5670_s23 + $0xe8] sm:$0xff] }
 0x4a9   : > { %v2362_v42 = vadd.f32 %v2361_v23, %v2313_v47 }
 0x4aa   : > { %v2462_v57 = vpop.f32.mrf.mxu2 }
 0x4ab   : > { %v2411_v62 = vadd.f32 %v2410_v41, %v2362_v42  ;;  %v2415_v20 = vpop.f32.mrf.mxu3  ;;  %v2463_v44 = vadd.f32 %v2462_v57, %v1180_v1 }
 0x4ac   : > { %2647 = vmatmul.bf16.gmra.mxu2 %v9883_v22  ;;  %v7445_v10 = vpop.f32.mrf.mxu0 }
 0x4ad   : > { %2765 = vst [vmem:[#allocation4 + $0x58] sm:$0xff] %v2411_v62  ;;  %v1197_v62 = vunpack.c.h.bf16 %v7308_v11 }
 0x4b0   : > { %v2364_v2 = vpop.f32.mrf.mxu1 }
 0x4b1   : > { %v2365_v29 = vadd.f32 %v2364_v2, %v7311_v50  ;;  %v2318_v50 = vadd.f32 %v7313_v34, %v1185_v45  ;;  %v2323_v2 = vadd.f32 %v7327_v7, %v1197_v62 }
 0x4b2   : > { %v7452_v4 = vpop.f32.mrf.mxu2 }
 0x4b3   : > { %v2414_v30 = vadd.f32 %v2413_v9, %v2365_v29  ;;  %v2418_v41 = vpop.f32.mrf.mxu3 }
 0x4b4   : > { %4993 = vmatmul.msk.bf16.gmra.mxu1 %vm1825_vm9, %v9884_v61  ;;  %5001 = vmatmul.msk.bf16.gmra.mxu0 %vm1825_vm9, %v9884_v61  ;;  %v2511_v46 = vpop.f32.mrf.mxu0 }
 0x4b5   : > { %2771 = vst [vmem:[#allocation4 + $0x210] sm:$0xff] %v2414_v30  ;;  %v7459_v14 = vadd.f32 %v2511_v46, %v2463_v44  ;;  %v7488_v46 = vld [vmem:[%s5670_s23 + $0x100] sm:$0xff] }
 0x4b8   : > { %v2366_v48 = vpop.f32.mrf.mxu1  ;;  %2603 = vmatmul.bf16.gmra.mxu3 %v9885_v63 }
 0x4b9   : > { %v2367_v33 = vadd.f32 %v2366_v48, %v2318_v50  ;;  %v1204_v50 = vunpack.c.l.bf16 %v7488_v46 }
 0x4ba   : > { %v2467_v39 = vpop.f32.mrf.mxu2 }
 0x4bb   : > { %v2416_v60 = vadd.f32 %v2415_v20, %v2367_v33  ;;  %v2420_v26 = vpop.f32.mrf.mxu3  ;;  %v2468_v34 = vadd.f32 %v2467_v39, %v1192_v8  ;;  %v9886_v20 = vld [vmem:[#allocation16_spill] sm:$0xff] }
 0x4bc   : > { %2652 = vmatmul.bf16.gmra.mxu2 %v9833_v38  ;;  %v7464_v9 = vpop.f32.mrf.mxu0 }
 0x4bd   : > { %2777 = vst [vmem:[#allocation4 + $0x78] sm:$0xff] %v2416_v60 }
 0x4c0   : > { %v2369_v47 = vpop.f32.mrf.mxu1 }
 0x4c1   : > { %v2370_v23 = vadd.f32 %v2369_v47, %v7325_v18  ;;  %v1198_v18 = vunpack.c.l.bf16 %v7472_v52 }
 0x4c2   : > { %v2469_v42 = vpop.f32.mrf.mxu2 }
 0x4c3   : > { %v2419_v57 = vadd.f32 %v2418_v41, %v2370_v23  ;;  %v2423_v1 = vpop.f32.mrf.mxu3  ;;  %v2470_v44 = vadd.f32 %v2469_v42, %v1198_v18 }
 0x4c4   : > { %4994 = vmatmul.msk.bf16.gmra.mxu1 %vm1825_vm9, %v9886_v20  ;;  %5002 = vmatmul.msk.bf16.gmra.mxu0 %vm1825_vm9, %v9886_v20  ;;  %v2516_v38 = vpop.f32.mrf.mxu0 }
 0x4c5   : > { %2783 = vst [vmem:[#allocation4 + $0x128] sm:$0xff] %v2419_v57  ;;  %v7479_v22 = vadd.f32 %v2516_v38, %v2468_v34  ;;  %v7509_v38 = vld [vmem:[%s5670_s23 + $0x130] sm:$0xff] }
 0x4c6   : > { %v1216_v18 = vunpack.c.l.bf16 %v7509_v38 }
 0x4c8   : > { %v2371_v29 = vpop.f32.mrf.mxu1  ;;  %2608 = vmatmul.bf16.gmra.mxu3 %v6549_v17  ;;  %v7493_v17 = vld [vmem:[%s5670_s23 + $0x118] sm:$0xff] }
 0x4c9   : > { %v2372_v11 = vadd.f32 %v2371_v29, %v2323_v2 }
 0x4ca   : > { %v2472_v30 = vpop.f32.mrf.mxu2 }
 0x4cb   : > { %v2421_v45 = vadd.f32 %v2420_v26, %v2372_v11  ;;  %v2425_v7 = vpop.f32.mrf.mxu3  ;;  %v2473_v33 = vadd.f32 %v2472_v30, %v1204_v50  ;;  %v1209_v26 = vunpack.c.h.bf16 %v7322_v49 }
 0x4cc   : > { %2657 = vmatmul.bf16.gmra.mxu2 %v9836_v43  ;;  %v2518_v41 = vpop.f32.mrf.mxu0 }
 0x4cd   : > { %2789 = vst [vmem:[#allocation4 + $0x290] sm:$0xff] %v2421_v45  ;;  %v7485_v61 = vadd.f32 %v2518_v41, %v2470_v44  ;;  %v2328_v47 = vadd.f32 %v7341_v58, %v1209_v26  ;;  %v1221_v44 = vunpack.c.h.bf16 %v7336_v3 }
 0x4cf   : > { %v2333_v41 = vadd.f32 %v7358_v24, %v1221_v44 }
 0x4d0   : > { %v2374_v48 = vpop.f32.mrf.mxu1 }
 0x4d1   : > { %v2375_v63 = vadd.f32 %v2374_v48, %v7339_v59  ;;  %v1210_v59 = vunpack.c.l.bf16 %v7493_v17  ;;  %v9887_v48 = vld [vmem:[#allocation7_spill] sm:$0xff] }
 0x4d2   : > { %v2474_v39 = vpop.f32.mrf.mxu2 }
 0x4d3   : > { %v2424_v60 = vadd.f32 %v2423_v1, %v2375_v63  ;;  %v2475_v34 = vadd.f32 %v2474_v39, %v1210_v59  ;;  %v2428_v42 = vpop.f32.mrf.mxu3 }
 0x4d4   : > { %4995 = vmatmul.msk.bf16.gmra.mxu1 %vm1825_vm9, %v9871_v28  ;;  %5003 = vmatmul.msk.bf16.gmra.mxu0 %vm1825_vm9, %v9871_v28  ;;  %v2521_v43 = vpop.f32.mrf.mxu0 }
 0x4d5   : > { %2795 = vst [vmem:[#allocation4 + $0x2a8] sm:$0xff] %v2424_v60  ;;  %v7500_v8 = vadd.f32 %v2521_v43, %v2473_v33  ;;  %v9888_v33 = vld [vmem:[#allocation35_spill] sm:$0xff]  ;;  %v7530_v43 = vld [vmem:[%s5670_s23 + $0x160] sm:$0xff] }
 0x4d6   : > { %v1228_v59 = vunpack.c.l.bf16 %v7530_v43 }
 0x4d8   : > { %v2376_v23 = vpop.f32.mrf.mxu1  ;;  %2613 = vmatmul.bf16.gmra.mxu3 %v6143_v5  ;;  %v7514_v5 = vld [vmem:[%s5670_s23 + $0x148] sm:$0xff] }
 0x4d9   : > { %v2377_v49 = vadd.f32 %v2376_v23, %v2328_v47 }
 0x4da   : > { %v2477_v57 = vpop.f32.mrf.mxu2 }
 0x4db   : > { %v2426_v62 = vadd.f32 %v2425_v7, %v2377_v49  ;;  %v2478_v2 = vadd.f32 %v2477_v57, %v1216_v18  ;;  %v7535_v49 = vld [vmem:[%s5670_s23 + $0x178] sm:$0xff] }
 0x4dc   : > { %2662 = vmatmul.bf16.gmra.mxu2 %v6516_v25  ;;  %v2523_v28 = vpop.f32.mrf.mxu0  ;;  %v2430_v25 = vpop.f32.mrf.mxu3 }
 0x4dd   : > { %2801 = vst [vmem:[#allocation4 + $0x2b8] sm:$0xff] %v2426_v62  ;;  %v7506_v20 = vadd.f32 %v2523_v28, %v2475_v34  ;;  %v9890_v62 = vld [vmem:[#allocation23_spill] sm:$0xff] }
 0x4e0   : > { %v2379_v58 = vpop.f32.mrf.mxu1 }
 0x4e1   : > { %v2380_v1 = vadd.f32 %v2379_v58, %v7355_v53  ;;  %v1222_v53 = vunpack.c.l.bf16 %v7514_v5  ;;  %v1234_v58 = vunpack.c.l.bf16 %v7535_v49 }
 0x4e2   : > { %v2479_v29 = vpop.f32.mrf.mxu2 }
 0x4e3   : > { %v2429_v11 = vadd.f32 %v2428_v42, %v2380_v1  ;;  %v2480_v7 = vadd.f32 %v2479_v29, %v1222_v53  ;;  %v9889_v42 = vld [vmem:[#allocation29_spill] sm:$0xff] }
 0x4e4   : > { %4996 = vmatmul.msk.bf16.gmra.mxu1 %vm1825_vm9, %v6451_v32  ;;  %5004 = vmatmul.msk.bf16.gmra.mxu0 %vm1825_vm9, %v6451_v32  ;;  %v2526_v30 = vpop.f32.mrf.mxu0  ;;  %v2433_v26 = vpop.f32.mrf.mxu3  ;;  %v1233_v57 = vunpack.c.h.bf16 %v9889_v42 }
 0x4e5   : > { %2807 = vst [vmem:[#allocation4 + $0x148] sm:$0xff] %v2429_v11  ;;  %v7521_v45 = vadd.f32 %v2526_v30, %v2478_v2  ;;  %v9891_v11 = vld [vmem:[#allocation8_spill] sm:$0xff] }
 0x4e8   : > { %v2381_v50 = vpop.f32.mrf.mxu1  ;;  %2618 = vmatmul.bf16.gmra.mxu3 %v9887_v48 }
 0x4e9   : > { %v2382_v3 = vadd.f32 %v2381_v50, %v2333_v41  ;;  %v9892_v50 = vld [vmem:[#allocation26_spill] sm:$0xff] }
 0x4ea   : > { %v2482_v32 = vpop.f32.mrf.mxu2 }
 0x4eb   : > { %v2431_v63 = vadd.f32 %v2430_v25, %v2382_v3  ;;  %v2483_v23 = vadd.f32 %v2482_v32, %v1228_v59 }
 0x4ec   : > { %2667 = vmatmul.bf16.gmra.mxu2 %v9888_v33  ;;  %v2528_v39 = vpop.f32.mrf.mxu0  ;;  %v2435_v29 = vpop.f32.mrf.mxu3 }
 0x4ed   : > { %2813 = vst [vmem:[#allocation4 + $0xd0] sm:$0xff] %v2431_v63  ;;  %v7527_v60 = vadd.f32 %v2528_v39, %v2480_v7  ;;  %v1097_v7 = vld [vmem:[%s5670_s23 + $0x28] sm:$0xff] }
 0x4ee   : > { %v1150_v33 = vunpack.c.l.bf16 %v1097_v7 }
 0x4f0   : > { %v2384_v24 = vpop.f32.mrf.mxu1 }
 0x4f1   : > { %v2385_v47 = vadd.f32 %v2384_v24, %v7365_v37  ;;  %v2338_v37 = vadd.f32 %v7370_v40, %v1233_v57  ;;  %v9893_v40 = vld [vmem:[#allocation30_spill] sm:$0xff]  ;;  %v1157_v57 = vunpack.c.h.bf16 %v7403_v56 }
 0x4f2   : > { %v2484_v1 = vpop.f32.mrf.mxu2 }
 0x4f3   : > { %v2434_v34 = vadd.f32 %v2433_v26, %v2385_v47  ;;  %v2485_v25 = vadd.f32 %v2484_v1, %v1234_v58  ;;  %v2450_v47 = vadd.f32 %v7383_v12, %v1150_v33 }
 0x4f4   : > { %4997 = vmatmul.msk.bf16.gmra.mxu1 %vm1825_vm9, %v9890_v62  ;;  %5005 = vmatmul.msk.bf16.gmra.mxu0 %vm1825_vm9, %v9890_v62  ;;  %v2531_v28 = vpop.f32.mrf.mxu0 }
 0x4f5   : > { %2819 = vst [vmem:[#allocation4 + $0x2f8] sm:$0xff] %v2434_v34  ;;  %v7542_v18 = vadd.f32 %v2531_v28, %v2483_v23  ;;  %v2499_v34 = vadd.f32 %v7400_v55, %v2450_v47 }
 0x4f8   : > { %v2386_v2 = vpop.f32.mrf.mxu1  ;;  %2623 = vmatmul.bf16.gmra.mxu3 %v9891_v11 }
 0x4f9   : > { %v2387_v44 = vadd.f32 %v2386_v2, %v2338_v37  ;;  %v1103_v2 = vld [vmem:[%s5670_s23 + $0x58] sm:$0xff] }
 0x4fa   : > { %v1162_v12 = vunpack.c.l.bf16 %v1103_v2 }
 0x4fb   : > { %v2436_v30 = vadd.f32 %v2435_v29, %v2387_v44 }
 0x4fc   : > { %2672 = vmatmul.bf16.gmra.mxu2 %v6594_v0  ;;  %v2533_v53 = vpop.f32.mrf.mxu0  ;;  %v1145_v0 = vunpack.c.h.bf16 %v7375_v27  ;;  %v2455_v56 = vadd.f32 %v7411_v31, %v1162_v12  ;;  %v1115_v12 = vld [vmem:[%s5670_s23 + $0xb8] sm:$0xff] }
 0x4fd   : > { %2825 = vst [vmem:[#allocation4 + $0x108] sm:$0xff] %v2436_v30  ;;  %v7548_v41 = vadd.f32 %v2533_v53, %v2485_v25  ;;  %v1163_v53 = vunpack.c.h.bf16 %v1103_v2 }
 0x504   : > { %4998 = vmatmul.msk.bf16.gmra.mxu1 %vm1825_vm9, %v9892_v50  ;;  %5006 = vmatmul.msk.bf16.gmra.mxu0 %vm1825_vm9, %v9892_v50 }
 0x508   : > { %2628 = vmatmul.bf16.gmra.mxu3 %v6226_v51 }
 0x50c   : > { %2677 = vmatmul.bf16.gmra.mxu2 %v6627_v15  ;;  %v1151_v15 = vunpack.c.h.bf16 %v1097_v7  ;;  %v1169_v7 = vunpack.c.h.bf16 %v7426_v54 }
 0x514   : > { %4999 = vmatmul.msk.bf16.gmra.mxu1 %vm1825_vm9, %v9893_v40  ;;  %5007 = vmatmul.msk.bf16.gmra.mxu0 %vm1825_vm9, %v9893_v40 }
 0x51b   : > { %v2594_v48 = vpop.f32.mrf.mxu3 }
 0x51c   : > { %v2595_v3 = vadd.f32 %v2594_v48, %v1145_v0  ;;  %v2504_v48 = vadd.f32 %v7423_v13, %v2455_v56 }
 0x51f   : > { %v2643_v63 = vpop.f32.mrf.mxu2 }
 0x520   : > { %v2644_v39 = vadd.f32 %v2643_v63, %v2595_v3 }
 0x521   : > { %v2545_v32 = vpop.f32.mrf.mxu1  ;;  %v2692_v26 = vpop.f32.mrf.mxu0 }
 0x522   : > { %v2546_v51 = vadd.f32 %v2545_v32, %v7388_v16  ;;  %v2693_v59 = vadd.f32 %v2692_v26, %v2644_v39 }
 0x523   : > { %v2596_v24 = vpop.f32.mrf.mxu3 }
 0x524   : > { %2736 = vst [vmem:[#allocation4 + $0xf0] sm:$0xff] %v2546_v51  ;;  %v2597_v23 = vadd.f32 %v2596_v24, %v1151_v15  ;;  %v1109_v51 = vld [vmem:[%s5670_s23 + $0x88] sm:$0xff] }
 0x525   : > { %2737 = vst [vmem:[#allocation4 + $0x1b0] sm:$0xff] %v2693_v59  ;;  %v1174_v31 = vunpack.c.l.bf16 %v1109_v51 }
 0x527   : > { %v2645_v27 = vpop.f32.mrf.mxu2  ;;  %v2460_v54 = vadd.f32 %v7433_v36, %v1174_v31  ;;  %v1186_v36 = vunpack.c.l.bf16 %v1115_v12 }
 0x528   : > { %v2646_v42 = vadd.f32 %v2645_v27, %v2597_v23  ;;  %v1175_v27 = vunpack.c.h.bf16 %v1109_v51 }
 0x529   : > { %v2547_v62 = vpop.f32.mrf.mxu1  ;;  %v2694_v28 = vpop.f32.mrf.mxu0 }
 0x52a   : > { %v2548_v58 = vadd.f32 %v2547_v62, %v2499_v34  ;;  %v2695_v1 = vadd.f32 %v2694_v28, %v2646_v42  ;;  %v2509_v62 = vadd.f32 %v7445_v10, %v2460_v54 }
 0x52b   : > { %v2599_v16 = vpop.f32.mrf.mxu3 }
 0x52c   : > { %2742 = vst [vmem:[#allocation4 + $0x2d0] sm:$0xff] %v2548_v58  ;;  %v2600_v37 = vadd.f32 %v2599_v16, %v1157_v57  ;;  %v1181_v58 = vunpack.c.h.bf16 %v7448_v19  ;;  %v2465_v19 = vadd.f32 %v7452_v4, %v1186_v36 }
 0x52d   : > { %2743 = vst [vmem:[#allocation4 + $0x1b8] sm:$0xff] %v2695_v1 }
 0x52f   : > { %v2648_v29 = vpop.f32.mrf.mxu2 }
 0x530   : > { %v2649_v11 = vadd.f32 %v2648_v29, %v2600_v37 }
 0x531   : > { %v2550_v44 = vpop.f32.mrf.mxu1  ;;  %v2697_v25 = vpop.f32.mrf.mxu0 }
 0x532   : > { %v2551_v30 = vadd.f32 %v2550_v44, %v7416_v35  ;;  %v2698_v55 = vadd.f32 %v2697_v25, %v2649_v11 }
 0x533   : > { %v2601_v50 = vpop.f32.mrf.mxu3 }
 0x534   : > { %2748 = vst [vmem:[#allocation4 + $0x100] sm:$0xff] %v2551_v30  ;;  %v2602_v40 = vadd.f32 %v2601_v50, %v1163_v53  ;;  %v1187_v53 = vunpack.c.h.bf16 %v1115_v12 }
 0x535   : > { %2749 = vst [vmem:[#allocation4 + $0x278] sm:$0xff] %v2698_v55 }
 0x537   : > { %v2650_v0 = vpop.f32.mrf.mxu2 }
 0x538   : > { %v2651_v3 = vadd.f32 %v2650_v0, %v2602_v40  ;;  %v2514_v0 = vadd.f32 %v7464_v9, %v2465_v19  ;;  %v1199_v9 = vunpack.c.h.bf16 %v7472_v52 }
 0x539   : > { %v2552_v63 = vpop.f32.mrf.mxu1  ;;  %v2699_v33 = vpop.f32.mrf.mxu0 }
 0x53a   : > { %v2553_v39 = vadd.f32 %v2552_v63, %v2504_v48  ;;  %v2700_v32 = vadd.f32 %v2699_v33, %v2651_v3  ;;  %v1193_v3 = vunpack.c.h.bf16 %v7467_v21 }
 0x53b   : > { %v2604_v35 = vpop.f32.mrf.mxu3 }
 0x53c   : > { %2754 = vst [vmem:[#allocation4 + $0x118] sm:$0xff] %v2553_v39  ;;  %v2605_v26 = vadd.f32 %v2604_v35, %v1169_v7 }
 0x53d   : > { %2755 = vst [vmem:[#allocation4 + $0x1a0] sm:$0xff] %v2700_v32 }
 0x53f   : > { %v2653_v59 = vpop.f32.mrf.mxu2 }
 0x540   : > { %v2654_v15 = vadd.f32 %v2653_v59, %v2605_v26 }
 0x541   : > { %v2555_v24 = vpop.f32.mrf.mxu1  ;;  %v2702_v47 = vpop.f32.mrf.mxu0 }
 0x542   : > { %v2556_v23 = vadd.f32 %v2555_v24, %v7440_v6  ;;  %v2703_v13 = vadd.f32 %v2702_v47, %v2654_v15 }
 0x543   : > { %v2606_v34 = vpop.f32.mrf.mxu3 }
 0x544   : > { %2760 = vst [vmem:[#allocation4 + $0x260] sm:$0xff] %v2556_v23  ;;  %v2607_v42 = vadd.f32 %v2606_v34, %v1175_v27  ;;  %v1205_v23 = vunpack.c.h.bf16 %v7488_v46 }
 0x545   : > { %2761 = vst [vmem:[#allocation4 + $0x98] sm:$0xff] %v2703_v13 }
 0x547   : > { %v2655_v57 = vpop.f32.mrf.mxu2 }
 0x548   : > { %v2656_v28 = vadd.f32 %v2655_v57, %v2607_v42 }
 0x549   : > { %v2557_v1 = vpop.f32.mrf.mxu1  ;;  %v2704_v16 = vpop.f32.mrf.mxu0 }
 0x54a   : > { %v2558_v37 = vadd.f32 %v2557_v1, %v2509_v62  ;;  %v2705_v2 = vadd.f32 %v2704_v16, %v2656_v28  ;;  %v1211_v16 = vunpack.c.h.bf16 %v7493_v17 }
 0x54b   : > { %v2609_v6 = vpop.f32.mrf.mxu3 }
 0x54c   : > { %2766 = vst [vmem:[#allocation4 + $0x2c0] sm:$0xff] %v2558_v37  ;;  %v2610_v29 = vadd.f32 %v2609_v6, %v1181_v58  ;;  %v1217_v6 = vunpack.c.h.bf16 %v7509_v38 }
 0x54d   : > { %2767 = vst [vmem:[#allocation4 + $0x110] sm:$0xff] %v2705_v2 }
 0x54f   : > { %v2658_v11 = vpop.f32.mrf.mxu2 }
 0x550   : > { %v2659_v44 = vadd.f32 %v2658_v11, %v2610_v29 }
 0x551   : > { %v2560_v25 = vpop.f32.mrf.mxu1  ;;  %v2707_v30 = vpop.f32.mrf.mxu0 }
 0x552   : > { %v2561_v55 = vadd.f32 %v2560_v25, %v7459_v14  ;;  %v2708_v10 = vadd.f32 %v2707_v30, %v2659_v44 }
 0x553   : > { %v2611_v50 = vpop.f32.mrf.mxu3 }
 0x554   : > { %2772 = vst [vmem:[#allocation4 + $0x270] sm:$0xff] %v2561_v55  ;;  %v2612_v56 = vadd.f32 %v2611_v50, %v1187_v53  ;;  %v1223_v50 = vunpack.c.h.bf16 %v7514_v5 }
 0x555   : > { %2773 = vst [vmem:[#allocation4] sm:$0xff] %v2708_v10 }
 0x557   : > { %v2660_v40 = vpop.f32.mrf.mxu2 }
 0x558   : > { %v2661_v48 = vadd.f32 %v2660_v40, %v2612_v56  ;;  %v1229_v40 = vunpack.c.h.bf16 %v7530_v43 }
 0x559   : > { %v2562_v7 = vpop.f32.mrf.mxu1  ;;  %v2709_v63 = vpop.f32.mrf.mxu0 }
 0x55a   : > { %v2563_v33 = vadd.f32 %v2562_v7, %v2514_v0  ;;  %v2710_v39 = vadd.f32 %v2709_v63, %v2661_v48 }
 0x55b   : > { %v2614_v32 = vpop.f32.mrf.mxu3 }
 0x55c   : > { %2778 = vst [vmem:[#allocation4 + $0x288] sm:$0xff] %v2563_v33  ;;  %v2615_v14 = vadd.f32 %v2614_v32, %v1193_v3 }
 0x55d   : > { %2779 = vst [vmem:[#allocation4 + $0x2e8] sm:$0xff] %v2710_v39 }
 0x55f   : > { %v2663_v35 = vpop.f32.mrf.mxu2 }
 0x560   : > { %v2664_v26 = vadd.f32 %v2663_v35, %v2615_v14 }
 0x561   : > { %v2565_v4 = vpop.f32.mrf.mxu1  ;;  %v2712_v51 = vpop.f32.mrf.mxu0 }
 0x562   : > { %v2566_v59 = vadd.f32 %v2565_v4, %v7479_v22  ;;  %v2713_v31 = vadd.f32 %v2712_v51, %v2664_v26  ;;  %v1235_v26 = vunpack.c.h.bf16 %v7535_v49 }
 0x563   : > { %v2616_v15 = vpop.f32.mrf.mxu3 }
 0x564   : > { %2784 = vst [vmem:[#allocation4 + $0x1f8] sm:$0xff] %v2566_v59  ;;  %v2617_v21 = vadd.f32 %v2616_v15, %v1199_v9 }
 0x565   : > { %2785 = vst [vmem:[#allocation4 + $0x68] sm:$0xff] %v2713_v31 }
 0x567   : > { %v2665_v24 = vpop.f32.mrf.mxu2 }
 0x568   : > { %v2666_v47 = vadd.f32 %v2665_v24, %v2617_v21 }
 0x569   : > { %v2567_v13 = vpop.f32.mrf.mxu1  ;;  %v2714_v27 = vpop.f32.mrf.mxu0 }
 0x56a   : > { %v2568_v34 = vadd.f32 %v2567_v13, %v7485_v61  ;;  %v2715_v54 = vadd.f32 %v2714_v27, %v2666_v47 }
 0x56b   : > { %v2619_v42 = vpop.f32.mrf.mxu3 }
 0x56c   : > { %2790 = vst [vmem:[#allocation4 + $0x170] sm:$0xff] %v2568_v34  ;;  %v2620_v57 = vadd.f32 %v2619_v42, %v1205_v23 }
 0x56d   : > { %2791 = vst [vmem:[#allocation4 + $0x1d8] sm:$0xff] %v2715_v54 }
 0x56f   : > { %v2668_v22 = vpop.f32.mrf.mxu2 }
 0x570   : > { %v2669_v62 = vadd.f32 %v2668_v22, %v2620_v57 }
 0x571   : > { %v2570_v52 = vpop.f32.mrf.mxu1  ;;  %v2717_v28 = vpop.f32.mrf.mxu0 }
 0x572   : > { %v2571_v58 = vadd.f32 %v2570_v52, %v7500_v8  ;;  %v2718_v1 = vadd.f32 %v2717_v28, %v2669_v62 }
 0x573   : > { %v2621_v37 = vpop.f32.mrf.mxu3 }
 0x574   : > { %2796 = vst [vmem:[#allocation4 + $0x60] sm:$0xff] %v2571_v58  ;;  %v2622_v46 = vadd.f32 %v2621_v37, %v1211_v16 }
 0x575   : > { %2797 = vst [vmem:[#allocation4 + $0x80] sm:$0xff] %v2718_v1 }
 0x577   : > { %v2670_v2 = vpop.f32.mrf.mxu2 }
 0x578   : > { %v2671_v61 = vadd.f32 %v2670_v2, %v2622_v46 }
 0x579   : > { %v2572_v29 = vpop.f32.mrf.mxu1  ;;  %v2719_v12 = vpop.f32.mrf.mxu0 }
 0x57a   : > { %v2573_v11 = vadd.f32 %v2572_v29, %v7506_v20  ;;  %v2720_v36 = vadd.f32 %v2719_v12, %v2671_v61 }
 0x57b   : > { %v2624_v44 = vpop.f32.mrf.mxu3 }
 0x57c   : > { %2802 = vst [vmem:[#allocation4 + $0x198] sm:$0xff] %v2573_v11  ;;  %v2625_v25 = vadd.f32 %v2624_v44, %v1217_v6 }
 0x57d   : > { %2803 = vst [vmem:[#allocation4 + $0x160] sm:$0xff] %v2720_v36 }
 0x57f   : > { %v2673_v8 = vpop.f32.mrf.mxu2 }
 0x580   : > { %v2674_v30 = vadd.f32 %v2673_v8, %v2625_v25 }
 0x581   : > { %v2575_v17 = vpop.f32.mrf.mxu1  ;;  %v2722_v55 = vpop.f32.mrf.mxu0 }
 0x582   : > { %v2576_v10 = vadd.f32 %v2575_v17, %v7521_v45  ;;  %v2723_v53 = vadd.f32 %v2722_v55, %v2674_v30 }
 0x583   : > { %v2626_v19 = vpop.f32.mrf.mxu3 }
 0x584   : > { %2808 = vst [vmem:[#allocation4 + $0x120] sm:$0xff] %v2576_v10  ;;  %v2627_v38 = vadd.f32 %v2626_v19, %v1223_v50 }
 0x585   : > { %2809 = vst [vmem:[#allocation4 + $0x40] sm:$0xff] %v2723_v53 }
 0x587   : > { %v2675_v56 = vpop.f32.mrf.mxu2 }
 0x588   : > { %v2676_v20 = vadd.f32 %v2675_v56, %v2627_v38 }
 0x589   : > { %v2577_v0 = vpop.f32.mrf.mxu1  ;;  %v2724_v48 = vpop.f32.mrf.mxu0 }
 0x58a   : > { %v2578_v3 = vadd.f32 %v2577_v0, %v7527_v60  ;;  %v2725_v7 = vadd.f32 %v2724_v48, %v2676_v20 }
 0x58b   : > { %v2629_v63 = vpop.f32.mrf.mxu3 }
 0x58c   : > { %2814 = vst [vmem:[#allocation4 + $0x138] sm:$0xff] %v2578_v3  ;;  %v2630_v33 = vadd.f32 %v2629_v63, %v1229_v40 }
 0x58d   : > { %2815 = vst [vmem:[#allocation4 + $0x158] sm:$0xff] %v2725_v7 }
 0x58f   : > { %v2678_v45 = vpop.f32.mrf.mxu2 }
 0x590   : > { %v2679_v39 = vadd.f32 %v2678_v45, %v2630_v33 }
 0x591   : > { %v2580_v5 = vpop.f32.mrf.mxu1  ;;  %v2727_v32 = vpop.f32.mrf.mxu0 }
 0x592   : > { %v2581_v14 = vadd.f32 %v2580_v5, %v7542_v18  ;;  %v2728_v35 = vadd.f32 %v2727_v32, %v2679_v39 }
 0x593   : > { %v2631_v4 = vpop.f32.mrf.mxu3 }
 0x594   : > { %2820 = vst [vmem:[#allocation4 + $0x180] sm:$0xff] %v2581_v14  ;;  %v2632_v43 = vadd.f32 %v2631_v4, %v1235_v26 }
 0x595   : > { %2821 = vst [vmem:[#allocation4 + $0xb8] sm:$0xff] %v2728_v35 }
 0x597   : > { %v2680_v51 = vpop.f32.mrf.mxu2 }
 0x598   : > { %v2681_v60 = vadd.f32 %v2680_v51, %v2632_v43 }
 0x599   : > { %v2582_v59 = vpop.f32.mrf.mxu1  ;;  %v2729_v31 = vpop.f32.mrf.mxu0 }
 0x59a   : > { %v2583_v9 = vadd.f32 %v2582_v59, %v7548_v41  ;;  %v2730_v15 = vadd.f32 %v2729_v31, %v2681_v60 }
 0x59c   : > { %2826 = vst [vmem:[#allocation4 + $0x208] sm:$0xff] %v2583_v9 }
 0x59d   : > { %2827 = vst [vmem:[#allocation4 + $0x250] sm:$0xff] %v2730_v15 }
 0x59e PF: > { %v2828_v21 = vld [vmem:[#allocation4 + $0x230] sm:$0xff]  ;;  %v2852_v24 = vld [vmem:[#allocation4 + $0x298] sm:$0xff]  ;;  %v2829_v23 = vld [vmem:[#allocation4 + $0x1c8] sm:$0xff]  ;;  %p5080_p7 = scmp.ne.s32.totalorder %s5599_s15, 7 }
 0x59f   : > { %v5008_v18 = vmul.f32 -1.442695, %v2828_v21  ;;  %v5032_v47 = vmul.f32 -1.442695, %v2852_v24  ;;  %v2853_v49 = vld [vmem:[#allocation4 + $0x200] sm:$0xff]  ;;  %v2854_v54 = vld [vmem:[#allocation4 + $0x268] sm:$0xff] }
 0x5a0   : > { %v5009_v13 = vmul.f32 -1.442695, %v2829_v23  ;;  %v5033_v27 = vmul.f32 -1.442695, %v2853_v49  ;;  %v2830_v34 = vld [vmem:[#allocation4 + $0x2a0] sm:$0xff]  ;;  %v2831_v62 = vld [vmem:[#allocation4 + $0x70] sm:$0xff] }
 0x5a1   : > { %5197 = vpow2.f32 %v5008_v18  ;;  %v2900_v42 = vld [vmem:[#allocation4 + $0x1e0] sm:$0xff]  ;;  %v5010_v57 = vmul.f32 -1.442695, %v2830_v34  ;;  %v5034_v22 = vmul.f32 -1.442695, %v2854_v54  ;;  %v2855_v28 = vld [vmem:[#allocation4 + $0x178] sm:$0xff] }
 0x5a2   : > { %5199 = vpow2.f32 %v5032_v47  ;;  %v2901_v41 = vld [vmem:[#allocation4 + $0xe0] sm:$0xff]  ;;  %v5011_v37 = vmul.f32 -1.442695, %v2831_v62  ;;  %v5035_v61 = vmul.f32 -1.442695, %v2855_v28 }
 0x5a3   : > { %5201 = vpow2.f32 %v5009_v13  ;;  %v2902_v52 = vld [vmem:[#allocation4 + $0x280] sm:$0xff] }
 0x5a4   : > { %5203 = vpow2.f32 %v5033_v27 }
 0x5a5   : > { %5205 = vtanh.f32 %v2900_v42 }
 0x5a6   : > { %5207 = vpow2.f32 %v5010_v57 }
 0x5a7   : > { %v5198_v58 = vpop.eup %5197  ;;  %5209 = vtanh.f32 %v2901_v41 }
 0x5a8   : > { %v5200_v1 = vpop.eup %5199  ;;  %v7596_v16 = vadd.f32 1.0, %v5198_v58  ;;  %5211 = vpow2.f32 %v5034_v22 }
 0x5a9   : > { %v5202_v46 = vpop.eup %5201  ;;  %v7598_v2 = vadd.f32 1.0, %v5200_v1  ;;  %5213 = vtanh.f32 %v2902_v52  ;;  %v4316_v52 = vld [vmem:[#allocation3 + $0xb0] sm:$0xff] }
 0x5aa   : > { %v5204_v6 = vpop.eup %5203  ;;  %5215 = vrcp.f32 %v7596_v16  ;;  %v3029_v12 = vand.u32 2147483647, %v7596_v16  ;;  %v3031_v11 = vand.u32 2147483648, %v7596_v16  ;;  %v7607_v25 = vadd.f32 1.0, %v5202_v46 }
 0x5ab   : > { %v7601_v29 = vpop.eup %5205  ;;  %5217 = vrcp.f32 %v7598_v2  ;;  %v3485_v44 = vand.u32 2147483647, %v7598_v2  ;;  %v7609_v8 = vadd.f32 1.0, %v5204_v6  ;;  %v3487_v17 = vand.u32 2147483648, %v7598_v2 }
 0x5ac   : > { %v5208_v36 = vpop.eup %5207  ;;  %5219 = vpow2.f32 %v5011_v37  ;;  %vm3025_vm10 = vweird.f32 %v7596_v16  ;;  %vm3481_vm11 = vweird.f32 %v7598_v2  ;;  %v3046_v53 = vand.u32 2147483648, %v7607_v25 }
 0x5ad   : > { %v7611_v30 = vpop.eup %5209  ;;  %v7614_v55 = vadd.f32 1.0, %v5208_v36  ;;  %5221 = vpow2.f32 %v5035_v61  ;;  %vm7622_vm12 = vcmp.eq.f32.partialorder %v3029_v12, 8.507059e+37  ;;  %v3032_v38 = vor.u32 1.1754944e-38, %v3031_v11 }
 0x5ae   : > { %v5212_v10 = vpop.eup %5211  ;;  %5223 = vrcp.f32 %v7607_v25  ;;  %v3044_v56 = vand.u32 2147483647, %v7607_v25  ;;  %vm7628_vm13 = vcmp.eq.f32.partialorder %v3485_v44, 8.507059e+37  ;;  %v3500_v0 = vand.u32 2147483647, %v7609_v8 }
 0x5af   : > { %v7620_v50 = vpop.eup %5213  ;;  %5225 = vrcp.f32 %v7609_v8  ;;  %v3502_v48 = vand.u32 2147483648, %v7609_v8  ;;  %v3488_v63 = vor.u32 1.1754944e-38, %v3487_v17  ;;  %vm3040_vm14 = vweird.f32 %v7607_v25 }
 0x5b0   : > { %v5216_v20 = vpop.eup %5215  ;;  %5227 = vrcp.f32 %v7614_v55  ;;  %vm3496_vm15 = vweird.f32 %v7609_v8  ;;  %v7639_v39 = vor.u32 1.1754944e-38, %v3046_v53  ;;  %v3059_v5 = vand.u32 2147483647, %v7614_v55  ;;  %v4317_v53 = vld [vmem:[#allocation3] sm:$0xff] }
 0x5b1   : > { %v5218_v3 = vpop.eup %5217  ;;  %v3021_v7 = vmul.f32 %v5216_v20, %v7596_v16  ;;  %v3061_v32 = vand.u32 2147483648, %v7614_v55  ;;  %vm3026_vm0 = vweird.f32 %v5216_v20  ;;  %vm7643_vm1 = vcmp.eq.f32.partialorder %v3044_v56, 8.507059e+37  ;;  %v2832_v56 = vld [vmem:[#allocation4 + $0xf0] sm:$0xff] }
 0x5b2   : > { %v5220_v33 = vpop.eup %5219  ;;  %v3477_v45 = vmul.f32 %v5218_v3, %v7598_v2  ;;  %vm3055_vm2 = vweird.f32 %v7614_v55  ;;  %v7648_v4 = vadd.f32 1.0, %v5212_v10  ;;  %vm3482_vm3 = vweird.f32 %v5218_v3  ;;  %vm7661_vm5 = vmor %vm3025_vm10, %vm3026_vm0 }
 0x5b3   : > { %v5222_v14 = vpop.eup %5221  ;;  %v3022_v35 = vsub.f32 1.0, %v3021_v7  ;;  %vm7650_vm4 = vcmp.eq.f32.partialorder %v3500_v0, 8.507059e+37  ;;  %v3503_v59 = vor.u32 1.1754944e-38, %v3502_v48  ;;  %v7656_v21 = vadd.f32 1.0, %v5220_v33  ;;  %vm7675_vm7 = vmor %vm3481_vm11, %vm3482_vm3  ;;  %v2856_v48 = vld [vmem:[#allocation4 + $0x260] sm:$0xff] }
 0x5b4   : > { %v5224_v43 = vpop.eup %5223  ;;  %v3478_v51 = vsub.f32 1.0, %v3477_v45  ;;  %5229 = vrcp.f32 %v7648_v4  ;;  %vm7666_vm6 = vcmp.eq.f32.partialorder %v3059_v5, 8.507059e+37  ;;  %v3062_v13 = vor.u32 1.1754944e-38, %v3061_v32 }
 0x5b5   : > { %v5226_v31 = vpop.eup %5225  ;;  %v3023_v9 = vmul.f32 %v5216_v20, %v3022_v35  ;;  %v3036_v15 = vmul.f32 %v5224_v43, %v7607_v25  ;;  %v7670_v27 = vadd.f32 1.0, %v5222_v14  ;;  %vm3041_vm8 = vweird.f32 %v5224_v43  ;;  %v2833_v14 = vld [vmem:[#allocation4 + $0x1b0] sm:$0xff] }
 0x5b6   : > { %v5228_v24 = vpop.eup %5227  ;;  %v3479_v47 = vmul.f32 %v5218_v3, %v3478_v51  ;;  %v3492_v23 = vmul.f32 %v5226_v31, %v7609_v8  ;;  %vm3497_vm9 = vweird.f32 %v5226_v31  ;;  %5231 = vrcp.f32 %v7656_v21  ;;  %vm7689_vm11 = vmor %vm3040_vm14, %vm3041_vm8 }
 0x5b7   : > { %v3024_v34 = vadd.f32 %v5216_v20, %v3023_v9  ;;  %v3037_v42 = vsub.f32 1.0, %v3036_v15  ;;  %v3051_v57 = vmul.f32 %v5228_v24, %v7614_v55  ;;  %vm3056_vm10 = vweird.f32 %v5228_v24 }
 0x5b8   : > { %v3480_v41 = vadd.f32 %v5218_v3, %v3479_v47  ;;  %v3493_v22 = vsub.f32 1.0, %v3492_v23  ;;  %vm3511_vm0 = vweird.f32 %v7648_v4  ;;  %vm7707_vm14 = vmor %vm3055_vm2, %vm3056_vm10  ;;  %v3515_v10 = vand.u32 2147483647, %v7648_v4  ;;  %v2857_v47 = vld [vmem:[#allocation4 + $0x98] sm:$0xff] }
 0x5b9   : > { %v3028_v62 = vsel %vm7661_vm5, %v5216_v20, %v3024_v34  ;;  %v3038_v28 = vmul.f32 %v5224_v43, %v3037_v42  ;;  %v3052_v58 = vsub.f32 1.0, %v3051_v57  ;;  %v5012_v32 = vmul.f32 -1.442695, %v2832_v56  ;;  %v2834_v34 = vld [vmem:[#allocation4 + $0x30] sm:$0xff]  ;;  %v2904_v57 = vld [vmem:[#allocation4 + $0x120] sm:$0xff] }
 0x5ba   : > { %v3033_v1 = vsel %vm7622_vm12, %v3032_v38, %v3028_v62  ;;  %v3484_v16 = vsel %vm7675_vm7, %v5218_v3, %v3480_v41  ;;  %v3494_v46 = vmul.f32 %v5226_v31, %v3493_v22  ;;  %v5230_v2 = vpop.eup %5229  ;;  %vm7700_vm12 = vmor %vm3496_vm15, %vm3497_vm9  ;;  %v3517_v38 = vand.u32 2147483648, %v7648_v4  ;;  %v2858_v22 = vld [vmem:[#allocation4 + $0xe8] sm:$0xff] }
 0x5bb   : > { %v3489_v61 = vsel %vm7628_vm13, %v3488_v63, %v3484_v16  ;;  %v4364_v6 = vmul.f32 %v7601_v29, %v3033_v1  ;;  %v3039_v12 = vadd.f32 %v5224_v43, %v3038_v28  ;;  %v3053_v36 = vmul.f32 %v5228_v24, %v3052_v58 }
 0x5bc   : > { %v4340_v44 = vmul.f32 %v4316_v52, %v3489_v61  ;;  %v3495_v25 = vadd.f32 %v5226_v31, %v3494_v46  ;;  %v3507_v29 = vmul.f32 %v5230_v2, %v7648_v4  ;;  %vm3512_vm13 = vweird.f32 %v5230_v2  ;;  %v7723_v3 = vpop.eup %5231 }
 0x5bd   : > { %v3043_v8 = vsel %vm7689_vm11, %v5224_v43, %v3039_v12  ;;  %v3054_v19 = vadd.f32 %v5228_v24, %v3053_v36  ;;  %vm7736_vm15 = vmor %vm3511_vm0, %vm3512_vm13  ;;  %v3066_v43 = vmul.f32 %v7723_v3, %v7656_v21  ;;  %v5036_v51 = vmul.f32 -1.442695, %v2856_v48 }
 0x5be   : > { %v7716_v20 = vadd.f32 %v4364_v6, %v4340_v44  ;;  %v3048_v55 = vsel %vm7643_vm1, %v7639_v39, %v3043_v8  ;;  %v3499_v40 = vsel %vm7700_vm12, %v5226_v31, %v3495_v25  ;;  %v3508_v0 = vsub.f32 1.0, %v3507_v29  ;;  %v2903_v39 = vld [vmem:[#allocation4 + $0x148] sm:$0xff]  ;;  %v4318_v31 = vld [vmem:[#allocation3 + $0x10] sm:$0xff]  ;;  %v2906_v8 = vld [vmem:[#allocation4 + $0x18] sm:$0xff] }
 0x5bf   : > { %v3504_v7 = vsel %vm7650_vm4, %v3503_v59, %v3499_v40  ;;  %v4365_v63 = vmul.f32 %v7611_v30, %v3048_v55  ;;  %v3058_v33 = vsel %vm7707_vm14, %v5228_v24, %v3054_v19  ;;  %v3518_v30 = vor.u32 1.1754944e-38, %v3517_v38  ;;  %v2835_v29 = vld [vmem:[#allocation4 + $0x2f0] sm:$0xff]  ;;  %v2905_v38 = vld [vmem:[#allocation4 + $0x40] sm:$0xff] }
 0x5c0   : > { %4460 = vst [vmem:[#allocation3 + $0xb0] sm:$0xff] %v7716_v20  ;;  %v4341_v45 = vmul.f32 %v4317_v53, %v3504_v7  ;;  %v3509_v5 = vmul.f32 %v5230_v2, %v3508_v0  ;;  %v3063_v35 = vsel %vm7666_vm6, %v3062_v13, %v3058_v33  ;;  %vm3516_vm1 = vcmp.eq.f32.partialorder %v3515_v10, 8.507059e+37  ;;  %v4319_v0 = vld [vmem:[#allocation3 + $0x48] sm:$0xff] }
 0x5c1   : > { %5233 = vrcp.f32 %v7670_v27  ;;  %v3067_v9 = vsub.f32 1.0, %v3066_v43  ;;  %vm3070_vm2 = vweird.f32 %v7656_v21  ;;  %v5013_v4 = vmul.f32 -1.442695, %v2833_v14 }
 0x5c2   : > { %v7742_v60 = vadd.f32 %v4365_v63, %v4341_v45  ;;  %v3510_v59 = vadd.f32 %v5230_v2, %v3509_v5  ;;  %5235 = vtanh.f32 %v2903_v39  ;;  %v4366_v24 = vmul.f32 %v7620_v50, %v3063_v35 }
 0x5c3   : > { %vm3071_vm3 = vweird.f32 %v7723_v3  ;;  %v3074_v18 = vand.u32 2147483647, %v7656_v21  ;;  %5237 = vtanh.f32 %v7716_v20  ;;  %v3068_v49 = vmul.f32 %v7723_v3, %v3067_v9 }
 0x5c4   : > { %4461 = vst [vmem:[#allocation3] sm:$0xff] %v7742_v60  ;;  %v3514_v15 = vsel %vm7736_vm15, %v5230_v2, %v3510_v59  ;;  %v3076_v13 = vand.u32 2147483648, %v7656_v21  ;;  %5239 = vpow2.f32 %v5012_v32  ;;  %vm7758_vm4 = vmor %vm3070_vm2, %vm3071_vm3  ;;  %v5037_v41 = vmul.f32 -1.442695, %v2857_v47 }
 0x5c5   : > { %v3519_v23 = vsel %vm3516_vm1, %v3518_v30, %v3514_v15  ;;  %v3069_v42 = vadd.f32 %v7723_v3, %v3068_v49  ;;  %5241 = vpow2.f32 %v5036_v51  ;;  %vm7765_vm5 = vcmp.eq.f32.partialorder %v3074_v18, 8.507059e+37 }
 0x5c6   : > { %v4342_v54 = vmul.f32 %v4318_v31, %v3519_v23  ;;  %5243 = vtanh.f32 %v7742_v60  ;;  %v5014_v58 = vmul.f32 -1.442695, %v2834_v34  ;;  %v3077_v21 = vor.u32 1.1754944e-38, %v3076_v13 }
 0x5c7   : > { %v5234_v62 = vpop.eup %5233  ;;  %vm3526_vm6 = vweird.f32 %v7670_v27  ;;  %5245 = vpow2.f32 %v5013_v4  ;;  %v3073_v37 = vsel %vm7758_vm4, %v7723_v3, %v3069_v42  ;;  %v3532_v46 = vand.u32 2147483648, %v7670_v27  ;;  %v2859_v3 = vld [vmem:[#allocation4 + $0x240] sm:$0xff] }
 0x5c8   : > { %v7763_v52 = vadd.f32 %v4366_v24, %v4342_v54  ;;  %v5236_v1 = vpop.eup %5235  ;;  %v3522_v16 = vmul.f32 %v5234_v62, %v7670_v27  ;;  %5247 = vtanh.f32 %v2904_v57  ;;  %v5038_v2 = vmul.f32 -1.442695, %v2858_v22 }
 0x5c9   : > { %v7776_v61 = vpop.eup %5237  ;;  %vm3527_vm7 = vweird.f32 %v5234_v62  ;;  %v3530_v12 = vand.u32 2147483647, %v7670_v27  ;;  %5249 = vpow2.f32 %v5037_v41  ;;  %v3078_v44 = vsel %vm7765_vm5, %v3077_v21, %v3073_v37 }
 0x5ca   : > { %4462 = vst [vmem:[#allocation3 + $0x10] sm:$0xff] %v7763_v52  ;;  %v3523_v6 = vsub.f32 1.0, %v3522_v16  ;;  %v5240_v11 = vpop.eup %5239  ;;  %5251 = vtanh.f32 %v7763_v52  ;;  %vm7788_vm8 = vmor %vm3526_vm6, %vm3527_vm7  ;;  %v3533_v53 = vor.u32 1.1754944e-38, %v3532_v46  ;;  %v4367_v48 = vmul.f32 %v5236_v1, %v3078_v44 }
 0x5cb   : > { %v5242_v36 = vpop.eup %5241  ;;  %v7782_v17 = vadd.f32 1.0, %v5240_v11  ;;  %5253 = vpow2.f32 %v5014_v58  ;;  %vm3531_vm9 = vcmp.eq.f32.partialorder %v3530_v12, 8.507059e+37  ;;  %v7799_v7 = vmul.f32 -1.442695, %v2835_v29 }
 0x5cc   : > { %v3524_v25 = vmul.f32 %v5234_v62, %v3523_v6  ;;  %v7784_v10 = vpop.eup %5243  ;;  %v7792_v19 = vadd.f32 1.0, %v5242_v36  ;;  %5255 = vpow2.f32 %v5038_v2  ;;  %v7814_v51 = vmul.f32 -1.442695, %v2859_v3  ;;  %v2837_v2 = vld [vmem:[#allocation4 + $0x140] sm:$0xff] }
 0x5cd   : > { %v5246_v56 = vpop.eup %5245  ;;  %5257 = vrcp.f32 %v7782_v17  ;;  %v3089_v27 = vand.u32 2147483647, %v7782_v17  ;;  %v3091_v45 = vand.u32 2147483648, %v7782_v17  ;;  %vm3085_vm10 = vweird.f32 %v7782_v17 }
 0x5ce   : > { %v3525_v55 = vadd.f32 %v5234_v62, %v3524_v25  ;;  %v7795_v40 = vpop.eup %5247  ;;  %5259 = vrcp.f32 %v7792_v19  ;;  %v7804_v5 = vadd.f32 1.0, %v5246_v56  ;;  %v3545_v14 = vand.u32 2147483647, %v7792_v19 }
 0x5cf   : > { %v5250_v63 = vpop.eup %5249  ;;  %5261 = vtanh.f32 %v2905_v38  ;;  %v3547_v35 = vand.u32 2147483648, %v7792_v19  ;;  %vm7816_vm11 = vcmp.eq.f32.partialorder %v3089_v27, 8.507059e+37  ;;  %vm3541_vm0 = vweird.f32 %v7792_v19 }
 0x5d0   : > { %v3529_v33 = vsel %vm7788_vm8, %v5234_v62, %v3525_v55  ;;  %v7806_v39 = vpop.eup %5251  ;;  %v7810_v26 = vadd.f32 1.0, %v5250_v63  ;;  %5263 = vrcp.f32 %v7804_v5  ;;  %v3104_v9 = vand.u32 2147483647, %v7804_v5  ;;  %v4320_v55 = vld [vmem:[#allocation3 + $0x60] sm:$0xff] }
 0x5d1   : > { %v3534_v32 = vsel %vm3531_vm9, %v3533_v53, %v3529_v33  ;;  %v5254_v30 = vpop.eup %5253  ;;  %v3092_v24 = vor.u32 1.1754944e-38, %v3091_v45  ;;  %v3106_v18 = vand.u32 2147483648, %v7804_v5  ;;  %vm7829_vm12 = vcmp.eq.f32.partialorder %v3545_v14, 8.507059e+37  ;;  %v2836_v45 = vld [vmem:[#allocation4 + $0x88] sm:$0xff] }
 0x5d2   : > { %v4343_v43 = vmul.f32 %v4319_v0, %v3534_v32  ;;  %v5256_v59 = vpop.eup %5255  ;;  %5265 = vrcp.f32 %v7810_v26  ;;  %v7826_v47 = vadd.f32 1.0, %v5254_v30  ;;  %v3548_v34 = vor.u32 1.1754944e-38, %v3547_v35 }
 0x5d3   : > { %v5258_v4 = vpop.eup %5257  ;;  %v3560_v54 = vand.u32 2147483647, %v7810_v26  ;;  %vm3100_vm14 = vweird.f32 %v7804_v5  ;;  %vm3556_vm13 = vweird.f32 %v7810_v26  ;;  %v3562_v57 = vand.u32 2147483648, %v7810_v26 }
 0x5d4   : > { %v7823_v15 = vadd.f32 %v4367_v48, %v4343_v43  ;;  %v5260_v23 = vpop.eup %5259  ;;  %v3081_v49 = vmul.f32 %v5258_v4, %v7782_v17  ;;  %vm3086_vm15 = vweird.f32 %v5258_v4  ;;  %vm7841_vm1 = vcmp.eq.f32.partialorder %v3104_v9, 8.507059e+37 }
 0x5d5   : > { %v7834_v42 = vpop.eup %5261  ;;  %v3537_v50 = vmul.f32 %v5260_v23, %v7792_v19  ;;  %5267 = vrcp.f32 %v7826_v47  ;;  %vm3542_vm2 = vweird.f32 %v5260_v23  ;;  %v3107_v58 = vor.u32 1.1754944e-38, %v3106_v18  ;;  %vm7856_vm4 = vmor %vm3085_vm10, %vm3086_vm15 }
 0x5d6   : > { %9924 = vst [vmem:[#allocation60_spill] sm:$0xff] %v7823_v15  ;;  %v3082_v41 = vsub.f32 1.0, %v3081_v49  ;;  %v5264_v62 = vpop.eup %5263  ;;  %v7846_v1 = vadd.f32 1.0, %v5256_v59  ;;  %5269 = vtanh.f32 %v7823_v15  ;;  %vm7850_vm3 = vcmp.eq.f32.partialorder %v3560_v54, 8.507059e+37  ;;  %vm7864_vm6 = vmor %vm3541_vm0, %vm3542_vm2 }
 0x5d7   : > { %4463 = vst [vmem:[#allocation3 + $0x48] sm:$0xff] %v7823_v15  ;;  %v3538_v28 = vsub.f32 1.0, %v3537_v50  ;;  %v3096_v37 = vmul.f32 %v5264_v62, %v7804_v5  ;;  %v3563_v11 = vor.u32 1.1754944e-38, %v3562_v57  ;;  %vm3115_vm5 = vweird.f32 %v7826_v47 }
 0x5d8   : > { %v5266_v21 = vpop.eup %5265  ;;  %v3083_v16 = vmul.f32 %v5258_v4, %v3082_v41  ;;  %vm3101_vm7 = vweird.f32 %v5264_v62  ;;  %5271 = vrcp.f32 %v7846_v1  ;;  %v3119_v53 = vand.u32 2147483647, %v7826_v47 }
 0x5d9   : > { %v3539_v6 = vmul.f32 %v5260_v23, %v3538_v28  ;;  %v3552_v12 = vmul.f32 %v5266_v21, %v7810_v26  ;;  %v3097_v25 = vsub.f32 1.0, %v3096_v37  ;;  %vm3557_vm8 = vweird.f32 %v5266_v21  ;;  %vm7881_vm9 = vmor %vm3100_vm14, %vm3101_vm7 }
 0x5da   : > { %v3084_v36 = vadd.f32 %v5258_v4, %v3083_v16  ;;  %v3121_v0 = vand.u32 2147483648, %v7826_v47  ;;  %5273 = vpow2.f32 %v7799_v7  ;;  %vm7894_vm10 = vmor %vm3556_vm13, %vm3557_vm8  ;;  %vm7902_vm0 = vcmp.eq.f32.partialorder %v3119_v53, 8.507059e+37  ;;  %v2907_v16 = vld [vmem:[#allocation4 + $0x1a8] sm:$0xff] }
 0x5db   : > { %v3540_v17 = vadd.f32 %v5260_v23, %v3539_v6  ;;  %v3553_v29 = vsub.f32 1.0, %v3552_v12  ;;  %v5268_v38 = vpop.eup %5267  ;;  %v3098_v19 = vmul.f32 %v5264_v62, %v3097_v25  ;;  %5275 = vtanh.f32 %v2906_v8  ;;  %v2838_v8 = vld [vmem:[#allocation4 + $0x2d0] sm:$0xff] }
 0x5dc   : > { %v3088_v56 = vsel %vm7856_vm4, %v5258_v4, %v3084_v36  ;;  %v3111_v33 = vmul.f32 %v5268_v38, %v7826_v47  ;;  %v7886_v32 = vpop.eup %5269  ;;  %v4321_v4 = vld [vmem:[#allocation3 + $0x28] sm:$0xff]  ;;  %5277 = vpow2.f32 %v7814_v51  ;;  %v5016_v26 = vmul.f32 -1.442695, %v2836_v45  ;;  %v2861_v36 = vld [vmem:[#allocation4 + $0x58] sm:$0xff]  ;;  %v2863_v45 = vld [vmem:[#allocation4 + $0x110] sm:$0xff] }
 0x5dd   : > { %v3093_v48 = vsel %vm7816_vm11, %v3092_v24, %v3088_v56  ;;  %v3544_v27 = vsel %vm7864_vm6, %v5260_v23, %v3540_v17  ;;  %v3554_v63 = vmul.f32 %v5266_v21, %v3553_v29  ;;  %v3099_v35 = vadd.f32 %v5264_v62, %v3098_v19  ;;  %v4322_v19 = vld [vmem:[#allocation3 + $0x40] sm:$0xff] }
 0x5de   : > { %v3549_v7 = vsel %vm7829_vm12, %v3548_v34, %v3544_v27  ;;  %v4368_v14 = vmul.f32 %v7795_v40, %v3093_v48  ;;  %v3112_v59 = vsub.f32 1.0, %v3111_v33  ;;  %vm3116_vm11 = vweird.f32 %v5268_v38  ;;  %v7898_v31 = vpop.eup %5271  ;;  %v2839_v48 = vld [vmem:[#allocation4 + $0x1b8] sm:$0xff] }
 0x5df   : > { %v4344_v30 = vmul.f32 %v4320_v55, %v3549_v7  ;;  %v3555_v43 = vadd.f32 %v5266_v21, %v3554_v63  ;;  %v3103_v9 = vsel %vm7881_vm9, %v5264_v62, %v3099_v35  ;;  %vm7918_vm12 = vmor %vm3115_vm5, %vm3116_vm11  ;;  %v3122_v50 = vor.u32 1.1754944e-38, %v3121_v0  ;;  %v2862_v55 = vld [vmem:[#allocation4 + $0x2c0] sm:$0xff]  ;;  %v2908_v63 = vld [vmem:[#allocation4 + $0x188] sm:$0xff] }
 0x5e0   : > { %v3108_v18 = vsel %vm7841_vm1, %v3107_v58, %v3103_v9  ;;  %v3113_v49 = vmul.f32 %v5268_v38, %v3112_v59  ;;  %v5274_v13 = vpop.eup %5273  ;;  %v3567_v57 = vmul.f32 %v7898_v31, %v7846_v1  ;;  %v3577_v62 = vand.u32 2147483648, %v7846_v1  ;;  %v2860_v58 = vld [vmem:[#allocation4 + $0x28] sm:$0xff] }
 0x5e1   : > { %v7907_v24 = vadd.f32 %v4368_v14, %v4344_v30  ;;  %v3559_v23 = vsel %vm7894_vm10, %v5266_v21, %v3555_v43  ;;  %v4369_v54 = vmul.f32 %v7834_v42, %v3108_v18  ;;  %v7926_v28 = vadd.f32 1.0, %v5274_v13  ;;  %v5276_v42 = vpop.eup %5275 }
 0x5e2   : > { %v3564_v34 = vsel %vm7850_vm3, %v3563_v11, %v3559_v23  ;;  %v3114_v22 = vadd.f32 %v5268_v38, %v3113_v49  ;;  %v3568_v21 = vsub.f32 1.0, %v3567_v57  ;;  %vm3571_vm14 = vweird.f32 %v7846_v1  ;;  %v5278_v6 = vpop.eup %5277 }
 0x5e3   : > { %9941 = vst [vmem:[#allocation61_spill] sm:$0xff] %v7907_v24  ;;  %v4345_v41 = vmul.f32 %v4321_v4, %v3564_v34  ;;  %vm3572_vm13 = vweird.f32 %v7898_v31  ;;  %v3575_v47 = vand.u32 2147483647, %v7846_v1  ;;  %5279 = vrcp.f32 %v7926_v28 }
 0x5e4   : > { %4464 = vst [vmem:[#allocation3 + $0x60] sm:$0xff] %v7907_v24  ;;  %v3118_v46 = vsel %vm7918_vm12, %v5268_v38, %v3114_v22  ;;  %5281 = vtanh.f32 %v7907_v24  ;;  %v3569_v12 = vmul.f32 %v7898_v31, %v3568_v21  ;;  %v5040_v11 = vmul.f32 -1.442695, %v2860_v58  ;;  %vm7943_vm15 = vmor %vm3571_vm14, %vm3572_vm13  ;;  %v2840_v22 = vld [vmem:[#allocation4 + $0x1f0] sm:$0xff] }
 0x5e5   : > { %v7931_v37 = vadd.f32 %v4369_v54, %v4345_v41  ;;  %v3123_v44 = vsel %vm7902_vm0, %v3122_v50, %v3118_v46  ;;  %v3578_v17 = vor.u32 1.1754944e-38, %v3577_v62  ;;  %v7947_v29 = vadd.f32 1.0, %v5278_v6 }
 0x5e6   : > { %5283 = vtanh.f32 %v2907_v16  ;;  %v3570_v53 = vadd.f32 %v7898_v31, %v3569_v12  ;;  %vm7950_vm1 = vcmp.eq.f32.partialorder %v3575_v47, 8.507059e+37  ;;  %v5017_v56 = vmul.f32 -1.442695, %v2837_v2 }
 0x5e7   : > { %9944 = vst [vmem:[#allocation62_spill] sm:$0xff] %v7931_v37  ;;  %5285 = vpow2.f32 %v5016_v26  ;;  %v3134_v1 = vand.u32 2147483647, %v7926_v28  ;;  %v5041_v0 = vmul.f32 -1.442695, %v2861_v36  ;;  %v4370_v3 = vmul.f32 %v5276_v42, %v3123_v44 }
 0x5e8   : > { %4465 = vst [vmem:[#allocation3 + $0x28] sm:$0xff] %v7931_v37  ;;  %5287 = vrcp.f32 %v7947_v29  ;;  %v3574_v27 = vsel %vm7943_vm15, %v7898_v31, %v3570_v53  ;;  %v5018_v33 = vmul.f32 -1.442695, %v2838_v8  ;;  %v3136_v35 = vand.u32 2147483648, %v7926_v28  ;;  %v2909_v31 = vld [vmem:[#allocation4 + $0xd0] sm:$0xff]  ;;  %v2910_v8 = vld [vmem:[#allocation4 + $0x138] sm:$0xff] }
 0x5e9   : > { %5289 = vpow2.f32 %v5040_v11  ;;  %v5280_v7 = vpop.eup %5279  ;;  %v3579_v14 = vsel %vm7950_vm1, %v3578_v17, %v3574_v27  ;;  %v5042_v5 = vmul.f32 -1.442695, %v2862_v55  ;;  %v7966_v9 = vmul.f32 -1.442695, %v2839_v48 }
 0x5ea   : > { %5291 = vtanh.f32 %v7931_v37  ;;  %v7963_v30 = vpop.eup %5281  ;;  %v4346_v43 = vmul.f32 %v4322_v19, %v3579_v14  ;;  %v3126_v59 = vmul.f32 %v5280_v7, %v7926_v28  ;;  %vm3130_vm2 = vweird.f32 %v7926_v28 }
 0x5eb   : > { %5293 = vpow2.f32 %v5017_v56  ;;  %vm7971_vm3 = vcmp.eq.f32.partialorder %v3134_v1, 8.507059e+37  ;;  %v7975_v26 = vmul.f32 -1.442695, %v2863_v45  ;;  %vm3131_vm4 = vweird.f32 %v5280_v7 }
 0x5ec   : > { %v7968_v4 = vpop.eup %5283  ;;  %5295 = vtanh.f32 %v2908_v63  ;;  %v7977_v23 = vadd.f32 %v4370_v3, %v4346_v43  ;;  %v3127_v49 = vsub.f32 1.0, %v3126_v59  ;;  %v3137_v34 = vor.u32 1.1754944e-38, %v3136_v35  ;;  %vm7990_vm6 = vmor %vm3130_vm2, %vm3131_vm4  ;;  %v4323_v3 = vld [vmem:[#allocation3 + $0x78] sm:$0xff] }
 0x5ed   : > { %v5286_v18 = vpop.eup %5285  ;;  %5297 = vpow2.f32 %v5041_v0  ;;  %vm3586_vm5 = vweird.f32 %v7947_v29  ;;  %v3590_v41 = vand.u32 2147483647, %v7947_v29  ;;  %v3592_v42 = vand.u32 2147483648, %v7947_v29 }
 0x5ee   : > { %9951 = vst [vmem:[#allocation63_spill] sm:$0xff] %v7977_v23  ;;  %v5288_v13 = vpop.eup %5287  ;;  %v7980_v54 = vadd.f32 1.0, %v5286_v18  ;;  %5299 = vtanh.f32 %v2909_v31  ;;  %v3128_v50 = vmul.f32 %v5280_v7, %v3127_v49  ;;  %v8005_v11 = vmul.f32 -1.442695, %v2840_v22 }
 0x5ef   : > { %v5290_v51 = vpop.eup %5289  ;;  %4466 = vst [vmem:[#allocation3 + $0x40] sm:$0xff] %v7977_v23  ;;  %v3582_v57 = vmul.f32 %v5288_v13, %v7947_v29  ;;  %5301 = vpow2.f32 %v5018_v33  ;;  %vm3587_vm7 = vweird.f32 %v5288_v13  ;;  %vm8009_vm8 = vcmp.eq.f32.partialorder %v3590_v41, 8.507059e+37 }
 0x5f0   : > { %v7985_v62 = vpop.eup %5291  ;;  %5303 = vrcp.f32 %v7980_v54  ;;  %v3149_v21 = vand.u32 2147483647, %v7980_v54  ;;  %v3129_v16 = vadd.f32 %v5280_v7, %v3128_v50  ;;  %v7997_v2 = vadd.f32 1.0, %v5290_v51  ;;  %vm8021_vm9 = vmor %vm3586_vm5, %vm3587_vm7 }
 0x5f1   : > { %v5294_v47 = vpop.eup %5293  ;;  %v3583_v46 = vsub.f32 1.0, %v3582_v57  ;;  %5305 = vpow2.f32 %v5042_v5  ;;  %v3151_v28 = vand.u32 2147483648, %v7980_v54  ;;  %v3593_v55 = vor.u32 1.1754944e-38, %v3592_v42 }
 0x5f2   : > { %v7999_v6 = vpop.eup %5295  ;;  %5307 = vtanh.f32 %v7977_v23  ;;  %v8003_v12 = vadd.f32 1.0, %v5294_v47  ;;  %v3133_v44 = vsel %vm7990_vm6, %v5280_v7, %v3129_v16  ;;  %v3605_v19 = vand.u32 2147483647, %v7997_v2 }
 0x5f3   : > { %v5298_v36 = vpop.eup %5297  ;;  %v3584_v25 = vmul.f32 %v5288_v13, %v3583_v46  ;;  %5309 = vrcp.f32 %v7997_v2  ;;  %v3138_v38 = vsel %vm7971_vm3, %v3137_v34, %v3133_v44  ;;  %vm3145_vm10 = vweird.f32 %v7980_v54 }
 0x5f4   : > { %v8014_v53 = vpop.eup %5299  ;;  %5311 = vrcp.f32 %v8003_v12  ;;  %vm8028_vm11 = vcmp.eq.f32.partialorder %v3149_v21, 8.507059e+37  ;;  %v3607_v27 = vand.u32 2147483648, %v7997_v2  ;;  %v3152_v63 = vor.u32 1.1754944e-38, %v3151_v28 }
 0x5f5   : > { %v5302_v1 = vpop.eup %5301  ;;  %v3585_v0 = vadd.f32 %v5288_v13, %v3584_v25  ;;  %vm3601_vm0 = vweird.f32 %v7997_v2  ;;  %v8034_v33 = vadd.f32 1.0, %v5298_v36  ;;  %5313 = vtanh.f32 %v2910_v8 }
 0x5f6   : > { %v5304_v29 = vpop.eup %5303  ;;  %v4371_v14 = vmul.f32 %v7968_v4, %v3138_v38  ;;  %vm3160_vm12 = vweird.f32 %v8003_v12  ;;  %vm8045_vm14 = vcmp.eq.f32.partialorder %v3605_v19, 8.507059e+37  ;;  %v3164_v31 = vand.u32 2147483647, %v8003_v12 }
 0x5f7   : > { %v5306_v45 = vpop.eup %5305  ;;  %v3589_v7 = vsel %vm8021_vm9, %v5288_v13, %v3585_v0  ;;  %v3141_v35 = vmul.f32 %v5304_v29, %v7980_v54  ;;  %5315 = vrcp.f32 %v8034_v33  ;;  %vm3146_vm13 = vweird.f32 %v5304_v29 }
 0x5f8   : > { %v8041_v5 = vpop.eup %5307  ;;  %v3594_v43 = vsel %vm8009_vm8, %v3593_v55, %v3589_v7  ;;  %v3608_v49 = vor.u32 1.1754944e-38, %v3607_v27  ;;  %v3166_v51 = vand.u32 2147483648, %v8003_v12  ;;  %v8053_v50 = vadd.f32 1.0, %v5302_v1  ;;  %vm8065_vm15 = vmor %vm3145_vm10, %vm3146_vm13 }
 0x5f9   : > { %v5310_v40 = vpop.eup %5309  ;;  %v4347_v18 = vmul.f32 %v4323_v3, %v3594_v43  ;;  %v3142_v4 = vsub.f32 1.0, %v3141_v35  ;;  %v8055_v57 = vadd.f32 1.0, %v5306_v45  ;;  %v3620_v42 = vand.u32 2147483647, %v8034_v33 }
 0x5fa   : > { %v5312_v13 = vpop.eup %5311  ;;  %v3597_v34 = vmul.f32 %v5310_v40, %v7997_v2  ;;  %vm3602_vm1 = vweird.f32 %v5310_v40  ;;  %v3622_v46 = vand.u32 2147483648, %v8034_v33  ;;  %5317 = vrcp.f32 %v8053_v50 }
 0x5fb   : > { %v8057_v41 = vadd.f32 %v4371_v14, %v4347_v18  ;;  %v3143_v22 = vmul.f32 %v5304_v29, %v3142_v4  ;;  %v3156_v58 = vmul.f32 %v5312_v13, %v8003_v12  ;;  %v8061_v21 = vpop.eup %5313  ;;  %vm3161_vm2 = vweird.f32 %v5312_v13  ;;  %vm8082_vm5 = vmor %vm3601_vm0, %vm3602_vm1 }
 0x5fc   : > { %v3598_v16 = vsub.f32 1.0, %v3597_v34  ;;  %vm8072_vm3 = vcmp.eq.f32.partialorder %v3164_v31, 8.507059e+37  ;;  %v3167_v17 = vor.u32 1.1754944e-38, %v3166_v51  ;;  %vm3616_vm4 = vweird.f32 %v8034_v33  ;;  %vm8095_vm7 = vmor %vm3160_vm12, %vm3161_vm2 }
 0x5fd   : > { %9962 = vst [vmem:[#allocation64_spill] sm:$0xff] %v8057_v41  ;;  %v3144_v28 = vadd.f32 %v5304_v29, %v3143_v22  ;;  %v3157_v36 = vsub.f32 1.0, %v3156_v58  ;;  %v5316_v54 = vpop.eup %5315  ;;  %5319 = vrcp.f32 %v8055_v57  ;;  %vm8087_vm6 = vcmp.eq.f32.partialorder %v3620_v42, 8.507059e+37  ;;  %v4325_v22 = vld [vmem:[#allocation3 + $0x90] sm:$0xff] }
 0x5fe   : > { %4467 = vst [vmem:[#allocation3 + $0x78] sm:$0xff] %v8057_v41  ;;  %v3599_v25 = vmul.f32 %v5310_v40, %v3598_v16  ;;  %v3612_v55 = vmul.f32 %v5316_v54, %v8034_v33  ;;  %v3623_v2 = vor.u32 1.1754944e-38, %v3622_v46  ;;  %vm3175_vm8 = vweird.f32 %v8053_v50  ;;  %v2864_v46 = vld [vmem:[#allocation4 + $0x228] sm:$0xff] }
 0x5ff   : > { %v3148_v8 = vsel %vm8065_vm15, %v5304_v29, %v3144_v28  ;;  %v3158_v56 = vmul.f32 %v5312_v13, %v3157_v36  ;;  %v4324_v29 = vld [vmem:[#allocation3 + $0x88] sm:$0xff]  ;;  %vm3617_vm9 = vweird.f32 %v5316_v54  ;;  %v3179_v7 = vand.u32 2147483647, %v8053_v50 }
 0x600   : > { %v3153_v1 = vsel %vm8028_vm11, %v3152_v63, %v3148_v8  ;;  %v3600_v0 = vadd.f32 %v5310_v40, %v3599_v25  ;;  %v3613_v45 = vsub.f32 1.0, %v3612_v55  ;;  %v5318_v14 = vpop.eup %5317  ;;  %v3181_v12 = vand.u32 2147483648, %v8053_v50  ;;  %vm8115_vm10 = vmor %vm3616_vm4, %vm3617_vm9  ;;  %v2911_v8 = vld [vmem:[#allocation4 + $0x158] sm:$0xff] }
 0x601   : > { %v3159_v3 = vadd.f32 %v5312_v13, %v3158_v56  ;;  %v4372_v63 = vmul.f32 %v7999_v6, %v3153_v1  ;;  %5321 = vpow2.f32 %v7966_v9  ;;  %v3171_v18 = vmul.f32 %v5318_v14, %v8053_v50  ;;  %v2841_v56 = vld [vmem:[#allocation4 + $0x1d0] sm:$0xff] }
 0x602   : > { %v3604_v48 = vsel %vm8082_vm5, %v5310_v40, %v3600_v0  ;;  %v3614_v31 = vmul.f32 %v5316_v54, %v3613_v45  ;;  %vm3631_vm11 = vweird.f32 %v8055_v57  ;;  %v3635_v9 = vand.u32 2147483647, %v8055_v57  ;;  %v4326_v45 = vld [vmem:[#allocation3 + $0x18] sm:$0xff] }
 0x603   : > { %v3609_v35 = vsel %vm8045_vm14, %v3608_v49, %v3604_v48  ;;  %v3163_v43 = vsel %vm8095_vm7, %v5312_v13, %v3159_v3  ;;  %v5320_v4 = vpop.eup %5319  ;;  %v3172_v49 = vsub.f32 1.0, %v3171_v18  ;;  %vm3176_vm0 = vweird.f32 %v5318_v14 }
 0x604   : > { %v4348_v34 = vmul.f32 %v4324_v29, %v3609_v35  ;;  %v3168_v40 = vsel %vm8072_vm3, %v3167_v17, %v3163_v43  ;;  %v3615_v59 = vadd.f32 %v5316_v54, %v3614_v31  ;;  %v3627_v13 = vmul.f32 %v5320_v4, %v8055_v57  ;;  %vm8136_vm14 = vmor %vm3175_vm8, %vm3176_vm0  ;;  %v2866_v31 = vld [vmem:[#allocation4 + $0x50] sm:$0xff] }
 0x605   : > { %v4373_v58 = vmul.f32 %v8014_v53, %v3168_v40  ;;  %v3637_v33 = vand.u32 2147483648, %v8055_v57  ;;  %5323 = vpow2.f32 %v7975_v26  ;;  %v3173_v47 = vmul.f32 %v5318_v14, %v3172_v49  ;;  %v2865_v57 = vld [vmem:[#allocation4 + $0x130] sm:$0xff]  ;;  %v2843_v40 = vld [vmem:[#allocation4 + $0x20] sm:$0xff] }
 0x606   : > { %v8122_v51 = vadd.f32 %v4372_v63, %v4348_v34  ;;  %v3619_v42 = vsel %vm8115_vm10, %v5316_v54, %v3615_v59  ;;  %v3628_v16 = vsub.f32 1.0, %v3627_v13  ;;  %vm3632_vm12 = vweird.f32 %v5320_v4  ;;  %v2842_v63 = vld [vmem:[#allocation4 + $0xc8] sm:$0xff]  ;;  %v2844_v26 = vld [vmem:[#allocation4 + $0x100] sm:$0xff] }
 0x607   : > { %v5322_v28 = vpop.eup %5321  ;;  %5325 = vtanh.f32 %v8057_v41  ;;  %v3624_v36 = vsel %vm8087_vm6, %v3623_v2, %v3619_v42  ;;  %vm8140_vm13 = vcmp.eq.f32.partialorder %v3179_v7, 8.507059e+37  ;;  %v3182_v44 = vor.u32 1.1754944e-38, %v3181_v12  ;;  %vm8149_vm15 = vmor %vm3631_vm11, %vm3632_vm12 }
 0x608   : > { %9975 = vst [vmem:[#allocation65_spill] sm:$0xff] %v8122_v51  ;;  %v4349_v54 = vmul.f32 %v4325_v22, %v3624_v36  ;;  %v3174_v25 = vadd.f32 %v5318_v14, %v3173_v47  ;;  %v3629_v17 = vmul.f32 %v5320_v4, %v3628_v16  ;;  %v8144_v38 = vadd.f32 1.0, %v5322_v28 }
 0x609   : > { %4468 = vst [vmem:[#allocation3 + $0x88] sm:$0xff] %v8122_v51  ;;  %vm8153_vm1 = vcmp.eq.f32.partialorder %v3635_v9, 8.507059e+37  ;;  %v3638_v19 = vor.u32 1.1754944e-38, %v3637_v33  ;;  %5327 = vpow2.f32 %v8005_v11  ;;  %v5044_v1 = vmul.f32 -1.442695, %v2864_v46  ;;  %v2912_v9 = vld [vmem:[#allocation4 + $0xd8] sm:$0xff] }
 0x60a   : > { %v8158_v0 = vadd.f32 %v4373_v58, %v4349_v54  ;;  %v3178_v27 = vsel %vm8136_vm14, %v5318_v14, %v3174_v25  ;;  %v3630_v2 = vadd.f32 %v5320_v4, %v3629_v17  ;;  %5329 = vrcp.f32 %v8144_v38 }
 0x60b   : > { %v5324_v29 = vpop.eup %5323  ;;  %v3183_v3 = vsel %vm8140_vm13, %v3182_v44, %v3178_v27  ;;  %5331 = vtanh.f32 %v2911_v8  ;;  %v5021_v7 = vmul.f32 -1.442695, %v2841_v56  ;;  %v5045_v43 = vmul.f32 -1.442695, %v2865_v57 }
 0x60c   : > { %9984 = vst [vmem:[#allocation66_spill] sm:$0xff] %v8158_v0  ;;  %5333 = vtanh.f32 %v8122_v51  ;;  %v3634_v11 = vsel %vm8149_vm15, %v5320_v4, %v3630_v2  ;;  %v4374_v14 = vmul.f32 %v8061_v21, %v3183_v3  ;;  %v8170_v48 = vadd.f32 1.0, %v5324_v29  ;;  %v2867_v4 = vld [vmem:[#allocation4 + $0x210] sm:$0xff] }
 0x60d   : > { %4469 = vst [vmem:[#allocation3 + $0x90] sm:$0xff] %v8158_v0  ;;  %v8172_v12 = vpop.eup %5325  ;;  %v3639_v35 = vsel %vm8153_vm1, %v3638_v19, %v3634_v11  ;;  %5335 = vpow2.f32 %v5044_v1  ;;  %v3194_v34 = vand.u32 2147483647, %v8144_v38  ;;  %v3196_v21 = vand.u32 2147483648, %v8144_v38  ;;  %v2913_v11 = vld [vmem:[#allocation4 + $0x1e8] sm:$0xff] }
 0x60e   : > { %v4350_v18 = vmul.f32 %v4326_v45, %v3639_v35  ;;  %5337 = vrcp.f32 %v8170_v48  ;;  %v5022_v59 = vmul.f32 -1.442695, %v2842_v63  ;;  %v5046_v58 = vmul.f32 -1.442695, %v2866_v31 }
 0x60f   : > { %v5328_v6 = vpop.eup %5327  ;;  %5339 = vtanh.f32 %v8158_v0  ;;  %v8187_v47 = vmul.f32 -1.442695, %v2843_v40  ;;  %v8189_v16 = vmul.f32 -1.442695, %v2867_v4  ;;  %vm3190_vm2 = vweird.f32 %v8144_v38 }
 0x610   : > { %v5330_v49 = vpop.eup %5329  ;;  %v8180_v13 = vadd.f32 %v4374_v14, %v4350_v18  ;;  %v8182_v22 = vadd.f32 1.0, %v5328_v6  ;;  %5341 = vpow2.f32 %v5021_v7  ;;  %vm8195_vm3 = vcmp.eq.f32.partialorder %v3194_v34, 8.507059e+37 }
 0x611   : > { %v8184_v33 = vpop.eup %5331  ;;  %v3186_v42 = vmul.f32 %v5330_v49, %v8144_v38  ;;  %5343 = vpow2.f32 %v5045_v43  ;;  %v3650_v36 = vand.u32 2147483647, %v8170_v48  ;;  %vm3191_vm4 = vweird.f32 %v5330_v49 }
 0x612   : > { %9985 = vst [vmem:[#allocation67_spill] sm:$0xff] %v8180_v13  ;;  %v8191_v46 = vpop.eup %5333  ;;  %5345 = vtanh.f32 %v2912_v9  ;;  %v3197_v54 = vor.u32 1.1754944e-38, %v3196_v21  ;;  %vm3646_vm5 = vweird.f32 %v8170_v48  ;;  %v3652_v17 = vand.u32 2147483648, %v8170_v48  ;;  %vm8213_vm6 = vmor %vm3190_vm2, %vm3191_vm4 }
 0x613   : > { %4470 = vst [vmem:[#allocation3 + $0x18] sm:$0xff] %v8180_v13  ;;  %v5336_v53 = vpop.eup %5335  ;;  %v3187_v44 = vsub.f32 1.0, %v3186_v42  ;;  %5347 = vrcp.f32 %v8182_v22  ;;  %v8209_v19 = vmul.f32 -1.442695, %v2844_v26  ;;  %vm8217_vm7 = vcmp.eq.f32.partialorder %v3650_v36, 8.507059e+37 }
 0x614   : > { %v5338_v25 = vpop.eup %5337  ;;  %5349 = vtanh.f32 %v8180_v13  ;;  %v8204_v8 = vadd.f32 1.0, %v5336_v53  ;;  %v3209_v57 = vand.u32 2147483647, %v8182_v22  ;;  %v3211_v29 = vand.u32 2147483648, %v8182_v22 }
 0x615   : > { %v8206_v56 = vpop.eup %5339  ;;  %v3188_v50 = vmul.f32 %v5330_v49, %v3187_v44  ;;  %v3642_v55 = vmul.f32 %v5338_v25, %v8170_v48  ;;  %5351 = vpow2.f32 %v5022_v59  ;;  %vm3647_vm8 = vweird.f32 %v5338_v25  ;;  %v4327_v48 = vld [vmem:[#allocation3 + $0x98] sm:$0xff] }
 0x616   : > { %v5342_v1 = vpop.eup %5341  ;;  %5353 = vrcp.f32 %v8204_v8  ;;  %v3653_v63 = vor.u32 1.1754944e-38, %v3652_v17  ;;  %v3665_v35 = vand.u32 2147483647, %v8204_v8  ;;  %v3667_v40 = vand.u32 2147483648, %v8204_v8  ;;  %vm8242_vm9 = vmor %vm3646_vm5, %vm3647_vm8 }
 0x617   : > { %v5344_v3 = vpop.eup %5343  ;;  %v3189_v45 = vadd.f32 %v5330_v49, %v3188_v50  ;;  %v3643_v7 = vsub.f32 1.0, %v3642_v55  ;;  %v8224_v38 = vadd.f32 1.0, %v5342_v1  ;;  %5355 = vpow2.f32 %v5046_v58 }
 0x618   : > { %v8226_v14 = vpop.eup %5345  ;;  %v8229_v43 = vadd.f32 1.0, %v5344_v3  ;;  %vm3205_vm10 = vweird.f32 %v8182_v22  ;;  %vm8248_vm11 = vcmp.eq.f32.partialorder %v3209_v57, 8.507059e+37  ;;  %v3212_v42 = vor.u32 1.1754944e-38, %v3211_v29 }
 0x619   : > { %v5348_v31 = vpop.eup %5347  ;;  %v3193_v18 = vsel %vm8213_vm6, %v5330_v49, %v3189_v45  ;;  %v3644_v34 = vmul.f32 %v5338_v25, %v3643_v7  ;;  %5357 = vrcp.f32 %v8224_v38  ;;  %vm3661_vm12 = vweird.f32 %v8204_v8 }
 0x61a   : > { %v8235_v4 = vpop.eup %5349  ;;  %v3198_v6 = vsel %vm8195_vm3, %v3197_v54, %v3193_v18  ;;  %v3201_v9 = vmul.f32 %v5348_v31, %v8182_v22  ;;  %5359 = vtanh.f32 %v2913_v11  ;;  %vm3206_vm0 = vweird.f32 %v5348_v31 }
 0x61b   : > { %v5352_v59 = vpop.eup %5351  ;;  %v3645_v49 = vadd.f32 %v5338_v25, %v3644_v34  ;;  %5361 = vrcp.f32 %v8229_v43  ;;  %vm8254_vm14 = vcmp.eq.f32.partialorder %v3665_v35, 8.507059e+37  ;;  %v4375_v44 = vmul.f32 %v8184_v33, %v3198_v6  ;;  %vm8268_vm15 = vmor %vm3205_vm10, %vm3206_vm0 }
 0x61c   : > { %v5354_v28 = vpop.eup %5353  ;;  %v3202_v36 = vsub.f32 1.0, %v3201_v9  ;;  %v3668_v17 = vor.u32 1.1754944e-38, %v3667_v40  ;;  %vm3220_vm13 = vweird.f32 %v8224_v38  ;;  %v3224_v27 = vand.u32 2147483647, %v8224_v38 }
 0x61d   : > { %v3649_v53 = vsel %vm8242_vm9, %v5338_v25, %v3645_v49  ;;  %v3657_v54 = vmul.f32 %v5354_v28, %v8204_v8  ;;  %v5356_v50 = vpop.eup %5355  ;;  %vm3662_vm1 = vweird.f32 %v5354_v28  ;;  %v8272_v3 = vadd.f32 1.0, %v5352_v59  ;;  %v2914_v25 = vld [vmem:[#allocation4 + $0x8] sm:$0xff] }
 0x61e   : > { %v3654_v55 = vsel %vm8217_vm7, %v3653_v63, %v3649_v53  ;;  %v3203_v1 = vmul.f32 %v5348_v31, %v3202_v36  ;;  %v3226_v11 = vand.u32 2147483648, %v8224_v38  ;;  %v3680_v63 = vand.u32 2147483647, %v8229_v43  ;;  %vm8286_vm2 = vmor %vm3661_vm12, %vm3662_vm1 }
 0x61f   : > { %v5358_v57 = vpop.eup %5357  ;;  %v4351_v29 = vmul.f32 %v4327_v48, %v3654_v55  ;;  %v3658_v33 = vsub.f32 1.0, %v3657_v54  ;;  %5363 = vrcp.f32 %v8272_v3  ;;  %v8280_v34 = vadd.f32 1.0, %v5356_v50 }
 0x620   : > { %v5360_v45 = vpop.eup %5359  ;;  %v3204_v2 = vadd.f32 %v5348_v31, %v3203_v1  ;;  %v3216_v7 = vmul.f32 %v5358_v57, %v8224_v38  ;;  %vm3221_vm3 = vweird.f32 %v5358_v57  ;;  %vm8294_vm4 = vcmp.eq.f32.partialorder %v3224_v27, 8.507059e+37 }
 0x621   : > { %v5362_v35 = vpop.eup %5361  ;;  %v8277_v18 = vadd.f32 %v4375_v44, %v4351_v29  ;;  %v3659_v22 = vmul.f32 %v5354_v28, %v3658_v33  ;;  %v3682_v8 = vand.u32 2147483648, %v8229_v43  ;;  %vm3676_vm5 = vweird.f32 %v8229_v43  ;;  %vm8305_vm7 = vmor %vm3220_vm13, %vm3221_vm3 }
 0x622   : > { %v3208_v40 = vsel %vm8268_vm15, %v5348_v31, %v3204_v2  ;;  %v3217_v21 = vsub.f32 1.0, %v3216_v7  ;;  %v3672_v9 = vmul.f32 %v5362_v35, %v8229_v43  ;;  %v4328_v31 = vld [vmem:[#allocation3 + $0x38] sm:$0xff]  ;;  %vm3677_vm6 = vweird.f32 %v5362_v35  ;;  %v2868_v2 = vld [vmem:[#allocation4 + $0x270] sm:$0xff] }
 0x623   : > { %10000 = vst [vmem:[#allocation68_spill] sm:$0xff] %v8277_v18  ;;  %v3213_v59 = vsel %vm8248_vm11, %v3212_v42, %v3208_v40  ;;  %v3660_v49 = vadd.f32 %v5354_v28, %v3659_v22  ;;  %v3227_v42 = vor.u32 1.1754944e-38, %v3226_v11  ;;  %5365 = vrcp.f32 %v8280_v34  ;;  %vm8316_vm9 = vmor %vm3676_vm5, %vm3677_vm6 }
 0x624   : > { %4471 = vst [vmem:[#allocation3 + $0x98] sm:$0xff] %v8277_v18  ;;  %v3218_v36 = vmul.f32 %v5358_v57, %v3217_v21  ;;  %v3673_v53 = vsub.f32 1.0, %v3672_v9  ;;  %v4376_v54 = vmul.f32 %v8226_v14, %v3213_v59  ;;  %vm8312_vm8 = vcmp.eq.f32.partialorder %v3680_v63, 8.507059e+37  ;;  %v4329_v63 = vld [vmem:[#allocation3 + $0x50] sm:$0xff] }
 0x625   : > { %v3664_v44 = vsel %vm8286_vm2, %v5354_v28, %v3660_v49  ;;  %v5364_v28 = vpop.eup %5363  ;;  %v3683_v27 = vor.u32 1.1754944e-38, %v3682_v8  ;;  %v3239_v29 = vand.u32 2147483647, %v8272_v3  ;;  %5367 = vpow2.f32 %v8187_v47 }
 0x626   : > { %v3669_v50 = vsel %vm8254_vm14, %v3668_v17, %v3664_v44  ;;  %v3219_v55 = vadd.f32 %v5358_v57, %v3218_v36  ;;  %v3674_v43 = vmul.f32 %v5362_v35, %v3673_v53  ;;  %v3231_v33 = vmul.f32 %v5364_v28, %v8272_v3  ;;  %v2845_v53 = vld [vmem:[#allocation4 + $0x278] sm:$0xff] }
 0x627   : > { %v4352_v14 = vmul.f32 %v4328_v31, %v3669_v50  ;;  %vm3235_vm10 = vweird.f32 %v8272_v3  ;;  %vm3236_vm11 = vweird.f32 %v5364_v28  ;;  %v3241_v22 = vand.u32 2147483648, %v8272_v3  ;;  %v2869_v3 = vld [vmem:[#allocation4] sm:$0xff] }
 0x628   : > { %v3223_v26 = vsel %vm8305_vm7, %v5358_v57, %v3219_v55  ;;  %v3675_v17 = vadd.f32 %v5362_v35, %v3674_v43  ;;  %v3232_v40 = vsub.f32 1.0, %v3231_v33  ;;  %5369 = vpow2.f32 %v8189_v16  ;;  %vm8346_vm14 = vmor %vm3235_vm10, %vm3236_vm11 }
 0x629   : > { %v8326_v7 = vadd.f32 %v4376_v54, %v4352_v14  ;;  %v3228_v11 = vsel %vm8294_vm4, %v3227_v42, %v3223_v26  ;;  %v5366_v6 = vpop.eup %5365  ;;  %vm8337_vm0 = vcmp.eq.f32.partialorder %v3239_v29, 8.507059e+37  ;;  %5371 = vtanh.f32 %v2914_v25  ;;  %v4330_v25 = vld [vmem:[#allocation3 + $0x70] sm:$0xff] }
 0x62a   : > { %v3679_v47 = vsel %vm8316_vm9, %v5362_v35, %v3675_v17  ;;  %v4377_v57 = vmul.f32 %v5360_v45, %v3228_v11  ;;  %v5048_v59 = vmul.f32 -1.442695, %v2868_v2  ;;  %v3233_v48 = vmul.f32 %v5364_v28, %v3232_v40  ;;  %v2915_v2 = vld [vmem:[#allocation4 + $0x2f8] sm:$0xff]  ;;  %v2846_v11 = vld [vmem:[#allocation4 + $0x48] sm:$0xff] }
 0x62b   : > { %10011 = vst [vmem:[#allocation69_spill] sm:$0xff] %v8326_v7  ;;  %v3684_v21 = vsel %vm8312_vm8, %v3683_v27, %v3679_v47  ;;  %v3687_v35 = vmul.f32 %v5366_v6, %v8280_v34  ;;  %vm3691_vm12 = vweird.f32 %v8280_v34  ;;  %v5368_v45 = vpop.eup %5367  ;;  %v3242_v8 = vor.u32 1.1754944e-38, %v3241_v22 }
 0x62c   : > { %4472 = vst [vmem:[#allocation3 + $0x38] sm:$0xff] %v8326_v7  ;;  %v4353_v49 = vmul.f32 %v4329_v63, %v3684_v21  ;;  %vm3692_vm13 = vweird.f32 %v5366_v6  ;;  %v3695_v31 = vand.u32 2147483647, %v8280_v34  ;;  %v3697_v36 = vand.u32 2147483648, %v8280_v34  ;;  %v2870_v63 = vld [vmem:[#allocation4 + $0x168] sm:$0xff] }
 0x62d   : > { %v3234_v54 = vadd.f32 %v5364_v28, %v3233_v48  ;;  %v3688_v58 = vsub.f32 1.0, %v3687_v35  ;;  %v8354_v42 = vadd.f32 1.0, %v5368_v45  ;;  %5373 = vpow2.f32 %v8209_v19  ;;  %vm8366_vm15 = vmor %vm3691_vm12, %vm3692_vm13  ;;  %v2916_v35 = vld [vmem:[#allocation4 + $0x180] sm:$0xff] }
 0x62e   : > { %v8352_v44 = vadd.f32 %v4377_v57, %v4353_v49  ;;  %v5370_v50 = vpop.eup %5369  ;;  %5375 = vtanh.f32 %v8277_v18  ;;  %v5025_v1 = vmul.f32 -1.442695, %v2845_v53  ;;  %vm8370_vm1 = vcmp.eq.f32.partialorder %v3695_v31, 8.507059e+37  ;;  %v2847_v57 = vld [vmem:[#allocation4 + $0x150] sm:$0xff]  ;;  %v2917_v53 = vld [vmem:[#allocation4 + $0xb8] sm:$0xff] }
 0x62f   : > { %v3238_v55 = vsel %vm8346_vm14, %v5364_v28, %v3234_v54  ;;  %v3689_v43 = vmul.f32 %v5366_v6, %v3688_v58  ;;  %v5372_v14 = vpop.eup %5371  ;;  %v3698_v29 = vor.u32 1.1754944e-38, %v3697_v36  ;;  %5377 = vrcp.f32 %v8354_v42 }
 0x630   : > { %10016 = vst [vmem:[#allocation70_spill] sm:$0xff] %v8352_v44  ;;  %v3243_v38 = vsel %vm8337_vm0, %v3242_v8, %v3238_v55  ;;  %v8375_v26 = vadd.f32 1.0, %v5370_v50  ;;  %5379 = vpow2.f32 %v5048_v59  ;;  %v5049_v17 = vmul.f32 -1.442695, %v2869_v3 }
 0x631   : > { %4473 = vst [vmem:[#allocation3 + $0x50] sm:$0xff] %v8352_v44  ;;  %v3690_v28 = vadd.f32 %v5366_v6, %v3689_v43  ;;  %5381 = vtanh.f32 %v8326_v7  ;;  %v4378_v33 = vmul.f32 %v5372_v14, %v3243_v38  ;;  %v3254_v9 = vand.u32 2147483647, %v8354_v42 }
 0x632   : > { %5383 = vrcp.f32 %v8375_v26  ;;  %v3256_v48 = vand.u32 2147483648, %v8354_v42  ;;  %v5026_v45 = vmul.f32 -1.442695, %v2846_v11  ;;  %v8389_v16 = vmul.f32 -1.442695, %v2870_v63 }
 0x633   : > { %v3694_v34 = vsel %vm8366_vm15, %v5366_v6, %v3690_v28  ;;  %v5374_v22 = vpop.eup %5373  ;;  %5385 = vpow2.f32 %v5025_v1  ;;  %v2871_v6 = vld [vmem:[#allocation4 + $0xb0] sm:$0xff]  ;;  %v8395_v54 = vmul.f32 -1.442695, %v2847_v57  ;;  %vm3250_vm2 = vweird.f32 %v8354_v42 }
 0x634   : > { %v3699_v47 = vsel %vm8370_vm1, %v3698_v29, %v3694_v34  ;;  %v8383_v40 = vpop.eup %5375  ;;  %v8386_v59 = vadd.f32 1.0, %v5374_v22  ;;  %5387 = vpow2.f32 %v5049_v17  ;;  %v8403_v50 = vmul.f32 -1.442695, %v2871_v6 }
 0x635   : > { %v4354_v21 = vmul.f32 %v4330_v25, %v3699_v47  ;;  %v5378_v49 = vpop.eup %5377  ;;  %5389 = vtanh.f32 %v2915_v2  ;;  %vm8406_vm4 = vcmp.eq.f32.partialorder %v3254_v9, 8.507059e+37  ;;  %v3257_v38 = vor.u32 1.1754944e-38, %v3256_v48 }
 0x636   : > { %v5380_v8 = vpop.eup %5379  ;;  %v3246_v36 = vmul.f32 %v5378_v49, %v8354_v42  ;;  %5391 = vrcp.f32 %v8386_v59  ;;  %vm3251_vm3 = vweird.f32 %v5378_v49  ;;  %v3710_v27 = vand.u32 2147483647, %v8375_v26 }
 0x637   : > { %v8391_v31 = vadd.f32 %v4378_v33, %v4354_v21  ;;  %v8397_v58 = vpop.eup %5381  ;;  %5393 = vtanh.f32 %v8352_v44  ;;  %v8401_v3 = vadd.f32 1.0, %v5380_v8  ;;  %vm3706_vm5 = vweird.f32 %v8375_v26  ;;  %vm8417_vm6 = vmor %vm3250_vm2, %vm3251_vm3 }
 0x638   : > { %v5384_v55 = vpop.eup %5383  ;;  %v3247_v43 = vsub.f32 1.0, %v3246_v36  ;;  %5395 = vtanh.f32 %v2916_v35  ;;  %v3712_v17 = vand.u32 2147483648, %v8375_v26  ;;  %v3269_v2 = vand.u32 2147483647, %v8386_v59 }
 0x639   : > { %10021 = vst [vmem:[#allocation71_spill] sm:$0xff] %v8391_v31  ;;  %v5386_v14 = vpop.eup %5385  ;;  %v3702_v19 = vmul.f32 %v5384_v55, %v8375_v26  ;;  %5397 = vtanh.f32 %v2917_v53  ;;  %vm3707_vm7 = vweird.f32 %v5384_v55  ;;  %v3271_v47 = vand.u32 2147483648, %v8386_v59  ;;  %v4332_v26 = vld [vmem:[#allocation3 + $0xa8] sm:$0xff] }
 0x63a   : > { %4474 = vst [vmem:[#allocation3 + $0x70] sm:$0xff] %v8391_v31  ;;  %v5388_v29 = vpop.eup %5387  ;;  %v3248_v28 = vmul.f32 %v5378_v49, %v3247_v43  ;;  %5399 = vrcp.f32 %v8401_v3  ;;  %v8422_v11 = vadd.f32 1.0, %v5386_v14  ;;  %vm8430_vm8 = vcmp.eq.f32.partialorder %v3710_v27, 8.507059e+37  ;;  %vm8440_vm9 = vmor %vm3706_vm5, %vm3707_vm7 }
 0x63b   : > { %v5390_v25 = vpop.eup %5389  ;;  %v3703_v33 = vsub.f32 1.0, %v3702_v19  ;;  %v8425_v57 = vadd.f32 1.0, %v5388_v29  ;;  %5401 = vpow2.f32 %v5026_v45  ;;  %v3713_v8 = vor.u32 1.1754944e-38, %v3712_v17  ;;  %v4331_v19 = vld [vmem:[#allocation3 + $0xa0] sm:$0xff]  ;;  %v2848_v17 = vld [vmem:[#allocation4 + $0x248] sm:$0xff] }
 0x63c   : > { %v5392_v63 = vpop.eup %5391  ;;  %v3249_v22 = vadd.f32 %v5378_v49, %v3248_v28  ;;  %5403 = vtanh.f32 %v8391_v31  ;;  %vm3265_vm10 = vweird.f32 %v8386_v59  ;;  %vm8450_vm0 = vcmp.eq.f32.partialorder %v3269_v2, 8.507059e+37 }
 0x63d   : > { %v8427_v21 = vpop.eup %5393  ;;  %v3704_v42 = vmul.f32 %v5384_v55, %v3703_v33  ;;  %v3261_v6 = vmul.f32 %v5392_v63, %v8386_v59  ;;  %5405 = vrcp.f32 %v8422_v11  ;;  %vm3266_vm11 = vweird.f32 %v5392_v63 }
 0x63e   : > { %v5396_v48 = vpop.eup %5395  ;;  %v3253_v35 = vsel %vm8417_vm6, %v5378_v49, %v3249_v22  ;;  %v3272_v27 = vor.u32 1.1754944e-38, %v3271_v47  ;;  %vm3721_vm12 = vweird.f32 %v8401_v3  ;;  %5407 = vrcp.f32 %v8425_v57  ;;  %vm8463_vm14 = vmor %vm3265_vm10, %vm3266_vm11 }
 0x63f   : > { %v8446_v36 = vpop.eup %5397  ;;  %v3258_v53 = vsel %vm8406_vm4, %v3257_v38, %v3253_v35  ;;  %v3705_v43 = vadd.f32 %v5384_v55, %v3704_v42  ;;  %v3262_v14 = vsub.f32 1.0, %v3261_v6  ;;  %v3725_v22 = vand.u32 2147483647, %v8401_v3 }
 0x640   : > { %v5400_v49 = vpop.eup %5399  ;;  %v4379_v28 = vmul.f32 %v5390_v25, %v3258_v53  ;;  %v3284_v45 = vand.u32 2147483647, %v8422_v11  ;;  %v3286_v59 = vand.u32 2147483648, %v8422_v11  ;;  %5409 = vpow2.f32 %v8389_v16 }
 0x641   : > { %v3709_v29 = vsel %vm8440_vm9, %v5384_v55, %v3705_v43  ;;  %v3263_v1 = vmul.f32 %v5392_v63, %v3262_v14  ;;  %v3717_v38 = vmul.f32 %v5400_v49, %v8401_v3  ;;  %v5402_v34 = vpop.eup %5401  ;;  %vm3722_vm13 = vweird.f32 %v5400_v49 }
 0x642   : > { %v3714_v33 = vsel %vm8430_vm8, %v3713_v8, %v3709_v29  ;;  %v3727_v55 = vand.u32 2147483648, %v8401_v3  ;;  %v8469_v25 = vpop.eup %5403  ;;  %v8471_v35 = vadd.f32 1.0, %v5402_v34  ;;  %v8476_v8 = vmul.f32 -1.442695, %v2848_v17  ;;  %vm8490_vm15 = vmor %vm3721_vm12, %vm3722_vm13 }
 0x643   : > { %v4355_v47 = vmul.f32 %v4331_v19, %v3714_v33  ;;  %v3264_v42 = vadd.f32 %v5392_v63, %v3263_v1  ;;  %v3718_v6 = vsub.f32 1.0, %v3717_v38  ;;  %v5406_v9 = vpop.eup %5405  ;;  %vm8494_vm1 = vcmp.eq.f32.partialorder %v3725_v22, 8.507059e+37 }
 0x644   : > { %v3276_v19 = vmul.f32 %v5406_v9, %v8422_v11  ;;  %v8483_v29 = vpop.eup %5407  ;;  %5411 = vrcp.f32 %v8471_v35  ;;  %vm3280_vm2 = vweird.f32 %v8422_v11  ;;  %vm3281_vm3 = vweird.f32 %v5406_v9 }
 0x645   : > { %v8478_v53 = vadd.f32 %v4379_v28, %v4355_v47  ;;  %v3268_v43 = vsel %vm8463_vm14, %v5392_v63, %v3264_v42  ;;  %v3719_v14 = vmul.f32 %v5400_v49, %v3718_v6  ;;  %v3728_v63 = vor.u32 1.1754944e-38, %v3727_v55  ;;  %v2872_v47 = vld [vmem:[#allocation4 + $0x1c0] sm:$0xff]  ;;  %v2849_v42 = vld [vmem:[#allocation4 + $0x2b0] sm:$0xff]  ;;  %vm8515_vm6 = vmor %vm3280_vm2, %vm3281_vm3 }
 0x646   : > { %v3273_v1 = vsel %vm8450_vm0, %v3272_v27, %v3268_v43  ;;  %v3277_v17 = vsub.f32 1.0, %v3276_v19  ;;  %vm8501_vm4 = vcmp.eq.f32.partialorder %v3284_v45, 8.507059e+37  ;;  %v3287_v27 = vor.u32 1.1754944e-38, %v3286_v59  ;;  %v5410_v6 = vpop.eup %5409  ;;  %v2873_v28 = vld [vmem:[#allocation4 + $0x78] sm:$0xff] }
 0x647   : > { %10034 = vst [vmem:[#allocation72_spill] sm:$0xff] %v8478_v53  ;;  %v3720_v38 = vadd.f32 %v5400_v49, %v3719_v14  ;;  %v3732_v34 = vmul.f32 %v8483_v29, %v8425_v57  ;;  %vm3736_vm5 = vweird.f32 %v8425_v57  ;;  %v4380_v2 = vmul.f32 %v5396_v48, %v3273_v1 }
 0x648   : > { %4475 = vst [vmem:[#allocation3 + $0xa0] sm:$0xff] %v8478_v53  ;;  %v3278_v22 = vmul.f32 %v5406_v9, %v3277_v17  ;;  %v3742_v55 = vand.u32 2147483648, %v8425_v57  ;;  %vm3737_vm7 = vweird.f32 %v8483_v29  ;;  %v3740_v48 = vand.u32 2147483647, %v8425_v57  ;;  %v4333_v57 = vld [vmem:[#allocation3 + $0x68] sm:$0xff] }
 0x649   : > { %v3724_v33 = vsel %vm8490_vm15, %v5400_v49, %v3720_v38  ;;  %v3733_v43 = vsub.f32 1.0, %v3732_v34  ;;  %v8521_v19 = vadd.f32 1.0, %v5410_v6  ;;  %5413 = vpow2.f32 %v8395_v54  ;;  %vm8536_vm8 = vmor %vm3736_vm5, %vm3737_vm7 }
 0x64a   : > { %v3729_v45 = vsel %vm8494_vm1, %v3728_v63, %v3724_v33  ;;  %v3279_v14 = vadd.f32 %v5406_v9, %v3278_v22  ;;  %v8524_v1 = vpop.eup %5411  ;;  %5415 = vpow2.f32 %v8403_v50  ;;  %v5052_v11 = vmul.f32 -1.442695, %v2872_v47  ;;  %v2918_v47 = vld [vmem:[#allocation4 + $0xf8] sm:$0xff] }
 0x64b   : > { %v4356_v49 = vmul.f32 %v4332_v26, %v3729_v45  ;;  %v3734_v16 = vmul.f32 %v8483_v29, %v3733_v43  ;;  %v8528_v63 = vmul.f32 -1.442695, %v2849_v42  ;;  %v3743_v54 = vor.u32 1.1754944e-38, %v3742_v55  ;;  %v2850_v55 = vld [vmem:[#allocation4 + $0x118] sm:$0xff]  ;;  %v2874_v45 = vld [vmem:[#allocation4 + $0x288] sm:$0xff] }
 0x64c   : > { %v3283_v17 = vsel %vm8515_vm6, %v5406_v9, %v3279_v14  ;;  %v3291_v34 = vmul.f32 %v8524_v1, %v8471_v35  ;;  %vm8545_vm9 = vcmp.eq.f32.partialorder %v3740_v48, 8.507059e+37  ;;  %5417 = vrcp.f32 %v8521_v19 }
 0x64d   : > { %v8530_v38 = vadd.f32 %v4380_v2, %v4356_v49  ;;  %v3288_v50 = vsel %vm8501_vm4, %v3287_v27, %v3283_v17  ;;  %v3735_v33 = vadd.f32 %v8483_v29, %v3734_v16  ;;  %5419 = vtanh.f32 %v8478_v53 }
 0x64e   : > { %v3292_v9 = vsub.f32 1.0, %v3291_v34  ;;  %vm3295_vm10 = vweird.f32 %v8471_v35  ;;  %v5053_v22 = vmul.f32 -1.442695, %v2873_v28  ;;  %v4381_v27 = vmul.f32 %v8446_v36, %v3288_v50  ;;  %v2919_v28 = vld [vmem:[#allocation4 + $0x2d8] sm:$0xff]  ;;  %v2875_v34 = vld [vmem:[#allocation4 + $0x2e8] sm:$0xff] }
 0x64f   : > { %10043 = vst [vmem:[#allocation73_spill] sm:$0xff] %v8530_v38  ;;  %v3739_v3 = vsel %vm8536_vm8, %v8483_v29, %v3735_v33  ;;  %v3299_v42 = vand.u32 2147483647, %v8471_v35  ;;  %v3301_v6 = vand.u32 2147483648, %v8471_v35  ;;  %v5414_v59 = vpop.eup %5413  ;;  %vm3296_vm11 = vweird.f32 %v8524_v1 }
 0x650   : > { %4476 = vst [vmem:[#allocation3 + $0xa8] sm:$0xff] %v8530_v38  ;;  %v3744_v43 = vsel %vm8545_vm9, %v3743_v54, %v3739_v3  ;;  %v3293_v48 = vmul.f32 %v8524_v1, %v3292_v9  ;;  %5421 = vpow2.f32 %v8476_v8  ;;  %v5416_v49 = vpop.eup %5415  ;;  %v8564_v14 = vadd.f32 1.0, %v5414_v59  ;;  %v2851_v54 = vld [vmem:[#allocation4 + $0x1a0] sm:$0xff]  ;;  %vm8579_vm0 = vmor %vm3295_vm10, %vm3296_vm11 }
 0x651   : > { %v4357_v29 = vmul.f32 %v4333_v57, %v3744_v43  ;;  %5423 = vpow2.f32 %v5052_v11  ;;  %v8566_v36 = vmul.f32 -1.442695, %v2850_v55  ;;  %v8569_v17 = vadd.f32 1.0, %v5416_v49 }
 0x652   : > { %v3294_v16 = vadd.f32 %v8524_v1, %v3293_v48  ;;  %5425 = vtanh.f32 %v2918_v47  ;;  %v8571_v26 = vmul.f32 -1.442695, %v2874_v45  ;;  %v5418_v50 = vpop.eup %5417  ;;  %vm8583_vm12 = vcmp.eq.f32.partialorder %v3299_v42, 8.507059e+37  ;;  %v2920_v48 = vld [vmem:[#allocation4 + $0x218] sm:$0xff] }
 0x653   : > { %v8573_v33 = vadd.f32 %v4381_v27, %v4357_v29  ;;  %v3755_v2 = vand.u32 2147483647, %v8521_v19  ;;  %5427 = vrcp.f32 %v8564_v14  ;;  %v8589_v57 = vpop.eup %5419  ;;  %v3302_v9 = vor.u32 1.1754944e-38, %v3301_v6 }
 0x654   : > { %5429 = vtanh.f32 %v8530_v38  ;;  %v3747_v55 = vmul.f32 %v5418_v50, %v8521_v19  ;;  %v3757_v35 = vand.u32 2147483648, %v8521_v19  ;;  %vm3751_vm14 = vweird.f32 %v8521_v19  ;;  %v4334_v19 = vld [vmem:[#allocation3 + $0x30] sm:$0xff] }
 0x655   : > { %10048 = vst [vmem:[#allocation74_spill] sm:$0xff] %v8573_v33  ;;  %5431 = vtanh.f32 %v2919_v28  ;;  %v8596_v3 = vmul.f32 -1.442695, %v2851_v54  ;;  %v8598_v27 = vmul.f32 -1.442695, %v2875_v34  ;;  %v3298_v42 = vsel %vm8579_vm0, %v8524_v1, %v3294_v16 }
 0x656   : > { %4477 = vst [vmem:[#allocation3 + $0x68] sm:$0xff] %v8573_v33  ;;  %v5422_v47 = vpop.eup %5421  ;;  %v3748_v45 = vsub.f32 1.0, %v3747_v55  ;;  %vm3752_vm13 = vweird.f32 %v5418_v50  ;;  %5433 = vrcp.f32 %v8569_v17  ;;  %vm8604_vm15 = vcmp.eq.f32.partialorder %v3755_v2, 8.507059e+37 }
 0x657   : > { %v5424_v6 = vpop.eup %5423  ;;  %v3314_v43 = vand.u32 2147483647, %v8564_v14  ;;  %v8609_v49 = vadd.f32 1.0, %v5422_v47  ;;  %5435 = vpow2.f32 %v8528_v63  ;;  %v3758_v54 = vor.u32 1.1754944e-38, %v3757_v35  ;;  %vm8619_vm1 = vmor %vm3751_vm14, %vm3752_vm13 }
 0x658   : > { %v5426_v29 = vpop.eup %5425  ;;  %v3749_v28 = vmul.f32 %v5418_v50, %v3748_v45  ;;  %v8612_v1 = vadd.f32 1.0, %v5424_v6  ;;  %5437 = vpow2.f32 %v5053_v22  ;;  %v3303_v34 = vsel %vm8583_vm12, %v3302_v9, %v3298_v42 }
 0x659   : > { %v5428_v16 = vpop.eup %5427  ;;  %v3316_v2 = vand.u32 2147483648, %v8564_v14  ;;  %v3770_v63 = vand.u32 2147483647, %v8569_v17  ;;  %5439 = vrcp.f32 %v8609_v49  ;;  %v3772_v11 = vand.u32 2147483648, %v8569_v17 }
 0x65a   : > { %v8626_v55 = vpop.eup %5429  ;;  %v3750_v22 = vadd.f32 %v5418_v50, %v3749_v28  ;;  %v3306_v35 = vmul.f32 %v5428_v16, %v8564_v14  ;;  %5441 = vtanh.f32 %v2920_v48  ;;  %vm3310_vm2 = vweird.f32 %v8564_v14 }
 0x65b   : > { %v5432_v9 = vpop.eup %5431  ;;  %vm8631_vm3 = vcmp.eq.f32.partialorder %v3314_v43, 8.507059e+37  ;;  %vm3766_vm4 = vweird.f32 %v8569_v17  ;;  %5443 = vrcp.f32 %v8612_v1  ;;  %v4382_v6 = vmul.f32 %v5426_v29, %v3303_v34 }
 0x65c   : > { %v5434_v42 = vpop.eup %5433  ;;  %v3754_v45 = vsel %vm8619_vm1, %v5418_v50, %v3750_v22  ;;  %v3307_v28 = vsub.f32 1.0, %v3306_v35  ;;  %vm3311_vm5 = vweird.f32 %v5428_v16  ;;  %v3317_v53 = vor.u32 1.1754944e-38, %v3316_v2 }
 0x65d   : > { %v5436_v48 = vpop.eup %5435  ;;  %v3759_v38 = vsel %vm8604_vm15, %v3758_v54, %v3754_v45  ;;  %v3762_v43 = vmul.f32 %v5434_v42, %v8569_v17  ;;  %vm8642_vm6 = vcmp.eq.f32.partialorder %v3770_v63, 8.507059e+37  ;;  %v3773_v13 = vor.u32 1.1754944e-38, %v3772_v11  ;;  %vm8649_vm8 = vmor %vm3310_vm2, %vm3311_vm5 }
 0x65e   : > { %v5438_v44 = vpop.eup %5437  ;;  %v4358_v7 = vmul.f32 %v4334_v19, %v3759_v38  ;;  %v3308_v18 = vmul.f32 %v5428_v16, %v3307_v28  ;;  %vm3325_vm7 = vweird.f32 %v8609_v49  ;;  %vm3767_vm9 = vweird.f32 %v5434_v42 }
 0x65f   : > { %v5440_v50 = vpop.eup %5439  ;;  %v3763_v59 = vsub.f32 1.0, %v3762_v43  ;;  %v3329_v54 = vand.u32 2147483647, %v8609_v49  ;;  %v8654_v34 = vadd.f32 1.0, %v5436_v48  ;;  %v3331_v22 = vand.u32 2147483648, %v8609_v49  ;;  %vm8670_vm10 = vmor %vm3766_vm4, %vm3767_vm9 }
 0x660   : > { %v5442_v8 = vpop.eup %5441  ;;  %v8656_v2 = vadd.f32 %v4382_v6, %v4358_v7  ;;  %v3309_v38 = vadd.f32 %v5428_v16, %v3308_v18  ;;  %v3321_v63 = vmul.f32 %v5440_v50, %v8609_v49  ;;  %v3785_v11 = vand.u32 2147483647, %v8612_v1 }
 0x661   : > { %v5444_v35 = vpop.eup %5443  ;;  %v3764_v14 = vmul.f32 %v5434_v42, %v3763_v59  ;;  %5445 = vrcp.f32 %v8654_v34  ;;  %v8662_v19 = vadd.f32 1.0, %v5438_v44  ;;  %vm3326_vm11 = vweird.f32 %v5440_v50 }
 0x662   : > { %10063 = vst [vmem:[#allocation75_spill] sm:$0xff] %v8656_v2  ;;  %v3313_v45 = vsel %vm8649_vm8, %v5428_v16, %v3309_v38  ;;  %v3322_v7 = vsub.f32 1.0, %v3321_v63  ;;  %v3777_v6 = vmul.f32 %v5444_v35, %v8612_v1  ;;  %vm3781_vm0 = vweird.f32 %v8612_v1  ;;  %v4335_v16 = vld [vmem:[#allocation3 + $0x58] sm:$0xff]  ;;  %vm8687_vm13 = vmor %vm3325_vm7, %vm3326_vm11 }
 0x663   : > { %4478 = vst [vmem:[#allocation3 + $0x30] sm:$0xff] %v8656_v2  ;;  %v3318_v44 = vsel %vm8631_vm3, %v3317_v53, %v3313_v45  ;;  %v3765_v28 = vadd.f32 %v5434_v42, %v3764_v14  ;;  %v3787_v48 = vand.u32 2147483648, %v8612_v1  ;;  %vm8679_vm12 = vcmp.eq.f32.partialorder %v3329_v54, 8.507059e+37 }
 0x664   : > { %v3323_v43 = vmul.f32 %v5440_v50, %v3322_v7  ;;  %v3778_v29 = vsub.f32 1.0, %v3777_v6  ;;  %vm3782_vm14 = vweird.f32 %v5444_v35  ;;  %v4383_v38 = vmul.f32 %v5432_v9, %v3318_v44  ;;  %v4336_v44 = vld [vmem:[#allocation3 + $0x80] sm:$0xff] }
 0x665   : > { %v3769_v59 = vsel %vm8670_vm10, %v5434_v42, %v3765_v28  ;;  %v3332_v47 = vor.u32 1.1754944e-38, %v3331_v22  ;;  %5447 = vrcp.f32 %v8662_v19  ;;  %vm8694_vm15 = vcmp.eq.f32.partialorder %v3785_v11, 8.507059e+37  ;;  %vm8700_vm1 = vmor %vm3781_vm0, %vm3782_vm14  ;;  %v2921_v11 = vld [vmem:[#allocation4 + $0x108] sm:$0xff] }
 0x666   : > { %v3774_v54 = vsel %vm8642_vm6, %v3773_v13, %v3769_v59  ;;  %v3324_v63 = vadd.f32 %v5440_v50, %v3323_v43  ;;  %v3779_v14 = vmul.f32 %v5444_v35, %v3778_v29  ;;  %v3788_v22 = vor.u32 1.1754944e-38, %v3787_v48  ;;  %v2876_v59 = vld [vmem:[#allocation4 + $0x38] sm:$0xff] }
 0x667   : > { %v5446_v42 = vpop.eup %5445  ;;  %v4359_v9 = vmul.f32 %v4335_v16, %v3774_v54  ;;  %v3344_v18 = vand.u32 2147483647, %v8654_v34  ;;  %5449 = vpow2.f32 %v8566_v36  ;;  %vm3340_vm2 = vweird.f32 %v8654_v34 }
 0x668   : > { %v3328_v13 = vsel %vm8687_vm13, %v5440_v50, %v3324_v63  ;;  %v3780_v31 = vadd.f32 %v5444_v35, %v3779_v14  ;;  %v3336_v7 = vmul.f32 %v5446_v42, %v8654_v34  ;;  %v3346_v28 = vand.u32 2147483648, %v8654_v34  ;;  %v2922_v63 = vld [vmem:[#allocation4 + $0x208] sm:$0xff] }
 0x669   : > { %v8710_v6 = vadd.f32 %v4383_v38, %v4359_v9  ;;  %v3333_v1 = vsel %vm8679_vm12, %v3332_v47, %v3328_v13  ;;  %5451 = vpow2.f32 %v8571_v26  ;;  %vm3341_vm3 = vweird.f32 %v5446_v42  ;;  %v2878_v13 = vld [vmem:[#allocation4 + $0xa8] sm:$0xff] }
 0x66a   : > { %v3784_v36 = vsel %vm8700_vm1, %v5444_v35, %v3780_v31  ;;  %v4384_v50 = vmul.f32 %v5442_v8, %v3333_v1  ;;  %v3337_v48 = vsub.f32 1.0, %v3336_v7  ;;  %vm8721_vm4 = vcmp.eq.f32.partialorder %v3344_v18, 8.507059e+37  ;;  %vm8730_vm6 = vmor %vm3340_vm2, %vm3341_vm3  ;;  %v2879_v31 = vld [vmem:[#allocation4 + $0x128] sm:$0xff]  ;;  %v2880_v1 = vld [vmem:[#allocation4 + $0x1f8] sm:$0xff] }
 0x66b   : > { %10074 = vst [vmem:[#allocation76_spill] sm:$0xff] %v8710_v6  ;;  %v5448_v16 = vpop.eup %5447  ;;  %v3789_v43 = vsel %vm8694_vm15, %v3788_v22, %v3784_v36  ;;  %vm3796_vm5 = vweird.f32 %v8662_v19  ;;  %5453 = vtanh.f32 %v2921_v11  ;;  %v3800_v8 = vand.u32 2147483647, %v8662_v19  ;;  %v2877_v22 = vld [vmem:[#allocation4 + $0x190] sm:$0xff] }
 0x66c   : > { %4479 = vst [vmem:[#allocation3 + $0x58] sm:$0xff] %v8710_v6  ;;  %v4360_v26 = vmul.f32 %v4336_v44, %v3789_v43  ;;  %v3338_v29 = vmul.f32 %v5446_v42, %v3337_v48  ;;  %v3792_v35 = vmul.f32 %v5448_v16, %v8662_v19  ;;  %v3347_v47 = vor.u32 1.1754944e-38, %v3346_v28 }
 0x66d   : > { %v5450_v38 = vpop.eup %5449  ;;  %vm3797_vm7 = vweird.f32 %v5448_v16  ;;  %v3802_v54 = vand.u32 2147483648, %v8662_v19  ;;  %5455 = vpow2.f32 %v8596_v3  ;;  %v5056_v34 = vmul.f32 -1.442695, %v2876_v59  ;;  %v2881_v59 = vld [vmem:[#allocation4 + $0x68] sm:$0xff] }
 0x66e   : > { %v8736_v14 = vadd.f32 %v4384_v50, %v4360_v26  ;;  %v3339_v45 = vadd.f32 %v5446_v42, %v3338_v29  ;;  %v3793_v9 = vsub.f32 1.0, %v3792_v35  ;;  %v8738_v49 = vadd.f32 1.0, %v5450_v38  ;;  %vm8753_vm9 = vmor %vm3796_vm5, %vm3797_vm7  ;;  %v2923_v26 = vld [vmem:[#allocation4 + $0x250] sm:$0xff] }
 0x66f   : > { %v5452_v18 = vpop.eup %5451  ;;  %5457 = vpow2.f32 %v8598_v27  ;;  %vm8744_vm8 = vcmp.eq.f32.partialorder %v3800_v8, 8.507059e+37  ;;  %v3803_v36 = vor.u32 1.1754944e-38, %v3802_v54  ;;  %v5057_v50 = vmul.f32 -1.442695, %v2877_v22 }
 0x670   : > { %10079 = vst [vmem:[#allocation77_spill] sm:$0xff] %v8736_v14  ;;  %v3343_v11 = vsel %vm8730_vm6, %v5446_v42, %v3339_v45  ;;  %v3794_v7 = vmul.f32 %v5448_v16, %v3793_v9  ;;  %5459 = vtanh.f32 %v2922_v63  ;;  %v4337_v42 = vld [vmem:[#allocation3 + $0xb8] sm:$0xff]  ;;  %v8758_v43 = vadd.f32 1.0, %v5452_v18  ;;  %v2882_v63 = vld [vmem:[#allocation4 + $0x220] sm:$0xff] }
 0x671   : > { %4480 = vst [vmem:[#allocation3 + $0x80] sm:$0xff] %v8736_v14  ;;  %v5454_v44 = vpop.eup %5453  ;;  %v3348_v28 = vsel %vm8721_vm4, %v3347_v47, %v3343_v11  ;;  %5461 = vrcp.f32 %v8738_v49  ;;  %v5058_v29 = vmul.f32 -1.442695, %v2878_v13  ;;  %v8760_v35 = vmul.f32 -1.442695, %v2879_v31 }
 0x672   : > { %v3795_v48 = vadd.f32 %v5448_v16, %v3794_v7  ;;  %v3359_v8 = vand.u32 2147483647, %v8738_v49  ;;  %v3361_v19 = vand.u32 2147483648, %v8738_v49  ;;  %5463 = vpow2.f32 %v5056_v34 }
 0x673   : > { %v5456_v17 = vpop.eup %5455  ;;  %v8764_v38 = vmul.f32 -1.442695, %v2880_v1  ;;  %v4385_v47 = vmul.f32 %v5454_v44, %v3348_v28  ;;  %5465 = vrcp.f32 %v8758_v43  ;;  %v3815_v54 = vand.u32 2147483647, %v8758_v43 }
 0x674   : > { %v3799_v53 = vsel %vm8753_vm9, %v5448_v16, %v3795_v48  ;;  %v3817_v22 = vand.u32 2147483648, %v8758_v43  ;;  %v8773_v18 = vadd.f32 1.0, %v5456_v17  ;;  %5467 = vpow2.f32 %v5057_v50 }
 0x675   : > { %v5458_v45 = vpop.eup %5457  ;;  %v3804_v9 = vsel %vm8744_vm8, %v3803_v36, %v3799_v53  ;;  %5469 = vtanh.f32 %v2923_v26  ;;  %v8779_v16 = vmul.f32 -1.442695, %v2881_v59  ;;  %vm3355_vm10 = vweird.f32 %v8738_v49 }
 0x676   : > { %v8775_v34 = vpop.eup %5459  ;;  %v4361_v13 = vmul.f32 %v4337_v42, %v3804_v9  ;;  %v8777_v31 = vadd.f32 1.0, %v5458_v45  ;;  %vm8782_vm11 = vcmp.eq.f32.partialorder %v3359_v8, 8.507059e+37  ;;  %5471 = vrcp.f32 %v8773_v18 }
 0x677   : > { %v5462_v11 = vpop.eup %5461  ;;  %v8787_v3 = vmul.f32 -1.442695, %v2882_v63  ;;  %v3362_v28 = vor.u32 1.1754944e-38, %v3361_v19  ;;  %v3374_v27 = vand.u32 2147483647, %v8773_v18  ;;  %vm3811_vm0 = vweird.f32 %v8758_v43 }
 0x678   : > { %v8789_v1 = vadd.f32 %v4385_v47, %v4361_v13  ;;  %v3351_v44 = vmul.f32 %v5462_v11, %v8738_v49  ;;  %v5464_v36 = vpop.eup %5463  ;;  %vm8794_vm12 = vcmp.eq.f32.partialorder %v3815_v54, 8.507059e+37  ;;  %v3818_v50 = vor.u32 1.1754944e-38, %v3817_v22 }
 0x679   : > { %5473 = vrcp.f32 %v8777_v31  ;;  %v5466_v48 = vpop.eup %5465  ;;  %vm3356_vm14 = vweird.f32 %v5462_v11  ;;  %v3376_v17 = vand.u32 2147483648, %v8773_v18  ;;  %v3830_v8 = vand.u32 2147483647, %v8777_v31 }
 0x67a   : > { %10086 = vst [vmem:[#allocation78_spill] sm:$0xff] %v8789_v1  ;;  %v3352_v26 = vsub.f32 1.0, %v3351_v44  ;;  %v5468_v19 = vpop.eup %5467  ;;  %v3807_v59 = vmul.f32 %v5466_v48, %v8758_v43  ;;  %vm3370_vm13 = vweird.f32 %v8773_v18  ;;  %v3832_v53 = vand.u32 2147483648, %v8777_v31  ;;  %vm8817_vm1 = vmor %vm3355_vm10, %vm3356_vm14 }
 0x67b   : > { %4481 = vst [vmem:[#allocation3 + $0xb8] sm:$0xff] %v8789_v1  ;;  %v8805_v47 = vadd.f32 1.0, %v5464_v36  ;;  %v8807_v54 = vpop.eup %5469  ;;  %vm8809_vm15 = vcmp.eq.f32.partialorder %v3374_v27, 8.507059e+37  ;;  %v8813_v9 = vadd.f32 1.0, %v5468_v19  ;;  %5475 = vpow2.f32 %v5058_v29 }
 0x67c   : > { %v3353_v63 = vmul.f32 %v5462_v11, %v3352_v26  ;;  %v5472_v22 = vpop.eup %5471  ;;  %v3808_v44 = vsub.f32 1.0, %v3807_v59  ;;  %vm3812_vm2 = vweird.f32 %v5466_v48  ;;  %vm3826_vm3 = vweird.f32 %v8777_v31 }
 0x67d   : > { %5477 = vrcp.f32 %v8805_v47  ;;  %v3366_v36 = vmul.f32 %v5472_v22, %v8773_v18  ;;  %v3377_v26 = vor.u32 1.1754944e-38, %v3376_v17  ;;  %vm8824_vm4 = vcmp.eq.f32.partialorder %v3830_v8, 8.507059e+37  ;;  %vm8834_vm6 = vmor %vm3811_vm0, %vm3812_vm2 }
 0x67e   : > { %v3354_v27 = vadd.f32 %v5462_v11, %v3353_v63  ;;  %v3809_v49 = vmul.f32 %v5466_v48, %v3808_v44  ;;  %v3833_v1 = vor.u32 1.1754944e-38, %v3832_v53  ;;  %vm3937_vm5 = vweird.f32 %v8805_v47 }
 0x67f   : > { %v5474_v29 = vpop.eup %5473  ;;  %5479 = vrcp.f32 %v8813_v9  ;;  %v3367_v17 = vsub.f32 1.0, %v3366_v36  ;;  %vm3371_vm7 = vweird.f32 %v5472_v22  ;;  %v3941_v14 = vand.u32 2147483647, %v8805_v47 }
 0x680   : > { %v3358_v59 = vsel %vm8817_vm1, %v5462_v11, %v3354_v27  ;;  %v3822_v8 = vmul.f32 %v5474_v29, %v8777_v31  ;;  %v3810_v44 = vadd.f32 %v5466_v48, %v3809_v49  ;;  %v3943_v6 = vand.u32 2147483648, %v8805_v47  ;;  %v4338_v11 = vld [vmem:[#allocation3 + $0x20] sm:$0xff]  ;;  %vm8850_vm10 = vmor %vm3370_vm13, %vm3371_vm7 }
 0x681   : > { %v3363_v53 = vsel %vm8782_vm11, %v3362_v28, %v3358_v59  ;;  %v5476_v13 = vpop.eup %5475  ;;  %v3368_v27 = vmul.f32 %v5472_v22, %v3367_v17  ;;  %vm3827_vm8 = vweird.f32 %v5474_v29  ;;  %vm3952_vm9 = vweird.f32 %v8813_v9  ;;  %v8874_v31 = vld [vmem:[%s9654_s0] sm:$0x3f] }
 0x682   : > { %v3823_v43 = vsub.f32 1.0, %v3822_v8  ;;  %v3814_v36 = vsel %vm8834_vm6, %v5466_v48, %v3810_v44  ;;  %v4386_v0 = vmul.f32 %v8775_v34, %v3363_v53  ;;  %5481 = vpow2.f32 %v8760_v35  ;;  %vm8862_vm11 = vmor %vm3826_vm3, %vm3827_vm8 }
 0x683   : > { %v5478_v2 = vpop.eup %5477  ;;  %v8855_v28 = vadd.f32 1.0, %v5476_v13  ;;  %v3819_v49 = vsel %vm8794_vm12, %v3818_v50, %v3814_v36  ;;  %v3369_v59 = vadd.f32 %v5472_v22, %v3368_v27  ;;  %v3956_v35 = vand.u32 2147483647, %v8813_v9 }
 0x684   : > { %v3824_v17 = vmul.f32 %v5474_v29, %v3823_v43  ;;  %v3933_v48 = vmul.f32 %v5478_v2, %v8805_v47  ;;  %v4362_v34 = vmul.f32 %v4338_v11, %v3819_v49  ;;  %vm3938_vm0 = vweird.f32 %v5478_v2  ;;  %v4339_v11 = vld [vmem:[#allocation3 + $0x8] sm:$0xff] }
 0x685   : > { %v5480_v63 = vpop.eup %5479  ;;  %5483 = vrcp.f32 %v8855_v28  ;;  %v3373_v42 = vsel %vm8850_vm10, %v5472_v22, %v3369_v59  ;;  %v3958_v27 = vand.u32 2147483648, %v8813_v9  ;;  %vm8890_vm14 = vmor %vm3937_vm5, %vm3938_vm0  ;;  %vm8894_vm13 = vcmp.eq.f32.partialorder %v3941_v14, 8.507059e+37 }
 0x686   : > { %v3825_v50 = vadd.f32 %v5474_v29, %v3824_v17  ;;  %v3934_v8 = vsub.f32 1.0, %v3933_v48  ;;  %v3948_v53 = vmul.f32 %v5480_v63, %v8813_v9  ;;  %v8876_v44 = vadd.f32 %v4386_v0, %v4362_v34 }
 0x687   : > { %v3378_v13 = vsel %vm8809_vm15, %v3377_v26, %v3373_v42  ;;  %vm3953_vm12 = vweird.f32 %v5480_v63  ;;  %vm8910_vm1 = vcmp.eq.f32.partialorder %v3956_v35, 8.507059e+37  ;;  %v8915_v34 = vperm.slane %v8874_v31, 1 }
 0x688   : > { %v3829_v22 = vsel %vm8862_vm11, %v5474_v29, %v3825_v50  ;;  %v4387_v43 = vmul.f32 %v8807_v54, %v3378_v13  ;;  %v3935_v36 = vmul.f32 %v5478_v2, %v3934_v8  ;;  %v3949_v7 = vsub.f32 1.0, %v3948_v53  ;;  %v5482_v49 = vpop.eup %5481  ;;  %4482 = vst [vmem:[#allocation3 + $0x20] sm:$0xff] %v8876_v44  ;;  %vm8906_vm15 = vmor %vm3952_vm9, %vm3953_vm12 }
 0x689   : > { %v3834_v0 = vsel %vm8824_vm4, %v3833_v1, %v3829_v22  ;;  %v3944_v54 = vor.u32 1.1754944e-38, %v3943_v6  ;;  %v8899_v29 = vperm.slane %v8874_v31, 0  ;;  %v8901_v19 = vadd.f32 1.0, %v5482_v49  ;;  %v2883_v22 = vld [vmem:[#allocation4 + $0x2e0] sm:$0xff] }
 0x68a   : > { %v4363_v59 = vmul.f32 %v4339_v11, %v3834_v0  ;;  %v3936_v17 = vadd.f32 %v5478_v2, %v3935_v36  ;;  %v3950_v48 = vmul.f32 %v5480_v63, %v3949_v7  ;;  %v3959_v6 = vor.u32 1.1754944e-38, %v3958_v27 }
 0x68b   : > { %v5484_v1 = vpop.eup %5483  ;;  %vm3967_vm2 = vweird.f32 %v8855_v28  ;;  %v3971_v8 = vand.u32 2147483647, %v8855_v28  ;;  %v3973_v53 = vand.u32 2147483648, %v8855_v28  ;;  %5485 = vrcp.f32 %v8901_v19 }
 0x68c   : > { %v8918_v18 = vadd.f32 %v4387_v43, %v4363_v59  ;;  %v3940_v42 = vsel %vm8890_vm14, %v5478_v2, %v3936_v17  ;;  %v3951_v9 = vadd.f32 %v5480_v63, %v3950_v48  ;;  %v3963_v50 = vmul.f32 %v5484_v1, %v8855_v28 }
 0x68d   : > { %v3945_v35 = vsel %vm8894_vm13, %v3944_v54, %v3940_v42  ;;  %vm3968_vm3 = vweird.f32 %v5484_v1  ;;  %5487 = vpow2.f32 %v8764_v38  ;;  %vm8950_vm5 = vcmp.eq.f32.partialorder %v3971_v8, 8.507059e+37  ;;  %v2888_v38 = vld [vmem:[#allocation4 + $0x258] sm:$0xff] }
 0x68e   : > { %4483 = vst [vmem:[#allocation3 + $0x8] sm:$0xff] %v8918_v18  ;;  %v3955_v13 = vsel %vm8906_vm15, %v5480_v63, %v3951_v9  ;;  %v8932_v11 = vmul.f32 %v7776_v61, %v3945_v35  ;;  %v3964_v2 = vsub.f32 1.0, %v3963_v50  ;;  %5489 = vpow2.f32 %v8779_v16  ;;  %v2884_v63 = vld [vmem:[#allocation4 + $0x238] sm:$0xff]  ;;  %v2885_v61 = vld [vmem:[#allocation4 + $0x290] sm:$0xff]  ;;  %vm8946_vm4 = vmor %vm3967_vm2, %vm3968_vm3 }
 0x68f   : > { %v3960_v27 = vsel %vm8910_vm1, %v3959_v6, %v3955_v13  ;;  %5491 = vtanh.f32 %v8573_v33  ;;  %v3986_v0 = vand.u32 2147483647, %v8901_v19  ;;  %v5063_v26 = vmul.f32 -1.442695, %v2883_v22  ;;  %v2886_v35 = vld [vmem:[#allocation4 + $0x170] sm:$0xff] }
 0x690   : > { %v8938_v43 = vmul.f32 %v7784_v10, %v3960_v27  ;;  %v4498_v36 = vmul.f32 %v8899_v29, %v8932_v11  ;;  %v3965_v7 = vmul.f32 %v5484_v1, %v3964_v2  ;;  %v3974_v10 = vor.u32 1.1754944e-38, %v3973_v53 }
 0x691   : > { %5493 = vpow2.f32 %v8787_v3  ;;  %v5486_v54 = vpop.eup %5485  ;;  %v3988_v28 = vand.u32 2147483648, %v8901_v19  ;;  %v8960_v59 = vperm.slane %v8874_v31, 2  ;;  %v5064_v17 = vmul.f32 -1.442695, %v2884_v63 }
 0x692   : > { %v4499_v16 = vmul.f32 %v8915_v34, %v8938_v43  ;;  %v3966_v45 = vadd.f32 %v5484_v1, %v3965_v7  ;;  %v5065_v48 = vmul.f32 -1.442695, %v2885_v61  ;;  %v3978_v6 = vmul.f32 %v5486_v54, %v8901_v19 }
 0x693   : > { %v8966_v42 = vperm.slane %v8874_v31, 3  ;;  %v5488_v9 = vpop.eup %5487  ;;  %vm3982_vm6 = vweird.f32 %v8901_v19  ;;  %vm8971_vm7 = vcmp.eq.f32.partialorder %v3986_v0, 8.507059e+37  ;;  %5495 = vpow2.f32 %v5063_v26 }
 0x694   : > { %v4522_v47 = vpack.c.bf16 %v4499_v16, %v4498_v36  ;;  %v3970_v14 = vsel %vm8946_vm4, %v5484_v1, %v3966_v45  ;;  %v5490_v8 = vpop.eup %5489  ;;  %v3979_v1 = vsub.f32 1.0, %v3978_v6  ;;  %vm3983_vm8 = vweird.f32 %v5486_v54  ;;  %v2887_v36 = vld [vmem:[#allocation4 + $0x1d8] sm:$0xff] }
 0x695   : > { %v3975_v3 = vsel %vm8950_vm5, %v3974_v10, %v3970_v14  ;;  %v8975_v53 = vadd.f32 1.0, %v5488_v9  ;;  %5497 = vpow2.f32 %v5064_v17  ;;  %v8977_v13 = vpop.eup %5491  ;;  %v3989_v2 = vor.u32 1.1754944e-38, %v3988_v28  ;;  %vm8991_vm9 = vmor %vm3982_vm6, %vm3983_vm8 }
 0x696   : > { %4534 = vst [vmem:[#allocation2 + $0x4] sm:$0xff] %v4522_v47  ;;  %v8980_v27 = vmul.f32 %v7806_v39, %v3975_v3  ;;  %v8982_v22 = vadd.f32 1.0, %v5490_v8  ;;  %5499 = vpow2.f32 %v5065_v48  ;;  %v3980_v63 = vmul.f32 %v5486_v54, %v3979_v1 }
 0x697   : > { %v5494_v7 = vpop.eup %5493  ;;  %5501 = vrcp.f32 %v8975_v53  ;;  %v8986_v61 = vperm.slane %v8874_v31, 4  ;;  %v5066_v49 = vmul.f32 -1.442695, %v2886_v35  ;;  %v4001_v39 = vand.u32 2147483647, %v8975_v53 }
 0x698   : > { %v4003_v0 = vand.u32 2147483648, %v8975_v53  ;;  %5503 = vrcp.f32 %v8982_v22  ;;  %v8999_v16 = vperm.slane %v8874_v31, 5  ;;  %v3981_v45 = vadd.f32 %v5486_v54, %v3980_v63 }
 0x699   : > { %v4016_v26 = vand.u32 2147483647, %v8982_v22  ;;  %v9002_v28 = vadd.f32 1.0, %v5494_v7  ;;  %v5067_v17 = vmul.f32 -1.442695, %v2887_v36  ;;  %v5496_v19 = vpop.eup %5495  ;;  %v4500_v48 = vmul.f32 %v8960_v59, %v8980_v27 }
 0x69a   : > { %vm3997_vm10 = vweird.f32 %v8975_v53  ;;  %v4018_v47 = vand.u32 2147483648, %v8982_v22  ;;  %v9008_v14 = vmul.f32 -1.442695, %v2888_v38  ;;  %v3985_v31 = vsel %vm8991_vm9, %v5486_v54, %v3981_v45 }
 0x69b   : > { %v5498_v6 = vpop.eup %5497  ;;  %vm4012_vm11 = vweird.f32 %v8982_v22  ;;  %v9013_v9 = vadd.f32 1.0, %v5496_v19  ;;  %5505 = vpow2.f32 %v5066_v49  ;;  %v3990_v35 = vsel %vm8971_vm7, %v3989_v2, %v3985_v31 }
 0x69c   : > { %v5500_v3 = vpop.eup %5499  ;;  %vm9017_vm0 = vcmp.eq.f32.partialorder %v4001_v39, 8.507059e+37  ;;  %v4004_v1 = vor.u32 1.1754944e-38, %v4003_v0  ;;  %5507 = vrcp.f32 %v9002_v28  ;;  %v9023_v7 = vmul.f32 %v7886_v32, %v3990_v35 }
 0x69d   : > { %v5502_v36 = vpop.eup %5501  ;;  %vm9025_vm12 = vcmp.eq.f32.partialorder %v4016_v26, 8.507059e+37  ;;  %v4031_v63 = vand.u32 2147483647, %v9002_v28  ;;  %5509 = vrcp.f32 %v9013_v9  ;;  %v4019_v49 = vor.u32 1.1754944e-38, %v4018_v47 }
 0x69e   : > { %v5504_v50 = vpop.eup %5503  ;;  %v3993_v2 = vmul.f32 %v5502_v36, %v8975_v53  ;;  %v4033_v38 = vand.u32 2147483648, %v9002_v28  ;;  %v4046_v10 = vand.u32 2147483647, %v9013_v9  ;;  %v4501_v32 = vmul.f32 %v8966_v42, %v9023_v7 }
 0x69f   : > { %v4008_v39 = vmul.f32 %v5504_v50, %v8982_v22  ;;  %vm4027_vm14 = vweird.f32 %v9002_v28  ;;  %vm4042_vm13 = vweird.f32 %v9013_v9  ;;  %vm3998_vm15 = vweird.f32 %v5502_v36 }
 0x6a0   : > { %v3994_v0 = vsub.f32 1.0, %v3993_v2  ;;  %v4048_v45 = vand.u32 2147483648, %v9013_v9  ;;  %v9040_v26 = vadd.f32 1.0, %v5498_v6  ;;  %v4523_v47 = vpack.c.bf16 %v4501_v32, %v4500_v48  ;;  %vm9056_vm4 = vmor %vm3997_vm10, %vm3998_vm15  ;;  %v2890_v2 = vld [vmem:[#allocation4 + $0x2c8] sm:$0xff] }
 0x6a1   : > { %v5506_v19 = vpop.eup %5505  ;;  %v4009_v31 = vsub.f32 1.0, %v4008_v39  ;;  %vm4013_vm1 = vweird.f32 %v5504_v50  ;;  %vm9042_vm2 = vcmp.eq.f32.partialorder %v4031_v63, 8.507059e+37  ;;  %v9046_v33 = vadd.f32 1.0, %v5500_v3 }
 0x6a2   : > { %v5508_v51 = vpop.eup %5507  ;;  %v3995_v41 = vmul.f32 %v5502_v36, %v3994_v0  ;;  %v4034_v23 = vor.u32 1.1754944e-38, %v4033_v38  ;;  %vm9048_vm3 = vcmp.eq.f32.partialorder %v4046_v10, 8.507059e+37  ;;  %5511 = vrcp.f32 %v9040_v26  ;;  %4535 = vst [vmem:[#allocation2 + $0xc] sm:$0xff] %v4523_v47  ;;  %vm9064_vm5 = vmor %vm4012_vm11, %vm4013_vm1 }
 0x6a3   : > { %v5510_v6 = vpop.eup %5509  ;;  %v4010_v3 = vmul.f32 %v5504_v50, %v4009_v31  ;;  %v4023_v63 = vmul.f32 %v5508_v51, %v9002_v28  ;;  %v4049_v32 = vor.u32 1.1754944e-38, %v4048_v45  ;;  %5513 = vpow2.f32 %v5067_v17 }
 0x6a4   : > { %v3996_v38 = vadd.f32 %v5502_v36, %v3995_v41  ;;  %v4038_v39 = vmul.f32 %v5510_v6, %v9013_v9  ;;  %vm4057_vm6 = vweird.f32 %v9040_v26  ;;  %v4063_v53 = vand.u32 2147483648, %v9040_v26 }
 0x6a5   : > { %v4011_v0 = vadd.f32 %v5504_v50, %v4010_v3  ;;  %v4024_v47 = vsub.f32 1.0, %v4023_v63  ;;  %vm4028_vm7 = vweird.f32 %v5508_v51  ;;  %5515 = vrcp.f32 %v9046_v33 }
 0x6a6   : > { %v4000_v41 = vsel %vm9056_vm4, %v5502_v36, %v3996_v38  ;;  %v4039_v17 = vsub.f32 1.0, %v4038_v39  ;;  %vm4043_vm8 = vweird.f32 %v5510_v6  ;;  %v4061_v22 = vand.u32 2147483647, %v9040_v26  ;;  %vm9086_vm9 = vmor %vm4027_vm14, %vm4028_vm7 }
 0x6a7   : > { %v4005_v45 = vsel %vm9017_vm0, %v4004_v1, %v4000_v41  ;;  %v4015_v31 = vsel %vm9064_vm5, %v5504_v50, %v4011_v0  ;;  %v4025_v37 = vmul.f32 %v5508_v51, %v4024_v47  ;;  %v4064_v24 = vor.u32 1.1754944e-38, %v4063_v53  ;;  %vm9097_vm11 = vmor %vm4042_vm13, %vm4043_vm8 }
 0x6a8   : > { %v5512_v3 = vpop.eup %5511  ;;  %v4020_v63 = vsel %vm9025_vm12, %v4019_v49, %v4015_v31  ;;  %v9082_v15 = vmul.f32 %v7963_v30, %v4005_v45  ;;  %v4040_v8 = vmul.f32 %v5510_v6, %v4039_v17  ;;  %vm4072_vm10 = vweird.f32 %v9046_v33  ;;  %v2889_v17 = vld [vmem:[#allocation4 + $0xa0] sm:$0xff] }
 0x6a9   : > { %v5514_v1 = vpop.eup %5513  ;;  %v9092_v50 = vmul.f32 %v7985_v62, %v4020_v63  ;;  %v4026_v48 = vadd.f32 %v5508_v51, %v4025_v37  ;;  %v4053_v28 = vmul.f32 %v5512_v3, %v9040_v26  ;;  %v4076_v54 = vand.u32 2147483647, %v9046_v33 }
 0x6aa   : > { %v4502_v49 = vmul.f32 %v8986_v61, %v9082_v15  ;;  %v4041_v38 = vadd.f32 %v5510_v6, %v4040_v8  ;;  %vm4058_vm0 = vweird.f32 %v5512_v3  ;;  %v4078_v62 = vand.u32 2147483648, %v9046_v33 }
 0x6ab   : > { %v5516_v10 = vpop.eup %5515  ;;  %v4503_v37 = vmul.f32 %v8999_v16, %v9092_v50  ;;  %v4030_v9 = vsel %vm9086_vm9, %v5508_v51, %v4026_v48  ;;  %v4054_v39 = vsub.f32 1.0, %v4053_v28  ;;  %v9110_v53 = vadd.f32 1.0, %v5506_v19  ;;  %vm9128_vm14 = vmor %vm4057_vm6, %vm4058_vm0 }
 0x6ac   : > { %v4035_v0 = vsel %vm9042_vm2, %v4034_v23, %v4030_v9  ;;  %v4045_v47 = vsel %vm9097_vm11, %v5510_v6, %v4041_v38  ;;  %v4068_v41 = vmul.f32 %v5516_v10, %v9046_v33  ;;  %vm4073_vm12 = vweird.f32 %v5516_v10 }
 0x6ad   : > { %v4524_v45 = vpack.c.bf16 %v4503_v37, %v4502_v49  ;;  %v4050_v31 = vsel %vm9048_vm3, %v4049_v32, %v4045_v47  ;;  %v9120_v63 = vmul.f32 %v8041_v5, %v4035_v0  ;;  %v4055_v51 = vmul.f32 %v5512_v3, %v4054_v39  ;;  %v2891_v32 = vld [vmem:[#allocation4 + $0x2a8] sm:$0xff]  ;;  %vm9146_vm15 = vmor %vm4072_vm10, %vm4073_vm12  ;;  %v2892_v39 = vld [vmem:[#allocation4 + $0x60] sm:$0xff] }
 0x6ae   : > { %v9123_v19 = vmul.f32 %v8172_v12, %v4050_v31  ;;  %v4069_v35 = vsub.f32 1.0, %v4068_v41  ;;  %v9132_v6 = vadd.f32 1.0, %v5514_v1  ;;  %5517 = vrcp.f32 %v9110_v53  ;;  %v2893_v0 = vld [vmem:[#allocation4 + $0x80] sm:$0xff] }
 0x6af   : > { %4536 = vst [vmem:[#allocation2 + $0x14] sm:$0xff] %v4524_v45  ;;  %v4504_v5 = vmul.f32 %v8899_v29, %v9120_v63  ;;  %v4056_v12 = vadd.f32 %v5512_v3, %v4055_v51  ;;  %vm4062_vm13 = vcmp.eq.f32.partialorder %v4061_v22, 8.507059e+37  ;;  %v5069_v36 = vmul.f32 -1.442695, %v2889_v17 }
 0x6b0   : > { %v4505_v26 = vmul.f32 %v8915_v34, %v9123_v19  ;;  %v4070_v8 = vmul.f32 %v5516_v10, %v4069_v35  ;;  %v4091_v48 = vand.u32 2147483647, %v9110_v53  ;;  %5519 = vrcp.f32 %v9132_v6  ;;  %v2895_v35 = vld [vmem:[#allocation4 + $0x10] sm:$0xff] }
 0x6b1   : > { %v4060_v1 = vsel %vm9128_vm14, %v5512_v3, %v4056_v12  ;;  %v4079_v22 = vor.u32 1.1754944e-38, %v4078_v62  ;;  %v5070_v28 = vmul.f32 -1.442695, %v2890_v2  ;;  %v5071_v49 = vmul.f32 -1.442695, %v2891_v32 }
 0x6b2   : > { %v4525_v38 = vpack.c.bf16 %v4505_v26, %v4504_v5  ;;  %v4065_v37 = vsel %vm4062_vm13, %v4064_v24, %v4060_v1  ;;  %v4071_v9 = vadd.f32 %v5516_v10, %v4070_v8  ;;  %vm4077_vm1 = vcmp.eq.f32.partialorder %v4076_v54, 8.507059e+37 }
 0x6b3   : > { %v9151_v47 = vmul.f32 %v8191_v46, %v4065_v37  ;;  %vm4087_vm2 = vweird.f32 %v9110_v53  ;;  %v4093_v33 = vand.u32 2147483648, %v9110_v53  ;;  %5521 = vpow2.f32 %v9008_v14  ;;  %v2894_v46 = vld [vmem:[#allocation4 + $0x90] sm:$0xff] }
 0x6b4   : > { %v5518_v3 = vpop.eup %5517  ;;  %4537 = vst [vmem:[#allocation2 + $0x24] sm:$0xff] %v4525_v38  ;;  %v4075_v62 = vsel %vm9146_vm15, %v5516_v10, %v4071_v9  ;;  %vm9158_vm3 = vcmp.eq.f32.partialorder %v4091_v48, 8.507059e+37  ;;  %vm4102_vm4 = vweird.f32 %v9132_v6  ;;  %5523 = vpow2.f32 %v5069_v36 }
 0x6b5   : > { %v4080_v54 = vsel %vm4077_vm1, %v4079_v22, %v4075_v62  ;;  %v4083_v41 = vmul.f32 %v5518_v3, %v9110_v53  ;;  %v5072_v17 = vmul.f32 -1.442695, %v2892_v39  ;;  %v5073_v45 = vmul.f32 -1.442695, %v2893_v0 }
 0x6b6   : > { %v5520_v31 = vpop.eup %5519  ;;  %v9165_v14 = vmul.f32 %v8206_v56, %v4080_v54  ;;  %v4506_v10 = vmul.f32 %v8960_v59, %v9151_v47  ;;  %vm4088_vm5 = vweird.f32 %v5518_v3  ;;  %5525 = vpow2.f32 %v5070_v28 }
 0x6b7   : > { %v4084_v51 = vsub.f32 1.0, %v4083_v41  ;;  %v4098_v23 = vmul.f32 %v5520_v31, %v9132_v6  ;;  %5527 = vpow2.f32 %v5071_v49  ;;  %v5074_v2 = vmul.f32 -1.442695, %v2894_v46  ;;  %vm9177_vm7 = vmor %vm4087_vm2, %vm4088_vm5 }
 0x6b8   : > { %v4507_v32 = vmul.f32 %v8966_v42, %v9165_v14  ;;  %v4094_v5 = vor.u32 1.1754944e-38, %v4093_v33  ;;  %v4106_v12 = vand.u32 2147483647, %v9132_v6  ;;  %v4108_v56 = vand.u32 2147483648, %v9132_v6 }
 0x6b9   : > { %v5522_v36 = vpop.eup %5521  ;;  %v4085_v26 = vmul.f32 %v5518_v3, %v4084_v51  ;;  %v4099_v8 = vsub.f32 1.0, %v4098_v23  ;;  %vm4103_vm6 = vweird.f32 %v5520_v31  ;;  %5529 = vpow2.f32 %v5072_v17 }
 0x6ba   : > { %v5524_v48 = vpop.eup %5523  ;;  %v4526_v1 = vpack.c.bf16 %v4507_v32, %v4506_v10  ;;  %v9181_v22 = vadd.f32 1.0, %v5522_v36  ;;  %5531 = vpow2.f32 %v5073_v45  ;;  %v5075_v28 = vmul.f32 -1.442695, %v2895_v35  ;;  %vm9187_vm8 = vmor %vm4102_vm4, %vm4103_vm6 }
 0x6bb   : > { %v4086_v49 = vadd.f32 %v5518_v3, %v4085_v26  ;;  %v4100_v38 = vmul.f32 %v5520_v31, %v4099_v8  ;;  %v9183_v37 = vadd.f32 1.0, %v5524_v48  ;;  %5533 = vpow2.f32 %v5074_v2 }
 0x6bc   : > { %v5526_v9 = vpop.eup %5525  ;;  %4538 = vst [vmem:[#allocation2 + $0x2c] sm:$0xff] %v4526_v1  ;;  %vm9191_vm9 = vcmp.eq.f32.partialorder %v4106_v12, 8.507059e+37  ;;  %v4109_v0 = vor.u32 1.1754944e-38, %v4108_v56  ;;  %5535 = vrcp.f32 %v9181_v22  ;;  %v4121_v33 = vand.u32 2147483647, %v9181_v22 }
 0x6bd   : > { %v5528_v62 = vpop.eup %5527  ;;  %v4090_v46 = vsel %vm9177_vm7, %v5518_v3, %v4086_v49  ;;  %v4101_v54 = vadd.f32 %v5520_v31, %v4100_v38  ;;  %v4123_v6 = vand.u32 2147483648, %v9181_v22  ;;  %5537 = vrcp.f32 %v9183_v37 }
 0x6be   : > { %v4095_v41 = vsel %vm9158_vm3, %v4094_v5, %v4090_v46  ;;  %v4136_v17 = vand.u32 2147483647, %v9183_v37  ;;  %5539 = vpow2.f32 %v5075_v28  ;;  %v4138_v3 = vand.u32 2147483648, %v9183_v37 }
 0x6bf   : > { %v5530_v45 = vpop.eup %5529  ;;  %v4105_v10 = vsel %vm9187_vm8, %v5520_v31, %v4101_v54  ;;  %v9207_v51 = vmul.f32 %v8235_v4, %v4095_v41  ;;  %v9210_v23 = vadd.f32 1.0, %v5526_v9  ;;  %vm4117_vm10 = vweird.f32 %v9181_v22 }
 0x6c0   : > { %v5532_v35 = vpop.eup %5531  ;;  %v4110_v2 = vsel %vm9191_vm9, %v4109_v0, %v4105_v10  ;;  %vm4132_vm11 = vweird.f32 %v9183_v37  ;;  %v9216_v24 = vadd.f32 1.0, %v5528_v62  ;;  %vm9225_vm0 = vcmp.eq.f32.partialorder %v4121_v33, 8.507059e+37 }
 0x6c1   : > { %v9218_v32 = vpop.eup %5533  ;;  %v9221_v31 = vmul.f32 %v8383_v40, %v4110_v2  ;;  %v4508_v4 = vmul.f32 %v8986_v61, %v9207_v51  ;;  %v4124_v12 = vor.u32 1.1754944e-38, %v4123_v6  ;;  %5541 = vrcp.f32 %v9210_v23  ;;  %v2898_v2 = vld [vmem:[#allocation4 + $0x198] sm:$0xff] }
 0x6c2   : > { %v5536_v56 = vpop.eup %5535  ;;  %vm9230_vm12 = vcmp.eq.f32.partialorder %v4136_v17, 8.507059e+37  ;;  %v4139_v26 = vor.u32 1.1754944e-38, %v4138_v3  ;;  %v4151_v8 = vand.u32 2147483647, %v9210_v23  ;;  %5543 = vrcp.f32 %v9216_v24 }
 0x6c3   : > { %v9236_v40 = vadd.f32 1.0, %v5530_v45  ;;  %v5538_v48 = vpop.eup %5537  ;;  %v4509_v1 = vmul.f32 %v8999_v16, %v9221_v31  ;;  %v4113_v30 = vmul.f32 %v5536_v56, %v9181_v22  ;;  %vm4147_vm14 = vweird.f32 %v9210_v23 }
 0x6c4   : > { %v4153_v28 = vand.u32 2147483648, %v9210_v23  ;;  %v5540_v49 = vpop.eup %5539  ;;  %vm4118_vm13 = vweird.f32 %v5536_v56  ;;  %v4128_v38 = vmul.f32 %v5538_v48, %v9183_v37  ;;  %vm4133_vm15 = vweird.f32 %v5538_v48 }
 0x6c5   : > { %vm4162_vm1 = vweird.f32 %v9216_v24  ;;  %v4527_v9 = vpack.c.bf16 %v4509_v1, %v4508_v4  ;;  %v4114_v39 = vsub.f32 1.0, %v4113_v30  ;;  %v4166_v53 = vand.u32 2147483647, %v9216_v24  ;;  %vm9259_vm4 = vmor %vm4117_vm10, %vm4118_vm13 }
 0x6c6   : > { %v4168_v0 = vand.u32 2147483648, %v9216_v24  ;;  %v4129_v33 = vsub.f32 1.0, %v4128_v38  ;;  %vm9247_vm2 = vcmp.eq.f32.partialorder %v4151_v8, 8.507059e+37  ;;  %v9251_v46 = vadd.f32 1.0, %v5532_v35  ;;  %vm9272_vm6 = vmor %vm4132_vm11, %vm4133_vm15 }
 0x6c7   : > { %5545 = vrcp.f32 %v9236_v40  ;;  %v5542_v54 = vpop.eup %5541  ;;  %4539 = vst [vmem:[#allocation2 + $0x34] sm:$0xff] %v4527_v9  ;;  %v4115_v6 = vmul.f32 %v5536_v56, %v4114_v39  ;;  %v4154_v41 = vor.u32 1.1754944e-38, %v4153_v28  ;;  %vm4177_vm3 = vweird.f32 %v9236_v40 }
 0x6c8   : > { %v4181_v17 = vand.u32 2147483647, %v9236_v40  ;;  %v5544_v45 = vpop.eup %5543  ;;  %v4130_v3 = vmul.f32 %v5538_v48, %v4129_v33  ;;  %v4143_v35 = vmul.f32 %v5542_v54, %v9210_v23  ;;  %vm9264_vm5 = vcmp.eq.f32.partialorder %v4166_v53, 8.507059e+37 }
 0x6c9   : > { %v4183_v4 = vand.u32 2147483648, %v9236_v40  ;;  %v4116_v8 = vadd.f32 %v5536_v56, %v4115_v6  ;;  %vm4148_vm7 = vweird.f32 %v5542_v54  ;;  %v4158_v22 = vmul.f32 %v5544_v45, %v9216_v24 }
 0x6ca   : > { %v4169_v30 = vor.u32 1.1754944e-38, %v4168_v0  ;;  %v4131_v28 = vadd.f32 %v5538_v48, %v4130_v3  ;;  %v4144_v38 = vsub.f32 1.0, %v4143_v35  ;;  %vm4163_vm8 = vweird.f32 %v5544_v45  ;;  %vm9297_vm11 = vmor %vm4147_vm14, %vm4148_vm7 }
 0x6cb   : > { %5547 = vrcp.f32 %v9251_v46  ;;  %v4120_v9 = vsel %vm9259_vm4, %v5536_v56, %v4116_v8  ;;  %v4159_v39 = vsub.f32 1.0, %v4158_v22  ;;  %vm9280_vm9 = vcmp.eq.f32.partialorder %v4181_v17, 8.507059e+37 }
 0x6cc   : > { %v4184_v37 = vor.u32 1.1754944e-38, %v4183_v4  ;;  %v4125_v6 = vsel %vm9225_vm0, %v4124_v12, %v4120_v9  ;;  %v4135_v0 = vsel %vm9272_vm6, %v5538_v48, %v4131_v28  ;;  %v4145_v3 = vmul.f32 %v5542_v54, %v4144_v38  ;;  %vm9308_vm0 = vmor %vm4162_vm1, %vm4163_vm8 }
 0x6cd   : > { %v5546_v33 = vpop.eup %5545  ;;  %vm4192_vm10 = vweird.f32 %v9251_v46  ;;  %v4140_v10 = vsel %vm9230_vm12, %v4139_v26, %v4135_v0  ;;  %v9292_v56 = vmul.f32 %v8397_v58, %v4125_v6  ;;  %v4160_v5 = vmul.f32 %v5544_v45, %v4159_v39  ;;  %v2896_v0 = vld [vmem:[#allocation4 + $0xc0] sm:$0xff] }
 0x6ce   : > { %v4173_v12 = vmul.f32 %v5546_v33, %v9236_v40  ;;  %v9303_v48 = vmul.f32 %v8427_v21, %v4140_v10  ;;  %v4146_v35 = vadd.f32 %v5542_v54, %v4145_v3  ;;  %v4196_v23 = vand.u32 2147483647, %v9251_v46  ;;  %v2897_v3 = vld [vmem:[#allocation4 + $0x2b8] sm:$0xff] }
 0x6cf   : > { %v4198_v36 = vand.u32 2147483648, %v9251_v46  ;;  %v4510_v26 = vmul.f32 %v8899_v29, %v9292_v56  ;;  %v4161_v4 = vadd.f32 %v5544_v45, %v4160_v5  ;;  %vm4178_vm12 = vweird.f32 %v5546_v33 }
 0x6d0   : > { %v4174_v8 = vsub.f32 1.0, %v4173_v12  ;;  %v4511_v1 = vmul.f32 %v8915_v34, %v9303_v48  ;;  %v4150_v24 = vsel %vm9297_vm11, %v5542_v54, %v4146_v35  ;;  %v9321_v22 = vadd.f32 1.0, %v9218_v32  ;;  %vm9338_vm14 = vmor %vm4177_vm3, %vm4178_vm12  ;;  %v5581_v35 = vld [vmem:[#allocation3 + $0x30] sm:$0xff] }
 0x6d1   : > { %v5548_v21 = vpop.eup %5547  ;;  %v9323_v28 = vadd.f32 1.0, %v5540_v49  ;;  %v4155_v38 = vsel %vm9247_vm2, %v4154_v41, %v4150_v24  ;;  %v4165_v9 = vsel %vm9308_vm0, %v5544_v45, %v4161_v4  ;;  %v5077_v17 = vmul.f32 -1.442695, %v2897_v3  ;;  %v5582_v3 = vld [vmem:[#allocation3 + $0x58] sm:$0xff] }
 0x6d2   : > { %v4175_v39 = vmul.f32 %v5546_v33, %v4174_v8  ;;  %v4188_v6 = vmul.f32 %v5548_v21, %v9251_v46  ;;  %v4528_v10 = vpack.c.bf16 %v4511_v1, %v4510_v26  ;;  %v4170_v54 = vsel %vm9264_vm5, %v4169_v30, %v4165_v9 }
 0x6d3   : > { %v9333_v32 = vmul.f32 %v8469_v25, %v4155_v38  ;;  %vm4193_vm13 = vweird.f32 %v5548_v21  ;;  %v9343_v62 = vmul.f32 %v8589_v57, %v4170_v54  ;;  %5549 = vrcp.f32 %v9321_v22  ;;  %v2899_v57 = vld [vmem:[#allocation4 + $0x160] sm:$0xff] }
 0x6d4   : > { %v4176_v41 = vadd.f32 %v5546_v33, %v4175_v39  ;;  %v4189_v45 = vsub.f32 1.0, %v4188_v6  ;;  %4540 = vst [vmem:[#allocation2 + $0x44] sm:$0xff] %v4528_v10  ;;  %v5076_v30 = vmul.f32 -1.442695, %v2896_v0  ;;  %5551 = vrcp.f32 %v9323_v28  ;;  %vm4194_vm15 = vmor %vm4192_vm10, %vm4193_vm13 }
 0x6d5   : > { %v4512_v25 = vmul.f32 %v8960_v59, %v9333_v32  ;;  %v4513_v40 = vmul.f32 %v8966_v42, %v9343_v62  ;;  %5553 = vtanh.f32 %v5581_v35  ;;  %v4199_v26 = vor.u32 1.1754944e-38, %v4198_v36 }
 0x6d6   : > { %v4180_v5 = vsel %vm9338_vm14, %v5546_v33, %v4176_v41  ;;  %v4190_v12 = vmul.f32 %v5548_v21, %v4189_v45  ;;  %v5078_v4 = vmul.f32 -1.442695, %v2898_v2  ;;  %vm4197_vm1 = vcmp.eq.f32.partialorder %v4196_v23, 8.507059e+37 }
 0x6d7   : > { %v4185_v58 = vsel %vm9280_vm9, %v4184_v37, %v4180_v5  ;;  %v4529_v8 = vpack.c.bf16 %v4513_v40, %v4512_v25  ;;  %5555 = vpow2.f32 %v5076_v30  ;;  %v5079_v24 = vmul.f32 -1.442695, %v2899_v57 }
 0x6d8   : > { %v4191_v1 = vadd.f32 %v5548_v21, %v4190_v12  ;;  %v9359_v33 = vmul.f32 %v8626_v55, %v4185_v58  ;;  %5557 = vpow2.f32 %v5077_v17  ;;  %vm4207_vm2 = vweird.f32 %v9321_v22 }
 0x6d9   : > { %v5550_v38 = vpop.eup %5549  ;;  %4541 = vst [vmem:[#allocation2 + $0x4c] sm:$0xff] %v4529_v8  ;;  %v4211_v46 = vand.u32 2147483647, %v9321_v22  ;;  %v4213_v23 = vand.u32 2147483648, %v9321_v22  ;;  %5559 = vpow2.f32 %v5078_v4  ;;  %vm4222_vm4 = vweird.f32 %v9323_v28 }
 0x6da   : > { %v4195_v9 = vsel %vm4194_vm15, %v5548_v21, %v4191_v1  ;;  %v4203_v37 = vmul.f32 %v5550_v38, %v9321_v22  ;;  %v5552_v36 = vpop.eup %5551  ;;  %v4514_v55 = vmul.f32 %v8986_v61, %v9359_v33  ;;  %vm4208_vm3 = vweird.f32 %v5550_v38 }
 0x6db   : > { %v4200_v53 = vsel %vm4197_vm1, %v4199_v26, %v4195_v9  ;;  %v5554_v6 = vpop.eup %5553  ;;  %v4218_v0 = vmul.f32 %v5552_v36, %v9323_v28  ;;  %5561 = vpow2.f32 %v5079_v24  ;;  %vm4223_vm5 = vweird.f32 %v5552_v36  ;;  %vm9379_vm6 = vmor %vm4207_vm2, %vm4208_vm3  ;;  %v5583_v9 = vld [vmem:[#allocation3 + $0x80] sm:$0xff] }
 0x6dc   : > { %v9365_v39 = vmul.f32 %v8977_v13, %v4200_v53  ;;  %v4204_v21 = vsub.f32 1.0, %v4203_v37  ;;  %5563 = vtanh.f32 %v5582_v3  ;;  %v4228_v13 = vand.u32 2147483648, %v9323_v28  ;;  %vm9389_vm8 = vmor %vm4222_vm4, %vm4223_vm5 }
 0x6dd   : > { %v5556_v54 = vpop.eup %5555  ;;  %v4219_v41 = vsub.f32 1.0, %v4218_v0  ;;  %v4226_v45 = vand.u32 2147483647, %v9323_v28  ;;  %v4214_v17 = vor.u32 1.1754944e-38, %v4213_v23  ;;  %vm9383_vm7 = vcmp.eq.f32.partialorder %v4211_v46, 8.507059e+37  ;;  %v5584_v28 = vld [vmem:[#allocation3 + $0xb8] sm:$0xff] }
 0x6de   : > { %v4515_v10 = vmul.f32 %v8999_v16, %v9365_v39  ;;  %v4205_v49 = vmul.f32 %v5550_v38, %v4204_v21  ;;  %v5558_v2 = vpop.eup %5557  ;;  %v3928_v40 = vadd.f32 1.0, %v5556_v54  ;;  %v4229_v22 = vor.u32 1.1754944e-38, %v4228_v13 }
 0x6df   : > { %v4220_v57 = vmul.f32 %v5552_v36, %v4219_v41  ;;  %v3929_v35 = vadd.f32 1.0, %v5558_v2  ;;  %v5560_v58 = vpop.eup %5559  ;;  %vm4227_vm9 = vcmp.eq.f32.partialorder %v4226_v45, 8.507059e+37 }
 0x6e0   : > { %v4530_v25 = vpack.c.bf16 %v4515_v10, %v4514_v55  ;;  %v4206_v5 = vadd.f32 %v5550_v38, %v4205_v49  ;;  %5565 = vrcp.f32 %v3928_v40  ;;  %v9401_v55 = vadd.f32 1.0, %v5560_v58 }
 0x6e1   : > { %v5562_v4 = vpop.eup %5561  ;;  %v4221_v1 = vadd.f32 %v5552_v36, %v4220_v57  ;;  %5567 = vrcp.f32 %v3929_v35  ;;  %v4241_v10 = vand.u32 2147483647, %v3928_v40  ;;  %v4243_v13 = vand.u32 2147483648, %v3928_v40 }
 0x6e2   : > { %4542 = vst [vmem:[#allocation2 + $0x54] sm:$0xff] %v4530_v25  ;;  %v4210_v8 = vsel %vm9379_vm6, %v5550_v38, %v4206_v5  ;;  %v5564_v24 = vpop.eup %5563  ;;  %5569 = vtanh.f32 %v5583_v9  ;;  %v9404_v23 = vadd.f32 1.0, %v5562_v4  ;;  %v4256_v49 = vand.u32 2147483647, %v3929_v35 }
 0x6e3   : > { %v4215_v53 = vsel %vm9383_vm7, %v4214_v17, %v4210_v8  ;;  %5571 = vtanh.f32 %v5584_v28  ;;  %v4225_v37 = vsel %vm9389_vm8, %v5552_v36, %v4221_v1  ;;  %v4258_v41 = vand.u32 2147483648, %v3929_v35 }
 0x6e4   : > { %v9399_v46 = vmul.f32 %v5554_v6, %v4215_v53  ;;  %5573 = vtanh.f32 %v8876_v44  ;;  %v4230_v38 = vsel %vm4227_vm9, %v4229_v22, %v4225_v37  ;;  %vm4237_vm10 = vweird.f32 %v3928_v40 }
 0x6e5   : > { %v9406_v21 = vmul.f32 %v5564_v24, %v4230_v38  ;;  %5575 = vrcp.f32 %v9401_v55  ;;  %vm9415_vm0 = vcmp.eq.f32.partialorder %v4241_v10, 8.507059e+37  ;;  %vm4252_vm12 = vweird.f32 %v3929_v35 }
 0x6e6   : > { %v4516_v0 = vmul.f32 %v8899_v29, %v9399_v46  ;;  %v5566_v3 = vpop.eup %5565  ;;  %5577 = vrcp.f32 %v9404_v23  ;;  %v4244_v58 = vor.u32 1.1754944e-38, %v4243_v13  ;;  %vm9419_vm13 = vcmp.eq.f32.partialorder %v4256_v49, 8.507059e+37 }
 0x6e7   : > { %v5568_v36 = vpop.eup %5567  ;;  %v4517_v6 = vmul.f32 %v8915_v34, %v9406_v21  ;;  %v4233_v54 = vmul.f32 %v5566_v3, %v3928_v40  ;;  %5579 = vtanh.f32 %v8918_v18  ;;  %vm4238_vm11 = vweird.f32 %v5566_v3 }
 0x6e8   : > { %v5570_v45 = vpop.eup %5569  ;;  %v4248_v2 = vmul.f32 %v5568_v36, %v3929_v35  ;;  %vm4253_vm14 = vweird.f32 %v5568_v36  ;;  %v4259_v22 = vor.u32 1.1754944e-38, %v4258_v41  ;;  %vm9423_vm15 = vmor %vm4237_vm10, %vm4238_vm11  ;;  %vm4267_vm1 = vweird.f32 %v9401_v55 }
 0x6e9   : > { %v5572_v25 = vpop.eup %5571  ;;  %v4531_v29 = vpack.c.bf16 %v4517_v6, %v4516_v0  ;;  %v4234_v30 = vsub.f32 1.0, %v4233_v54  ;;  %v4271_v24 = vand.u32 2147483647, %v9401_v55  ;;  %vm9431_vm2 = vmor %vm4252_vm12, %vm4253_vm14  ;;  %v4273_v28 = vand.u32 2147483648, %v9401_v55 }
 0x6ea   : > { %v5574_v17 = vpop.eup %5573  ;;  %v4249_v12 = vsub.f32 1.0, %v4248_v2  ;;  %vm4282_vm3 = vweird.f32 %v9404_v23  ;;  %v4288_v13 = vand.u32 2147483648, %v9404_v23  ;;  %v4286_v54 = vand.u32 2147483647, %v9404_v23 }
 0x6eb   : > { %v5576_v34 = vpop.eup %5575  ;;  %4543 = vst [vmem:[#allocation2 + $0x64] sm:$0xff] %v4531_v29  ;;  %v4235_v57 = vmul.f32 %v5566_v3, %v4234_v30  ;;  %vm4272_vm7 = vcmp.eq.f32.partialorder %v4271_v24, 8.507059e+37 }
 0x6ec   : > { %v5578_v4 = vpop.eup %5577  ;;  %v4250_v8 = vmul.f32 %v5568_v36, %v4249_v12  ;;  %v4263_v1 = vmul.f32 %v5576_v34, %v9401_v55  ;;  %vm4268_vm4 = vweird.f32 %v5576_v34  ;;  %v4274_v12 = vor.u32 1.1754944e-38, %v4273_v28 }
 0x6ed   : > { %v4236_v9 = vadd.f32 %v5566_v3, %v4235_v57  ;;  %v4278_v37 = vmul.f32 %v5578_v4, %v9404_v23  ;;  %v5580_v38 = vpop.eup %5579  ;;  %vm4283_vm5 = vweird.f32 %v5578_v4  ;;  %vm4269_vm6 = vmor %vm4267_vm1, %vm4268_vm4  ;;  %v4289_v5 = vor.u32 1.1754944e-38, %v4288_v13 }
 0x6ee   : > { %v4251_v0 = vadd.f32 %v5568_v36, %v4250_v8  ;;  %v4264_v10 = vsub.f32 1.0, %v4263_v1  ;;  %vm4284_vm8 = vmor %vm4282_vm3, %vm4283_vm5  ;;  %vm4287_vm9 = vcmp.eq.f32.partialorder %v4286_v54, 8.507059e+37 }
 0x6ef   : > { %v4240_v6 = vsel %vm9423_vm15, %v5566_v3, %v4236_v9  ;;  %v4279_v35 = vsub.f32 1.0, %v4278_v37 }
 0x6f0   : > { %v4245_v49 = vsel %vm9415_vm0, %v4244_v58, %v4240_v6  ;;  %v4255_v41 = vsel %vm9431_vm2, %v5568_v36, %v4251_v0  ;;  %v4265_v2 = vmul.f32 %v5576_v34, %v4264_v10 }
 0x6f1   : > { %v4260_v29 = vsel %vm9419_vm13, %v4259_v22, %v4255_v41  ;;  %v4456_v30 = vmul.f32 %v5570_v45, %v4245_v49  ;;  %v4280_v3 = vmul.f32 %v5578_v4, %v4279_v35 }
 0x6f2   : > { %v4457_v57 = vmul.f32 %v5572_v25, %v4260_v29  ;;  %v4266_v40 = vadd.f32 %v5576_v34, %v4265_v2 }
 0x6f3   : > { %v4518_v58 = vmul.f32 %v8960_v59, %v4456_v30  ;;  %v4281_v36 = vadd.f32 %v5578_v4, %v4280_v3 }
 0x6f4   : > { %v4519_v26 = vmul.f32 %v8966_v42, %v4457_v57  ;;  %v4270_v22 = vsel %vm4269_vm6, %v5576_v34, %v4266_v40 }
 0x6f5   : > { %v4275_v45 = vsel %vm4272_vm7, %v4274_v12, %v4270_v22  ;;  %v4285_v8 = vsel %vm4284_vm8, %v5578_v4, %v4281_v36 }
 0x6f6   : > { %v4532_v55 = vpack.c.bf16 %v4519_v26, %v4518_v58  ;;  %v4290_v1 = vsel %vm4287_vm9, %v4289_v5, %v4285_v8  ;;  %v4458_v9 = vmul.f32 %v5574_v17, %v4275_v45 }
 0x6f7   : > { %v4459_v53 = vmul.f32 %v5580_v38, %v4290_v1 }
 0x6f8   : > { %4544 = vst [vmem:[#allocation2 + $0x6c] sm:$0xff] %v4532_v55  ;;  %v4520_v25 = vmul.f32 %v8986_v61, %v4458_v9 }
 0x6f9   : > { %v4521_v23 = vmul.f32 %v8999_v16, %v4459_v53  ;;  %4549 = sbr.rel (%p5080_p7) target bundleno = 1838 (0x72e), region = 44 }
 0x6fb   : > { %v4533_v24 = vpack.c.bf16 %v4521_v23, %v4520_v25 }
 0x6fd   : > { %4545 = vst [vmem:[#allocation2 + $0x74] sm:$0xff] %v4533_v24 }
 0x6fe   : > { %4550 = vst [vmem:[%s9657_s3] sm:$0xff] %v8932_v11  ;;  %v10180_v11 = vld [vmem:[#allocation61_spill] sm:$0xff]  ;;  %v10185_v59 = vld [vmem:[#allocation66_spill] sm:$0xff]  ;;  %v10186_v42 = vld [vmem:[#allocation67_spill] sm:$0xff] }
 0x6ff   : > { %4551 = vst [vmem:[%s9657_s3 + $0x8] sm:$0xff] %v8938_v43  ;;  %v10184_v43 = vld [vmem:[#allocation65_spill] sm:$0xff]  ;;  %v10189_v16 = vld [vmem:[#allocation70_spill] sm:$0xff] }
 0x700   : > { %4552 = vst [vmem:[%s9657_s3 + $0x10] sm:$0xff] %v8980_v27  ;;  %v10187_v27 = vld [vmem:[#allocation68_spill] sm:$0xff]  ;;  %v10188_v61 = vld [vmem:[#allocation69_spill] sm:$0xff] }
 0x701   : > { %4553 = vst [vmem:[%s9657_s3 + $0x18] sm:$0xff] %v9023_v7  ;;  %v10190_v7 = vld [vmem:[#allocation71_spill] sm:$0xff] }
 0x702   : > { %4554 = vst [vmem:[%s9657_s3 + $0x20] sm:$0xff] %v9082_v15  ;;  %v10179_v15 = vld [vmem:[#allocation60_spill] sm:$0xff] }
 0x703   : > { %4555 = vst [vmem:[%s9657_s3 + $0x28] sm:$0xff] %v9092_v50  ;;  %v10191_v50 = vld [vmem:[#allocation72_spill] sm:$0xff] }
 0x704   : > { %4556 = vst [vmem:[%s9657_s3 + $0x30] sm:$0xff] %v9120_v63  ;;  %v10192_v63 = vld [vmem:[#allocation73_spill] sm:$0xff] }
 0x705   : > { %4557 = vst [vmem:[%s9657_s3 + $0x38] sm:$0xff] %v9123_v19  ;;  %v10193_v19 = vld [vmem:[#allocation74_spill] sm:$0xff] }
 0x706   : > { %4558 = vst [vmem:[%s9657_s3 + $0x40] sm:$0xff] %v9151_v47  ;;  %v10194_v47 = vld [vmem:[#allocation75_spill] sm:$0xff] }
 0x707   : > { %4559 = vst [vmem:[%s9657_s3 + $0x48] sm:$0xff] %v9165_v14  ;;  %v10195_v14 = vld [vmem:[#allocation76_spill] sm:$0xff] }
 0x708   : > { %4560 = vst [vmem:[%s9657_s3 + $0x50] sm:$0xff] %v9207_v51  ;;  %v10196_v51 = vld [vmem:[#allocation77_spill] sm:$0xff] }
 0x709   : > { %4561 = vst [vmem:[%s9657_s3 + $0x58] sm:$0xff] %v9221_v31  ;;  %v10197_v31 = vld [vmem:[#allocation78_spill] sm:$0xff] }
 0x70a   : > { %4562 = vst [vmem:[%s9657_s3 + $0x60] sm:$0xff] %v9292_v56 }
 0x70b   : > { %4563 = vst [vmem:[%s9657_s3 + $0x68] sm:$0xff] %v9303_v48 }
 0x70c   : > { %4564 = vst [vmem:[%s9657_s3 + $0x70] sm:$0xff] %v9333_v32 }
 0x70d   : > { %4565 = vst [vmem:[%s9657_s3 + $0x78] sm:$0xff] %v9343_v62 }
 0x70e   : > { %4566 = vst [vmem:[%s9657_s3 + $0x80] sm:$0xff] %v9359_v33 }
 0x70f   : > { %4567 = vst [vmem:[%s9657_s3 + $0x88] sm:$0xff] %v9365_v39 }
 0x710   : > { %4568 = vst [vmem:[%s9657_s3 + $0x90] sm:$0xff] %v9399_v46 }
 0x711   : > { %4569 = vst [vmem:[%s9657_s3 + $0x98] sm:$0xff] %v9406_v21 }
 0x712   : > { %4570 = vst [vmem:[%s9657_s3 + $0xa0] sm:$0xff] %v4456_v30 }
 0x713   : > { %4571 = vst [vmem:[%s9657_s3 + $0xa8] sm:$0xff] %v4457_v57 }
 0x714   : > { %4572 = vst [vmem:[%s9657_s3 + $0xb0] sm:$0xff] %v4458_v9 }
 0x715   : > { %4573 = vst [vmem:[%s9657_s3 + $0xb8] sm:$0xff] %v4459_v53 }
 0x716   : > { %4574 = vst [vmem:[%s9658_s4] sm:$0xff] %v7716_v20  ;;  %v10181_v20 = vld [vmem:[#allocation62_spill] sm:$0xff] }
 0x717   : > { %4575 = vst [vmem:[%s9658_s4 + $0x8] sm:$0xff] %v7742_v60  ;;  %v10182_v60 = vld [vmem:[#allocation63_spill] sm:$0xff] }
 0x718   : > { %4576 = vst [vmem:[%s9658_s4 + $0x10] sm:$0xff] %v7763_v52  ;;  %v10183_v52 = vld [vmem:[#allocation64_spill] sm:$0xff] }
 0x719   : > { %4577 = vst [vmem:[%s9658_s4 + $0x18] sm:$0xff] %v10179_v15 }
 0x71a   : > { %4578 = vst [vmem:[%s9658_s4 + $0x20] sm:$0xff] %v10180_v11 }
 0x71b   : > { %4579 = vst [vmem:[%s9658_s4 + $0x28] sm:$0xff] %v10181_v20 }
 0x71c   : > { %4580 = vst [vmem:[%s9658_s4 + $0x30] sm:$0xff] %v10182_v60 }
 0x71d   : > { %4581 = vst [vmem:[%s9658_s4 + $0x38] sm:$0xff] %v10183_v52 }
 0x71e   : > { %4582 = vst [vmem:[%s9658_s4 + $0x40] sm:$0xff] %v10184_v43 }
 0x71f   : > { %4583 = vst [vmem:[%s9658_s4 + $0x48] sm:$0xff] %v10185_v59 }
 0x720   : > { %4584 = vst [vmem:[%s9658_s4 + $0x50] sm:$0xff] %v10186_v42 }
 0x721   : > { %4585 = vst [vmem:[%s9658_s4 + $0x58] sm:$0xff] %v10187_v27 }
 0x722   : > { %4586 = vst [vmem:[%s9658_s4 + $0x60] sm:$0xff] %v10188_v61 }
 0x723   : > { %4587 = vst [vmem:[%s9658_s4 + $0x68] sm:$0xff] %v10189_v16 }
 0x724   : > { %4588 = vst [vmem:[%s9658_s4 + $0x70] sm:$0xff] %v10190_v7 }
 0x725   : > { %4589 = vst [vmem:[%s9658_s4 + $0x78] sm:$0xff] %v10191_v50 }
 0x726   : > { %4590 = vst [vmem:[%s9658_s4 + $0x80] sm:$0xff] %v10192_v63 }
 0x727   : > { %4591 = vst [vmem:[%s9658_s4 + $0x88] sm:$0xff] %v10193_v19 }
 0x728   : > { %4592 = vst [vmem:[%s9658_s4 + $0x90] sm:$0xff] %v10194_v47 }
 0x729   : > { %4593 = vst [vmem:[%s9658_s4 + $0x98] sm:$0xff] %v10195_v14 }
 0x72a   : > { %4594 = vst [vmem:[%s9658_s4 + $0xa0] sm:$0xff] %v10196_v51 }
 0x72b   : > { %4595 = vst [vmem:[%s9658_s4 + $0xa8] sm:$0xff] %v10197_v31 }
 0x72c   : > { %4596 = vst [vmem:[%s9658_s4 + $0xb0] sm:$0xff] %v8876_v44 }
 0x72d   : > { %4597 = vst [vmem:[%s9658_s4 + $0xb8] sm:$0xff] %v8918_v18 }
 0x72e PF: > { %s15_s17 = sadd.s32 1, %s5607_s17   ;;  %s10198_s15 = smov %s5603_s16 }
 0x72f   : > { %p12_p8 = scmp.ge.s32.totalorder %s15_s17, 10   ;;  %s10199_s16 = smov %s10201_s18 }
 0x731   :  { %14 = sbr.rel (!%p12_p8) target bundleno = 2 (0x2), region = 86 }

</bundles_post_ra>
